<compile_context>
chip_gen: v5e
topology: v5e:2x2
jax: 0.10.0
libtpu: 0.0.40
codegen_flags: <defaults>
</compile_context>

<pallas_src>
import functools

import jax
import jax.numpy as jnp
import numpy as np
from jax.experimental import pallas as pl
from jax.experimental.pallas import tpu as pltpu

_SQRT_HALF = 0.7071067811865476


def _erf_f32(z):
    # Abramowitz & Stegun 7.1.26 rational approximation, |err| < 1.5e-7 (f32-exact
    # for our purposes).  exp() runs on the EUP, the short polynomial on the VPU.
    a = jnp.abs(z)
    t = 1.0 / (1.0 + 0.3275911 * a)
    poly = t * (0.254829592 + t * (-0.284496736 + t * (1.421413741
             + t * (-1.453152027 + t * 1.061405429))))
    e = 1.0 - poly * jnp.exp(-a * a)
    return jnp.where(z < 0.0, -e, e)


def _gelu_exact(x):
    return 0.5 * x * (1.0 + _erf_f32(x * _SQRT_HALF))


def conv_embedder_kernel(x_ref, pool_ref,
                         w1_ref, s1_ref, b1_ref,
                         w2_ref, s2_ref, b2_ref,
                         w3_ref, s3_ref, b3_ref,
                         wp_ref, bp_ref, out_ref, *, seq_len, dilations=(1, 2, 4)):
    L = seq_len
    x = x_ref[0].astype(jnp.float32)                     # (Cin, N), N = bt*L
    N = x.shape[-1]

    # Hoisted per-sequence validity masks, one per distinct tap shift. Padding is
    # applied per sequence (lane position modulo L) since bt sequences share lanes.
    lane_pos = jax.lax.broadcasted_iota(jnp.int32, (1, N), 1) % L
    shift_set = sorted({(t - 1) * d for d in dilations for t in (0, 2)})
    masks = {s: (lane_pos >= -s) if s < 0 else (lane_pos < L - s) for s in shift_set}

    def shifted(h, s):
        # g[:, l] = h[:, l + s] inside each length-L sequence, 0 in the padding region.
        if s == 0:
            return h
        g = pltpu.roll(h, shift=(-s) % N, axis=1)        # XLU lane rotation
        return jnp.where(masks[s], g, 0.0)

    def conv_layer(h_in, w_ref, d):
        cin_l = w_ref.shape[2]
        acc = None
        for t in range(3):
            g = shifted(h_in, (t - 1) * d)
            if cin_l == 1:
                # K == 1 is a rank-1 update: do it on the VPU, not the MXU.
                term = w_ref[t] * g                       # (Cout,1)*(1,N) -> (Cout,N)
            else:
                term = jnp.dot(w_ref[t], g, preferred_element_type=jnp.float32)
            acc = term if acc is None else acc + term
        return acc

    def block(h_in, w_ref, s_ref, b_ref, d):
        h = conv_layer(h_in, w_ref, d)                    # Conv1d (bias=False)
        h = h * s_ref[...] + b_ref[...]                   # folded eval BatchNorm1d
        # TODO(synk): Dropout is identity in eval mode; training-mode RNG dropout omitted.
        return _gelu_exact(h)                             # exact (erf) GELU

    h = block(x, w1_ref, s1_ref, b1_ref, dilations[0])
    h = block(h, w2_ref, s2_ref, b2_ref, dilations[1])
    h = block(h, w3_ref, s3_ref, b3_ref, dilations[2])

    # AdaptiveAvgPool1d(1) for each of the bt sequences: (C3, N) @ (N, bt) -> (C3, bt).
    pooled = jnp.dot(h, pool_ref[...], preferred_element_type=jnp.float32)
    # Final Linear with real M = bt: pooled^T @ Wp -> (bt, E), lane-dense output.
    out = jax.lax.dot_general(pooled, wp_ref[...], (((0,), (0,)), ((), ())),
                              preferred_element_type=jnp.float32)
    out_ref[0] = (out + bp_ref[...]).astype(out_ref.dtype)


def conv_embedder(x, params, block_b=8):
    B, cin, L = x.shape
    E = params["wp"].shape[1]

    # Batch-tile size: as large as practical, but keep >= 2 grid steps when B >= 2
    # so the "parallel" axis can shard across both TensorCores on v7x.
    bt = min(block_b, B)
    if B >= 2:
        bt = min(bt, max(1, B // 2))
    while B % bt:
        bt -= 1
    nsteps = B // bt
    N = bt * L

    # Layout plumbing (outside the kernel): fold bt sequences into the lane axis.
    x_tiles = x.reshape(nsteps, bt, cin, L).transpose(0, 2, 1, 3).reshape(nsteps, cin, N)

    # Constant block-mean matrix: pool[b*L + l, b'] = (b == b') / L.
    pool = jnp.asarray(np.repeat(np.eye(bt, dtype=np.float32), L, axis=0) / L)

    order = ["w1", "s1", "b1", "w2", "s2", "b2", "w3", "s3", "b3", "wp", "bp"]

    def full_spec(a):
        nd = a.ndim
        return pl.BlockSpec(a.shape, lambda i, _nd=nd: (0,) * _nd)

    out = pl.pallas_call(
        functools.partial(conv_embedder_kernel, seq_len=L),
        out_shape=jax.ShapeDtypeStruct((nsteps, bt, E), jnp.float32),
        grid_spec=pltpu.PrefetchScalarGridSpec(
            num_scalar_prefetch=0,
            grid=(nsteps,),
            in_specs=[pl.BlockSpec((1, cin, N), lambda i: (i, 0, 0)),
                      full_spec(pool)]
                     + [full_spec(params[k]) for k in order],
            out_specs=pl.BlockSpec((1, bt, E), lambda i: (i, 0, 0)),
        ),
        compiler_params=pltpu.CompilerParams(dimension_semantics=("parallel",)),
    )(x_tiles, pool, *[params[k] for k in order])
    return out.reshape(B, E)                              # (B, E)


def make_params(key, in_ch=1, hidden=(16, 32, 64), embed_dim=1024, eps=1e-5):
    keys = iter(jax.random.split(key, 32))
    raw = {}
    chans = [in_ch] + list(hidden)
    for i in range(3):
        cin, cout = chans[i], chans[i + 1]
        raw[f"conv{i}_w"] = 0.2 * jax.random.normal(next(keys), (cout, cin, 3), jnp.float32)
        raw[f"bn{i}_gamma"] = 1.0 + 0.1 * jax.random.normal(next(keys), (cout,), jnp.float32)
        raw[f"bn{i}_beta"] = 0.1 * jax.random.normal(next(keys), (cout,), jnp.float32)
        raw[f"bn{i}_mean"] = 0.1 * jax.random.normal(next(keys), (cout,), jnp.float32)
        raw[f"bn{i}_var"] = jax.random.uniform(next(keys), (cout,), jnp.float32, 0.5, 1.5)
    raw["lin_w"] = 0.05 * jax.random.normal(next(keys), (embed_dim, hidden[-1]), jnp.float32)
    raw["lin_b"] = 0.01 * jax.random.normal(next(keys), (embed_dim,), jnp.float32)

    kp = {}
    for i in range(3):
        scale = raw[f"bn{i}_gamma"] / jnp.sqrt(raw[f"bn{i}_var"] + eps)
        shift = raw[f"bn{i}_beta"] - raw[f"bn{i}_mean"] * scale
        kp[f"w{i+1}"] = jnp.transpose(raw[f"conv{i}_w"], (2, 0, 1))   # (3, Cout, Cin)
        kp[f"s{i+1}"] = scale[:, None]                                # (Cout, 1)
        kp[f"b{i+1}"] = shift[:, None]                                # (Cout, 1)
    kp["wp"] = raw["lin_w"].T                                         # (C3, E)
    kp["bp"] = raw["lin_b"][None, :]                                  # (1, E)
    return raw, kp


def reference(x, raw, eps=1e-5):
    """Pure-JAX replica of the PyTorch forward (eval mode)."""
    h = x
    for i, d in enumerate((1, 2, 4)):
        h = jax.lax.conv_general_dilated(
            h, raw[f"conv{i}_w"], window_strides=(1,), padding=[(d, d)],
            rhs_dilation=(d,), dimension_numbers=("NCH", "OIH", "NCH"))
        scale = raw[f"bn{i}_gamma"] / jnp.sqrt(raw[f"bn{i}_var"] + eps)
        shift = raw[f"bn{i}_beta"] - raw[f"bn{i}_mean"] * scale
        h = h * scale[None, :, None] + shift[None, :, None]
        h = jax.nn.gelu(h, approximate=False)
    pooled = h.mean(axis=-1)                                          # (B, C3)
    return pooled @ raw["lin_w"].T + raw["lin_b"]                     # (B, E)


if __name__ == "__main__":
    key = jax.random.PRNGKey(0)
    k_x, k_p = jax.random.split(key)
    B, C, L = 8, 1, 128            # x: (B, C, L) like the PyTorch module
    x = jax.random.normal(k_x, (B, C, L), jnp.float32)
    raw, params = make_params(k_p)

    out = conv_embedder(x, params)
    out = jax.block_until_ready(out)

    ref = reference(x, raw)
    np.testing.assert_allclose(np.asarray(out), np.asarray(ref), rtol=5e-4, atol=5e-4)
    print("KERNEL_OK")
</pallas_src>

<mosaic_0001>
module attributes {stable_mosaic.version = 11 : i64} {
  func.func @conv_embedder_kernel(%arg0: i32, %arg1: memref<1x1x512xf32, #tpu.memory_space<vmem>>, %arg2: memref<512x4xf32, #tpu.memory_space<vmem>>, %arg3: memref<3x16x1xf32, #tpu.memory_space<vmem>>, %arg4: memref<16x1xf32, #tpu.memory_space<vmem>>, %arg5: memref<16x1xf32, #tpu.memory_space<vmem>>, %arg6: memref<3x32x16xf32, #tpu.memory_space<vmem>>, %arg7: memref<32x1xf32, #tpu.memory_space<vmem>>, %arg8: memref<32x1xf32, #tpu.memory_space<vmem>>, %arg9: memref<3x64x32xf32, #tpu.memory_space<vmem>>, %arg10: memref<64x1xf32, #tpu.memory_space<vmem>>, %arg11: memref<64x1xf32, #tpu.memory_space<vmem>>, %arg12: memref<64x1024xf32, #tpu.memory_space<vmem>>, %arg13: memref<1x1024xf32, #tpu.memory_space<vmem>>, %arg14: memref<1x4x1024xf32, #tpu.memory_space<vmem>>) attributes {dimension_semantics = [#tpu.dimension_semantics<parallel>], iteration_bounds = array<i64: 2>, scalar_prefetch = 0 : i64, scratch_operands = 0 : i64, tpu.core_type = #tpu.core_type<tc>, window_params = [{transform_indices = @transform_0, window_bounds = array<i64: 1, 1, 512>}, {pipeline_mode = #tpu.pipeline_mode<synchronous>, transform_indices = @transform_1, window_bounds = array<i64: 512, 4>}, {pipeline_mode = #tpu.pipeline_mode<synchronous>, transform_indices = @transform_2, window_bounds = array<i64: 3, 16, 1>}, {pipeline_mode = #tpu.pipeline_mode<synchronous>, transform_indices = @transform_3, window_bounds = array<i64: 16, 1>}, {pipeline_mode = #tpu.pipeline_mode<synchronous>, transform_indices = @transform_4, window_bounds = array<i64: 16, 1>}, {pipeline_mode = #tpu.pipeline_mode<synchronous>, transform_indices = @transform_5, window_bounds = array<i64: 3, 32, 16>}, {pipeline_mode = #tpu.pipeline_mode<synchronous>, transform_indices = @transform_6, window_bounds = array<i64: 32, 1>}, {pipeline_mode = #tpu.pipeline_mode<synchronous>, transform_indices = @transform_7, window_bounds = array<i64: 32, 1>}, {pipeline_mode = #tpu.pipeline_mode<synchronous>, transform_indices = @transform_8, window_bounds = array<i64: 3, 64, 32>}, {pipeline_mode = #tpu.pipeline_mode<synchronous>, transform_indices = @transform_9, window_bounds = array<i64: 64, 1>}, {pipeline_mode = #tpu.pipeline_mode<synchronous>, transform_indices = @transform_10, window_bounds = array<i64: 64, 1>}, {pipeline_mode = #tpu.pipeline_mode<synchronous>, transform_indices = @transform_11, window_bounds = array<i64: 64, 1024>}, {pipeline_mode = #tpu.pipeline_mode<synchronous>, transform_indices = @transform_12, window_bounds = array<i64: 1, 1024>}, {transform_indices = @transform_13, window_bounds = array<i64: 1, 4, 1024>}]} {
    %c0 = arith.constant 0 : index
    %c0_0 = arith.constant 0 : index
    %c0_1 = arith.constant 0 : index
    %0 = vector.load %arg1[%c0, %c0_0, %c0_1] : memref<1x1x512xf32, #tpu.memory_space<vmem>>, vector<1x1x512xf32>
    %1 = vector.shape_cast %0 : vector<1x1x512xf32> to vector<1x512xf32>
    %2 = tpu.iota {dimensions = array<i32: 1>} : vector<1x512xi32>
    %c128_i32 = arith.constant 128 : i32
    %c0_i32 = arith.constant 0 : i32
    %3 = arith.cmpi eq, %c128_i32, %c0_i32 : i32
    %c1_i32 = arith.constant 1 : i32
    %4 = arith.select %3, %c1_i32, %c128_i32 : i32
    %5 = vector.broadcast %4 : i32 to vector<1x512xi32>
    %6 = arith.remsi %2, %5 : vector<1x512xi32>
    %c0_i32_2 = arith.constant 0 : i32
    %7 = vector.broadcast %c0_i32_2 : i32 to vector<1x512xi32>
    %8 = arith.cmpi ne, %6, %7 : vector<1x512xi32>
    %c0_i32_3 = arith.constant 0 : i32
    %9 = vector.broadcast %c0_i32_3 : i32 to vector<1x512xi32>
    %10 = arith.cmpi slt, %6, %9 : vector<1x512xi32>
    %c0_i32_4 = arith.constant 0 : i32
    %11 = arith.cmpi slt, %4, %c0_i32_4 : i32
    %12 = vector.broadcast %11 : i1 to vector<1x512xi1>
    %13 = vector.broadcast %12 : vector<1x512xi1> to vector<1x512xi1>
    %14 = arith.xori %10, %13 : vector<1x512xi1>
    %15 = arith.andi %14, %8 : vector<1x512xi1>
    %16 = vector.broadcast %4 : i32 to vector<1x512xi32>
    %17 = arith.addi %6, %16 : vector<1x512xi32>
    %18 = arith.select %15, %17, %6 : vector<1x512xi1>, vector<1x512xi32>
    %c4_i32 = arith.constant 4 : i32
    %19 = vector.broadcast %c4_i32 : i32 to vector<1x512xi32>
    %20 = arith.cmpi sge, %18, %19 : vector<1x512xi32>
    %c2_i32 = arith.constant 2 : i32
    %21 = vector.broadcast %c2_i32 : i32 to vector<1x512xi32>
    %22 = arith.cmpi sge, %18, %21 : vector<1x512xi32>
    %c1_i32_5 = arith.constant 1 : i32
    %23 = vector.broadcast %c1_i32_5 : i32 to vector<1x512xi32>
    %24 = arith.cmpi sge, %18, %23 : vector<1x512xi32>
    %c127_i32 = arith.constant 127 : i32
    %25 = vector.broadcast %c127_i32 : i32 to vector<1x512xi32>
    %26 = arith.cmpi slt, %18, %25 : vector<1x512xi32>
    %c126_i32 = arith.constant 126 : i32
    %27 = vector.broadcast %c126_i32 : i32 to vector<1x512xi32>
    %28 = arith.cmpi slt, %18, %27 : vector<1x512xi32>
    %c124_i32 = arith.constant 124 : i32
    %29 = vector.broadcast %c124_i32 : i32 to vector<1x512xi32>
    %30 = arith.cmpi slt, %18, %29 : vector<1x512xi32>
    %c1_i32_6 = arith.constant 1 : i32
    %31 = tpu.dynamic_rotate %1 by %c1_i32_6 dim 1 : vector<1x512xf32>, i32 -> vector<1x512xf32>
    %cst = arith.constant 0.000000e+00 : f32
    %32 = vector.broadcast %cst : f32 to vector<1x512xf32>
    %33 = arith.select %24, %31, %32 : vector<1x512xi1>, vector<1x512xf32>
    %c0_7 = arith.constant 0 : index
    %c0_8 = arith.constant 0 : index
    %c0_9 = arith.constant 0 : index
    %34 = vector.load %arg3[%c0_7, %c0_8, %c0_9] : memref<3x16x1xf32, #tpu.memory_space<vmem>>, vector<1x16x1xf32>
    %35 = vector.shape_cast %34 : vector<1x16x1xf32> to vector<16x1xf32>
    %36 = vector.broadcast %35 : vector<16x1xf32> to vector<16x512xf32>
    %37 = vector.broadcast %33 : vector<1x512xf32> to vector<16x512xf32>
    %38 = arith.mulf %36, %37 : vector<16x512xf32>
    %c1 = arith.constant 1 : index
    %c0_10 = arith.constant 0 : index
    %c0_11 = arith.constant 0 : index
    %39 = vector.load %arg3[%c1, %c0_10, %c0_11] : memref<3x16x1xf32, #tpu.memory_space<vmem>>, vector<1x16x1xf32>
    %40 = vector.shape_cast %39 : vector<1x16x1xf32> to vector<16x1xf32>
    %41 = vector.broadcast %40 : vector<16x1xf32> to vector<16x512xf32>
    %42 = vector.broadcast %1 : vector<1x512xf32> to vector<16x512xf32>
    %43 = arith.mulf %41, %42 : vector<16x512xf32>
    %44 = arith.addf %38, %43 : vector<16x512xf32>
    %c511_i32 = arith.constant 511 : i32
    %45 = tpu.dynamic_rotate %1 by %c511_i32 dim 1 : vector<1x512xf32>, i32 -> vector<1x512xf32>
    %cst_12 = arith.constant 0.000000e+00 : f32
    %46 = vector.broadcast %cst_12 : f32 to vector<1x512xf32>
    %47 = arith.select %26, %45, %46 : vector<1x512xi1>, vector<1x512xf32>
    %c2 = arith.constant 2 : index
    %c0_13 = arith.constant 0 : index
    %c0_14 = arith.constant 0 : index
    %48 = vector.load %arg3[%c2, %c0_13, %c0_14] : memref<3x16x1xf32, #tpu.memory_space<vmem>>, vector<1x16x1xf32>
    %49 = vector.shape_cast %48 : vector<1x16x1xf32> to vector<16x1xf32>
    %50 = vector.broadcast %49 : vector<16x1xf32> to vector<16x512xf32>
    %51 = vector.broadcast %47 : vector<1x512xf32> to vector<16x512xf32>
    %52 = arith.mulf %50, %51 : vector<16x512xf32>
    %53 = arith.addf %44, %52 : vector<16x512xf32>
    %c0_15 = arith.constant 0 : index
    %c0_16 = arith.constant 0 : index
    %54 = vector.load %arg4[%c0_15, %c0_16] : memref<16x1xf32, #tpu.memory_space<vmem>>, vector<16x1xf32>
    %55 = vector.broadcast %54 : vector<16x1xf32> to vector<16x512xf32>
    %56 = arith.mulf %53, %55 : vector<16x512xf32>
    %c0_17 = arith.constant 0 : index
    %c0_18 = arith.constant 0 : index
    %57 = vector.load %arg5[%c0_17, %c0_18] : memref<16x1xf32, #tpu.memory_space<vmem>>, vector<16x1xf32>
    %58 = vector.broadcast %57 : vector<16x1xf32> to vector<16x512xf32>
    %59 = arith.addf %56, %58 : vector<16x512xf32>
    %cst_19 = arith.constant 5.000000e-01 : f32
    %60 = vector.broadcast %cst_19 : f32 to vector<16x512xf32>
    %61 = arith.mulf %60, %59 : vector<16x512xf32>
    %cst_20 = arith.constant 0.707106769 : f32
    %62 = vector.broadcast %cst_20 : f32 to vector<16x512xf32>
    %63 = arith.mulf %59, %62 : vector<16x512xf32>
    %64 = math.absf %63 : vector<16x512xf32>
    %cst_21 = arith.constant 0.327591091 : f32
    %65 = vector.broadcast %cst_21 : f32 to vector<16x512xf32>
    %66 = arith.mulf %65, %64 : vector<16x512xf32>
    %cst_22 = arith.constant 1.000000e+00 : f32
    %67 = vector.broadcast %cst_22 : f32 to vector<16x512xf32>
    %68 = arith.addf %67, %66 : vector<16x512xf32>
    %cst_23 = arith.constant 1.000000e+00 : f32
    %69 = vector.broadcast %cst_23 : f32 to vector<16x512xf32>
    %70 = arith.divf %69, %68 : vector<16x512xf32>
    %cst_24 = arith.constant 1.06140542 : f32
    %71 = vector.broadcast %cst_24 : f32 to vector<16x512xf32>
    %72 = arith.mulf %70, %71 : vector<16x512xf32>
    %cst_25 = arith.constant -1.45315206 : f32
    %73 = vector.broadcast %cst_25 : f32 to vector<16x512xf32>
    %74 = arith.addf %73, %72 : vector<16x512xf32>
    %75 = arith.mulf %70, %74 : vector<16x512xf32>
    %cst_26 = arith.constant 1.42141378 : f32
    %76 = vector.broadcast %cst_26 : f32 to vector<16x512xf32>
    %77 = arith.addf %76, %75 : vector<16x512xf32>
    %78 = arith.mulf %70, %77 : vector<16x512xf32>
    %cst_27 = arith.constant -0.284496725 : f32
    %79 = vector.broadcast %cst_27 : f32 to vector<16x512xf32>
    %80 = arith.addf %79, %78 : vector<16x512xf32>
    %81 = arith.mulf %70, %80 : vector<16x512xf32>
    %cst_28 = arith.constant 0.254829586 : f32
    %82 = vector.broadcast %cst_28 : f32 to vector<16x512xf32>
    %83 = arith.addf %82, %81 : vector<16x512xf32>
    %84 = arith.mulf %70, %83 : vector<16x512xf32>
    %cst_29 = arith.constant 0.000000e+00 : f32
    %85 = vector.broadcast %cst_29 : f32 to vector<16x512xf32>
    %86 = arith.subf %85, %64 : vector<16x512xf32>
    %87 = arith.mulf %86, %64 : vector<16x512xf32>
    %88 = math.exp %87 : vector<16x512xf32>
    %89 = arith.mulf %84, %88 : vector<16x512xf32>
    %cst_30 = arith.constant 1.000000e+00 : f32
    %90 = vector.broadcast %cst_30 : f32 to vector<16x512xf32>
    %91 = arith.subf %90, %89 : vector<16x512xf32>
    %cst_31 = arith.constant 0.000000e+00 : f32
    %92 = vector.broadcast %cst_31 : f32 to vector<16x512xf32>
    %93 = arith.cmpf olt, %63, %92 : vector<16x512xf32>
    %cst_32 = arith.constant 0.000000e+00 : f32
    %94 = vector.broadcast %cst_32 : f32 to vector<16x512xf32>
    %95 = arith.subf %94, %91 : vector<16x512xf32>
    %96 = arith.select %93, %95, %91 : vector<16x512xi1>, vector<16x512xf32>
    %cst_33 = arith.constant 1.000000e+00 : f32
    %97 = vector.broadcast %cst_33 : f32 to vector<16x512xf32>
    %98 = arith.addf %97, %96 : vector<16x512xf32>
    %99 = arith.mulf %61, %98 : vector<16x512xf32>
    %c2_i32_34 = arith.constant 2 : i32
    %100 = tpu.dynamic_rotate %99 by %c2_i32_34 dim 1 : vector<16x512xf32>, i32 -> vector<16x512xf32>
    %cst_35 = arith.constant 0.000000e+00 : f32
    %101 = vector.shape_cast %22 : vector<1x512xi1> to vector<1x512xi1>
    %102 = vector.broadcast %101 : vector<1x512xi1> to vector<16x512xi1>
    %103 = vector.broadcast %cst_35 : f32 to vector<16x512xf32>
    %104 = arith.select %102, %100, %103 : vector<16x512xi1>, vector<16x512xf32>
    %c0_36 = arith.constant 0 : index
    %c0_37 = arith.constant 0 : index
    %c0_38 = arith.constant 0 : index
    %105 = vector.load %arg6[%c0_36, %c0_37, %c0_38] : memref<3x32x16xf32, #tpu.memory_space<vmem>>, vector<1x32x16xf32>
    %106 = vector.shape_cast %105 : vector<1x32x16xf32> to vector<32x16xf32>
    %cst_39 = arith.constant dense<0.000000e+00> : vector<32x512xf32>
    %107 = tpu.matmul %106, %104, %cst_39 {dimension_numbers = #tpu.dot_dimension_numbers<[1], [0], [0], [1], [0, 0, 1, 1], [], []>} : vector<32x16xf32>, vector<16x512xf32>, vector<32x512xf32> -> vector<32x512xf32>
    %c1_40 = arith.constant 1 : index
    %c0_41 = arith.constant 0 : index
    %c0_42 = arith.constant 0 : index
    %108 = vector.load %arg6[%c1_40, %c0_41, %c0_42] : memref<3x32x16xf32, #tpu.memory_space<vmem>>, vector<1x32x16xf32>
    %109 = vector.shape_cast %108 : vector<1x32x16xf32> to vector<32x16xf32>
    %cst_43 = arith.constant dense<0.000000e+00> : vector<32x512xf32>
    %110 = tpu.matmul %109, %99, %cst_43 {dimension_numbers = #tpu.dot_dimension_numbers<[1], [0], [0], [1], [0, 0, 1, 1], [], []>} : vector<32x16xf32>, vector<16x512xf32>, vector<32x512xf32> -> vector<32x512xf32>
    %111 = arith.addf %107, %110 : vector<32x512xf32>
    %c510_i32 = arith.constant 510 : i32
    %112 = tpu.dynamic_rotate %99 by %c510_i32 dim 1 : vector<16x512xf32>, i32 -> vector<16x512xf32>
    %cst_44 = arith.constant 0.000000e+00 : f32
    %113 = vector.shape_cast %28 : vector<1x512xi1> to vector<1x512xi1>
    %114 = vector.broadcast %113 : vector<1x512xi1> to vector<16x512xi1>
    %115 = vector.broadcast %cst_44 : f32 to vector<16x512xf32>
    %116 = arith.select %114, %112, %115 : vector<16x512xi1>, vector<16x512xf32>
    %c2_45 = arith.constant 2 : index
    %c0_46 = arith.constant 0 : index
    %c0_47 = arith.constant 0 : index
    %117 = vector.load %arg6[%c2_45, %c0_46, %c0_47] : memref<3x32x16xf32, #tpu.memory_space<vmem>>, vector<1x32x16xf32>
    %118 = vector.shape_cast %117 : vector<1x32x16xf32> to vector<32x16xf32>
    %cst_48 = arith.constant dense<0.000000e+00> : vector<32x512xf32>
    %119 = tpu.matmul %118, %116, %cst_48 {dimension_numbers = #tpu.dot_dimension_numbers<[1], [0], [0], [1], [0, 0, 1, 1], [], []>} : vector<32x16xf32>, vector<16x512xf32>, vector<32x512xf32> -> vector<32x512xf32>
    %120 = arith.addf %111, %119 : vector<32x512xf32>
    %c0_49 = arith.constant 0 : index
    %c0_50 = arith.constant 0 : index
    %121 = vector.load %arg7[%c0_49, %c0_50] : memref<32x1xf32, #tpu.memory_space<vmem>>, vector<32x1xf32>
    %122 = vector.broadcast %121 : vector<32x1xf32> to vector<32x512xf32>
    %123 = arith.mulf %120, %122 : vector<32x512xf32>
    %c0_51 = arith.constant 0 : index
    %c0_52 = arith.constant 0 : index
    %124 = vector.load %arg8[%c0_51, %c0_52] : memref<32x1xf32, #tpu.memory_space<vmem>>, vector<32x1xf32>
    %125 = vector.broadcast %124 : vector<32x1xf32> to vector<32x512xf32>
    %126 = arith.addf %123, %125 : vector<32x512xf32>
    %cst_53 = arith.constant 5.000000e-01 : f32
    %127 = vector.broadcast %cst_53 : f32 to vector<32x512xf32>
    %128 = arith.mulf %127, %126 : vector<32x512xf32>
    %cst_54 = arith.constant 0.707106769 : f32
    %129 = vector.broadcast %cst_54 : f32 to vector<32x512xf32>
    %130 = arith.mulf %126, %129 : vector<32x512xf32>
    %131 = math.absf %130 : vector<32x512xf32>
    %cst_55 = arith.constant 0.327591091 : f32
    %132 = vector.broadcast %cst_55 : f32 to vector<32x512xf32>
    %133 = arith.mulf %132, %131 : vector<32x512xf32>
    %cst_56 = arith.constant 1.000000e+00 : f32
    %134 = vector.broadcast %cst_56 : f32 to vector<32x512xf32>
    %135 = arith.addf %134, %133 : vector<32x512xf32>
    %cst_57 = arith.constant 1.000000e+00 : f32
    %136 = vector.broadcast %cst_57 : f32 to vector<32x512xf32>
    %137 = arith.divf %136, %135 : vector<32x512xf32>
    %cst_58 = arith.constant 1.06140542 : f32
    %138 = vector.broadcast %cst_58 : f32 to vector<32x512xf32>
    %139 = arith.mulf %137, %138 : vector<32x512xf32>
    %cst_59 = arith.constant -1.45315206 : f32
    %140 = vector.broadcast %cst_59 : f32 to vector<32x512xf32>
    %141 = arith.addf %140, %139 : vector<32x512xf32>
    %142 = arith.mulf %137, %141 : vector<32x512xf32>
    %cst_60 = arith.constant 1.42141378 : f32
    %143 = vector.broadcast %cst_60 : f32 to vector<32x512xf32>
    %144 = arith.addf %143, %142 : vector<32x512xf32>
    %145 = arith.mulf %137, %144 : vector<32x512xf32>
    %cst_61 = arith.constant -0.284496725 : f32
    %146 = vector.broadcast %cst_61 : f32 to vector<32x512xf32>
    %147 = arith.addf %146, %145 : vector<32x512xf32>
    %148 = arith.mulf %137, %147 : vector<32x512xf32>
    %cst_62 = arith.constant 0.254829586 : f32
    %149 = vector.broadcast %cst_62 : f32 to vector<32x512xf32>
    %150 = arith.addf %149, %148 : vector<32x512xf32>
    %151 = arith.mulf %137, %150 : vector<32x512xf32>
    %cst_63 = arith.constant 0.000000e+00 : f32
    %152 = vector.broadcast %cst_63 : f32 to vector<32x512xf32>
    %153 = arith.subf %152, %131 : vector<32x512xf32>
    %154 = arith.mulf %153, %131 : vector<32x512xf32>
    %155 = math.exp %154 : vector<32x512xf32>
    %156 = arith.mulf %151, %155 : vector<32x512xf32>
    %cst_64 = arith.constant 1.000000e+00 : f32
    %157 = vector.broadcast %cst_64 : f32 to vector<32x512xf32>
    %158 = arith.subf %157, %156 : vector<32x512xf32>
    %cst_65 = arith.constant 0.000000e+00 : f32
    %159 = vector.broadcast %cst_65 : f32 to vector<32x512xf32>
    %160 = arith.cmpf olt, %130, %159 : vector<32x512xf32>
    %cst_66 = arith.constant 0.000000e+00 : f32
    %161 = vector.broadcast %cst_66 : f32 to vector<32x512xf32>
    %162 = arith.subf %161, %158 : vector<32x512xf32>
    %163 = arith.select %160, %162, %158 : vector<32x512xi1>, vector<32x512xf32>
    %cst_67 = arith.constant 1.000000e+00 : f32
    %164 = vector.broadcast %cst_67 : f32 to vector<32x512xf32>
    %165 = arith.addf %164, %163 : vector<32x512xf32>
    %166 = arith.mulf %128, %165 : vector<32x512xf32>
    %c4_i32_68 = arith.constant 4 : i32
    %167 = tpu.dynamic_rotate %166 by %c4_i32_68 dim 1 : vector<32x512xf32>, i32 -> vector<32x512xf32>
    %cst_69 = arith.constant 0.000000e+00 : f32
    %168 = vector.shape_cast %20 : vector<1x512xi1> to vector<1x512xi1>
    %169 = vector.broadcast %168 : vector<1x512xi1> to vector<32x512xi1>
    %170 = vector.broadcast %cst_69 : f32 to vector<32x512xf32>
    %171 = arith.select %169, %167, %170 : vector<32x512xi1>, vector<32x512xf32>
    %c0_70 = arith.constant 0 : index
    %c0_71 = arith.constant 0 : index
    %c0_72 = arith.constant 0 : index
    %172 = vector.load %arg9[%c0_70, %c0_71, %c0_72] : memref<3x64x32xf32, #tpu.memory_space<vmem>>, vector<1x64x32xf32>
    %173 = vector.shape_cast %172 : vector<1x64x32xf32> to vector<64x32xf32>
    %cst_73 = arith.constant dense<0.000000e+00> : vector<64x512xf32>
    %174 = tpu.matmul %173, %171, %cst_73 {dimension_numbers = #tpu.dot_dimension_numbers<[1], [0], [0], [1], [0, 0, 1, 1], [], []>} : vector<64x32xf32>, vector<32x512xf32>, vector<64x512xf32> -> vector<64x512xf32>
    %c1_74 = arith.constant 1 : index
    %c0_75 = arith.constant 0 : index
    %c0_76 = arith.constant 0 : index
    %175 = vector.load %arg9[%c1_74, %c0_75, %c0_76] : memref<3x64x32xf32, #tpu.memory_space<vmem>>, vector<1x64x32xf32>
    %176 = vector.shape_cast %175 : vector<1x64x32xf32> to vector<64x32xf32>
    %cst_77 = arith.constant dense<0.000000e+00> : vector<64x512xf32>
    %177 = tpu.matmul %176, %166, %cst_77 {dimension_numbers = #tpu.dot_dimension_numbers<[1], [0], [0], [1], [0, 0, 1, 1], [], []>} : vector<64x32xf32>, vector<32x512xf32>, vector<64x512xf32> -> vector<64x512xf32>
    %178 = arith.addf %174, %177 : vector<64x512xf32>
    %c508_i32 = arith.constant 508 : i32
    %179 = tpu.dynamic_rotate %166 by %c508_i32 dim 1 : vector<32x512xf32>, i32 -> vector<32x512xf32>
    %cst_78 = arith.constant 0.000000e+00 : f32
    %180 = vector.shape_cast %30 : vector<1x512xi1> to vector<1x512xi1>
    %181 = vector.broadcast %180 : vector<1x512xi1> to vector<32x512xi1>
    %182 = vector.broadcast %cst_78 : f32 to vector<32x512xf32>
    %183 = arith.select %181, %179, %182 : vector<32x512xi1>, vector<32x512xf32>
    %c2_79 = arith.constant 2 : index
    %c0_80 = arith.constant 0 : index
    %c0_81 = arith.constant 0 : index
    %184 = vector.load %arg9[%c2_79, %c0_80, %c0_81] : memref<3x64x32xf32, #tpu.memory_space<vmem>>, vector<1x64x32xf32>
    %185 = vector.shape_cast %184 : vector<1x64x32xf32> to vector<64x32xf32>
    %cst_82 = arith.constant dense<0.000000e+00> : vector<64x512xf32>
    %186 = tpu.matmul %185, %183, %cst_82 {dimension_numbers = #tpu.dot_dimension_numbers<[1], [0], [0], [1], [0, 0, 1, 1], [], []>} : vector<64x32xf32>, vector<32x512xf32>, vector<64x512xf32> -> vector<64x512xf32>
    %187 = arith.addf %178, %186 : vector<64x512xf32>
    %c0_83 = arith.constant 0 : index
    %c0_84 = arith.constant 0 : index
    %188 = vector.load %arg10[%c0_83, %c0_84] : memref<64x1xf32, #tpu.memory_space<vmem>>, vector<64x1xf32>
    %189 = vector.broadcast %188 : vector<64x1xf32> to vector<64x512xf32>
    %190 = arith.mulf %187, %189 : vector<64x512xf32>
    %c0_85 = arith.constant 0 : index
    %c0_86 = arith.constant 0 : index
    %191 = vector.load %arg11[%c0_85, %c0_86] : memref<64x1xf32, #tpu.memory_space<vmem>>, vector<64x1xf32>
    %192 = vector.broadcast %191 : vector<64x1xf32> to vector<64x512xf32>
    %193 = arith.addf %190, %192 : vector<64x512xf32>
    %cst_87 = arith.constant 5.000000e-01 : f32
    %194 = vector.broadcast %cst_87 : f32 to vector<64x512xf32>
    %195 = arith.mulf %194, %193 : vector<64x512xf32>
    %cst_88 = arith.constant 0.707106769 : f32
    %196 = vector.broadcast %cst_88 : f32 to vector<64x512xf32>
    %197 = arith.mulf %193, %196 : vector<64x512xf32>
    %198 = math.absf %197 : vector<64x512xf32>
    %cst_89 = arith.constant 0.327591091 : f32
    %199 = vector.broadcast %cst_89 : f32 to vector<64x512xf32>
    %200 = arith.mulf %199, %198 : vector<64x512xf32>
    %cst_90 = arith.constant 1.000000e+00 : f32
    %201 = vector.broadcast %cst_90 : f32 to vector<64x512xf32>
    %202 = arith.addf %201, %200 : vector<64x512xf32>
    %cst_91 = arith.constant 1.000000e+00 : f32
    %203 = vector.broadcast %cst_91 : f32 to vector<64x512xf32>
    %204 = arith.divf %203, %202 : vector<64x512xf32>
    %cst_92 = arith.constant 1.06140542 : f32
    %205 = vector.broadcast %cst_92 : f32 to vector<64x512xf32>
    %206 = arith.mulf %204, %205 : vector<64x512xf32>
    %cst_93 = arith.constant -1.45315206 : f32
    %207 = vector.broadcast %cst_93 : f32 to vector<64x512xf32>
    %208 = arith.addf %207, %206 : vector<64x512xf32>
    %209 = arith.mulf %204, %208 : vector<64x512xf32>
    %cst_94 = arith.constant 1.42141378 : f32
    %210 = vector.broadcast %cst_94 : f32 to vector<64x512xf32>
    %211 = arith.addf %210, %209 : vector<64x512xf32>
    %212 = arith.mulf %204, %211 : vector<64x512xf32>
    %cst_95 = arith.constant -0.284496725 : f32
    %213 = vector.broadcast %cst_95 : f32 to vector<64x512xf32>
    %214 = arith.addf %213, %212 : vector<64x512xf32>
    %215 = arith.mulf %204, %214 : vector<64x512xf32>
    %cst_96 = arith.constant 0.254829586 : f32
    %216 = vector.broadcast %cst_96 : f32 to vector<64x512xf32>
    %217 = arith.addf %216, %215 : vector<64x512xf32>
    %218 = arith.mulf %204, %217 : vector<64x512xf32>
    %cst_97 = arith.constant 0.000000e+00 : f32
    %219 = vector.broadcast %cst_97 : f32 to vector<64x512xf32>
    %220 = arith.subf %219, %198 : vector<64x512xf32>
    %221 = arith.mulf %220, %198 : vector<64x512xf32>
    %222 = math.exp %221 : vector<64x512xf32>
    %223 = arith.mulf %218, %222 : vector<64x512xf32>
    %cst_98 = arith.constant 1.000000e+00 : f32
    %224 = vector.broadcast %cst_98 : f32 to vector<64x512xf32>
    %225 = arith.subf %224, %223 : vector<64x512xf32>
    %cst_99 = arith.constant 0.000000e+00 : f32
    %226 = vector.broadcast %cst_99 : f32 to vector<64x512xf32>
    %227 = arith.cmpf olt, %197, %226 : vector<64x512xf32>
    %cst_100 = arith.constant 0.000000e+00 : f32
    %228 = vector.broadcast %cst_100 : f32 to vector<64x512xf32>
    %229 = arith.subf %228, %225 : vector<64x512xf32>
    %230 = arith.select %227, %229, %225 : vector<64x512xi1>, vector<64x512xf32>
    %cst_101 = arith.constant 1.000000e+00 : f32
    %231 = vector.broadcast %cst_101 : f32 to vector<64x512xf32>
    %232 = arith.addf %231, %230 : vector<64x512xf32>
    %233 = arith.mulf %195, %232 : vector<64x512xf32>
    %c0_102 = arith.constant 0 : index
    %c0_103 = arith.constant 0 : index
    %234 = vector.load %arg2[%c0_102, %c0_103] : memref<512x4xf32, #tpu.memory_space<vmem>>, vector<512x4xf32>
    %cst_104 = arith.constant dense<0.000000e+00> : vector<64x4xf32>
    %235 = tpu.matmul %233, %234, %cst_104 {dimension_numbers = #tpu.dot_dimension_numbers<[1], [0], [0], [1], [0, 0, 1, 1], [], []>} : vector<64x512xf32>, vector<512x4xf32>, vector<64x4xf32> -> vector<64x4xf32>
    %c0_105 = arith.constant 0 : index
    %c0_106 = arith.constant 0 : index
    %236 = vector.load %arg12[%c0_105, %c0_106] : memref<64x1024xf32, #tpu.memory_space<vmem>>, vector<64x1024xf32>
    %cst_107 = arith.constant dense<0.000000e+00> : vector<4x1024xf32>
    %237 = tpu.matmul %235, %236, %cst_107 {dimension_numbers = #tpu.dot_dimension_numbers<[0], [0], [1], [1], [0, 1, 1, 1], [], []>} : vector<64x4xf32>, vector<64x1024xf32>, vector<4x1024xf32> -> vector<4x1024xf32>
    %c0_108 = arith.constant 0 : index
    %c0_109 = arith.constant 0 : index
    %238 = vector.load %arg13[%c0_108, %c0_109] : memref<1x1024xf32, #tpu.memory_space<vmem>>, vector<1x1024xf32>
    %239 = vector.broadcast %238 : vector<1x1024xf32> to vector<4x1024xf32>
    %240 = arith.addf %237, %239 : vector<4x1024xf32>
    %c0_110 = arith.constant 0 : index
    %c0_111 = arith.constant 0 : index
    %c0_112 = arith.constant 0 : index
    %241 = vector.load %arg14[%c0_110, %c0_111, %c0_112] : memref<1x4x1024xf32, #tpu.memory_space<vmem>>, vector<1x4x1024xf32>
    %242 = vector.shape_cast %241 : vector<1x4x1024xf32> to vector<4x1024xf32>
    %243 = vector.shape_cast %240 : vector<4x1024xf32> to vector<1x4x1024xf32>
    tpu.vector_store %arg14[%c0_110, %c0_111, %c0_112], %243 {strides = array<i32>} : memref<1x4x1024xf32, #tpu.memory_space<vmem>>, vector<1x4x1024xf32>,
    return
  }
  func.func @transform_0(%arg0: i32) -> (i32, i32, i32) {
    %c0_i32 = arith.constant 0 : i32
    %c0_i32_0 = arith.constant 0 : i32
    %c0_i32_1 = arith.constant 0 : i32
    return %arg0, %c0_i32, %c0_i32_0 : i32, i32, i32
  }
  func.func @transform_1(%arg0: i32) -> (i32, i32) {
    %c0_i32 = arith.constant 0 : i32
    %c0_i32_0 = arith.constant 0 : i32
    %c0_i32_1 = arith.constant 0 : i32
    return %c0_i32, %c0_i32_0 : i32, i32
  }
  func.func @transform_2(%arg0: i32) -> (i32, i32, i32) {
    %c0_i32 = arith.constant 0 : i32
    %c0_i32_0 = arith.constant 0 : i32
    %c0_i32_1 = arith.constant 0 : i32
    %c0_i32_2 = arith.constant 0 : i32
    return %c0_i32, %c0_i32_0, %c0_i32_1 : i32, i32, i32
  }
  func.func @transform_3(%arg0: i32) -> (i32, i32) {
    %c0_i32 = arith.constant 0 : i32
    %c0_i32_0 = arith.constant 0 : i32
    %c0_i32_1 = arith.constant 0 : i32
    return %c0_i32, %c0_i32_0 : i32, i32
  }
  func.func @transform_4(%arg0: i32) -> (i32, i32) {
    %c0_i32 = arith.constant 0 : i32
    %c0_i32_0 = arith.constant 0 : i32
    %c0_i32_1 = arith.constant 0 : i32
    return %c0_i32, %c0_i32_0 : i32, i32
  }
  func.func @transform_5(%arg0: i32) -> (i32, i32, i32) {
    %c0_i32 = arith.constant 0 : i32
    %c0_i32_0 = arith.constant 0 : i32
    %c0_i32_1 = arith.constant 0 : i32
    %c0_i32_2 = arith.constant 0 : i32
    return %c0_i32, %c0_i32_0, %c0_i32_1 : i32, i32, i32
  }
  func.func @transform_6(%arg0: i32) -> (i32, i32) {
    %c0_i32 = arith.constant 0 : i32
    %c0_i32_0 = arith.constant 0 : i32
    %c0_i32_1 = arith.constant 0 : i32
    return %c0_i32, %c0_i32_0 : i32, i32
  }
  func.func @transform_7(%arg0: i32) -> (i32, i32) {
    %c0_i32 = arith.constant 0 : i32
    %c0_i32_0 = arith.constant 0 : i32
    %c0_i32_1 = arith.constant 0 : i32
    return %c0_i32, %c0_i32_0 : i32, i32
  }
  func.func @transform_8(%arg0: i32) -> (i32, i32, i32) {
    %c0_i32 = arith.constant 0 : i32
    %c0_i32_0 = arith.constant 0 : i32
    %c0_i32_1 = arith.constant 0 : i32
    %c0_i32_2 = arith.constant 0 : i32
    return %c0_i32, %c0_i32_0, %c0_i32_1 : i32, i32, i32
  }
  func.func @transform_9(%arg0: i32) -> (i32, i32) {
    %c0_i32 = arith.constant 0 : i32
    %c0_i32_0 = arith.constant 0 : i32
    %c0_i32_1 = arith.constant 0 : i32
    return %c0_i32, %c0_i32_0 : i32, i32
  }
  func.func @transform_10(%arg0: i32) -> (i32, i32) {
    %c0_i32 = arith.constant 0 : i32
    %c0_i32_0 = arith.constant 0 : i32
    %c0_i32_1 = arith.constant 0 : i32
    return %c0_i32, %c0_i32_0 : i32, i32
  }
  func.func @transform_11(%arg0: i32) -> (i32, i32) {
    %c0_i32 = arith.constant 0 : i32
    %c0_i32_0 = arith.constant 0 : i32
    %c0_i32_1 = arith.constant 0 : i32
    return %c0_i32, %c0_i32_0 : i32, i32
  }
  func.func @transform_12(%arg0: i32) -> (i32, i32) {
    %c0_i32 = arith.constant 0 : i32
    %c0_i32_0 = arith.constant 0 : i32
    %c0_i32_1 = arith.constant 0 : i32
    return %c0_i32, %c0_i32_0 : i32, i32
  }
  func.func @transform_13(%arg0: i32) -> (i32, i32, i32) {
    %c0_i32 = arith.constant 0 : i32
    %c0_i32_0 = arith.constant 0 : i32
    %c0_i32_1 = arith.constant 0 : i32
    return %arg0, %c0_i32, %c0_i32_0 : i32, i32, i32
  }
}

</mosaic_0001>

<bundles_post_ra>
// kernel: tpu_custom_call.1
= control target key start
LH: loop header
LB: loop body
LE: loop exit
PB: predicated region body
PF: predicated region fallthrough
CT: control target
= control target key end

     0   :  { %s9846_s0 = inlined_call_operand.vmem [shape: f32[2,1,512], index: 0, kind: input, shape index: {}]   ;;  %s9847_s1 = inlined_call_operand.vmem [shape: f32[512,4], index: 1, kind: input, shape index: {}]   ;;  %s9848_s2 = inlined_call_operand.vmem [shape: f32[3,16,1], index: 2, kind: input, shape index: {}]   ;;  %s9849_s3 = inlined_call_operand.vmem [shape: f32[16,1], index: 3, kind: input, shape index: {}]   ;;  %s9850_s4 = inlined_call_operand.vmem [shape: f32[16,1], index: 4, kind: input, shape index: {}]   ;;  %s9851_s5 = inlined_call_operand.vmem [shape: f32[3,32,16], index: 5, kind: input, shape index: {}]   ;;  %s9852_s6 = inlined_call_operand.vmem [shape: f32[32,1], index: 6, kind: input, shape index: {}]   ;;  %s9853_s7 = inlined_call_operand.vmem [shape: f32[32,1], index: 7, kind: input, shape index: {}]   ;;  %s9854_s8 = inlined_call_operand.vmem [shape: f32[3,64,32], index: 8, kind: input, shape index: {}]   ;;  %s9855_s9 = inlined_call_operand.vmem [shape: f32[64,1], index: 9, kind: input, shape index: {}]   ;;  %s9856_s10 = inlined_call_operand.vmem [shape: f32[64,1], index: 10, kind: input, shape index: {}]   ;;  %s9857_s11 = inlined_call_operand.vmem [shape: f32[64,1024], index: 11, kind: input, shape index: {}]   ;;  %s9858_s12 = inlined_call_operand.vmem [shape: f32[1,1024], index: 12, kind: input, shape index: {}]   ;;  %s9859_s13 = inlined_call_operand.hbm [shape: f32[2,4,1024], index: 13, kind: output, shape index: {}]  }
   0x1   :  { %10048 = sst [smem:[#allocation122_spill]] %s9846_s0 }
   0x2   :  { %18 = vsyncpa [#allocation3], 0 }
   0x3   :  { %20 = vsyncpa [#allocation3 + $0x1], 0  ;;  %s5691_s25 = smov 0   ;;  %s5693_s26 = smov 0  }
   0x4   :  { %s5695_s27 = smov 0   ;;  %s5697_s28 = smov 0  }
   0x5 LB: > { %10049 = sst [smem:[#allocation5_spill]] %s5608_s27  ;;  %s5712_s29 = sadd.s32 4294967295, %s5612_s28   ;;  %s5612_s28 = sphi %s5697_s28, %s10561_s28   ;;  %s5608_s27 = sphi %s5695_s27, %s10558_s27   ;;  %s5604_s26 = sphi %s5693_s26, %s10560_s26   ;;  %s5600_s25 = sphi %s5691_s25, %s10559_s25  }
   0x6   : > { %s5036_s30 = sadd.s32 4294967294, %s5612_s28   ;;  %s5716_s14 = sadd.s32 1, %s5612_s28  }
   0x7   : > { %s311_s15 = sadd.s32 1, %s5608_s27  ;;  %s308_s16 = ssub.s32 %s5612_s28, %s5716_s14 }
   0x8   : > { %p321_p0 = scmp.ne.s32.totalorder %s5608_s27, %s5604_s26  ;;  %p309_p1 = scmp.eq.s32.totalorder %s308_s16, 0 }
   0x9   : > { %p322_p2 = scmp.eq.s32.totalorder %s5712_s29, 1  ;;  %p327_p3 = scmp.ne.s32.totalorder %s5604_s26, %s5600_s25 }
   0xa   : > { %p328_p4 = scmp.eq.s32.totalorder %s5036_s30, 1  ;;  %p5039_p7 = scmp.ge.s32.totalorder %s5612_s28, 1 }
   0xb   : > { %s5727_s17 = scalar_select %p309_p1, %s5608_s27, %s311_s15  }
   0xc   : > { %p5729_p5 = por %p322_p2, %p321_p0  ;;  %p5733_p6 = por %p328_p4, %p327_p3 }
   0xd   : > { %10050 = sst [smem:[#allocation6_spill]] %s5727_s17  ;;  %p389_p8 = scmp.lt.s32.totalorder %s5612_s28, 3 }
   0xf   : > { %p390_p9 = pnand %p5039_p7, %p389_p8 }
  0x11   : > { %393 = sbr.rel (%p390_p9) target bundleno = 1805 (0x70d), region = 72 }
  0x16   : > { %p432_p10 = scmp.lt.s32.totalorder %s5712_s29, 1  ;;  %v5614_v0 = vmov 0   ;;  %s10053_s0 = sld [smem:[#allocation122_spill]]  ;;  %v541_v6 = vld [vmem:[%s9848_s2 + $0x8] sm:$0xff]  ;;  %v5043_v7 = vld [vmem:[%s9848_s2 + $0x18] sm:$0xff]  ;;  %v540_v8 = vld [vmem:[%s9848_s2] sm:$0xff]  ;;  %v437_v20 = vlaneseq }
  0x17   : > { %5324 = vset.pattern.permute.xlu2 %v5614_v0  ;;  %5323 = vset.pattern.permute.xlu1 %v5614_v0  ;;  %s5615_s30 = smov 1   ;;  %s5616_s15 = smov 127   ;;  %v5042_v9 = vld [vmem:[%s9848_s2 + $0x10] sm:$0xff]  ;;  %v5044_v10 = vld [vmem:[%s9848_s2 + $0x20] sm:$0xff]  ;;  %v644_v11 = vld [vmem:[%s9849_s3 + $0x8] sm:$0xff] }
  0x18   : > { %s433_s20 = scalar_select %p432_p10, %s5712_s29, 1  ;;  %5325 = vset.pattern.permute.xlu0 %v5614_v0  ;;  %v5045_v12 = vld [vmem:[%s9848_s2 + $0x28] sm:$0xff]  ;;  %v643_v13 = vld [vmem:[%s9849_s3] sm:$0xff]  ;;  %v5790_v22 = vand.u32 127, %v437_v20 }
  0x19   : > { %v664_v14 = vld [vmem:[%s9850_s4 + $0x8] sm:$0xff]  ;;  %v663_v15 = vld [vmem:[%s9850_s4] sm:$0xff]  ;;  %s5617_s27 = smov 2   ;;  %s5618_s16 = smov 126  }
  0x1a   : > { %s5041_s21 = sshll.u32 %s433_s20, 2  ;;  %10054 = vst [vmem:[#allocation7_spill] sm:$0xff] %v5790_v22  ;;  %v439_v25 = vadd.s32 128, %v5790_v22  ;;  %v441_v26 = vadd.s32 384, %v5790_v22  ;;  %v440_v27 = vadd.s32 256, %v5790_v22  ;;  %vm502_vm0 = vcmp.lt.s32.totalorder %v5790_v22, 127 }
  0x1b   : > { %vm531_vm1 = vcmp.lt.s32.totalorder %v5790_v22, 1  ;;  %vm498_vm5 = vcmp.ge.s32.totalorder %v5790_v22, 1  ;;  %s5570_s20 = scalar_lea.hbm %s9859_s13, 64 }
  0x1c   : > { %s435_s24 = scalar_lea.vmem %s10053_s0, %s5041_s21  ;;  %v5799_v29 = vand.u32 127, %v439_v25  ;;  %v5801_v30 = vand.u32 127, %v441_v26  ;;  %v5803_v32 = vand.u32 127, %v440_v27 }
  0x1d   : > { %v436_v1 = vld [vmem:[%s435_s24] sm:$0xf]  ;;  %s5619_s24 = smov 4  }
  0x1e   : > { %v5744_v2 = vperm.slane %v436_v1, 2  ;;  %v5746_v3 = vperm.slane %v436_v1, 1  ;;  %v5748_v4 = vperm.slane %v436_v1, 0  ;;  %v5753_v5 = vperm.slane %v436_v1, 3  ;;  %10055 = vst [vmem:[#allocation8_spill] sm:$0xff] %v5799_v29 }
  0x1f   : > { %10056 = vst [vmem:[#allocation9_spill] sm:$0xff] %v5801_v30  ;;  %vm503_vm2 = vcmp.lt.s32.totalorder %v5799_v29, 127  ;;  %vm501_vm3 = vcmp.ge.s32.totalorder %v5801_v30, 1  ;;  %vm500_vm4 = vcmp.ge.s32.totalorder %v5803_v32, 1  ;;  %vm499_vm6 = vcmp.ge.s32.totalorder %v5799_v29, 1 }
  0x20   : > { %527 = vrot.lane.b32.xlu1 %v5744_v2, %s5615_s30  ;;  %595 = vrot.lane.b32.xlu2 %v5746_v3, %s5616_s15  ;;  %10057 = vst [vmem:[#allocation10_spill] sm:$0xff] %v5803_v32  ;;  %vm504_vm7 = vcmp.lt.s32.totalorder %v5803_v32, 127  ;;  %vm505_vm8 = vcmp.lt.s32.totalorder %v5801_v30, 127 }
  0x21   : > { %523 = vrot.lane.b32.xlu0 %v5748_v4, %s5615_s30 }
  0x28   : > { %529 = vrot.lane.b32.xlu1 %v5753_v5, %s5615_s30  ;;  %597 = vrot.lane.b32.xlu2 %v5744_v2, %s5616_s15 }
  0x29   : > { %525 = vrot.lane.b32.xlu0 %v5746_v3, %s5615_s30  ;;  %s5620_s30 = smov 124  }
  0x30   : > { %549 = vperm.xlu1 %5323, %v541_v6   ;;  %574 = vperm.xlu2 %5324, %v5043_v7  }
  0x31   : > { %599 = vrot.lane.b32.xlu0 %v5753_v5, %s5616_s15 }
  0x38   : > { %544 = vperm.xlu1 %5323, %v540_v8   ;;  %569 = vperm.xlu2 %5324, %v5042_v9  }
  0x39   : > { %593 = vrot.lane.b32.xlu0 %v5748_v4, %s5616_s15 }
  0x40   : > { %615 = vperm.xlu1 %5323, %v5044_v10   ;;  %652 = vperm.xlu2 %5324, %v644_v11  }
  0x41   : > { %620 = vperm.xlu0 %5325, %v5045_v12  }
  0x48   : > { %647 = vperm.xlu1 %5323, %v643_v13   ;;  %672 = vperm.xlu2 %5324, %v664_v14  }
  0x49   : > { %667 = vperm.xlu0 %5325, %v663_v15  }
  0x7a   : > { %v596_v16 = vpop.permute.xlu2 %595 }
  0x82   : > { %v598_v17 = vpop.permute.xlu2 %597 }
  0x83   : > { %v603_v34 = vsel %vm502_vm0, %v596_v16, %v598_v17 }
  0x84   : > { %v607_v39 = vsel %vm503_vm2, %v603_v34, 0.0 }
  0x85   : > { %v624_v48 = vperm.slane %v607_v39, 0 }
  0x8a   : > { %v5792_v23 = vpop.permute.xlu2 %574 }
  0x8b   : > { %v583_v52 = vmul.f32 %v5792_v23, %v5744_v2  ;;  %v584_v53 = vmul.f32 %v5792_v23, %v5753_v5 }
  0x92   : > { %v528_v18 = vpop.permute.xlu1 %527  ;;  %v570_v33 = vpop.permute.xlu2 %569 }
  0x93   : > { %v524_v19 = vpop.permute.xlu0 %523  ;;  %v577_v61 = vmul.f32 %v570_v33, %v5748_v4  ;;  %v578_v62 = vmul.f32 %v570_v33, %v5746_v3  ;;  %v579_v63 = vmul.f32 %v570_v33, %v5744_v2  ;;  %v580_v1 = vmul.f32 %v570_v33, %v5753_v5 }
  0x9a   : > { %v530_v21 = vpop.permute.xlu1 %529  ;;  %v5828_v54 = vpop.permute.xlu2 %652 }
  0x9b   : > { %v526_v24 = vpop.permute.xlu0 %525  ;;  %v532_v35 = vsel %vm531_vm1, %v528_v18, %v530_v21  ;;  %v535_v37 = vsel %vm531_vm1, %v530_v21, %v524_v19 }
  0x9c   : > { %v533_v36 = vsel %vm531_vm1, %v526_v24, %v528_v18  ;;  %v539_v40 = vsel %vm501_vm3, %v532_v35, 0.0  ;;  %v534_v41 = vsel %vm531_vm1, %v524_v19, %v526_v24  ;;  %v5820_v46 = vsel %vm498_vm5, %v535_v37, 0.0 }
  0x9d   : > { %v538_v42 = vsel %vm500_vm4, %v533_v36, 0.0  ;;  %v555_v49 = vperm.slane %v539_v40, 0  ;;  %v537_v50 = vsel %vm499_vm6, %v534_v41, 0.0  ;;  %v552_v57 = vperm.slane %v5820_v46, 0 }
  0x9e   : > { %v554_v51 = vperm.slane %v538_v42, 0  ;;  %v553_v0 = vperm.slane %v537_v50, 0  ;;  %v582_v41 = vmul.f32 %v5792_v23, %v5746_v3 }
  0xa2   : > { %v5797_v28 = vpop.permute.xlu1 %549  ;;  %v5842_v36 = vpop.permute.xlu2 %672 }
  0xa3   : > { %v600_v31 = vpop.permute.xlu0 %599  ;;  %v562_v58 = vmul.f32 %v554_v51, %v5797_v28  ;;  %v563_v59 = vmul.f32 %v555_v49, %v5797_v28  ;;  %v561_v33 = vmul.f32 %v553_v0, %v5797_v28 }
  0xa4   : > { %v602_v44 = vsel %vm502_vm0, %v598_v17, %v600_v31 }
  0xa5   : > { %v608_v55 = vsel %vm504_vm7, %v602_v44, 0.0  ;;  %v591_v15 = vadd.f32 %v583_v52, %v562_v58  ;;  %v590_v50 = vadd.f32 %v582_v41, %v561_v33 }
  0xa6   : > { %v625_v6 = vperm.slane %v608_v55, 0 }
  0xaa   : > { %v545_v38 = vpop.permute.xlu1 %544 }
  0xab   : > { %v594_v43 = vpop.permute.xlu0 %593  ;;  %v556_v7 = vmul.f32 %v552_v57, %v545_v38  ;;  %v557_v10 = vmul.f32 %v553_v0, %v545_v38  ;;  %v558_v11 = vmul.f32 %v554_v51, %v545_v38  ;;  %v559_v12 = vmul.f32 %v555_v49, %v545_v38 }
  0xac   : > { %v605_v45 = vsel %vm502_vm0, %v600_v31, %v594_v43  ;;  %v604_v47 = vsel %vm502_vm0, %v594_v43, %v596_v16  ;;  %v592_v16 = vadd.f32 %v584_v53, %v563_v59  ;;  %v560_v59 = vmul.f32 %v552_v57, %v5797_v28 }
  0xad   : > { %v609_v56 = vsel %vm505_vm8, %v605_v45, 0.0  ;;  %v606_v60 = vsel %vm502_vm0, %v604_v47, 0.0  ;;  %v585_v5 = vadd.f32 %v577_v61, %v556_v7  ;;  %v586_v26 = vadd.f32 %v578_v62, %v557_v10 }
  0xae   : > { %v626_v8 = vperm.slane %v609_v56, 0  ;;  %v623_v13 = vperm.slane %v606_v60, 0  ;;  %v587_v27 = vadd.f32 %v579_v63, %v558_v11  ;;  %v588_v31 = vadd.f32 %v580_v1, %v559_v12 }
  0xb2   : > { %v616_v9 = vpop.permute.xlu1 %615 }
  0xb3   : > { %v621_v14 = vpop.permute.xlu0 %620  ;;  %v627_v19 = vmul.f32 %v623_v13, %v616_v9  ;;  %v628_v20 = vmul.f32 %v624_v48, %v616_v9  ;;  %v629_v21 = vmul.f32 %v625_v6, %v616_v9  ;;  %v630_v2 = vmul.f32 %v626_v8, %v616_v9 }
  0xb4   : > { %v633_v17 = vmul.f32 %v625_v6, %v621_v14  ;;  %v634_v18 = vmul.f32 %v626_v8, %v621_v14  ;;  %v632_v42 = vmul.f32 %v624_v48, %v621_v14  ;;  %v581_v48 = vmul.f32 %v5792_v23, %v5748_v4 }
  0xb5   : > { %v635_v37 = vadd.f32 %v627_v19, %v585_v5  ;;  %v636_v38 = vadd.f32 %v628_v20, %v586_v26  ;;  %v637_v39 = vadd.f32 %v629_v21, %v587_v27  ;;  %v638_v40 = vadd.f32 %v630_v2, %v588_v31 }
  0xb6   : > { %v641_v24 = vadd.f32 %v633_v17, %v591_v15  ;;  %v642_v25 = vadd.f32 %v634_v18, %v592_v16  ;;  %v640_v60 = vadd.f32 %v632_v42, %v590_v50  ;;  %v631_v0 = vmul.f32 %v623_v13, %v621_v14 }
  0xb7   : > { %v589_v57 = vadd.f32 %v581_v48, %v560_v59 }
  0xb8   : > { %v661_v34 = vmul.f32 %v5828_v54, %v641_v24  ;;  %v662_v35 = vmul.f32 %v5828_v54, %v642_v25  ;;  %v660_v9 = vmul.f32 %v5828_v54, %v640_v60 }
  0xb9   : > { %v639_v13 = vadd.f32 %v631_v0, %v589_v57 }
  0xba   : > { %v648_v43 = vpop.permute.xlu1 %647  ;;  %v682_v44 = vadd.f32 %v5842_v36, %v662_v35  ;;  %v681_v53 = vadd.f32 %v5842_v36, %v661_v34  ;;  %v680_v5 = vadd.f32 %v5842_v36, %v660_v9 }
  0xbb   : > { %v655_v45 = vmul.f32 %v648_v43, %v635_v37  ;;  %v656_v46 = vmul.f32 %v648_v43, %v636_v38  ;;  %v657_v47 = vmul.f32 %v648_v43, %v637_v39  ;;  %v658_v49 = vmul.f32 %v648_v43, %v638_v40  ;;  %v668_v51 = vpop.permute.xlu0 %667 }
  0xbc   : > { %v5847_v52 = vmul.f32 0.70710677, %v682_v44  ;;  %v5874_v7 = vmul.f32 0.70710677, %v681_v53  ;;  %v659_v26 = vmul.f32 %v5828_v54, %v639_v13  ;;  %v5901_v39 = vmul.f32 0.70710677, %v680_v5 }
  0xbd   : > { %v5850_v55 = vadd.f32 %v668_v51, %v655_v45  ;;  %v5852_v56 = vadd.f32 %v668_v51, %v656_v46  ;;  %v5854_v58 = vadd.f32 %v668_v51, %v657_v47  ;;  %v5856_v3 = vadd.f32 %v668_v51, %v658_v49 }
  0xbe   : > { %v706_v6 = vand.u32 2147483647, %v5847_v52  ;;  %v705_v16 = vand.u32 2147483647, %v5874_v7  ;;  %v5906_v54 = vadd.f32 %v5842_v36, %v659_v26  ;;  %v5910_v43 = vmul.f32 0.5, %v682_v44 }
  0xbf   : > { %v5862_v61 = vmul.f32 0.70710677, %v5850_v55  ;;  %v5865_v62 = vmul.f32 0.70710677, %v5852_v56  ;;  %v5868_v63 = vmul.f32 0.70710677, %v5854_v58 }
  0xc0   : > { %v5871_v1 = vmul.f32 0.70710677, %v5856_v3  ;;  %v714_v20 = vmul.f32 0.3275911, %v706_v6  ;;  %v922_v25 = vsub.f32 0.0, %v706_v6  ;;  %v921_v34 = vsub.f32 0.0, %v705_v16 }
  0xc1   : > { %v5877_v4 = vand.u32 2147483647, %v5862_v61  ;;  %v700_v23 = vand.u32 2147483647, %v5865_v62  ;;  %v701_v28 = vand.u32 2147483647, %v5868_v63 }
  0xc2   : > { %v702_v8 = vand.u32 2147483647, %v5871_v1  ;;  %v713_v31 = vmul.f32 0.3275911, %v705_v16  ;;  %v5898_v33 = vadd.f32 1.0, %v714_v20  ;;  %v930_v38 = vmul.f32 %v922_v25, %v706_v6 }
  0xc3   : > { %v707_v10 = vmul.f32 0.3275911, %v5877_v4  ;;  %v708_v11 = vmul.f32 0.3275911, %v700_v23  ;;  %v709_v12 = vmul.f32 0.3275911, %v701_v28  ;;  %v929_v46 = vmul.f32 %v921_v34, %v705_v16 }
  0xc4   : > { %v710_v14 = vmul.f32 0.3275911, %v702_v8  ;;  %v917_v15 = vsub.f32 0.0, %v701_v28  ;;  %v916_v2 = vsub.f32 0.0, %v700_v23  ;;  %v918_v24 = vsub.f32 0.0, %v702_v8 }
  0xc5   : > { %v5885_v17 = vadd.f32 1.0, %v707_v10  ;;  %v5887_v18 = vadd.f32 1.0, %v708_v11  ;;  %v5889_v19 = vadd.f32 1.0, %v709_v12  ;;  %v5903_v41 = vadd.f32 1.0, %v713_v31 }
  0xc6   : > { %v5891_v21 = vadd.f32 1.0, %v710_v14  ;;  %v925_v27 = vmul.f32 %v917_v15, %v701_v28  ;;  %v924_v35 = vmul.f32 %v916_v2, %v700_v23  ;;  %v926_v37 = vmul.f32 %v918_v24, %v702_v8 }
  0xc7   : > { %5326 = vrcp.f32 %v5885_v17  ;;  %v837_v45 = vand.u32 2147483647, %v5898_v33  ;;  %v704_v47 = vand.u32 2147483647, %v5901_v39  ;;  %v839_v48 = vand.u32 2147483648, %v5898_v33 }
  0xc8   : > { %5328 = vrcp.f32 %v5887_v18  ;;  %v935_v40 = vmul.f32 1.442695, %v925_v27  ;;  %v5916_v50 = vmul.f32 1.442695, %v924_v35  ;;  %v937_v51 = vmul.f32 1.442695, %v926_v37 }
  0xc9   : > { %5330 = vrcp.f32 %v5889_v19  ;;  %v5919_v59 = vmul.f32 0.5, %v681_v53  ;;  %v945_v44 = vmul.f32 1.442695, %v930_v38  ;;  %v712_v60 = vmul.f32 0.3275911, %v704_v47 }
  0xca   : > { %5332 = vrcp.f32 %v5891_v21  ;;  %v920_v0 = vsub.f32 0.0, %v704_v47  ;;  %v824_v28 = vand.u32 2147483648, %v5903_v41  ;;  %v5930_v57 = vmul.f32 0.70710677, %v5906_v54 }
  0xcb   : > { %5334 = vrcp.f32 %v5898_v33  ;;  %v943_v8 = vmul.f32 1.442695, %v929_v46  ;;  %v5937_v9 = vadd.f32 1.0, %v712_v60  ;;  %v5948_v15 = vor.u32 1.1754944e-38, %v839_v48 }
  0xcc   : > { %5336 = vpow2.f32 %v935_v40  ;;  %v928_v12 = vmul.f32 %v920_v0, %v704_v47  ;;  %v703_v13 = vand.u32 2147483647, %v5930_v57  ;;  %v5950_v16 = vmul.f32 0.5, %v680_v5 }
  0xcd   : > { %v5908_v42 = vpop.eup %5326  ;;  %5338 = vrcp.f32 %v5903_v41  ;;  %vm833_vm9 = vweird.f32 %v5898_v33  ;;  %v822_v20 = vand.u32 2147483647, %v5903_v41  ;;  %v5955_v2 = vor.u32 1.1754944e-38, %v824_v28 }
  0xce   : > { %v5914_v49 = vpop.eup %5328  ;;  %v5934_v53 = vmul.f32 %v5908_v42, %v5885_v17  ;;  %5340 = vrcp.f32 %v5937_v9  ;;  %v711_v24 = vmul.f32 0.3275911, %v703_v13  ;;  %v809_v27 = vand.u32 2147483648, %v5937_v9 }
  0xcf   : > { %v5921_v36 = vpop.eup %5330  ;;  %v5941_v10 = vmul.f32 %v5914_v49, %v5887_v18  ;;  %5342 = vpow2.f32 %v937_v51  ;;  %vm5964_vm10 = vcmp.eq.f32.partialorder %v837_v45, 8.507059e+37  ;;  %vm818_vm11 = vweird.f32 %v5903_v41 }
  0xd0   : > { %v5924_v6 = vpop.eup %5332  ;;  %v754_v23 = vmul.f32 %v5921_v36, %v5889_v19  ;;  %5344 = vpow2.f32 %v945_v44  ;;  %v807_v38 = vand.u32 2147483647, %v5937_v9  ;;  %v941_v40 = vmul.f32 1.442695, %v928_v12 }
  0xd1   : > { %v5946_v14 = vmul.f32 %v5924_v6, %v5891_v21  ;;  %v5335_v25 = vpop.eup %5334  ;;  %5346 = vpow2.f32 %v943_v8  ;;  %v5971_v51 = vadd.f32 1.0, %v711_v24  ;;  %v919_v48 = vsub.f32 0.0, %v703_v13 }
  0xd2   : > { %v755_v11 = vsub.f32 1.0, %v754_v23  ;;  %v5960_v5 = vpop.eup %5336  ;;  %v829_v35 = vmul.f32 %v5335_v25, %v5898_v33  ;;  %vm834_vm12 = vweird.f32 %v5335_v25  ;;  %vm5974_vm13 = vcmp.eq.f32.partialorder %v822_v20, 8.507059e+37 }
  0xd3   : > { %v5339_v46 = vpop.eup %5338  ;;  %v770_v47 = vsub.f32 1.0, %v5946_v14  ;;  %vm803_vm14 = vweird.f32 %v5937_v9  ;;  %v810_v23 = vor.u32 1.1754944e-38, %v809_v27  ;;  %5348 = vrcp.f32 %v5971_v51  ;;  %vm835_vm4 = vmor %vm833_vm9, %vm834_vm12 }
  0xd4   : > { %v756_v31 = vmul.f32 %v5921_v36, %v755_v11  ;;  %v830_v44 = vsub.f32 1.0, %v829_v35  ;;  %v814_v60 = vmul.f32 %v5339_v46, %v5903_v41  ;;  %v5341_v0 = vpop.eup %5340  ;;  %vm759_vm15 = vweird.f32 %v5921_v36 }
  0xd5   : > { %v5982_v8 = vpop.eup %5342  ;;  %v799_v14 = vmul.f32 %v5341_v0, %v5937_v9  ;;  %vm5985_vm0 = vcmp.eq.f32.partialorder %v807_v38, 8.507059e+37  ;;  %5350 = vpow2.f32 %v941_v40  ;;  %vm819_vm1 = vweird.f32 %v5339_v46 }
  0xd6   : > { %v757_v28 = vadd.f32 %v5921_v36, %v756_v31  ;;  %v831_v11 = vmul.f32 %v5335_v25, %v830_v44  ;;  %v815_v12 = vsub.f32 1.0, %v814_v60  ;;  %v5989_v24 = vpop.eup %5344  ;;  %v792_v27 = vand.u32 2147483647, %v5971_v51  ;;  %vm820_vm8 = vmor %vm818_vm11, %vm819_vm1 }
  0xd7   : > { %v927_v35 = vmul.f32 %v919_v48, %v703_v13  ;;  %vm758_vm2 = vweird.f32 %v5889_v19  ;;  %v800_v34 = vsub.f32 1.0, %v799_v14  ;;  %v762_v38 = vand.u32 2147483647, %v5889_v19  ;;  %v6000_v40 = vpop.eup %5346 }
  0xd8   : > { %v832_v31 = vadd.f32 %v5335_v25, %v831_v11  ;;  %v816_v26 = vmul.f32 %v5339_v46, %v815_v12  ;;  %vm5995_vm3 = vmor %vm758_vm2, %vm759_vm15  ;;  %vm804_vm5 = vweird.f32 %v5341_v0  ;;  %v794_v13 = vand.u32 2147483648, %v5971_v51 }
  0xd9   : > { %v761_v48 = vsel %vm5995_vm3, %v5921_v36, %v757_v28  ;;  %v764_v60 = vand.u32 2147483648, %v5889_v19  ;;  %v801_v14 = vmul.f32 %v5341_v0, %v800_v34  ;;  %vm788_vm6 = vweird.f32 %v5971_v51  ;;  %v5349_v33 = vpop.eup %5348 }
  0xda   : > { %v836_v11 = vsel %vm835_vm4, %v5335_v25, %v832_v31  ;;  %v817_v12 = vadd.f32 %v5339_v46, %v816_v26  ;;  %vm6011_vm7 = vcmp.eq.f32.partialorder %v762_v38, 8.507059e+37  ;;  %v771_v36 = vmul.f32 %v5924_v6, %v770_v47 }
  0xdb   : > { %v6018_v32 = vsel %vm5964_vm10, %v5948_v15, %v836_v11  ;;  %v765_v19 = vor.u32 1.1754944e-38, %v764_v60  ;;  %vm773_vm9 = vweird.f32 %v5891_v21  ;;  %v6025_v25 = vpop.eup %5350  ;;  %v802_v28 = vadd.f32 %v5341_v0, %v801_v14  ;;  %vm805_vm10 = vmor %vm803_vm14, %vm804_vm5 }
  0xdc   : > { %v850_v26 = vmul.f32 1.0614054, %v6018_v32  ;;  %v821_v34 = vsel %vm820_vm8, %v5339_v46, %v817_v12  ;;  %v784_v31 = vmul.f32 %v5349_v33, %v5971_v51  ;;  %vm6029_vm12 = vcmp.eq.f32.partialorder %v792_v27, 8.507059e+37 }
  0xdd   : > { %v6036_v41 = vsel %vm5974_vm13, %v5955_v2, %v821_v34  ;;  %vm789_vm11 = vweird.f32 %v5349_v33  ;;  %v6043_v37 = vsel %vm6011_vm7, %v765_v19, %v761_v48  ;;  %v772_v46 = vadd.f32 %v5924_v6, %v771_v36 }
  0xde   : > { %v858_v47 = vadd.f32 -1.4531521, %v850_v26  ;;  %v849_v27 = vmul.f32 1.0614054, %v6036_v41  ;;  %v806_v44 = vsel %vm805_vm10, %v5341_v0, %v802_v28  ;;  %v785_v38 = vsub.f32 1.0, %v784_v31  ;;  %vm790_vm15 = vmor %vm788_vm6, %vm789_vm11 }
  0xdf   : > { %v6049_v2 = vsel %vm5985_vm0, %v810_v23, %v806_v44  ;;  %v845_v45 = vmul.f32 1.0614054, %v6043_v37  ;;  %vm774_vm13 = vweird.f32 %v5924_v6  ;;  %v777_v9 = vand.u32 2147483647, %v5891_v21 }
  0xe0   : > { %v866_v29 = vmul.f32 %v858_v47, %v6018_v32  ;;  %v857_v48 = vadd.f32 -1.4531521, %v849_v27  ;;  %v848_v60 = vmul.f32 1.0614054, %v6049_v2  ;;  %v786_v11 = vmul.f32 %v5349_v33, %v785_v38  ;;  %vm6058_vm14 = vmor %vm773_vm9, %vm774_vm13 }
  0xe1   : > { %v795_v23 = vor.u32 1.1754944e-38, %v794_v13  ;;  %v853_v20 = vadd.f32 -1.4531521, %v845_v45  ;;  %v776_v12 = vsel %vm6058_vm14, %v5924_v6, %v772_v46  ;;  %v779_v14 = vand.u32 2147483648, %v5891_v21 }
  0xe2   : > { %v874_v19 = vadd.f32 1.4214138, %v866_v29  ;;  %v865_v36 = vmul.f32 %v857_v48, %v6036_v41  ;;  %v856_v26 = vadd.f32 -1.4531521, %v848_v60  ;;  %v787_v34 = vadd.f32 %v5349_v33, %v786_v11 }
  0xe3   : > { %v939_v28 = vmul.f32 1.442695, %v927_v35  ;;  %v861_v31 = vmul.f32 %v853_v20, %v6043_v37  ;;  %vm778_vm0 = vcmp.eq.f32.partialorder %v777_v9, 8.507059e+37  ;;  %v780_v13 = vor.u32 1.1754944e-38, %v779_v14 }
  0xe4   : > { %v882_v47 = vmul.f32 %v874_v19, %v6018_v32  ;;  %v873_v27 = vadd.f32 1.4214138, %v865_v36  ;;  %v864_v6 = vmul.f32 %v856_v26, %v6049_v2  ;;  %v791_v21 = vsel %vm790_vm15, %v5349_v33, %v787_v34 }
  0xe5   : > { %v6075_v46 = vsel %vm6029_vm12, %v795_v23, %v791_v21  ;;  %v869_v44 = vadd.f32 1.4214138, %v861_v31  ;;  %v6077_v38 = vsel %vm778_vm0, %v780_v13, %v776_v12  ;;  %v10072_v51 = vsub.f32 1.0, %v5941_v10 }
  0xe6   : > { %v890_v45 = vadd.f32 -0.28449672, %v882_v47  ;;  %v881_v9 = vmul.f32 %v873_v27, %v6036_v41  ;;  %v872_v29 = vadd.f32 1.4214138, %v864_v6  ;;  %v847_v48 = vmul.f32 1.0614054, %v6075_v46 }
  0xe7   : > { %v741_v35 = vmul.f32 %v5914_v49, %v10072_v51  ;;  %5352 = vpow2.f32 %v939_v28  ;;  %v6085_v33 = vmul.f32 0.5, %v5854_v58  ;;  %v877_v15 = vmul.f32 %v869_v44, %v6043_v37 }
  0xe8   : > { %v846_v60 = vmul.f32 1.0614054, %v6077_v38  ;;  %v898_v11 = vmul.f32 %v890_v45, %v6018_v32  ;;  %v889_v0 = vadd.f32 -0.28449672, %v881_v9  ;;  %v880_v10 = vmul.f32 %v872_v29, %v6049_v2 }
  0xe9   : > { %v855_v23 = vadd.f32 -1.4531521, %v847_v48  ;;  %v885_v20 = vadd.f32 -0.28449672, %v877_v15  ;;  %v742_v14 = vadd.f32 %v5914_v49, %v741_v35  ;;  %vm744_vm1 = vweird.f32 %v5914_v49 }
  0xea   : > { %v854_v12 = vadd.f32 -1.4531521, %v846_v60  ;;  %v906_v19 = vadd.f32 0.2548296, %v898_v11  ;;  %v897_v58 = vmul.f32 %v889_v0, %v6036_v41  ;;  %v888_v36 = vadd.f32 -0.28449672, %v880_v10 }
  0xeb   : > { %v863_v26 = vmul.f32 %v855_v23, %v6075_v46  ;;  %vm970_vm2 = vcmp.lt.f32.partialorder %v5847_v52, 0.0  ;;  %v893_v34 = vmul.f32 %v885_v20, %v6043_v37  ;;  %vm743_vm3 = vweird.f32 %v5887_v18 }
  0xec   : > { %v862_v28 = vmul.f32 %v854_v12, %v6077_v38  ;;  %v747_v31 = vand.u32 2147483647, %v5887_v18  ;;  %v914_v13 = vmul.f32 %v906_v19, %v6018_v32  ;;  %v905_v47 = vadd.f32 0.2548296, %v897_v58  ;;  %vm6102_vm4 = vmor %vm743_vm3, %vm744_vm1 }
  0xed   : > { %v896_v27 = vmul.f32 %v888_v36, %v6049_v2  ;;  %v871_v6 = vadd.f32 1.4214138, %v863_v26  ;;  %v5353_v44 = vpop.eup %5352  ;;  %vm969_vm5 = vcmp.lt.f32.partialorder %v5874_v7, 0.0  ;;  %v901_v51 = vadd.f32 0.2548296, %v893_v34 }
  0xee   : > { %v870_v35 = vadd.f32 1.4214138, %v862_v28  ;;  %v746_v45 = vsel %vm6102_vm4, %v5914_v49, %v742_v14  ;;  %v749_v9 = vand.u32 2147483648, %v5887_v18  ;;  %v954_v32 = vmul.f32 %v5989_v24, %v914_v13 }
  0xef   : > { %v913_v29 = vmul.f32 %v905_v47, %v6036_v41  ;;  %v904_v48 = vadd.f32 0.2548296, %v896_v27  ;;  %v879_v15 = vmul.f32 %v871_v6, %v6075_v46  ;;  %vm965_vm6 = vcmp.lt.f32.partialorder %v5868_v63, 0.0 }
  0xf0   : > { %vm968_vm7 = vcmp.lt.f32.partialorder %v5901_v39, 0.0  ;;  %v909_v60 = vmul.f32 %v901_v51, %v6043_v37  ;;  %v878_v11 = vmul.f32 %v870_v35, %v6077_v38  ;;  %vm748_vm8 = vcmp.eq.f32.partialorder %v747_v31, 8.507059e+37 }
  0xf1   : > { %v750_v0 = vor.u32 1.1754944e-38, %v749_v9  ;;  %v962_v49 = vsub.f32 1.0, %v954_v32  ;;  %v953_v18 = vmul.f32 %v6000_v40, %v913_v29  ;;  %v912_v24 = vmul.f32 %v904_v48, %v6049_v2 }
  0xf2   : > { %v887_v10 = vadd.f32 -0.28449672, %v879_v15  ;;  %v949_v41 = vmul.f32 %v5960_v5, %v909_v60  ;;  %v886_v23 = vadd.f32 -0.28449672, %v878_v11  ;;  %v10075_v12 = vsub.f32 1.0, %v5934_v53 }
  0xf3   : > { %v6121_v20 = vsel %vm748_vm8, %v750_v0, %v746_v45  ;;  %v978_v37 = vsub.f32 0.0, %v962_v49  ;;  %v961_v19 = vsub.f32 1.0, %v953_v18  ;;  %v952_v58 = vmul.f32 %v6025_v25, %v912_v24 }
  0xf4   : > { %v726_v14 = vmul.f32 %v5908_v42, %v10075_v12  ;;  %v895_v36 = vmul.f32 %v887_v10, %v6075_v46  ;;  %v957_v26 = vsub.f32 1.0, %v949_v41  ;;  %v894_v40 = vmul.f32 %v886_v23, %v6077_v38 }
  0xf5   : > { %v844_v2 = vmul.f32 1.0614054, %v6121_v20  ;;  %v986_v34 = vsel %vm970_vm2, %v978_v37, %v962_v49  ;;  %v977_v28 = vsub.f32 0.0, %v961_v19  ;;  %v960_v53 = vsub.f32 1.0, %v952_v58 }
  0xf6   : > { %v727_v5 = vadd.f32 %v5908_v42, %v726_v14  ;;  %v903_v31 = vadd.f32 0.2548296, %v895_v36  ;;  %v994_v13 = vadd.f32 1.0, %v986_v34  ;;  %v973_v47 = vsub.f32 0.0, %v957_v26 }
  0xf7   : > { %v902_v27 = vadd.f32 0.2548296, %v894_v40  ;;  %v852_v6 = vadd.f32 -1.4531521, %v844_v2  ;;  %v985_v25 = vsel %vm969_vm5, %v977_v28, %v961_v19  ;;  %v976_v21 = vsub.f32 0.0, %v960_v53 }
  0xf8   : > { %v911_v51 = vmul.f32 %v903_v31, %v6075_v46  ;;  %vm728_vm9 = vweird.f32 %v5885_v17  ;;  %v6138_v35 = vmul.f32 %v994_v13, %v5910_v43  ;;  %v993_v52 = vadd.f32 1.0, %v985_v25 }
  0xf9   : > { %v981_v45 = vsel %vm965_vm6, %v973_v47, %v957_v26  ;;  %v910_v9 = vmul.f32 %v902_v27, %v6077_v38  ;;  %v984_v32 = vsel %vm968_vm7, %v976_v21, %v960_v53  ;;  %v860_v48 = vmul.f32 %v852_v6, %v6121_v20 }
  0xfa   : > { %v951_v29 = vmul.f32 %v5353_v44, %v911_v51  ;;  %v989_v7 = vadd.f32 1.0, %v981_v45  ;;  %1167 = vmatpush.msra.mxu3 %v6138_v35  ;;  %v6148_v46 = vmul.f32 %v993_v52, %v5919_v59  ;;  %v992_v43 = vadd.f32 1.0, %v984_v32 }
  0xfb   : > { %v950_v15 = vmul.f32 %v5982_v8, %v910_v9  ;;  %vm729_vm12 = vweird.f32 %v5908_v42  ;;  %v868_v39 = vadd.f32 1.4214138, %v860_v48  ;;  %v732_v44 = vand.u32 2147483647, %v5885_v17  ;;  %v1502_v48 = vld [vmem:[%s9852_s6 + $0x10] sm:$0xff]  ;;  %v5049_v8 = vld [vmem:[%s9851_s5 + $0x38] sm:$0xff] }
  0xfc   : > { %v959_v63 = vsub.f32 1.0, %v951_v29  ;;  %v6153_v38 = vmul.f32 %v989_v7, %v6085_v33  ;;  %1013 = vrot.lane.b32.xlu2 %v6148_v46, %s5617_s27  ;;  %1138 = vmatpush.msra.mxu2 %v6148_v46  ;;  %v6160_v59 = vmul.f32 %v992_v43, %v5950_v16  ;;  %vm6164_vm10 = vmor %vm728_vm9, %vm729_vm12  ;;  %v734_v33 = vand.u32 2147483648, %v5885_v17  ;;  %v5046_v7 = vld [vmem:[%s9851_s5 + $0x20] sm:$0xff]  ;;  %v1542_v43 = vld [vmem:[%s9853_s7 + $0x10] sm:$0xff] }
  0xfd   : > { %v958_v60 = vsub.f32 1.0, %v950_v15  ;;  %v915_v11 = vsub.f32 0.0, %v5877_v4  ;;  %v876_v49 = vmul.f32 %v868_v39, %v6121_v20  ;;  %v731_v18 = vsel %vm6164_vm10, %v5908_v42, %v727_v5  ;;  %v5047_v15 = vld [vmem:[%s9851_s5 + $0x28] sm:$0xff] }
  0xfe   : > { %v975_v0 = vsub.f32 0.0, %v959_v63  ;;  %5354 = vpow2.f32 %v5916_v50  ;;  %1009 = vrot.lane.b32.xlu1 %v6160_v59, %s5617_s27  ;;  %vm967_vm11 = vcmp.lt.f32.partialorder %v5930_v57, 0.0  ;;  %1109 = vmatpush.msra.mxu1 %v6160_v59  ;;  %v735_v17 = vor.u32 1.1754944e-38, %v734_v33  ;;  %v10078_v33 = vld [vmem:[#allocation10_spill] sm:$0xff] }
  0xff   : > { %v974_v16 = vsub.f32 0.0, %v958_v60  ;;  %1139 = vmatpush.msra.mxu2 %v6153_v38  ;;  %vm966_vm13 = vcmp.lt.f32.partialorder %v5871_v1, 0.0  ;;  %v884_v10 = vadd.f32 -0.28449672, %v876_v49  ;;  %vm733_vm14 = vcmp.eq.f32.partialorder %v732_v44, 8.507059e+37  ;;  %v5048_v44 = vld [vmem:[%s9851_s5 + $0x30] sm:$0xff] }
 0x100   : > { %v983_v24 = vsel %vm967_vm11, %v975_v0, %v959_v63  ;;  %v687_v42 = vmul.f32 0.5, %v5906_v54  ;;  %v736_v23 = vsel %vm733_vm14, %v735_v17, %v731_v18  ;;  %v686_v12 = vmul.f32 0.5, %v5856_v3  ;;  %v1541_v63 = vld [vmem:[%s9853_s7 + $0x8] sm:$0xff] }
 0x101   : > { %v991_v41 = vadd.f32 1.0, %v983_v24  ;;  %v982_v50 = vsel %vm966_vm13, %v974_v16, %v958_v60  ;;  %v892_v57 = vmul.f32 %v884_v10, %v6121_v20  ;;  %v843_v37 = vmul.f32 1.0614054, %v736_v23  ;;  %v10079_v16 = vld [vmem:[#allocation8_spill] sm:$0xff] }
 0x102   : > { %v990_v14 = vadd.f32 1.0, %v982_v50  ;;  %v923_v1 = vmul.f32 %v915_v11, %v5877_v4  ;;  %vm964_vm15 = vcmp.lt.f32.partialorder %v5865_v62, 0.0  ;;  %v684_v27 = vmul.f32 0.5, %v5852_v56 }
 0x103   : > { %v999_v19 = vmul.f32 %v991_v41, %v687_v42  ;;  %v900_v36 = vadd.f32 0.2548296, %v892_v57  ;;  %v851_v26 = vadd.f32 -1.4531521, %v843_v37  ;;  %vm963_vm0 = vcmp.lt.f32.partialorder %v5862_v61, 0.0  ;;  %v1543_v61 = vld [vmem:[%s9853_s7 + $0x18] sm:$0xff] }
 0x104   : > { %v998_v58 = vmul.f32 %v990_v14, %v686_v12  ;;  %v5355_v40 = vpop.eup %5354  ;;  %1017 = vrot.lane.b32.xlu2 %v6138_v35, %s5617_s27  ;;  %v931_v34 = vmul.f32 1.442695, %v923_v1  ;;  %v683_v56 = vmul.f32 0.5, %v5850_v55  ;;  %v1503_v55 = vld [vmem:[%s9852_s6 + $0x18] sm:$0xff]  ;;  %vm1053_vm1 = vcmask 130048   ;;  %v1044_v41 = vld [vmem:[%s9851_s5] sm:$0xff] }
 0x105   : > { %1080 = vmatpush.msra.mxu0 %v999_v19  ;;  %v908_v54 = vmul.f32 %v900_v36, %v6121_v20  ;;  %v859_v2 = vmul.f32 %v851_v26, %v736_v23  ;;  %5058 = vmatmul.msk.f32.vlgmr.msra.gmra.mxu2 %vm1053_vm1, %v5046_v7  ;;  %vm1019_vm2 = vcmp.lt.s32.totalorder %v5790_v22, 2  ;;  %vm497_vm3 = vcmp.ge.s32.totalorder %v5801_v30, 2  ;;  %v1045_v37 = vld [vmem:[%s9851_s5 + $0x8] sm:$0xff] }
 0x106   : > { %1168 = vmatpush.msra.mxu3 %v998_v58  ;;  %1011 = vrot.lane.b32.xlu1 %v6153_v38, %s5617_s27  ;;  %5356 = vpow2.f32 %v931_v34  ;;  %vm496_vm4 = vcmp.ge.s32.totalorder %v10078_v33, 2  ;;  %vm494_vm5 = vcmp.ge.s32.totalorder %v5790_v22, 2  ;;  %vm495_vm6 = vcmp.ge.s32.totalorder %v10079_v16, 2  ;;  %v1047_v34 = vld [vmem:[%s9851_s5 + $0x18] sm:$0xff] }
 0x107   : > { %v948_v3 = vmul.f32 %v5355_v40, %v908_v54  ;;  %v867_v5 = vadd.f32 1.4214138, %v859_v2  ;;  %5062 = vmatmul.msk.f32.vlgmr.msra.gmra.mxu3 %vm1053_vm1, %v5046_v7  ;;  %vm506_vm7 = vcmp.lt.s32.totalorder %v5790_v22, 126  ;;  %vm509_vm8 = vcmp.lt.s32.totalorder %v5801_v30, 126  ;;  %v1046_v2 = vld [vmem:[%s9851_s5 + $0x10] sm:$0xff] }
 0x108   : > { %vm508_vm9 = vcmp.lt.s32.totalorder %v10078_v33, 126  ;;  %vm507_vm12 = vcmp.lt.s32.totalorder %v10079_v16, 126 }
 0x109   : > { %v956_v28 = vsub.f32 1.0, %v948_v3  ;;  %v875_v53 = vmul.f32 %v867_v5, %v736_v23 }
 0x10b   : > { %v972_v31 = vsub.f32 0.0, %v956_v28  ;;  %v883_v13 = vadd.f32 -0.28449672, %v875_v53 }
 0x10c   : > { %v5357_v51 = vpop.eup %5356 }
 0x10d   : > { %v980_v4 = vsel %vm964_vm15, %v972_v31, %v956_v28  ;;  %v891_v47 = vmul.f32 %v883_v13, %v736_v23  ;;  %5059 = vmatmul.msk.f32.gmra.mxu2 %vm1053_vm1, %v5047_v15  ;;  %v5090_v13 = vld [vmem:[%s9851_s5 + $0x40] sm:$0xff] }
 0x10e   : > { %v988_v6 = vadd.f32 1.0, %v980_v4  ;;  %1005 = vrot.lane.b32.xlu1 %v999_v19, %s5617_s27 }
 0x10f   : > { %v899_v20 = vadd.f32 0.2548296, %v891_v47  ;;  %5063 = vmatmul.msk.f32.gmra.mxu3 %vm1053_vm1, %v5047_v15 }
 0x110   : > { %v996_v25 = vmul.f32 %v988_v6, %v684_v27 }
 0x111   : > { %v907_v21 = vmul.f32 %v899_v20, %v736_v23  ;;  %v5091_v20 = vld [vmem:[%s9851_s5 + $0x48] sm:$0xff] }
 0x112   : > { %1007 = vrot.lane.b32.xlu0 %v996_v25, %s5617_s27  ;;  %1110 = vmatpush.msra.mxu1 %v996_v25 }
 0x113   : > { %v947_v52 = vmul.f32 %v5357_v51, %v907_v21  ;;  %5054 = vmatmul.msk.f32.vlgmr.msra.gmra.mxu1 %vm1053_vm1, %v5046_v7  ;;  %v5093_v21 = vld [vmem:[%s9851_s5 + $0x58] sm:$0xff] }
 0x115   : > { %v955_v45 = vsub.f32 1.0, %v947_v52  ;;  %5060 = vmatmul.msk.f32.gmra.mxu2 %vm1053_vm1, %v5048_v44 }
 0x116   : > { %1324 = vrot.lane.b32.xlu1 %v6138_v35, %s5618_s16  ;;  %v1500_v35 = vld [vmem:[%s9852_s6] sm:$0xff] }
 0x117   : > { %v971_v62 = vsub.f32 0.0, %v955_v45  ;;  %5064 = vmatmul.msk.f32.gmra.mxu3 %vm1053_vm1, %v5048_v44 }
 0x119   : > { %v979_v9 = vsel %vm963_vm0, %v971_v62, %v955_v45 }
 0x11a   : > { %v987_v32 = vadd.f32 1.0, %v979_v9  ;;  %1015 = vrot.lane.b32.xlu0 %v998_v58, %s5617_s27 }
 0x11b   : > { %5055 = vmatmul.msk.f32.gmra.mxu1 %vm1053_vm1, %v5047_v15 }
 0x11c   : > { %v995_v29 = vmul.f32 %v987_v32, %v683_v56 }
 0x11d   : > { %5061 = vmatmul.msk.f32.gmra.mxu2 %vm1053_vm1, %v5049_v8 }
 0x11e   : > { %1081 = vmatpush.msra.mxu0 %v995_v29  ;;  %1003 = vrot.lane.b32.xlu2 %v995_v29, %s5617_s27 }
 0x11f   : > { %1322 = vrot.lane.b32.xlu1 %v998_v58, %s5618_s16  ;;  %5050 = vmatmul.msk.f32.vlgmr.msra.gmra.mxu0 %vm1053_vm1, %v5046_v7 }
 0x120   : > { %5065 = vmatmul.msk.f32.gmra.mxu3 %vm1053_vm1, %v5049_v8 }
 0x122   : > { %1320 = vrot.lane.b32.xlu0 %v6148_v46, %s5618_s16  ;;  %v1501_v46 = vld [vmem:[%s9852_s6 + $0x8] sm:$0xff] }
 0x123   : > { %5056 = vmatmul.msk.f32.gmra.mxu1 %vm1053_vm1, %v5048_v44 }
 0x126   : > { %1312 = vrot.lane.b32.xlu2 %v999_v19, %s5618_s16 }
 0x127   : > { %1314 = vrot.lane.b32.xlu1 %v996_v25, %s5618_s16  ;;  %5051 = vmatmul.msk.f32.gmra.mxu0 %vm1053_vm1, %v5047_v15  ;;  %v5092_v25 = vld [vmem:[%s9851_s5 + $0x50] sm:$0xff] }
 0x12a   : > { %1318 = vrot.lane.b32.xlu0 %v6153_v38, %s5618_s16  ;;  %v1540_v38 = vld [vmem:[%s9853_s7] sm:$0xff] }
 0x12b   : > { %5057 = vmatmul.msk.f32.gmra.mxu1 %vm1053_vm1, %v5049_v8 }
 0x12e   : > { %1310 = vrot.lane.b32.xlu2 %v995_v29, %s5618_s16 }
 0x12f   : > { %1561 = vperm.xlu1 %5323, %v1543_v61   ;;  %5052 = vmatmul.msk.f32.gmra.mxu0 %vm1053_vm1, %v5048_v44 }
 0x132   : > { %1316 = vrot.lane.b32.xlu0 %v6160_v59, %s5618_s16 }
 0x136   : > { %1521 = vperm.xlu2 %5324, %v1503_v55  }
 0x137   : > { %1506 = vperm.xlu1 %5323, %v1500_v35   ;;  %5053 = vmatmul.msk.f32.gmra.mxu0 %vm1053_vm1, %v5049_v8 }
 0x13a   : > { %1516 = vperm.xlu0 %5325, %v1502_v48  }
 0x13e   : > { %1511 = vperm.xlu2 %5324, %v1501_v46  }
 0x142   : > { %1556 = vperm.xlu0 %5325, %v1542_v43  }
 0x146   : > { %1551 = vperm.xlu2 %5324, %v1541_v63  }
 0x14a   : > { %1546 = vperm.xlu0 %5325, %v1540_v38  }
 0x156   : > { %v1014_v39 = vpop.permute.xlu2 %1013 }
 0x15e   : > { %v1018_v59 = vpop.permute.xlu2 %1017 }
 0x15f   : > { %v1021_v60 = vsel %vm1019_vm2, %v1014_v39, %v1018_v59 }
 0x160   : > { %5084 = vmatpush.msk.msrb.mxu3 %vm497_vm3, %v1021_v60 }
 0x170   : > { %v1010_v11 = vpop.permute.xlu1 %1009 }
 0x171   : > { %v1023_v0 = vsel %vm1019_vm2, %v1010_v11, %v1014_v39 }
 0x172   : > { %5078 = vmatpush.msk.msrb.mxu2 %vm496_vm4, %v1023_v0 }
 0x178   : > { %v1012_v49 = vpop.permute.xlu1 %1011  ;;  %v1004_v18 = vpop.permute.xlu2 %1003 }
 0x180   : > { %v1006_v17 = vpop.permute.xlu1 %1005  ;;  %v1313_v12 = vpop.permute.xlu2 %1312 }
 0x181   : > { %v1027_v24 = vsel %vm1019_vm2, %v1018_v59, %v1006_v17  ;;  %v1025_v10 = vsel %vm1019_vm2, %v1006_v17, %v1010_v11 }
 0x182   : > { %5066 = vmatpush.msk.msrb.mxu0 %vm494_vm5, %v1027_v24  ;;  %5072 = vmatpush.msk.msrb.mxu1 %vm495_vm6, %v1025_v10 }
 0x184   : > { %v1008_v42 = vpop.permute.xlu0 %1007 }
 0x185   : > { %v1022_v50 = vsel %vm1019_vm2, %v1008_v42, %v1012_v49  ;;  %v1024_v23 = vsel %vm1019_vm2, %v1004_v18, %v1008_v42 }
 0x186   : > { %5079 = vmatpush.msk.msrb.mxu2 %vm496_vm4, %v1022_v50  ;;  %5073 = vmatpush.msk.msrb.mxu1 %vm495_vm6, %v1024_v23 }
 0x187   : > { %5080 = vmatmul.msk.f32.vlgmr.msrb.gmra.mxu2 %vm1053_vm1, %v1044_v41  ;;  %5074 = vmatmul.msk.f32.vlgmr.msrb.gmra.mxu1 %vm1053_vm1, %v1044_v41 }
 0x188   : > { %v1325_v14 = vpop.permute.xlu1 %1324  ;;  %v1311_v26 = vpop.permute.xlu2 %1310 }
 0x189   : > { %v1334_v36 = vsel %vm506_vm7, %v1325_v14, %v1313_v12  ;;  %v1141_v52 = vpop.f32.mrf.mxu2 }
 0x18a   : > { %v1170_v9 = vpop.f32.mrf.mxu3 }
 0x18c   : > { %v1016_v57 = vpop.permute.xlu0 %1015 }
 0x18d   : > { %v1020_v19 = vsel %vm1019_vm2, %v1012_v49, %v1016_v57  ;;  %v1026_v58 = vsel %vm1019_vm2, %v1016_v57, %v1004_v18 }
 0x18e   : > { %5085 = vmatpush.msk.msrb.mxu3 %vm497_vm3, %v1020_v19  ;;  %5067 = vmatpush.msk.msrb.mxu0 %vm494_vm5, %v1026_v58 }
 0x18f   : > { %5086 = vmatmul.msk.f32.vlgmr.msrb.gmra.mxu3 %vm1053_vm1, %v1044_v41  ;;  %5081 = vmatmul.msk.f32.gmra.mxu2 %vm1053_vm1, %v1045_v37 }
 0x190   : > { %5068 = vmatmul.msk.f32.vlgmr.msrb.gmra.mxu0 %vm1053_vm1, %v1044_v41  ;;  %5112 = vmatpush.msk.msra.mxu3 %vm509_vm8, %v1334_v36  ;;  %v1112_v51 = vpop.f32.mrf.mxu1  ;;  %v6401_v41 = vpop.permute.xlu2 %1521 }
 0x191   : > { %5075 = vmatmul.msk.f32.gmra.mxu1 %vm1053_vm1, %v1045_v37  ;;  %v1323_v40 = vpop.permute.xlu1 %1322  ;;  %v1144_v56 = vpop.f32.mrf.mxu2 }
 0x192   : > { %v1333_v1 = vsel %vm506_vm7, %v1323_v40, %v1311_v26  ;;  %v6371_v61 = vpop.f32.mrf.mxu3 }
 0x193   : > { %5113 = vmatpush.msk.msra.mxu3 %vm509_vm8, %v1333_v1 }
 0x194   : > { %v1321_v54 = vpop.permute.xlu0 %1320 }
 0x195   : > { %v1328_v3 = vsel %vm506_vm7, %v1321_v54, %v1325_v14 }
 0x196   : > { %5106 = vmatpush.msk.msra.mxu2 %vm508_vm9, %v1328_v3 }
 0x197   : > { %5087 = vmatmul.msk.f32.gmra.mxu3 %vm1053_vm1, %v1045_v37  ;;  %5082 = vmatmul.msk.f32.gmra.mxu2 %vm1053_vm1, %v1046_v2 }
 0x198   : > { %5069 = vmatmul.msk.f32.gmra.mxu0 %vm1053_vm1, %v1045_v37  ;;  %v1115_v62 = vpop.f32.mrf.mxu1 }
 0x199   : > { %5076 = vmatmul.msk.f32.gmra.mxu1 %vm1053_vm1, %v1046_v2  ;;  %v1315_v53 = vpop.permute.xlu1 %1314  ;;  %v6373_v55 = vpop.f32.mrf.mxu2 }
 0x19a   : > { %v1331_v6 = vsel %vm506_vm7, %v1311_v26, %v1315_v53  ;;  %v6379_v48 = vpop.f32.mrf.mxu3 }
 0x19c   : > { %v1319_v5 = vpop.permute.xlu0 %1318  ;;  %v1083_v45 = vpop.f32.mrf.mxu0 }
 0x19d   : > { %v1327_v28 = vsel %vm506_vm7, %v1319_v5, %v1323_v40  ;;  %v1329_v27 = vsel %vm506_vm7, %v1315_v53, %v1319_v5 }
 0x19e   : > { %5107 = vmatpush.msk.msra.mxu2 %vm508_vm9, %v1327_v28 }
 0x19f   : > { %5088 = vmatmul.msk.f32.gmra.mxu3 %vm1053_vm1, %v1046_v2  ;;  %5083 = vmatmul.msk.f32.gmra.mxu2 %vm1053_vm1, %v1047_v34 }
 0x1a0   : > { %5070 = vmatmul.msk.f32.gmra.mxu0 %vm1053_vm1, %v1046_v2  ;;  %v6369_v29 = vpop.f32.mrf.mxu1 }
 0x1a1   : > { %5077 = vmatmul.msk.f32.gmra.mxu1 %vm1053_vm1, %v1047_v34  ;;  %v6381_v46 = vpop.f32.mrf.mxu2  ;;  %v6395_v24 = vpop.permute.xlu1 %1561 }
 0x1a3   : > { %v6385_v63 = vpop.f32.mrf.mxu3 }
 0x1a4   : > { %v1317_v31 = vpop.permute.xlu0 %1316  ;;  %v6367_v32 = vpop.f32.mrf.mxu0 }
 0x1a5   : > { %v1330_v4 = vsel %vm506_vm7, %v1317_v31, %v1321_v54  ;;  %v1332_v47 = vsel %vm506_vm7, %v1313_v12, %v1317_v31  ;;  %v6411_v54 = vpop.permute.xlu2 %1511 }
 0x1a6   : > { %5094 = vmatpush.msk.msra.mxu0 %vm506_vm7, %v1332_v47  ;;  %5100 = vmatpush.msk.msra.mxu1 %vm507_vm12, %v1330_v4 }
 0x1a7   : > { %5089 = vmatmul.msk.f32.gmra.mxu3 %vm1053_vm1, %v1047_v34  ;;  %5108 = vmatmul.msk.f32.vlgmr.msra.gmra.mxu2 %vm1053_vm1, %v5090_v13 }
 0x1a8   : > { %5095 = vmatpush.msk.msra.mxu0 %vm506_vm7, %v1331_v6  ;;  %5101 = vmatpush.msk.msra.mxu1 %vm507_vm12, %v1329_v27  ;;  %v6377_v7 = vpop.f32.mrf.mxu1 }
 0x1a9   : > { %5071 = vmatmul.msk.f32.gmra.mxu0 %vm1053_vm1, %v1047_v34  ;;  %5102 = vmatmul.msk.f32.vlgmr.msra.gmra.mxu1 %vm1053_vm1, %v5090_v13  ;;  %v1507_v19 = vpop.permute.xlu1 %1506 }
 0x1ac   : > { %v6375_v35 = vpop.f32.mrf.mxu0  ;;  %v6387_v8 = vpop.permute.xlu0 %1516 }
 0x1af   : > { %5114 = vmatmul.msk.f32.vlgmr.msra.gmra.mxu3 %vm1053_vm1, %v5090_v13  ;;  %5109 = vmatmul.msk.f32.gmra.mxu2 %vm1053_vm1, %v5091_v20 }
 0x1b1   : > { %5096 = vmatmul.msk.f32.vlgmr.msra.gmra.mxu0 %vm1053_vm1, %v5090_v13  ;;  %5103 = vmatmul.msk.f32.gmra.mxu1 %vm1053_vm1, %v5091_v20 }
 0x1b4   : > { %v6383_v43 = vpop.f32.mrf.mxu0  ;;  %v6399_v42 = vpop.permute.xlu0 %1556 }
 0x1b7   : > { %5115 = vmatmul.msk.f32.gmra.mxu3 %vm1053_vm1, %v5091_v20  ;;  %5110 = vmatmul.msk.f32.gmra.mxu2 %vm1053_vm1, %v5092_v25 }
 0x1b9   : > { %5097 = vmatmul.msk.f32.gmra.mxu0 %vm1053_vm1, %v5091_v20  ;;  %5104 = vmatmul.msk.f32.gmra.mxu1 %vm1053_vm1, %v5092_v25 }
 0x1bc   : > { %v1547_v58 = vpop.permute.xlu0 %1546 }
 0x1bf   : > { %5116 = vmatmul.msk.f32.gmra.mxu3 %vm1053_vm1, %v5092_v25  ;;  %5111 = vmatmul.msk.f32.gmra.mxu2 %vm1053_vm1, %v5093_v21 }
 0x1c1   : > { %5098 = vmatmul.msk.f32.gmra.mxu0 %vm1053_vm1, %v5092_v25  ;;  %5105 = vmatmul.msk.f32.gmra.mxu1 %vm1053_vm1, %v5093_v21 }
 0x1c7   : > { %5117 = vmatmul.msk.f32.gmra.mxu3 %vm1053_vm1, %v5093_v21 }
 0x1c9   : > { %5099 = vmatmul.msk.f32.gmra.mxu0 %vm1053_vm1, %v5093_v21 }
 0x204   : > { %v1240_v15 = vpop.f32.mrf.mxu1 }
 0x205   : > { %v1241_v12 = vadd.f32 %v1240_v15, %v1112_v51 }
 0x20a   : > { %v1269_v38 = vpop.f32.mrf.mxu2 }
 0x20b   : > { %v1270_v36 = vadd.f32 %v1269_v38, %v1141_v52 }
 0x20d   : > { %v1211_v39 = vpop.f32.mrf.mxu0 }
 0x20e   : > { %v1243_v44 = vpop.f32.mrf.mxu1  ;;  %v1212_v5 = vadd.f32 %v1211_v39, %v1083_v45 }
 0x20f   : > { %v1244_v4 = vadd.f32 %v1243_v44, %v1115_v62  ;;  %v1552_v44 = vpop.permute.xlu2 %1551 }
 0x212   : > { %v1298_v59 = vpop.f32.mrf.mxu3  ;;  %v1272_v60 = vpop.f32.mrf.mxu2 }
 0x213   : > { %v1299_v20 = vadd.f32 %v1298_v59, %v1170_v9  ;;  %v1273_v25 = vadd.f32 %v1272_v60, %v1144_v56 }
 0x215   : > { %v1214_v11 = vpop.f32.mrf.mxu0 }
 0x216   : > { %v6389_v0 = vpop.f32.mrf.mxu1 }
 0x21a   : > { %v1301_v49 = vpop.f32.mrf.mxu3  ;;  %v6391_v18 = vpop.f32.mrf.mxu2 }
 0x21d   : > { %v6393_v17 = vpop.f32.mrf.mxu0 }
 0x21e   : > { %v6397_v10 = vpop.f32.mrf.mxu1 }
 0x222   : > { %v6403_v50 = vpop.f32.mrf.mxu3  ;;  %v6405_v23 = vpop.f32.mrf.mxu2 }
 0x226   : > { %v6407_v14 = vpop.f32.mrf.mxu0  ;;  %v1414_v57 = vpop.f32.mrf.mxu1 }
 0x227   : > { %v1485_v37 = vadd.f32 %v1414_v57, %v1241_v12  ;;  %v1215_v57 = vadd.f32 %v1214_v11, %v6367_v32 }
 0x229   : > { %v1525_v26 = vmul.f32 %v1507_v19, %v1485_v37 }
 0x22a   : > { %v6409_v40 = vpop.f32.mrf.mxu3  ;;  %v1443_v1 = vpop.f32.mrf.mxu2 }
 0x22b   : > { %v1486_v2 = vadd.f32 %v1443_v1, %v1270_v36  ;;  %v6413_v3 = vadd.f32 %v1547_v58, %v1525_v26 }
 0x22d   : > { %v1526_v34 = vmul.f32 %v1507_v19, %v1486_v2  ;;  %v6418_v13 = vmul.f32 0.70710677, %v6413_v3 }
 0x22e   : > { %v1385_v28 = vpop.f32.mrf.mxu0  ;;  %v1417_v47 = vpop.f32.mrf.mxu1 }
 0x22f   : > { %v6415_v53 = vadd.f32 %v1547_v58, %v1526_v34  ;;  %v1484_v31 = vadd.f32 %v1385_v28, %v1212_v5  ;;  %v1489_v52 = vadd.f32 %v1417_v47, %v1244_v4  ;;  %v1613_v38 = vand.u32 2147483647, %v6418_v13 }
 0x230   : > { %v1302_v4 = vadd.f32 %v1301_v49, %v6371_v61 }
 0x231   : > { %v6421_v27 = vmul.f32 0.70710677, %v6415_v53  ;;  %v1524_v6 = vmul.f32 %v1507_v19, %v1484_v31  ;;  %v1529_v62 = vmul.f32 %v6411_v54, %v1489_v52  ;;  %v1629_v26 = vmul.f32 0.3275911, %v1613_v38 }
 0x232   : > { %v1472_v21 = vpop.f32.mrf.mxu3  ;;  %v1446_v51 = vpop.f32.mrf.mxu2  ;;  %v2045_v1 = vsub.f32 0.0, %v1613_v38 }
 0x233   : > { %v1614_v45 = vand.u32 2147483647, %v6421_v27  ;;  %v6424_v15 = vadd.f32 %v1547_v58, %v1524_v6  ;;  %v1487_v39 = vadd.f32 %v1472_v21, %v1299_v20  ;;  %v1490_v12 = vadd.f32 %v1446_v51, %v1273_v25 }
 0x234   : > { %v6433_v60 = vadd.f32 %v1552_v44, %v1529_v62  ;;  %v6450_v47 = vadd.f32 1.0, %v1629_v26  ;;  %v2061_v6 = vmul.f32 %v2045_v1, %v1613_v38  ;;  %v1276_v38 = vadd.f32 %v6391_v18, %v6373_v55 }
 0x235   : > { %10080 = vst [vmem:[#allocation11_spill] sm:$0xff] %v6424_v15  ;;  %v6430_v37 = vmul.f32 0.70710677, %v6424_v15  ;;  %v1527_v9 = vmul.f32 %v1507_v19, %v1487_v39  ;;  %v1530_v56 = vmul.f32 %v6411_v54, %v1490_v12  ;;  %v1630_v36 = vmul.f32 0.3275911, %v1614_v45 }
 0x236   : > { %v1388_v59 = vpop.f32.mrf.mxu0  ;;  %v2046_v5 = vsub.f32 0.0, %v1614_v45  ;;  %v6440_v32 = vmul.f32 0.70710677, %v6433_v60  ;;  %v1247_v12 = vadd.f32 %v6389_v0, %v6369_v29  ;;  %5358 = vrcp.f32 %v6450_v47 }
 0x237   : > { %10081 = vst [vmem:[#allocation12_spill] sm:$0xff] %v6430_v37  ;;  %v1488_v2 = vadd.f32 %v1388_v59, %v1215_v57  ;;  %v6435_v34 = vadd.f32 %v1547_v58, %v1527_v9  ;;  %v6437_v28 = vadd.f32 %v1552_v44, %v1530_v56  ;;  %v6443_v11 = vand.u32 2147483647, %v6430_v37 }
 0x238   : > { %v6455_v25 = vadd.f32 1.0, %v1630_v36  ;;  %v2062_v21 = vmul.f32 %v2046_v5, %v1614_v45  ;;  %v1617_v52 = vand.u32 2147483647, %v6440_v32  ;;  %v2078_v62 = vmul.f32 1.442695, %v2061_v6 }
 0x239   : > { %10082 = vst [vmem:[#allocation13_spill] sm:$0xff] %v6435_v34  ;;  %v6446_v19 = vmul.f32 0.70710677, %v6435_v34  ;;  %v1528_v31 = vmul.f32 %v6411_v54, %v1488_v2  ;;  %v6453_v58 = vmul.f32 0.70710677, %v6437_v28  ;;  %v1218_v29 = vadd.f32 %v6393_v17, %v6375_v35 }
 0x23a   : > { %10083 = vst [vmem:[#allocation14_spill] sm:$0xff] %v6443_v11  ;;  %v1475_v20 = vpop.f32.mrf.mxu3  ;;  %v1628_v39 = vmul.f32 0.3275911, %v6443_v11  ;;  %5360 = vrcp.f32 %v6455_v25  ;;  %v2080_v57 = vmul.f32 1.442695, %v2062_v21  ;;  %v1449_v59 = vpop.f32.mrf.mxu2  ;;  %v1305_v0 = vadd.f32 %v6403_v50, %v6379_v48 }
 0x23b   : > { %10084 = vst [vmem:[#allocation15_spill] sm:$0xff] %v6446_v19  ;;  %v6457_v51 = vadd.f32 %v1552_v44, %v1528_v31  ;;  %v1615_v61 = vand.u32 2147483647, %v6446_v19  ;;  %v1491_v49 = vadd.f32 %v1475_v20, %v1302_v4  ;;  %v1618_v45 = vand.u32 2147483647, %v6453_v58 }
 0x23c   : > { %v1633_v56 = vmul.f32 0.3275911, %v1617_v52  ;;  %v6478_v55 = vadd.f32 %v6397_v10, %v6377_v7  ;;  %v6480_v18 = vadd.f32 1.0, %v1628_v39  ;;  %v1279_v36 = vadd.f32 %v6405_v23, %v6381_v46  ;;  %v6498_v23 = vpop.eup %5358 }
 0x23d   : > { %10085 = vst [vmem:[#allocation16_spill] sm:$0xff] %v6457_v51  ;;  %v6470_v9 = vmul.f32 0.70710677, %v6457_v51  ;;  %v6486_v26 = vadd.f32 %v6407_v14, %v6383_v43  ;;  %v1631_v1 = vmul.f32 0.3275911, %v1615_v61  ;;  %v1531_v2 = vmul.f32 %v6411_v54, %v1491_v49  ;;  %v1420_v43 = vpop.f32.mrf.mxu1 }
 0x23e   : > { %10087 = vst [vmem:[#allocation18_spill] sm:$0xff] %v6480_v18  ;;  %v6491_v35 = vadd.f32 %v6409_v40, %v6385_v63  ;;  %5362 = vpow2.f32 %v2078_v62  ;;  %v2047_v48 = vsub.f32 0.0, %v1615_v61  ;;  %v1634_v7 = vmul.f32 0.3275911, %v1618_v45  ;;  %v1391_v17 = vpop.f32.mrf.mxu0 }
 0x23f   : > { %10086 = vst [vmem:[#allocation17_spill] sm:$0xff] %v6470_v9  ;;  %5364 = vpow2.f32 %v2080_v57  ;;  %v1616_v10 = vand.u32 2147483647, %v6470_v9  ;;  %v6494_v50 = vadd.f32 1.0, %v1633_v56  ;;  %v6496_v46 = vadd.f32 %v1552_v44, %v1531_v2 }
 0x240   : > { %5366 = vrcp.f32 %v6480_v18  ;;  %v2049_v14 = vsub.f32 0.0, %v1617_v52  ;;  %v1494_v54 = vadd.f32 %v1449_v59, %v1276_v38  ;;  %v6502_v40 = vmul.f32 0.5, %v6415_v53  ;;  %v6504_v5 = vpop.eup %5360 }
 0x241   : > { %10088 = vst [vmem:[#allocation19_spill] sm:$0xff] %v6496_v46  ;;  %v6506_v31 = vadd.f32 1.0, %v1631_v1  ;;  %v2050_v4 = vsub.f32 0.0, %v1618_v45  ;;  %v6509_v6 = vmul.f32 0.70710677, %v6496_v46  ;;  %v1492_v44 = vadd.f32 %v1391_v17, %v1218_v29 }
 0x242   : > { %v1478_v63 = vpop.f32.mrf.mxu3  ;;  %v2063_v20 = vmul.f32 %v2047_v48, %v1615_v61  ;;  %v6511_v21 = vadd.f32 1.0, %v1634_v7  ;;  %v1534_v39 = vmul.f32 %v6387_v8, %v1494_v54  ;;  %v1493_v49 = vadd.f32 %v1420_v43, %v1247_v12  ;;  %v1452_v48 = vpop.f32.mrf.mxu2 }
 0x243   : > { %10089 = vst [vmem:[#allocation20_spill] sm:$0xff] %v6506_v31  ;;  %v1632_v38 = vmul.f32 0.3275911, %v1616_v10  ;;  %5368 = vrcp.f32 %v6494_v50  ;;  %v1532_v53 = vmul.f32 %v6387_v8, %v1492_v44  ;;  %v1495_v62 = vadd.f32 %v1478_v63, %v1305_v0 }
 0x244   : > { %10090 = vst [vmem:[#allocation21_spill] sm:$0xff] %v6509_v6  ;;  %v6516_v57 = vpop.eup %5362  ;;  %v6520_v56 = vmul.f32 %v6504_v5, %v6455_v25  ;;  %v6524_v61 = vmul.f32 %v6498_v23, %v6450_v47  ;;  %v6527_v59 = vadd.f32 %v6399_v42, %v1534_v39  ;;  %v1533_v12 = vmul.f32 %v6387_v8, %v1493_v49 }
 0x245   : > { %v6530_v29 = vpop.eup %5364  ;;  %5370 = vrcp.f32 %v6506_v31  ;;  %v2066_v0 = vmul.f32 %v2050_v4, %v1618_v45  ;;  %v2065_v1 = vmul.f32 %v2049_v14, %v1617_v52  ;;  %v6534_v2 = vand.u32 2147483647, %v6509_v6 }
 0x246   : > { %v6536_v7 = vpop.eup %5366  ;;  %v2082_v17 = vmul.f32 1.442695, %v2063_v20  ;;  %v6539_v43 = vmul.f32 0.70710677, %v6527_v59  ;;  %v6542_v54 = vadd.f32 %v6399_v42, %v1532_v53  ;;  %v6545_v63 = vadd.f32 %v6399_v42, %v1533_v12 }
 0x247   : > { %10091 = vst [vmem:[#allocation22_spill] sm:$0xff] %v6536_v7  ;;  %5372 = vrcp.f32 %v6511_v21  ;;  %v6548_v45 = vadd.f32 1.0, %v1632_v38  ;;  %v2048_v52 = vsub.f32 0.0, %v1616_v10  ;;  %v1535_v14 = vmul.f32 %v6387_v8, %v1495_v62 }
 0x248   : > { %10092 = vst [vmem:[#allocation23_spill] sm:$0xff] %v6542_v54  ;;  %v1622_v4 = vand.u32 2147483647, %v6539_v43  ;;  %v6553_v44 = vmul.f32 0.70710677, %v6542_v54  ;;  %v1498_v39 = vadd.f32 %v1452_v48, %v1279_v36  ;;  %v6562_v53 = vmul.f32 %v6536_v7, %v6480_v18  ;;  %v1423_v54 = vpop.f32.mrf.mxu1 }
 0x249   : > { %10093 = vst [vmem:[#allocation24_spill] sm:$0xff] %v6545_v63  ;;  %v6556_v20 = vmul.f32 0.70710677, %v6545_v63  ;;  %v6558_v49 = vpop.eup %5368  ;;  %v2088_v38 = vmul.f32 1.442695, %v2066_v0  ;;  %v6566_v8 = vadd.f32 %v6399_v42, %v1535_v14  ;;  %5374 = vpow2.f32 %v2082_v17 }
 0x24a   : > { %10094 = vst [vmem:[#allocation25_spill] sm:$0xff] %v6548_v45  ;;  %v1635_v12 = vmul.f32 0.3275911, %v6534_v2  ;;  %v1638_v62 = vmul.f32 0.3275911, %v1622_v4  ;;  %v1538_v33 = vmul.f32 %v6401_v41, %v1498_v39  ;;  %v2064_v36 = vmul.f32 %v2048_v52, %v1616_v10 }
 0x24b   : > { %10095 = vst [vmem:[#allocation26_spill] sm:$0xff] %v6553_v44  ;;  %v1620_v16 = vand.u32 2147483647, %v6553_v44  ;;  %v6570_v30 = vpop.eup %5370  ;;  %v2086_v48 = vmul.f32 1.442695, %v2065_v1  ;;  %5376 = vrcp.f32 %v6548_v45  ;;  %v6581_v17 = vmul.f32 %v6558_v49, %v6494_v50  ;;  %v1481_v44 = vpop.f32.mrf.mxu3 }
 0x24c   : > { %10096 = vst [vmem:[#allocation27_spill] sm:$0xff] %v6556_v20  ;;  %v1621_v22 = vand.u32 2147483647, %v6556_v20  ;;  %v6574_v15 = vmul.f32 0.70710677, %v6566_v8  ;;  %5378 = vpow2.f32 %v2088_v38  ;;  %v6585_v10 = vadd.f32 1.0, %v1635_v12  ;;  %v1394_v12 = vpop.f32.mrf.mxu0 }
 0x24d   : > { %10097 = vst [vmem:[#allocation28_spill] sm:$0xff] %v6562_v53  ;;  %v6583_v14 = vpop.eup %5372  ;;  %v2054_v1 = vsub.f32 0.0, %v1622_v4  ;;  %v6589_v37 = vadd.f32 1.0, %v1638_v62  ;;  %v1636_v0 = vmul.f32 0.3275911, %v1620_v16  ;;  %v6592_v42 = vadd.f32 %v6395_v24, %v1538_v33 }
 0x24e   : > { %10098 = vst [vmem:[#allocation29_spill] sm:$0xff] %v6570_v30  ;;  %v1623_v52 = vand.u32 2147483647, %v6574_v15  ;;  %v6596_v46 = vmul.f32 %v6570_v30, %v6506_v31  ;;  %v6598_v6 = vmul.f32 1.442695, %v2064_v36  ;;  %5380 = vpow2.f32 %v2086_v48 }
 0x24f   : > { %10099 = vst [vmem:[#allocation30_spill] sm:$0xff] %v6574_v15  ;;  %v1637_v38 = vmul.f32 0.3275911, %v1621_v22  ;;  %v6600_v51 = vpop.eup %5374  ;;  %v6604_v39 = vmul.f32 %v6583_v14, %v6511_v21  ;;  %v2051_v33 = vsub.f32 0.0, %v6534_v2  ;;  %v2052_v9 = vsub.f32 0.0, %v1620_v16 }
 0x250   : > { %10100 = vst [vmem:[#allocation31_spill] sm:$0xff] %v6585_v10  ;;  %5382 = vrcp.f32 %v6585_v10  ;;  %v2070_v36 = vmul.f32 %v2054_v1, %v1622_v4  ;;  %v2053_v11 = vsub.f32 0.0, %v1621_v22  ;;  %v1639_v48 = vmul.f32 0.3275911, %v1623_v52 }
 0x251   : > { %10101 = vst [vmem:[#allocation32_spill] sm:$0xff] %v6598_v6  ;;  %v6609_v6 = vpop.eup %5376  ;;  %5384 = vrcp.f32 %v6589_v37  ;;  %v6612_v18 = vadd.f32 1.0, %v1636_v0  ;;  %v6615_v7 = vmul.f32 0.70710677, %v6592_v42  ;;  %v1496_v62 = vadd.f32 %v1394_v12, %v6486_v26 }
 0x252   : > { %10102 = vst [vmem:[#allocation33_spill] sm:$0xff] %v6600_v51  ;;  %v6618_v53 = vpop.eup %5378  ;;  %v6620_v19 = vadd.f32 1.0, %v1637_v38  ;;  %v2055_v34 = vsub.f32 0.0, %v1623_v52  ;;  %v1497_v4 = vadd.f32 %v1423_v54, %v6478_v55  ;;  %v1499_v1 = vadd.f32 %v1481_v44, %v6491_v35 }
 0x253   : > { %10103 = vst [vmem:[#allocation34_spill] sm:$0xff] %v6609_v6  ;;  %v2068_v20 = vmul.f32 %v2052_v9, %v1620_v16  ;;  %v1626_v0 = vand.u32 2147483647, %v6615_v7  ;;  %v1536_v63 = vmul.f32 %v6401_v41, %v1496_v62  ;;  %v6631_v26 = vmul.f32 %v6609_v6, %v6548_v45 }
 0x254   : > { %10104 = vst [vmem:[#allocation35_spill] sm:$0xff] %v6612_v18  ;;  %v6627_v31 = vpop.eup %5380  ;;  %v6633_v38 = vadd.f32 1.0, %v1639_v48  ;;  %v1537_v12 = vmul.f32 %v6401_v41, %v1497_v4  ;;  %v1539_v55 = vmul.f32 %v6401_v41, %v1499_v1  ;;  %5386 = vrcp.f32 %v6612_v18 }
 0x255   : > { %10105 = vst [vmem:[#allocation36_spill] sm:$0xff] %v6615_v7  ;;  %v2069_v35 = vmul.f32 %v2053_v11, %v1621_v22  ;;  %v1642_v16 = vmul.f32 0.3275911, %v1626_v0  ;;  %v6639_v9 = vadd.f32 %v6395_v24, %v1536_v63  ;;  %v2096_v44 = vmul.f32 1.442695, %v2070_v36 }
 0x256   : > { %10106 = vst [vmem:[#allocation37_spill] sm:$0xff] %v6631_v26  ;;  %v6641_v54 = vpop.eup %5382  ;;  %5388 = vrcp.f32 %v6620_v19  ;;  %v2071_v62 = vmul.f32 %v2055_v34, %v1623_v52  ;;  %v6645_v48 = vadd.f32 %v6395_v24, %v1537_v12  ;;  %v2092_v4 = vmul.f32 1.442695, %v2068_v20 }
 0x257   : > { %10107 = vst [vmem:[#allocation38_spill] sm:$0xff] %v6639_v9  ;;  %v6647_v51 = vpop.eup %5384  ;;  %v6650_v1 = vadd.f32 1.0, %v1642_v16  ;;  %v2058_v22 = vsub.f32 0.0, %v1626_v0  ;;  %5390 = vrcp.f32 %v6633_v38  ;;  %v6654_v11 = vmul.f32 0.70710677, %v6639_v9 }
 0x258   : > { %10108 = vst [vmem:[#allocation39_spill] sm:$0xff] %v6641_v54  ;;  %v6657_v63 = vmul.f32 0.70710677, %v6645_v48  ;;  %v1579_v34 = vadd.f32 %v6395_v24, %v1539_v55  ;;  %v6662_v52 = vmul.f32 %v6641_v54, %v6585_v10  ;;  %v6665_v36 = vmul.f32 %v2051_v33, %v6534_v2 }
 0x259   : > { %10109 = vst [vmem:[#allocation40_spill] sm:$0xff] %v6645_v48  ;;  %v2094_v20 = vmul.f32 1.442695, %v2069_v35  ;;  %5392 = vrcp.f32 %v6650_v1  ;;  %v2098_v16 = vmul.f32 1.442695, %v2071_v62  ;;  %v6674_v24 = vmul.f32 %v6647_v51, %v6589_v37 }
 0x25a   : > { %10110 = vst [vmem:[#allocation41_spill] sm:$0xff] %v6654_v11  ;;  %5394 = vpow2.f32 %v2096_v44  ;;  %v1624_v41 = vand.u32 2147483647, %v6654_v11  ;;  %v6670_v9 = vpop.eup %5386  ;;  %v6677_v55 = vmul.f32 0.5, %v6592_v42  ;;  %v2074_v2 = vmul.f32 %v2058_v22, %v1626_v0 }
 0x25b   : > { %10111 = vst [vmem:[#allocation42_spill] sm:$0xff] %v6657_v63  ;;  %v1625_v33 = vand.u32 2147483647, %v6657_v63  ;;  %5396 = vpow2.f32 %v2092_v4  ;;  %v6682_v44 = vmul.f32 0.70710677, %v1579_v34  ;;  %v10117_v62 = vsub.f32 1.0, %v6520_v56 }
 0x25c   : > { %10112 = vst [vmem:[#allocation43_spill] sm:$0xff] %v6662_v52  ;;  %v6680_v35 = vpop.eup %5388  ;;  %v1640_v12 = vmul.f32 0.3275911, %v1624_v41  ;;  %5398 = vpow2.f32 %v2094_v20  ;;  %v6692_v0 = vmul.f32 %v6670_v9, %v6612_v18  ;;  %vm1696_vm10 = vweird.f32 %v6504_v5 }
 0x25d   : > { %10113 = vst [vmem:[#allocation44_spill] sm:$0xff] %v6665_v36  ;;  %v1693_v36 = vmul.f32 %v6504_v5, %v10117_v62  ;;  %v1641_v11 = vmul.f32 0.3275911, %v1625_v33  ;;  %v2057_v54 = vsub.f32 0.0, %v1625_v33  ;;  %v6688_v42 = vpop.eup %5390  ;;  %5400 = vpow2.f32 %v2098_v16 }
 0x25e   : > { %10114 = vst [vmem:[#allocation45_spill] sm:$0xff] %v6670_v9  ;;  %v6694_v4 = vadd.f32 1.0, %v1640_v12  ;;  %v1627_v22 = vand.u32 2147483647, %v6682_v44  ;;  %v6702_v20 = vmul.f32 %v6680_v35, %v6620_v19  ;;  %v2104_v62 = vmul.f32 1.442695, %v2074_v2 }
 0x25f   : > { %10115 = vst [vmem:[#allocation46_spill] sm:$0xff] %v6677_v55  ;;  %v6697_v48 = vpop.eup %5392  ;;  %v6704_v10 = vadd.f32 1.0, %v1641_v11  ;;  %v2073_v16 = vmul.f32 %v2057_v54, %v1625_v33  ;;  %v1694_v12 = vadd.f32 %v6504_v5, %v1693_v36  ;;  %v6713_v45 = vmul.f32 %v6688_v42, %v6633_v38 }
 0x260   : > { %10116 = vst [vmem:[#allocation47_spill] sm:$0xff] %v6682_v44  ;;  %v6706_v52 = vpop.eup %5394  ;;  %5402 = vrcp.f32 %v6694_v4  ;;  %v2056_v56 = vsub.f32 0.0, %v1624_v41  ;;  %v6716_v6 = vmul.f32 0.5, %v1579_v34  ;;  %v1871_v54 = vmul.f32 %v6697_v48, %v6650_v1 }
 0x261   : > { %10118 = vst [vmem:[#allocation48_spill] sm:$0xff] %v6692_v0  ;;  %5404 = vrcp.f32 %v6704_v10  ;;  %v6718_v11 = vpop.eup %5396  ;;  %v1643_v33 = vmul.f32 0.3275911, %v1627_v22  ;;  %vm1695_vm11 = vweird.f32 %v6455_v25  ;;  %v2059_v55 = vsub.f32 0.0, %v1627_v22 }
 0x262   : > { %10119 = vst [vmem:[#allocation49_spill] sm:$0xff] %v6716_v6  ;;  %v6724_v36 = vpop.eup %5398  ;;  %vm6727_vm13 = vmor %vm1695_vm11, %vm1696_vm10  ;;  %v1699_v34 = vand.u32 2147483647, %v6455_v25  ;;  %5406 = vpow2.f32 %v2104_v62  ;;  %v2102_v63 = vmul.f32 1.442695, %v2073_v16  ;;  %v1827_v26 = vsub.f32 1.0, %v6713_v45 }
 0x263   : > { %10120 = vst [vmem:[#allocation50_spill] sm:$0xff] %v6718_v11  ;;  %v1701_v11 = vand.u32 2147483648, %v6455_v25  ;;  %v6733_v2 = vpop.eup %5400  ;;  %v1698_v18 = vsel %vm6727_vm13, %v6504_v5, %v1694_v12  ;;  %v6741_v0 = vmul.f32 %v2056_v56, %v1624_v41  ;;  %v1872_v25 = vsub.f32 1.0, %v1871_v54 }
 0x264   : > { %10121 = vst [vmem:[#allocation51_spill] sm:$0xff] %v6724_v36  ;;  %v6746_v30 = vadd.f32 1.0, %v1643_v33  ;;  %vm1700_vm14 = vcmp.eq.f32.partialorder %v1699_v34, 8.507059e+37  ;;  %v2075_v44 = vmul.f32 %v2059_v55, %v1627_v22  ;;  %v10124_v41 = vsub.f32 1.0, %v6524_v61 }
 0x265   : > { %v1702_v7 = vor.u32 1.1754944e-38, %v1701_v11  ;;  %5408 = vpow2.f32 %v2102_v63  ;;  %vm1681_vm15 = vweird.f32 %v6498_v23  ;;  %vm1680_vm0 = vweird.f32 %v6450_v47 }
 0x266   : > { %v6743_v36 = vpop.eup %5402  ;;  %v1678_v56 = vmul.f32 %v6498_v23, %v10124_v41  ;;  %v1684_v55 = vand.u32 2147483647, %v6450_v47  ;;  %v6768_v61 = vmul.f32 %v6697_v48, %v1872_v25  ;;  %5410 = vrcp.f32 %v6746_v30  ;;  %vm1682_vm1 = vmor %vm1680_vm0, %vm1681_vm15 }
 0x267   : > { %v6748_v62 = vpop.eup %5404  ;;  %v1841_v5 = vmul.f32 %v6743_v36, %v6694_v4  ;;  %v6752_v16 = vsel %vm1700_vm14, %v1702_v7, %v1698_v18  ;;  %v1686_v18 = vand.u32 2147483648, %v6450_v47  ;;  %v6772_v22 = vmul.f32 0.5, %v6413_v3 }
 0x268   : > { %v1856_v12 = vmul.f32 %v6748_v62, %v6704_v10  ;;  %v1902_v11 = vmul.f32 1.0614054, %v6752_v16  ;;  %v1679_v54 = vadd.f32 %v6498_v23, %v1678_v56  ;;  %v6765_v7 = vpop.eup %5406  ;;  %v2106_v34 = vmul.f32 1.442695, %v2075_v44 }
 0x269   : > { %v1842_v33 = vsub.f32 1.0, %v1841_v5  ;;  %v1687_v56 = vor.u32 1.1754944e-38, %v1686_v18  ;;  %vm1685_vm2 = vcmp.eq.f32.partialorder %v1684_v55, 8.507059e+37  ;;  %v10125_v15 = vsub.f32 1.0, %v6604_v39 }
 0x26a   : > { %v1918_v63 = vadd.f32 -1.4531521, %v1902_v11  ;;  %v1683_v41 = vsel %vm1682_vm1, %v6498_v23, %v1679_v54  ;;  %v1857_v9 = vsub.f32 1.0, %v1856_v12  ;;  %vm1755_vm3 = vweird.f32 %v6511_v21 }
 0x26b   : > { %v1753_v25 = vmul.f32 %v6583_v14, %v10125_v15  ;;  %v6779_v6 = vsel %vm1685_vm2, %v1687_v56, %v1683_v41  ;;  %vm1756_vm4 = vweird.f32 %v6583_v14  ;;  %v1759_v3 = vand.u32 2147483647, %v6511_v21  ;;  %v6784_v5 = vpop.eup %5408 }
 0x26c   : > { %v1934_v47 = vmul.f32 %v1918_v63, %v6752_v16  ;;  %v1901_v44 = vmul.f32 1.0614054, %v6779_v6  ;;  %v1761_v11 = vand.u32 2147483648, %v6511_v21  ;;  %v6790_v39 = vmul.f32 %v6743_v36, %v1842_v33  ;;  %vm1757_vm5 = vmor %vm1755_vm3, %vm1756_vm4  ;;  %v6796_v55 = vpop.eup %5410 }
 0x26d   : > { %v1754_v12 = vadd.f32 %v6583_v14, %v1753_v25  ;;  %v1896_v15 = vand.u32 2147483648, %v6746_v30  ;;  %5412 = vpow2.f32 %v2106_v34  ;;  %v6794_v54 = vmul.f32 0.5, %v6437_v28 }
 0x26e   : > { %v1950_v23 = vadd.f32 1.4214138, %v1934_v47  ;;  %v1917_v63 = vadd.f32 -1.4531521, %v1901_v44  ;;  %v1762_v56 = vor.u32 1.1754944e-38, %v1761_v11  ;;  %v6801_v21 = vmul.f32 %v6748_v62, %v1857_v9 }
 0x26f   : > { %v1758_v41 = vsel %vm1757_vm5, %v6583_v14, %v1754_v12  ;;  %vm1760_vm6 = vcmp.eq.f32.partialorder %v1759_v3, 8.507059e+37  ;;  %v10126_v33 = vsub.f32 1.0, %v6581_v17  ;;  %vm1741_vm7 = vweird.f32 %v6558_v49 }
 0x270   : > { %v1966_v18 = vmul.f32 %v1950_v23, %v6752_v16  ;;  %v1933_v47 = vmul.f32 %v1917_v63, %v6779_v6  ;;  %v6808_v25 = vsel %vm1760_vm6, %v1762_v56, %v1758_v41  ;;  %v1744_v23 = vand.u32 2147483647, %v6494_v50 }
 0x271   : > { %v1738_v34 = vmul.f32 %v6558_v49, %v10126_v33  ;;  %v1906_v14 = vmul.f32 1.0614054, %v6808_v25  ;;  %vm1740_vm8 = vweird.f32 %v6494_v50  ;;  %v1746_v9 = vand.u32 2147483648, %v6494_v50 }
 0x272   : > { %v1982_v28 = vadd.f32 -0.28449672, %v1966_v18  ;;  %v1886_v17 = vmul.f32 %v6796_v55, %v6746_v30  ;;  %v1949_v12 = vadd.f32 1.4214138, %v1933_v47  ;;  %vm1742_vm9 = vmor %vm1740_vm8, %vm1741_vm7  ;;  %vm1745_vm12 = vcmp.eq.f32.partialorder %v1744_v23, 8.507059e+37 }
 0x273   : > { %v1739_v44 = vadd.f32 %v6558_v49, %v1738_v34  ;;  %v6818_v11 = vpop.eup %5412  ;;  %v1922_v18 = vadd.f32 -1.4531521, %v1906_v14  ;;  %v1747_v41 = vor.u32 1.1754944e-38, %v1746_v9  ;;  %v10127_v56 = vsub.f32 1.0, %v6674_v24 }
 0x274   : > { %v1998_v3 = vmul.f32 %v1982_v28, %v6752_v16  ;;  %v1965_v50 = vmul.f32 %v1949_v12, %v6779_v6  ;;  %vm1815_vm10 = vweird.f32 %v6589_v37  ;;  %vm1816_vm11 = vweird.f32 %v6647_v51 }
 0x275   : > { %v1743_v63 = vsel %vm1742_vm9, %v6558_v49, %v1739_v44  ;;  %v1813_v33 = vmul.f32 %v6647_v51, %v10127_v56  ;;  %vm2142_vm13 = vcmp.lt.f32.partialorder %v6421_v27, 0.0  ;;  %v1938_v28 = vmul.f32 %v1922_v18, %v6808_v25  ;;  %vm6835_vm14 = vmor %vm1815_vm10, %vm1816_vm11 }
 0x276   : > { %v2014_v34 = vadd.f32 0.2548296, %v1998_v3  ;;  %v6829_v47 = vsel %vm1745_vm12, %v1747_v41, %v1743_v63  ;;  %v1819_v23 = vand.u32 2147483647, %v6589_v37  ;;  %v1981_v14 = vadd.f32 -0.28449672, %v1965_v50 }
 0x277   : > { %v1814_v49 = vadd.f32 %v6647_v51, %v1813_v33  ;;  %v1905_v44 = vmul.f32 1.0614054, %v6829_v47  ;;  %v1821_v3 = vand.u32 2147483648, %v6589_v37  ;;  %v1887_v12 = vsub.f32 1.0, %v1886_v17 }
 0x278   : > { %v2030_v24 = vmul.f32 %v2014_v34, %v6752_v16  ;;  %v1954_v56 = vadd.f32 1.4214138, %v1938_v28  ;;  %v6841_v18 = vmul.f32 0.5, %v6433_v60  ;;  %v1997_v41 = vmul.f32 %v1981_v14, %v6779_v6 }
 0x279   : > { %v1818_v63 = vsel %vm6835_vm14, %v6647_v51, %v1814_v49  ;;  %v1921_v33 = vadd.f32 -1.4531521, %v1905_v44  ;;  %v1822_v34 = vor.u32 1.1754944e-38, %v1821_v3  ;;  %vm1820_vm15 = vcmp.eq.f32.partialorder %v1819_v23, 8.507059e+37 }
 0x27a   : > { %v2110_v16 = vmul.f32 %v6530_v29, %v2030_v24  ;;  %v1970_v50 = vmul.f32 %v1954_v56, %v6808_v25  ;;  %v1828_v37 = vmul.f32 %v6688_v42, %v1827_v26  ;;  %vm1830_vm0 = vweird.f32 %v6633_v38 }
 0x27b   : > { %v2013_v17 = vadd.f32 0.2548296, %v1997_v41  ;;  %v1937_v28 = vmul.f32 %v1921_v33, %v6829_v47  ;;  %v6854_v51 = vsel %vm1820_vm15, %v1822_v34, %v1818_v63  ;;  %vm2141_vm1 = vcmp.lt.f32.partialorder %v6418_v13, 0.0 }
 0x27c   : > { %v2126_v60 = vsub.f32 1.0, %v2110_v16  ;;  %v1986_v29 = vadd.f32 -0.28449672, %v1970_v50  ;;  %v1910_v49 = vmul.f32 1.0614054, %v6854_v51  ;;  %v1829_v24 = vadd.f32 %v6688_v42, %v1828_v37 }
 0x27d   : > { %vm1831_vm2 = vweird.f32 %v6688_v42  ;;  %v2029_v26 = vmul.f32 %v2013_v17, %v6779_v6  ;;  %v1953_v23 = vadd.f32 1.4214138, %v1937_v28  ;;  %v1834_v14 = vand.u32 2147483647, %v6633_v38 }
 0x27e   : > { %v2158_v45 = vsub.f32 0.0, %v2126_v60  ;;  %v6863_v44 = vmul.f32 %v6796_v55, %v1887_v12  ;;  %v2002_v9 = vmul.f32 %v1986_v29, %v6808_v25  ;;  %v1926_v3 = vadd.f32 -1.4531521, %v1910_v49  ;;  %vm6868_vm3 = vmor %vm1830_vm0, %vm1831_vm2 }
 0x27f   : > { %v1836_v63 = vand.u32 2147483648, %v6633_v38  ;;  %v2109_v16 = vmul.f32 %v6516_v57, %v2029_v26  ;;  %v1969_v41 = vmul.f32 %v1953_v23, %v6829_v47  ;;  %v1833_v12 = vsel %vm6868_vm3, %v6688_v42, %v1829_v24 }
 0x280   : > { %v2174_v6 = vsel %vm2142_vm13, %v2158_v45, %v2126_v60  ;;  %v2018_v34 = vadd.f32 0.2548296, %v2002_v9  ;;  %v1942_v50 = vmul.f32 %v1926_v3, %v6854_v51  ;;  %vm2146_vm4 = vcmp.lt.f32.partialorder %v6453_v58, 0.0 }
 0x281   : > { %v2190_v33 = vadd.f32 1.0, %v2174_v6  ;;  %v1837_v37 = vor.u32 1.1754944e-38, %v1836_v63  ;;  %v2125_v17 = vsub.f32 1.0, %v2109_v16  ;;  %v1985_v38 = vadd.f32 -0.28449672, %v1969_v41 }
 0x282   : > { %v6883_v27 = vmul.f32 0.5, %v6527_v59  ;;  %vm1835_vm5 = vcmp.eq.f32.partialorder %v1834_v14, 8.507059e+37  ;;  %vm1875_vm6 = vweird.f32 %v6650_v1  ;;  %v2034_v42 = vmul.f32 %v2018_v34, %v6808_v25 }
 0x283   : > { %v6887_v57 = vmul.f32 %v2190_v33, %v6502_v40  ;;  %v1958_v60 = vadd.f32 1.4214138, %v1942_v50  ;;  %v6890_v28 = vsel %vm1835_vm5, %v1837_v37, %v1833_v12  ;;  %v2157_v29 = vsub.f32 0.0, %v2125_v17 }
 0x284   : > { %v2001_v49 = vmul.f32 %v1985_v38, %v6829_v47  ;;  %v1911_v24 = vmul.f32 1.0614054, %v6890_v28  ;;  %v10132_v45 = vsub.f32 1.0, %v6702_v20  ;;  %v2114_v40 = vmul.f32 %v6618_v53, %v2034_v42 }
 0x285   : > { %2236 = vrot.lane.b32.xlu1 %v6887_v57, %s5619_s24  ;;  %v1974_v25 = vmul.f32 %v1958_v60, %v6854_v51  ;;  %vm1800_vm7 = vweird.f32 %v6620_v19  ;;  %vm1801_vm8 = vweird.f32 %v6680_v35  ;;  %v2173_v26 = vsel %vm2141_vm1, %v2157_v29, %v2125_v17 }
 0x286   : > { %v1798_v59 = vmul.f32 %v6680_v35, %v10132_v45  ;;  %v2017_v23 = vadd.f32 0.2548296, %v2001_v49  ;;  %v1927_v14 = vadd.f32 -1.4531521, %v1911_v24  ;;  %v2189_v9 = vadd.f32 1.0, %v2173_v26  ;;  %vm6916_vm10 = vmor %vm1800_vm7, %vm1801_vm8 }
 0x287   : > { %v2130_v3 = vsub.f32 1.0, %v2114_v40  ;;  %vm2145_vm9 = vcmp.lt.f32.partialorder %v6440_v32, 0.0  ;;  %v1990_v56 = vadd.f32 -0.28449672, %v1974_v25  ;;  %v1804_v53 = vand.u32 2147483647, %v6620_v19 }
 0x288   : > { %v1799_v20 = vadd.f32 %v6680_v35, %v1798_v59  ;;  %vm1890_vm12 = vweird.f32 %v6746_v30  ;;  %v2033_v63 = vmul.f32 %v2017_v23, %v6829_v47  ;;  %v6911_v6 = vmul.f32 0.5, %v6566_v8 }
 0x289   : > { %v1943_v13 = vmul.f32 %v1927_v14, %v6890_v28  ;;  %v1806_v41 = vand.u32 2147483648, %v6620_v19  ;;  %v6922_v12 = vmul.f32 %v2189_v9, %v6772_v22  ;;  %v2162_v33 = vsub.f32 0.0, %v2130_v3 }
 0x28a   : > { %v2006_v34 = vmul.f32 %v1990_v56, %v6854_v51  ;;  %v1803_v8 = vsel %vm6916_vm10, %v6680_v35, %v1799_v20  ;;  %v2113_v47 = vmul.f32 %v6627_v31, %v2033_v63  ;;  %vm1805_vm11 = vcmp.eq.f32.partialorder %v1804_v53, 8.507059e+37 }
 0x28b   : > { %v1959_v50 = vadd.f32 1.4214138, %v1943_v13  ;;  %v1807_v37 = vor.u32 1.1754944e-38, %v1806_v41  ;;  %2228 = vrot.lane.b32.xlu0 %v6922_v12, %s5619_s24  ;;  %v2178_v19 = vsel %vm2146_vm4, %v2162_v33, %v2130_v3  ;;  %v1874_v17 = vadd.f32 %v6697_v48, %v6768_v61 }
 0x28c   : > { %v2022_v22 = vadd.f32 0.2548296, %v2006_v34  ;;  %vm1876_vm13 = vweird.f32 %v6697_v48  ;;  %vm1860_vm14 = vweird.f32 %v6704_v10  ;;  %v2194_v35 = vadd.f32 1.0, %v2178_v19 }
 0x28d   : > { %v2129_v38 = vsub.f32 1.0, %v2113_v47  ;;  %vm2150_vm15 = vcmp.lt.f32.partialorder %v6539_v43, 0.0  ;;  %v1975_v31 = vmul.f32 %v1959_v50, %v6890_v28  ;;  %v6939_v42 = vsel %vm1805_vm11, %v1807_v37, %v1803_v8  ;;  %vm6943_vm0 = vmor %vm1875_vm6, %vm1876_vm13 }
 0x28e   : > { %v2038_v61 = vmul.f32 %v2022_v22, %v6854_v51  ;;  %v1909_v60 = vmul.f32 1.0614054, %v6939_v42  ;;  %v1878_v29 = vsel %vm6943_vm0, %v6697_v48, %v1874_v17  ;;  %v1879_v49 = vand.u32 2147483647, %v6650_v1  ;;  %v10143_v17 = vld [vmem:[#allocation29_spill] sm:$0xff] }
 0x28f   : > { %v6954_v24 = vmul.f32 %v2194_v35, %v6794_v54  ;;  %v2161_v45 = vsub.f32 0.0, %v2129_v38  ;;  %v1991_v59 = vadd.f32 -0.28449672, %v1975_v31  ;;  %v10137_v40 = vand.u32 2147483648, %v6650_v1 }
 0x290   : > { %v2118_v26 = vmul.f32 %v6706_v52, %v2038_v61  ;;  %v1925_v23 = vadd.f32 -1.4531521, %v1909_v60  ;;  %vm1880_vm1 = vcmp.eq.f32.partialorder %v1879_v49, 8.507059e+37  ;;  %v1889_v51 = vadd.f32 %v6796_v55, %v6863_v44  ;;  %v10145_v60 = vld [vmem:[#allocation30_spill] sm:$0xff] }
 0x291   : > { %v1882_v25 = vor.u32 1.1754944e-38, %v10137_v40  ;;  %2238 = vrot.lane.b32.xlu1 %v6954_v24, %s5619_s24  ;;  %v2177_v48 = vsel %vm2145_vm9, %v2161_v45, %v2129_v38  ;;  %v2007_v54 = vmul.f32 %v1991_v59, %v6890_v28  ;;  %vm1891_vm2 = vweird.f32 %v6796_v55 }
 0x292   : > { %v2193_v1 = vadd.f32 1.0, %v2177_v48  ;;  %v2134_v20 = vsub.f32 1.0, %v2118_v26  ;;  %v1941_v52 = vmul.f32 %v1925_v23, %v6939_v42  ;;  %vm6973_vm3 = vmor %vm1890_vm12, %vm1891_vm2  ;;  %v1894_v56 = vand.u32 2147483647, %v6746_v30 }
 0x293   : > { %v6966_v14 = vsel %vm1880_vm1, %v1882_v25, %v1878_v29  ;;  %v2023_v32 = vadd.f32 0.2548296, %v2007_v54  ;;  %v1893_v3 = vsel %vm6973_vm3, %v6796_v55, %v1889_v51  ;;  %v1897_v53 = vor.u32 1.1754944e-38, %v1896_v15  ;;  %v10146_v25 = vld [vmem:[#allocation20_spill] sm:$0xff] }
 0x294   : > { %v1914_v9 = vmul.f32 1.0614054, %v6966_v14  ;;  %v6984_v63 = vmul.f32 %v2193_v1, %v6841_v18  ;;  %v2166_v13 = vsub.f32 0.0, %v2134_v20  ;;  %v1957_v16 = vadd.f32 1.4214138, %v1941_v52 }
 0x295   : > { %v2039_v33 = vmul.f32 %v2023_v32, %v6890_v28  ;;  %vm1895_vm4 = vcmp.eq.f32.partialorder %v1894_v56, 8.507059e+37  ;;  %v1859_v34 = vadd.f32 %v6748_v62, %v6801_v21  ;;  %vm1861_vm5 = vweird.f32 %v6748_v62 }
 0x296   : > { %v1930_v41 = vadd.f32 -1.4531521, %v1914_v9  ;;  %2230 = vrot.lane.b32.xlu0 %v6984_v63, %s5619_s24  ;;  %v2182_v30 = vsel %vm2150_vm15, %v2166_v13, %v2134_v20  ;;  %v1973_v15 = vmul.f32 %v1957_v16, %v6939_v42  ;;  %v6996_v18 = vsel %vm1895_vm4, %v1897_v53, %v1893_v3  ;;  %vm7000_vm6 = vmor %vm1860_vm14, %vm1861_vm5  ;;  %v10149_v9 = vld [vmem:[#allocation24_spill] sm:$0xff] }
 0x297   : > { %v2198_v21 = vadd.f32 1.0, %v2182_v30  ;;  %v2119_v8 = vmul.f32 %v6733_v2, %v2039_v33  ;;  %v1915_v47 = vmul.f32 1.0614054, %v6996_v18  ;;  %v1863_v43 = vsel %vm7000_vm6, %v6748_v62, %v1859_v34  ;;  %v10151_v33 = vld [vmem:[#allocation36_spill] sm:$0xff] }
 0x298   : > { %v1946_v55 = vmul.f32 %v1930_v41, %v6966_v14  ;;  %v1989_v50 = vadd.f32 -0.28449672, %v1973_v15  ;;  %v1864_v19 = vand.u32 2147483647, %v6704_v10  ;;  %v10142_v22 = vsub.f32 1.0, %v6596_v46 }
 0x299   : > { %v7014_v38 = vmul.f32 %v2198_v21, %v6883_v27  ;;  %v2135_v31 = vsub.f32 1.0, %v2119_v8  ;;  %v1931_v58 = vadd.f32 -1.4531521, %v1915_v47  ;;  %v10144_v2 = vand.u32 2147483648, %v6704_v10  ;;  %v10152_v21 = vld [vmem:[#allocation27_spill] sm:$0xff] }
 0x29a   : > { %v1962_v37 = vadd.f32 1.4214138, %v1946_v55  ;;  %v1708_v35 = vmul.f32 %v10143_v17, %v10142_v22  ;;  %vm2151_vm7 = vcmp.lt.f32.partialorder %v10145_v60, 0.0  ;;  %v2005_v62 = vmul.f32 %v1989_v50, %v6939_v42 }
 0x29b   : > { %v1867_v61 = vor.u32 1.1754944e-38, %v10144_v2  ;;  %vm1865_vm8 = vcmp.eq.f32.partialorder %v1864_v19, 8.507059e+37  ;;  %vm1845_vm9 = vweird.f32 %v6694_v4  ;;  %2240 = vrot.lane.b32.xlu1 %v7014_v38, %s5619_s24  ;;  %v2167_v46 = vsub.f32 0.0, %v2135_v31 }
 0x29c   : > { %v1978_v29 = vmul.f32 %v1962_v37, %v6966_v14  ;;  %v1947_v27 = vmul.f32 %v1931_v58, %v6996_v18  ;;  %v1709_v10 = vadd.f32 %v10143_v17, %v1708_v35  ;;  %v2021_v45 = vadd.f32 0.2548296, %v2005_v62 }
 0x29d   : > { %v7025_v49 = vsel %vm1865_vm8, %v1867_v61, %v1863_v43  ;;  %vm1710_vm12 = vweird.f32 %v10146_v25  ;;  %v2183_v26 = vsel %vm2151_vm7, %v2167_v46, %v2135_v31  ;;  %vm1711_vm10 = vweird.f32 %v10143_v17 }
 0x29e   : > { %v1994_v59 = vadd.f32 -0.28449672, %v1978_v29  ;;  %v1913_v40 = vmul.f32 1.0614054, %v7025_v49  ;;  %v1963_v23 = vadd.f32 1.4214138, %v1947_v27  ;;  %v2037_v54 = vmul.f32 %v2021_v45, %v6939_v42  ;;  %vm7034_vm11 = vmor %vm1710_vm12, %vm1711_vm10 }
 0x29f   : > { %v1714_v51 = vand.u32 2147483647, %v10146_v25  ;;  %v2199_v48 = vadd.f32 1.0, %v2183_v26  ;;  %v1589_v44 = vmul.f32 0.5, %v10149_v9  ;;  %v1713_v3 = vsel %vm7034_vm11, %v10143_v17, %v1709_v10  ;;  %v10150_v42 = vld [vmem:[#allocation51_spill] sm:$0xff]  ;;  %v10154_v29 = vld [vmem:[#allocation48_spill] sm:$0xff] }
 0x2a0   : > { %v2010_v1 = vmul.f32 %v1994_v59, %v6966_v14  ;;  %v1929_v20 = vadd.f32 -1.4531521, %v1913_v40  ;;  %v1979_v32 = vmul.f32 %v1963_v23, %v6996_v18  ;;  %v1716_v56 = vand.u32 2147483648, %v10146_v25  ;;  %v10156_v27 = vld [vmem:[#allocation45_spill] sm:$0xff] }
 0x2a1   : > { %v7045_v53 = vmul.f32 %v2199_v48, %v6911_v6  ;;  %v2117_v13 = vmul.f32 %v10150_v42, %v2037_v54  ;;  %vm2154_vm13 = vcmp.lt.f32.partialorder %v10151_v33, 0.0  ;;  %vm1715_vm14 = vcmp.eq.f32.partialorder %v1714_v51, 8.507059e+37  ;;  %v10159_v42 = vld [vmem:[#allocation47_spill] sm:$0xff] }
 0x2a2   : > { %v2026_v16 = vadd.f32 0.2548296, %v2010_v1  ;;  %v1945_v41 = vmul.f32 %v1929_v20, %v7025_v49  ;;  %v1995_v34 = vadd.f32 -0.28449672, %v1979_v32  ;;  %v1717_v30 = vor.u32 1.1754944e-38, %v1716_v56  ;;  %v10158_v1 = vld [vmem:[#allocation42_spill] sm:$0xff] }
 0x2a3   : > { %v1844_v15 = vadd.f32 %v6743_v36, %v6790_v39  ;;  %2248 = vrot.lane.b32.xlu2 %v7045_v53, %s5619_s24  ;;  %v2133_v55 = vsub.f32 1.0, %v2117_v13  ;;  %vm1846_vm15 = vweird.f32 %v6743_v36  ;;  %vm2149_vm0 = vcmp.lt.f32.partialorder %v10152_v21, 0.0  ;;  %v10160_v13 = vld [vmem:[#allocation46_spill] sm:$0xff] }
 0x2a4   : > { %v2042_v6 = vmul.f32 %v2026_v16, %v6966_v14  ;;  %v1961_v28 = vadd.f32 1.4214138, %v1945_v41  ;;  %v2011_v8 = vmul.f32 %v1995_v34, %v6996_v18  ;;  %v7058_v47 = vsel %vm1715_vm14, %v1717_v30, %v1713_v3  ;;  %vm1847_vm1 = vmor %vm1845_vm9, %vm1846_vm15  ;;  %v10165_v21 = vld [vmem:[#allocation34_spill] sm:$0xff] }
 0x2a5   : > { %v1849_v43 = vand.u32 2147483647, %v6694_v4  ;;  %v2165_v50 = vsub.f32 0.0, %v2133_v55  ;;  %v1903_v19 = vmul.f32 1.0614054, %v7058_v47  ;;  %v1848_v22 = vsel %vm1847_vm1, %v6743_v36, %v1844_v15 }
 0x2a6   : > { %v2122_v39 = vmul.f32 %v6765_v7, %v2042_v6  ;;  %v1977_v37 = vmul.f32 %v1961_v28, %v7025_v49  ;;  %v2027_v14 = vadd.f32 0.2548296, %v2011_v8  ;;  %v10153_v17 = vand.u32 2147483648, %v6694_v4  ;;  %v10163_v6 = vld [vmem:[#allocation37_spill] sm:$0xff] }
 0x2a7   : > { %vm1850_vm2 = vcmp.eq.f32.partialorder %v1849_v43, 8.507059e+37  ;;  %v2181_v31 = vsel %vm2149_vm0, %v2165_v50, %v2133_v55  ;;  %v1919_v61 = vadd.f32 -1.4531521, %v1903_v19  ;;  %v10155_v46 = vsub.f32 1.0, %v10154_v29 }
 0x2a8   : > { %v1852_v35 = vor.u32 1.1754944e-38, %v10153_v17  ;;  %v2138_v58 = vsub.f32 1.0, %v2122_v39  ;;  %v1993_v2 = vadd.f32 -0.28449672, %v1977_v37  ;;  %v2197_v60 = vadd.f32 1.0, %v2181_v31 }
 0x2a9   : > { %v2043_v7 = vmul.f32 %v2027_v14, %v6996_v18  ;;  %v1783_v10 = vmul.f32 %v10156_v27, %v10155_v46  ;;  %v1935_v59 = vmul.f32 %v1919_v61, %v7058_v47  ;;  %v10157_v18 = vld [vmem:[#allocation35_spill] sm:$0xff]  ;;  %vm2153_vm4 = vcmp.lt.f32.partialorder %v10158_v1, 0.0  ;;  %v10166_v14 = vld [vmem:[#allocation25_spill] sm:$0xff]  ;;  %v10182_v61 = vld [vmem:[#allocation18_spill] sm:$0xff] }
 0x2aa   : > { %v7070_v62 = vsel %vm1850_vm2, %v1852_v35, %v1848_v22  ;;  %v2170_v45 = vsub.f32 0.0, %v2138_v58  ;;  %v2009_v36 = vmul.f32 %v1993_v2, %v7025_v49  ;;  %v7078_v40 = vmul.f32 %v2197_v60, %v1589_v44  ;;  %v10167_v22 = vld [vmem:[#allocation49_spill] sm:$0xff] }
 0x2ab   : > { %v1912_v4 = vmul.f32 1.0614054, %v7070_v62  ;;  %v2123_v25 = vmul.f32 %v6818_v11, %v2043_v7  ;;  %v1784_v26 = vadd.f32 %v10156_v27, %v1783_v10  ;;  %vm1785_vm3 = vweird.f32 %v10157_v18  ;;  %v10175_v1 = vld [vmem:[#allocation41_spill] sm:$0xff] }
 0x2ac   : > { %v2186_v23 = vsel %vm2154_vm13, %v2170_v45, %v2138_v58  ;;  %v2025_v51 = vadd.f32 0.2548296, %v2009_v36  ;;  %v1951_v48 = vadd.f32 1.4214138, %v1935_v59  ;;  %2232 = vrot.lane.b32.xlu0 %v7078_v40, %s5619_s24  ;;  %vm1786_vm5 = vweird.f32 %v10156_v27  ;;  %v10170_v45 = vld [vmem:[#allocation40_spill] sm:$0xff] }
 0x2ad   : > { %v1928_v54 = vadd.f32 -1.4531521, %v1912_v4  ;;  %v2202_v20 = vadd.f32 1.0, %v2186_v23  ;;  %v2139_v52 = vsub.f32 1.0, %v2123_v25  ;;  %v1789_v11 = vand.u32 2147483647, %v10157_v18  ;;  %vm7101_vm7 = vmor %vm1785_vm3, %vm1786_vm5 }
 0x2ae   : > { %v2041_v9 = vmul.f32 %v2025_v51, %v7025_v49  ;;  %v1967_v44 = vmul.f32 %v1951_v48, %v7058_v47  ;;  %v1791_v3 = vand.u32 2147483648, %v10157_v18  ;;  %v2100_v56 = vmul.f32 1.442695, %v6741_v0  ;;  %v10174_v48 = vld [vmem:[#allocation39_spill] sm:$0xff] }
 0x2af   : > { %v1944_v32 = vmul.f32 %v1928_v54, %v7070_v62  ;;  %vm2155_vm6 = vcmp.lt.f32.partialorder %v10159_v42, 0.0  ;;  %v7097_v16 = vmul.f32 %v2202_v20, %v10160_v13  ;;  %v2171_v41 = vsub.f32 0.0, %v2139_v52 }
 0x2b0   : > { %v2121_v49 = vmul.f32 %v6784_v5, %v2041_v9  ;;  %v1983_v34 = vadd.f32 -0.28449672, %v1967_v44  ;;  %v1788_v0 = vsel %vm7101_vm7, %v10156_v27, %v1784_v26  ;;  %vm1790_vm8 = vcmp.eq.f32.partialorder %v1789_v11, 8.507059e+37  ;;  %v10171_v26 = vld [vmem:[#allocation33_spill] sm:$0xff]  ;;  %v10176_v9 = vld [vmem:[#allocation31_spill] sm:$0xff] }
 0x2b1   : > { %v1960_v30 = vadd.f32 1.4214138, %v1944_v32  ;;  %2429 = vmatpush.msrb.mxu2 %v7097_v16  ;;  %v2187_v15 = vsel %vm2155_vm6, %v2171_v41, %v2139_v52  ;;  %2242 = vrot.lane.b32.xlu2 %v7097_v16, %s5619_s24  ;;  %v1792_v55 = vor.u32 1.1754944e-38, %v1791_v3  ;;  %v10164_v28 = vsub.f32 1.0, %v10163_v6 }
 0x2b2   : > { %v2203_v43 = vadd.f32 1.0, %v2187_v15  ;;  %v2137_v5 = vsub.f32 1.0, %v2121_v49  ;;  %v1999_v50 = vmul.f32 %v1983_v34, %v7058_v47  ;;  %vm1725_vm9 = vweird.f32 %v10166_v14  ;;  %v10177_v49 = vld [vmem:[#allocation13_spill] sm:$0xff]  ;;  %v10178_v15 = vld [vmem:[#allocation15_spill] sm:$0xff] }
 0x2b3   : > { %v1723_v8 = vmul.f32 %v10165_v21, %v10164_v28  ;;  %v1976_v39 = vmul.f32 %v1960_v30, %v7070_v62  ;;  %2430 = vmatpush.msrb.mxu2 %v7014_v38  ;;  %v7118_v37 = vsel %vm1790_vm8, %v1792_v55, %v1788_v0  ;;  %vm1726_vm12 = vweird.f32 %v10165_v21 }
 0x2b4   : > { %v7124_v17 = vmul.f32 %v2203_v43, %v10167_v22  ;;  %v2169_v35 = vsub.f32 0.0, %v2137_v5  ;;  %v2015_v31 = vadd.f32 0.2548296, %v1999_v50  ;;  %5414 = vpow2.f32 %v2100_v56  ;;  %vm7128_vm10 = vmor %vm1725_vm9, %vm1726_vm12  ;;  %v10181_v22 = vld [vmem:[#allocation22_spill] sm:$0xff] }
 0x2b5   : > { %v1724_v19 = vadd.f32 %v10165_v21, %v1723_v8  ;;  %v1992_v58 = vadd.f32 -0.28449672, %v1976_v39  ;;  %2431 = vmatpush.msrb.mxu2 %v6954_v24  ;;  %v1908_v2 = vmul.f32 1.0614054, %v7118_v37  ;;  %v1729_v60 = vand.u32 2147483647, %v10166_v14 }
 0x2b6   : > { %v1731_v7 = vand.u32 2147483648, %v10166_v14  ;;  %2470 = vmatpush.msrb.mxu3 %v7124_v17  ;;  %v2185_v29 = vsel %vm2153_vm4, %v2169_v35, %v2137_v5  ;;  %v2031_v46 = vmul.f32 %v2015_v31, %v7058_v47  ;;  %v1593_v36 = vmul.f32 0.5, %v10170_v45  ;;  %v10172_v47 = vld [vmem:[#allocation43_spill] sm:$0xff] }
 0x2b7   : > { %v2008_v27 = vmul.f32 %v1992_v58, %v7070_v62  ;;  %v1728_v10 = vsel %vm7128_vm10, %v10165_v21, %v1724_v19  ;;  %v2201_v59 = vadd.f32 1.0, %v2185_v29  ;;  %v1924_v4 = vadd.f32 -1.4531521, %v1908_v2  ;;  %2432 = vmatpush.msrb.mxu2 %v6887_v57  ;;  %v10179_v19 = vld [vmem:[#allocation28_spill] sm:$0xff] }
 0x2b8   : > { %v1732_v25 = vor.u32 1.1754944e-38, %v1731_v7  ;;  %v2111_v18 = vmul.f32 %v10171_v26, %v2031_v46  ;;  %2471 = vmatpush.msrb.mxu3 %v7045_v53  ;;  %vm1730_vm11 = vcmp.eq.f32.partialorder %v1729_v60, 8.507059e+37  ;;  %v10173_v51 = vsub.f32 1.0, %v10172_v47 }
 0x2b9   : > { %v2024_v23 = vadd.f32 0.2548296, %v2008_v27  ;;  %vm2152_vm13 = vcmp.lt.f32.partialorder %v10175_v1, 0.0  ;;  %v7150_v20 = vmul.f32 %v2201_v59, %v1593_v36  ;;  %v1940_v52 = vmul.f32 %v1924_v4, %v7118_v37  ;;  %2250 = vrot.lane.b32.xlu2 %v7124_v17, %s5619_s24  ;;  %v10183_v36 = vld [vmem:[#allocation38_spill] sm:$0xff] }
 0x2ba   : > { %v1768_v54 = vmul.f32 %v10174_v48, %v10173_v51  ;;  %v7153_v11 = vsel %vm1730_vm11, %v1732_v25, %v1728_v10  ;;  %vm1770_vm14 = vweird.f32 %v10176_v9  ;;  %v2127_v44 = vsub.f32 1.0, %v2111_v18  ;;  %v5415_v42 = vpop.eup %5414 }
 0x2bb   : > { %v2040_v32 = vmul.f32 %v2024_v23, %v7070_v62  ;;  %v1904_v3 = vmul.f32 1.0614054, %v7153_v11  ;;  %2388 = vmatpush.msrb.mxu1 %v7150_v20  ;;  %2234 = vrot.lane.b32.xlu1 %v7150_v20, %s5619_s24  ;;  %v1956_v13 = vadd.f32 1.4214138, %v1940_v52  ;;  %vm1771_vm15 = vweird.f32 %v10174_v48 }
 0x2bc   : > { %v1769_v56 = vadd.f32 %v10174_v48, %v1768_v54  ;;  %v1774_v41 = vand.u32 2147483647, %v10176_v9  ;;  %v1776_v33 = vand.u32 2147483648, %v10176_v9  ;;  %v1583_v34 = vmul.f32 0.5, %v10177_v49  ;;  %vm1772_vm0 = vmor %vm1770_vm14, %vm1771_vm15 }
 0x2bd   : > { %v2159_v62 = vsub.f32 0.0, %v2127_v44  ;;  %v2120_v30 = vmul.f32 %v5415_v42, %v2040_v32  ;;  %v1920_v0 = vadd.f32 -1.4531521, %v1904_v3  ;;  %vm2143_vm1 = vcmp.lt.f32.partialorder %v10178_v15, 0.0  ;;  %2389 = vmatpush.msrb.mxu1 %v7078_v40  ;;  %v10187_v32 = vld [vmem:[#allocation14_spill] sm:$0xff] }
 0x2be   : > { %v1972_v55 = vmul.f32 %v1956_v13, %v7118_v37  ;;  %v1773_v6 = vsel %vm1772_vm0, %v10174_v48, %v1769_v56  ;;  %v1777_v28 = vor.u32 1.1754944e-38, %v1776_v33  ;;  %vm1775_vm2 = vcmp.eq.f32.partialorder %v1774_v41, 8.507059e+37  ;;  %v10186_v48 = vld [vmem:[#allocation32_spill] sm:$0xff]  ;;  %v10189_v13 = vld [vmem:[#allocation50_spill] sm:$0xff] }
 0x2bf   : > { %v2175_v21 = vsel %vm2143_vm1, %v2159_v62, %v2127_v44  ;;  %v2136_v8 = vsub.f32 1.0, %v2120_v30  ;;  %v1936_v43 = vmul.f32 %v1920_v0, %v7153_v11  ;;  %2390 = vmatpush.msrb.mxu1 %v6984_v63  ;;  %v10180_v14 = vsub.f32 1.0, %v10179_v19  ;;  %v10188_v56 = vld [vmem:[#allocation44_spill] sm:$0xff] }
 0x2c0   : > { %v2191_v5 = vadd.f32 1.0, %v2175_v21  ;;  %v1988_v50 = vadd.f32 -0.28449672, %v1972_v55  ;;  %v1778_v39 = vsel %vm1775_vm2, %v1777_v28, %v1773_v6  ;;  %vm1665_vm3 = vweird.f32 %v10182_v61  ;;  %v10190_v21 = vld [vmem:[#allocation26_spill] sm:$0xff] }
 0x2c1   : > { %v1663_v35 = vmul.f32 %v10181_v22, %v10180_v14  ;;  %v2168_v31 = vsub.f32 0.0, %v2136_v8  ;;  %v1952_v58 = vadd.f32 1.4214138, %v1936_v43  ;;  %v1907_v2 = vmul.f32 1.0614054, %v1778_v39  ;;  %2391 = vmatpush.msrb.mxu1 %v6922_v12 }
 0x2c2   : > { %v7180_v60 = vmul.f32 %v2191_v5, %v1583_v34  ;;  %v2004_v7 = vmul.f32 %v1988_v50, %v7118_v37  ;;  %vm1666_vm4 = vweird.f32 %v10181_v22  ;;  %v1669_v45 = vand.u32 2147483647, %v10182_v61  ;;  %v10191_v50 = vld [vmem:[#allocation23_spill] sm:$0xff] }
 0x2c3   : > { %v1664_v29 = vadd.f32 %v10181_v22, %v1663_v35  ;;  %v2184_v46 = vsel %vm2152_vm13, %v2168_v31, %v2136_v8  ;;  %v1968_v27 = vmul.f32 %v1952_v58, %v7153_v11  ;;  %v1923_v10 = vadd.f32 -1.4531521, %v1907_v2  ;;  %vm7193_vm5 = vmor %vm1665_vm3, %vm1666_vm4 }
 0x2c4   : > { %v1592_v59 = vmul.f32 0.5, %v10183_v36  ;;  %2244 = vrot.lane.b32.xlu0 %v7180_v60, %s5619_s24  ;;  %v2200_v4 = vadd.f32 1.0, %v2184_v46  ;;  %v2020_v25 = vadd.f32 0.2548296, %v2004_v7  ;;  %v1671_v18 = vand.u32 2147483648, %v10182_v61 }
 0x2c5   : > { %v1984_v23 = vadd.f32 -0.28449672, %v1968_v27  ;;  %v1939_v47 = vmul.f32 %v1923_v10, %v1778_v39  ;;  %v1668_v51 = vsel %vm7193_vm5, %v10181_v22, %v1664_v29  ;;  %5416 = vpow2.f32 %v10186_v48  ;;  %v10192_v27 = vld [vmem:[#allocation17_spill] sm:$0xff] }
 0x2c6   : > { %v7202_v54 = vmul.f32 %v2200_v4, %v1592_v59  ;;  %v2036_v1 = vmul.f32 %v2020_v25, %v7118_v37  ;;  %v1672_v52 = vor.u32 1.1754944e-38, %v1671_v18  ;;  %vm1670_vm6 = vcmp.eq.f32.partialorder %v1669_v45, 8.507059e+37  ;;  %v10193_v59 = vld [vmem:[#allocation16_spill] sm:$0xff]  ;;  %v10194_v48 = vld [vmem:[#allocation21_spill] sm:$0xff] }
 0x2c7   : > { %v2000_v9 = vmul.f32 %v1984_v23, %v7153_v11  ;;  %v1955_v44 = vadd.f32 1.4214138, %v1939_v47  ;;  %v2044_v3 = vsub.f32 0.0, %v10187_v32  ;;  %v2090_v42 = vmul.f32 1.442695, %v10188_v56 }
 0x2c8   : > { %2347 = vmatpush.msrb.mxu0 %v7202_v54  ;;  %v2116_v41 = vmul.f32 %v10189_v13, %v2036_v1  ;;  %v1673_v33 = vsel %vm1670_vm6, %v1672_v52, %v1668_v51  ;;  %2226 = vrot.lane.b32.xlu1 %v7202_v54, %s5619_s24  ;;  %vm2148_vm7 = vcmp.lt.f32.partialorder %v10190_v21, 0.0  ;;  %v1588_v19 = vmul.f32 0.5, %v10191_v50  ;;  %v5124_v21 = vld [vmem:[%s9854_s8 + $0x70] sm:$0xff] }
 0x2c9   : > { %v2016_v49 = vadd.f32 0.2548296, %v2000_v9  ;;  %v1971_v34 = vmul.f32 %v1955_v44, %v1778_v39  ;;  %v1900_v37 = vmul.f32 1.0614054, %v1673_v33  ;;  %v2060_v6 = vmul.f32 %v2044_v3, %v10187_v32  ;;  %v10195_v9 = vld [vmem:[#allocation19_spill] sm:$0xff] }
 0x2ca   : > { %v2132_v62 = vsub.f32 1.0, %v2116_v41  ;;  %5418 = vpow2.f32 %v2090_v42  ;;  %vm2144_vm8 = vcmp.lt.f32.partialorder %v10192_v27, 0.0  ;;  %v1584_v4 = vmul.f32 0.5, %v10193_v59  ;;  %v10196_v41 = vld [vmem:[#allocation12_spill] sm:$0xff] }
 0x2cb   : > { %v2032_v30 = vmul.f32 %v2016_v49, %v7153_v11  ;;  %v1987_v0 = vadd.f32 -0.28449672, %v1971_v34  ;;  %v1916_v15 = vadd.f32 -1.4531521, %v1900_v37  ;;  %v5417_v55 = vpop.eup %5416  ;;  %v2076_v11 = vmul.f32 1.442695, %v2060_v6 }
 0x2cc   : > { %v2164_v28 = vsub.f32 0.0, %v2132_v62  ;;  %vm2147_vm9 = vcmp.lt.f32.partialorder %v10194_v48, 0.0  ;;  %v1587_v44 = vmul.f32 0.5, %v10195_v9  ;;  %vm2140_vm12 = vcmp.lt.f32.partialorder %v10196_v41, 0.0  ;;  %v10197_v49 = vld [vmem:[#allocation11_spill] sm:$0xff]  ;;  %v2996_v9 = vld [vmem:[%s9855_s9 + $0x38] sm:$0xff] }
 0x2cd   : > { %v2112_v8 = vmul.f32 %v5417_v55, %v2032_v30  ;;  %v2003_v43 = vmul.f32 %v1987_v0, %v1778_v39  ;;  %v1932_v5 = vmul.f32 %v1916_v15, %v1673_v33  ;;  %5420 = vpow2.f32 %v2076_v11  ;;  %v5118_v30 = vld [vmem:[%s9854_s8 + $0x40] sm:$0xff]  ;;  %v2992_v55 = vld [vmem:[%s9855_s9 + $0x18] sm:$0xff]  ;;  %v2995_v11 = vld [vmem:[%s9855_s9 + $0x30] sm:$0xff] }
 0x2ce   : > { %v2180_v14 = vsel %vm2148_vm7, %v2164_v28, %v2132_v62  ;;  %v1580_v34 = vmul.f32 0.5, %v10197_v49  ;;  %vm2310_vm10 = vcmask 261120   ;;  %v10199_v28 = vld [vmem:[#allocation9_spill] sm:$0xff] }
 0x2cf   : > { %v2196_v22 = vadd.f32 1.0, %v2180_v14  ;;  %v2128_v35 = vsub.f32 1.0, %v2112_v8  ;;  %v2019_v31 = vadd.f32 0.2548296, %v2003_v43  ;;  %v1948_v58 = vadd.f32 1.4214138, %v1932_v5  ;;  %5142 = vmatmul.msk.f32.vlgmr.msrb.gmra.mxu2 %vm2310_vm10, %v5118_v30  ;;  %5134 = vmatmul.msk.f32.vlgmr.msrb.gmra.mxu1 %vm2310_vm10, %v5118_v30 }
 0x2d0   : > { %v5419_v46 = vpop.eup %5418  ;;  %vm493_vm13 = vcmp.ge.s32.totalorder %v10199_v28, 4  ;;  %v5125_v14 = vld [vmem:[%s9854_s8 + $0x78] sm:$0xff]  ;;  %vm513_vm2 = vcmp.lt.s32.totalorder %v10199_v28, 124 }
 0x2d1   : > { %v2212_v2 = vmul.f32 %v2196_v22, %v1588_v19  ;;  %v2160_v61 = vsub.f32 0.0, %v2128_v35  ;;  %v2035_v7 = vmul.f32 %v2019_v31, %v1778_v39  ;;  %v1964_v29 = vmul.f32 %v1948_v58, %v1673_v33  ;;  %v2990_v19 = vld [vmem:[%s9855_s9 + $0x8] sm:$0xff]  ;;  %v3073_v22 = vld [vmem:[%s9856_s10 + $0x20] sm:$0xff]  ;;  %v3072_v31 = vld [vmem:[%s9856_s10 + $0x18] sm:$0xff] }
 0x2d2   : > { %v3071_v58 = vld [vmem:[%s9856_s10 + $0x10] sm:$0xff] }
 0x2d3   : > { %2348 = vmatpush.msrb.mxu0 %v2212_v2  ;;  %v2176_v10 = vsel %vm2144_vm8, %v2160_v61, %v2128_v35  ;;  %v2115_v45 = vmul.f32 %v5419_v46, %v2035_v7  ;;  %v1980_v36 = vadd.f32 -0.28449672, %v1964_v29  ;;  %v5421_v52 = vpop.eup %5420  ;;  %v2993_v61 = vld [vmem:[%s9855_s9 + $0x20] sm:$0xff]  ;;  %v3076_v29 = vld [vmem:[%s9856_s10 + $0x38] sm:$0xff] }
 0x2d4   : > { %v2192_v25 = vadd.f32 1.0, %v2176_v10  ;;  %v10200_v46 = vld [vmem:[#allocation10_spill] sm:$0xff] }
 0x2d5   : > { %v2131_v26 = vsub.f32 1.0, %v2115_v45  ;;  %v1996_v18 = vmul.f32 %v1980_v36, %v1673_v33  ;;  %vm492_vm14 = vcmp.ge.s32.totalorder %v10200_v46, 4  ;;  %v3075_v36 = vld [vmem:[%s9856_s10 + $0x30] sm:$0xff]  ;;  %vm512_vm1 = vcmp.lt.s32.totalorder %v10200_v46, 124 }
 0x2d6   : > { %v2208_v23 = vmul.f32 %v2192_v25, %v1584_v4  ;;  %v3074_v4 = vld [vmem:[%s9856_s10 + $0x28] sm:$0xff] }
 0x2d7   : > { %v2163_v47 = vsub.f32 0.0, %v2131_v26  ;;  %v2012_v51 = vadd.f32 0.2548296, %v1996_v18  ;;  %v2293_v18 = vld [vmem:[%s9854_s8] sm:$0xff] }
 0x2d8   : > { %2349 = vmatpush.msrb.mxu0 %v2208_v23  ;;  %2222 = vrot.lane.b32.xlu0 %v2208_v23, %s5619_s24 }
 0x2d9   : > { %v2179_v39 = vsel %vm2147_vm9, %v2163_v47, %v2131_v26  ;;  %v2028_v1 = vmul.f32 %v2012_v51, %v1673_v33 }
 0x2da   : > { %v2195_v32 = vadd.f32 1.0, %v2179_v39  ;;  %v10201_v39 = vld [vmem:[#allocation8_spill] sm:$0xff] }
 0x2db   : > { %v2108_v3 = vmul.f32 %v5421_v52, %v2028_v1  ;;  %vm491_vm0 = vcmp.ge.s32.totalorder %v10201_v39, 4  ;;  %vm511_vm4 = vcmp.lt.s32.totalorder %v10201_v39, 124 }
 0x2dc   : > { %v2211_v56 = vmul.f32 %v2195_v32, %v1587_v44  ;;  %v2294_v44 = vld [vmem:[%s9854_s8 + $0x8] sm:$0xff] }
 0x2dd   : > { %v2124_v42 = vsub.f32 1.0, %v2108_v3 }
 0x2de   : > { %2472 = vmatpush.msrb.mxu3 %v2211_v56  ;;  %2246 = vrot.lane.b32.xlu2 %v2211_v56, %s5619_s24 }
 0x2df   : > { %v2156_v13 = vsub.f32 0.0, %v2124_v42 }
 0x2e0   : > { %2473 = vmatpush.msrb.mxu3 %v7180_v60  ;;  %2715 = vrot.lane.b32.xlu0 %v7045_v53, %s5620_s30  ;;  %v5119_v53 = vld [vmem:[%s9854_s8 + $0x48] sm:$0xff] }
 0x2e1   : > { %v2172_v33 = vsel %vm2140_vm12, %v2156_v13, %v2124_v42  ;;  %5150 = vmatmul.msk.f32.vlgmr.msrb.gmra.mxu3 %vm2310_vm10, %v5118_v30  ;;  %5143 = vmatmul.msk.f32.gmra.mxu2 %vm2310_vm10, %v5119_v53  ;;  %v2295_v42 = vld [vmem:[%s9854_s8 + $0x10] sm:$0xff] }
 0x2e2   : > { %v2188_v37 = vadd.f32 1.0, %v2172_v33  ;;  %5135 = vmatmul.msk.f32.gmra.mxu1 %vm2310_vm10, %v5119_v53 }
 0x2e4   : > { %v2204_v62 = vmul.f32 %v2188_v37, %v1580_v34  ;;  %v2296_v34 = vld [vmem:[%s9854_s8 + $0x18] sm:$0xff] }
 0x2e6   : > { %2350 = vmatpush.msrb.mxu0 %v2204_v62  ;;  %2220 = vrot.lane.b32.xlu1 %v2204_v62, %s5619_s24 }
 0x2e7   : > { %2224 = vrot.lane.b32.xlu2 %v2212_v2, %s5619_s24  ;;  %5126 = vmatmul.msk.f32.vlgmr.msrb.gmra.mxu0 %vm2310_vm10, %v5118_v30  ;;  %v7466_v30 = vld [vmem:[%s9854_s8 + $0x20] sm:$0xff]  ;;  %s429_s24 = sand.u32 1, %s5604_s26  }
 0x2e8   : > { %2713 = vrot.lane.b32.xlu0 %v2211_v56, %s5620_s30  ;;  %s5040_s27 = sshll.u32 %s429_s24, 5  ;;  %s4961_s17 = scalar_lea.sflag [#allocation3], %s429_s24 }
 0x2e9   : > { %5151 = vmatmul.msk.f32.gmra.mxu3 %vm2310_vm10, %v5119_v53  ;;  %s9803_s16 = scalar_lea.vmem [#allocation2], %s5040_s27 }
 0x2ee   : > { %2693 = vrot.lane.b32.xlu1 %v7202_v54, %s5620_s30  ;;  %v5120_v54 = vld [vmem:[%s9854_s8 + $0x50] sm:$0xff] }
 0x2ef   : > { %2707 = vrot.lane.b32.xlu2 %v7014_v38, %s5620_s30  ;;  %5127 = vmatmul.msk.f32.gmra.mxu0 %vm2310_vm10, %v5119_v53  ;;  %v5121_v38 = vld [vmem:[%s9854_s8 + $0x58] sm:$0xff] }
 0x2f0   : > { %2717 = vrot.lane.b32.xlu0 %v7124_v17, %s5620_s30  ;;  %5144 = vmatmul.msk.f32.gmra.mxu2 %vm2310_vm10, %v5120_v54 }
 0x2f1   : > { %5152 = vmatmul.msk.f32.gmra.mxu3 %vm2310_vm10, %v5120_v54  ;;  %5136 = vmatmul.msk.f32.gmra.mxu1 %vm2310_vm10, %v5120_v54 }
 0x2f6   : > { %2691 = vrot.lane.b32.xlu1 %v2212_v2, %s5620_s30  ;;  %v2994_v2 = vld [vmem:[%s9855_s9 + $0x28] sm:$0xff] }
 0x2f7   : > { %2705 = vrot.lane.b32.xlu2 %v6954_v24, %s5620_s30  ;;  %5128 = vmatmul.msk.f32.gmra.mxu0 %vm2310_vm10, %v5120_v54  ;;  %v2989_v24 = vld [vmem:[%s9855_s9] sm:$0xff] }
 0x2f8   : > { %2711 = vrot.lane.b32.xlu0 %v7180_v60, %s5620_s30  ;;  %5145 = vmatmul.msk.f32.gmra.mxu2 %vm2310_vm10, %v5121_v38  ;;  %v7283_v60 = vpop.permute.xlu1 %2236 }
 0x2f9   : > { %5153 = vmatmul.msk.f32.gmra.mxu3 %vm2310_vm10, %v5121_v38  ;;  %5137 = vmatmul.msk.f32.gmra.mxu1 %vm2310_vm10, %v5121_v38 }
 0x2fd   : > { %v7278_v17 = vpop.permute.xlu2 %2248  ;;  %v7326_v5 = vpop.permute.xlu0 %2228 }
 0x2fe   : > { %2689 = vrot.lane.b32.xlu1 %v2208_v23, %s5620_s30 }
 0x2ff   : > { %2703 = vrot.lane.b32.xlu2 %v6887_v57, %s5620_s30  ;;  %5129 = vmatmul.msk.f32.gmra.mxu0 %vm2310_vm10, %v5121_v38  ;;  %v5122_v57 = vld [vmem:[%s9854_s8 + $0x60] sm:$0xff] }
 0x300   : > { %2699 = vrot.lane.b32.xlu0 %v7078_v40, %s5620_s30  ;;  %5146 = vmatmul.msk.f32.gmra.mxu2 %vm2310_vm10, %v5122_v57  ;;  %v3070_v40 = vld [vmem:[%s9856_s10 + $0x8] sm:$0xff] }
 0x301   : > { %5154 = vmatmul.msk.f32.gmra.mxu3 %vm2310_vm10, %v5122_v57  ;;  %5138 = vmatmul.msk.f32.gmra.mxu1 %vm2310_vm10, %v5122_v57 }
 0x303   : > { %v7302_v15 = vpop.permute.xlu1 %2238 }
 0x306   : > { %2687 = vrot.lane.b32.xlu1 %v2204_v62, %s5620_s30 }
 0x307   : > { %2709 = vrot.lane.b32.xlu2 %v7097_v16, %s5620_s30  ;;  %5130 = vmatmul.msk.f32.gmra.mxu0 %vm2310_vm10, %v5122_v57  ;;  %v5123_v16 = vld [vmem:[%s9854_s8 + $0x68] sm:$0xff] }
 0x308   : > { %2999 = vperm.xlu0 %5325, %v2989_v24   ;;  %5147 = vmatmul.msk.f32.gmra.mxu2 %vm2310_vm10, %v5123_v16  ;;  %v2231_v35 = vpop.permute.xlu0 %2230  ;;  %v7488_v57 = vld [vmem:[%s9854_s8 + $0x28] sm:$0xff] }
 0x309   : > { %5155 = vmatmul.msk.f32.gmra.mxu3 %vm2310_vm10, %v5123_v16  ;;  %5139 = vmatmul.msk.f32.gmra.mxu1 %vm2310_vm10, %v5123_v16 }
 0x30b   : > { %v2243_v0 = vpop.permute.xlu2 %2242 }
 0x30d   : > { %v2241_v43 = vpop.permute.xlu1 %2240 }
 0x30e   : > { %2697 = vrot.lane.b32.xlu1 %v6984_v63, %s5620_s30  ;;  %v3069_v63 = vld [vmem:[%s9856_s10] sm:$0xff] }
 0x30f   : > { %2701 = vrot.lane.b32.xlu2 %v7150_v20, %s5620_s30  ;;  %5131 = vmatmul.msk.f32.gmra.mxu0 %vm2310_vm10, %v5123_v16  ;;  %v10198_v20 = vld [vmem:[#allocation7_spill] sm:$0xff] }
 0x310   : > { %3084 = vperm.xlu0 %5325, %v3070_v40   ;;  %vm2252_vm11 = vcmp.lt.s32.totalorder %v10198_v20, 4  ;;  %5148 = vmatmul.msk.f32.gmra.mxu2 %vm2310_vm10, %v5124_v21  ;;  %vm490_vm15 = vcmp.ge.s32.totalorder %v10198_v20, 4  ;;  %vm510_vm3 = vcmp.lt.s32.totalorder %v10198_v20, 124  ;;  %v5209_v20 = vld [vmem:[%s9854_s8 + $0x98] sm:$0xff] }
 0x311   : > { %5156 = vmatmul.msk.f32.gmra.mxu3 %vm2310_vm10, %v5124_v21  ;;  %v2255_v50 = vsel %vm2252_vm11, %v2241_v43, %v7278_v17  ;;  %5140 = vmatmul.msk.f32.gmra.mxu1 %vm2310_vm10, %v5124_v21  ;;  %v2258_v59 = vsel %vm2252_vm11, %v2231_v35, %v7302_v15  ;;  %v2257_v25 = vsel %vm2252_vm11, %v7326_v5, %v7283_v60 }
 0x313   : > { %v7314_v6 = vpop.permute.xlu2 %2250 }
 0x314   : > { %v2256_v8 = vsel %vm2252_vm11, %v2243_v0, %v7314_v6 }
 0x315   : > { %5194 = vmatpush.msk.msra.mxu3 %vm493_vm13, %v2256_v8 }
 0x316   : > { %3079 = vperm.xlu1 %5323, %v3069_v63  }
 0x317   : > { %2695 = vrot.lane.b32.xlu2 %v6922_v12, %s5620_s30  ;;  %5132 = vmatmul.msk.f32.gmra.mxu0 %vm2310_vm10, %v5124_v21  ;;  %v2991_v12 = vld [vmem:[%s9855_s9 + $0x10] sm:$0xff]  ;;  %s5275_s30 = sshll.u32 %s5712_s29, 5  ;;  %s4974_s29 = sshll.u32 %s9803_s16, 4  ;;  %s4975_s29 = int_to_ptr.vmem [resolvable:$true] %s4974_s29 }
 0x318   : > { %3014 = vperm.xlu0 %5325, %v2992_v55   ;;  %5195 = vmatpush.msk.msra.mxu3 %vm493_vm13, %v2255_v50  ;;  %v7515_v55 = vld [vmem:[%s9854_s8 + $0x30] sm:$0xff]  ;;  %s4972_s22 = scalar_lea.hbm %s9859_s13, %s5275_s30 }
 0x319   : > { %5157 = vmatmul.msk.f32.gmra.mxu3 %vm2310_vm10, %v5125_v14  ;;  %5149 = vmatmul.msk.f32.gmra.mxu2 %vm2310_vm10, %v5125_v14  ;;  %s4976_s0 = sshll.u32 %s4972_s22, 4  ;;  %s4977_s0 = int_to_ptr.hbm [resolvable:$true] %s4976_s0 }
 0x31a   : > { %5141 = vmatmul.msk.f32.gmra.mxu1 %vm2310_vm10, %v5125_v14  ;;  %s5564_s15 = sshra.s32 %s4977_s0, 4  ;;  %s5565_s15 = int_to_ptr.hbm [resolvable:$true] %s5564_s15 }
 0x31b   : > { %s5566_s23 = scalar_lea.hbm %s5565_s15, 32  ;;  %p5571_p0 = scmp.lt.s32.totalorder %s5565_s15, %s9859_s13 }
 0x31c   : > { %p5567_p11 = scmp.ne.s32.totalorder %s5565_s15, %s5566_s23  ;;  %p5572_p1 = scmp.lt.s32.totalorder %s5570_s20, %s5566_s23 }
 0x31e   : > { %3009 = vperm.xlu1 %5323, %v2991_v12   ;;  %v2233_v7 = vpop.permute.xlu0 %2232  ;;  %p5568_p12 = pnand %p5567_p11, %p5729_p5  ;;  %p5573_p2 = por %p5572_p1, %p5571_p0 }
 0x31f   : > { %3004 = vperm.xlu2 %5324, %v2990_v19   ;;  %5133 = vmatmul.msk.f32.gmra.mxu0 %vm2310_vm10, %v5125_v14  ;;  %v2259_v45 = vsel %vm2252_vm11, %v2233_v7, %v2241_v43  ;;  %v2300_v14 = vld [vmem:[%s9854_s8 + $0x38] sm:$0xff] }
 0x320   : > { %3099 = vperm.xlu0 %5325, %v3073_v22   ;;  %p5569_p13 = pneg %p5568_p12 }
 0x322   : > { %p5574_p3 = pnand %p5573_p2, %p5569_p13 }
 0x326   : > { %3094 = vperm.xlu1 %5323, %v3072_v31  }
 0x327   : > { %3089 = vperm.xlu2 %5324, %v3071_v58  }
 0x328   : > { %3029 = vperm.xlu0 %5325, %v2995_v11  }
 0x32d   : > { %v2235_v27 = vpop.permute.xlu1 %2234 }
 0x32e   : > { %3024 = vperm.xlu1 %5323, %v2994_v2   ;;  %v2260_v10 = vsel %vm2252_vm11, %v2235_v27, %v2243_v0 }
 0x32f   : > { %3019 = vperm.xlu2 %5324, %v2993_v61   ;;  %5182 = vmatpush.msk.msra.mxu2 %vm492_vm14, %v2260_v10  ;;  %v5206_v61 = vld [vmem:[%s9854_s8 + $0x80] sm:$0xff]  ;;  %v5207_v10 = vld [vmem:[%s9854_s8 + $0x88] sm:$0xff] }
 0x330   : > { %3114 = vperm.xlu0 %5325, %v3076_v29  }
 0x331   : > { %5183 = vmatpush.msk.msra.mxu2 %vm492_vm14, %v2259_v45 }
 0x333   : > { %5184 = vmatpush.msk.msra.mxu2 %vm492_vm14, %v2258_v59 }
 0x335   : > { %5185 = vmatpush.msk.msra.mxu2 %vm492_vm14, %v2257_v25 }
 0x336   : > { %3109 = vperm.xlu1 %5323, %v3075_v36   ;;  %v2245_v26 = vpop.permute.xlu0 %2244  ;;  %5186 = vmatmul.msk.f32.vlgmr.msra.gmra.mxu2 %vm2310_vm10, %v2293_v18 }
 0x337   : > { %3104 = vperm.xlu2 %5324, %v3074_v4   ;;  %v2253_v51 = vsel %vm2252_vm11, %v7283_v60, %v2245_v26 }
 0x338   : > { %v2247_v23 = vpop.permute.xlu2 %2246 }
 0x339   : > { %v2254_v47 = vsel %vm2252_vm11, %v7302_v15, %v2247_v23 }
 0x33a   : > { %5196 = vmatpush.msk.msra.mxu3 %vm493_vm13, %v2254_v47  ;;  %v2227_v48 = vpop.permute.xlu1 %2226 }
 0x33b   : > { %v2264_v1 = vsel %vm2252_vm11, %v2227_v48, %v2235_v27  ;;  %v2268_v52 = vsel %vm2252_vm11, %v7314_v6, %v2227_v48 }
 0x33c   : > { %5197 = vmatpush.msk.msra.mxu3 %vm493_vm13, %v2253_v51  ;;  %5158 = vmatpush.msk.msra.mxu0 %vm490_vm15, %v2268_v52 }
 0x33d   : > { %5198 = vmatmul.msk.f32.vlgmr.msra.gmra.mxu3 %vm2310_vm10, %v2293_v18  ;;  %5170 = vmatpush.msk.msra.mxu1 %vm491_vm0, %v2264_v1  ;;  %v5210_v1 = vld [vmem:[%s9854_s8 + $0xa0] sm:$0xff] }
 0x33e   : > { %5187 = vmatmul.msk.f32.gmra.mxu2 %vm2310_vm10, %v2294_v44 }
 0x33f   : > { %3034 = vperm.xlu2 %5324, %v2996_v9  }
 0x341   : > { %v2225_v32 = vpop.permute.xlu2 %2224 }
 0x342   : > { %v2263_v3 = vsel %vm2252_vm11, %v2225_v32, %v2233_v7  ;;  %v2267_v56 = vsel %vm2252_vm11, %v7278_v17, %v2225_v32 }
 0x343   : > { %5159 = vmatpush.msk.msra.mxu0 %vm490_vm15, %v2267_v56  ;;  %5171 = vmatpush.msk.msra.mxu1 %vm491_vm0, %v2263_v3  ;;  %v5211_v3 = vld [vmem:[%s9854_s8 + $0xa8] sm:$0xff] }
 0x345   : > { %5199 = vmatmul.msk.f32.gmra.mxu3 %vm2310_vm10, %v2294_v44 }
 0x346   : > { %5188 = vmatmul.msk.f32.gmra.mxu2 %vm2310_vm10, %v2295_v42 }
 0x349   : > { %v7445_v13 = vpop.permute.xlu2 %2707 }
 0x34a   : > { %v2223_v41 = vpop.permute.xlu0 %2222 }
 0x34b   : > { %v2262_v33 = vsel %vm2252_vm11, %v2223_v41, %v2231_v35  ;;  %v2266_v49 = vsel %vm2252_vm11, %v2247_v23, %v2223_v41  ;;  %v5212_v41 = vld [vmem:[%s9854_s8 + $0xb0] sm:$0xff] }
 0x34c   : > { %5160 = vmatpush.msk.msra.mxu0 %vm490_vm15, %v2266_v49  ;;  %5172 = vmatpush.msk.msra.mxu1 %vm491_vm0, %v2262_v33  ;;  %v7637_v39 = vpop.f32.mrf.mxu1 }
 0x34d   : > { %5200 = vmatmul.msk.f32.gmra.mxu3 %vm2310_vm10, %v2295_v42 }
 0x34e   : > { %5189 = vmatmul.msk.f32.gmra.mxu2 %vm2310_vm10, %v2296_v34 }
 0x351   : > { %v7460_v37 = vpop.permute.xlu2 %2705 }
 0x352   : > { %v2716_v62 = vpop.permute.xlu0 %2715  ;;  %v7583_v27 = vpop.f32.mrf.mxu2 }
 0x353   : > { %v2722_v63 = vsel %vm510_vm3, %v7445_v13, %v2716_v62 }
 0x355   : > { %5201 = vmatmul.msk.f32.gmra.mxu3 %vm2310_vm10, %v2296_v34 }
 0x356   : > { %5190 = vmatmul.msk.f32.gmra.mxu2 %vm2310_vm10, %v7466_v30 }
 0x358   : > { %v2221_v53 = vpop.permute.xlu1 %2220 }
 0x359   : > { %v2261_v54 = vsel %vm2252_vm11, %v2221_v53, %v7326_v5  ;;  %v2265_v38 = vsel %vm2252_vm11, %v2245_v26, %v2221_v53  ;;  %v7475_v24 = vpop.permute.xlu2 %2703 }
 0x35a   : > { %5161 = vmatpush.msk.msra.mxu0 %vm490_vm15, %v2265_v38  ;;  %5173 = vmatpush.msk.msra.mxu1 %vm491_vm0, %v2261_v54  ;;  %v2714_v17 = vpop.permute.xlu0 %2713 }
 0x35b   : > { %5162 = vmatmul.msk.f32.vlgmr.msra.gmra.mxu0 %vm2310_vm10, %v2293_v18  ;;  %5174 = vmatmul.msk.f32.vlgmr.msra.gmra.mxu1 %vm2310_vm10, %v2293_v18  ;;  %v2721_v6 = vsel %vm510_vm3, %v7460_v37, %v2714_v17  ;;  %v5208_v18 = vld [vmem:[%s9854_s8 + $0x90] sm:$0xff] }
 0x35d   : > { %5202 = vmatmul.msk.f32.gmra.mxu3 %vm2310_vm10, %v7466_v30 }
 0x35e   : > { %5191 = vmatmul.msk.f32.gmra.mxu2 %vm2310_vm10, %v7488_v57 }
 0x35f   : > { %v7652_v32 = vpop.f32.mrf.mxu1 }
 0x360   : > { %v2694_v60 = vpop.permute.xlu1 %2693 }
 0x361   : > { %v2710_v40 = vpop.permute.xlu2 %2709 }
 0x362   : > { %v2718_v0 = vpop.permute.xlu0 %2717 }
 0x363   : > { %5163 = vmatmul.msk.f32.gmra.mxu0 %vm2310_vm10, %v2294_v44  ;;  %5175 = vmatmul.msk.f32.gmra.mxu1 %vm2310_vm10, %v2294_v44  ;;  %v2723_v16 = vsel %vm510_vm3, %v2710_v40, %v2718_v0  ;;  %v2735_v15 = vsel %vm510_vm3, %v2718_v0, %v2694_v60 }
 0x364   : > { %5238 = vmatpush.msk.msrb.mxu2 %vm512_vm1, %v2723_v16  ;;  %5250 = vmatpush.msk.msrb.mxu3 %vm513_vm2, %v2735_v15  ;;  %v7550_v35 = vpop.f32.mrf.mxu3  ;;  %v7617_v23 = vpop.f32.mrf.mxu2 }
 0x365   : > { %5203 = vmatmul.msk.f32.gmra.mxu3 %vm2310_vm10, %v7488_v57  ;;  %v7633_v48 = vpop.f32.mrf.mxu0 }
 0x366   : > { %5239 = vmatpush.msk.msrb.mxu2 %vm512_vm1, %v2722_v63 }
 0x367   : > { %5192 = vmatmul.msk.f32.gmra.mxu2 %vm2310_vm10, %v7515_v55 }
 0x368   : > { %v2692_v21 = vpop.permute.xlu1 %2691  ;;  %5240 = vmatpush.msk.msrb.mxu2 %vm512_vm1, %v2721_v6 }
 0x369   : > { %v2734_v8 = vsel %vm510_vm3, %v2716_v62, %v2692_v21  ;;  %v2702_v43 = vpop.permute.xlu2 %2701 }
 0x36a   : > { %5251 = vmatpush.msk.msrb.mxu3 %vm513_vm2, %v2734_v8  ;;  %v2727_v5 = vsel %vm510_vm3, %v2702_v43, %v2710_v40  ;;  %v2731_v50 = vsel %vm510_vm3, %v2694_v60, %v2702_v43  ;;  %v2712_v12 = vpop.permute.xlu0 %2711 }
 0x36b   : > { %5164 = vmatmul.msk.f32.gmra.mxu0 %vm2310_vm10, %v2295_v42  ;;  %5176 = vmatmul.msk.f32.gmra.mxu1 %vm2310_vm10, %v2295_v42  ;;  %v2720_v19 = vsel %vm510_vm3, %v7475_v24, %v2712_v12 }
 0x36c   : > { %5214 = vmatpush.msk.msrb.mxu0 %vm510_vm3, %v2731_v50  ;;  %5226 = vmatpush.msk.msrb.mxu1 %vm511_vm4, %v2727_v5  ;;  %v7576_v46 = vpop.f32.mrf.mxu3 }
 0x36d   : > { %5241 = vmatpush.msk.msrb.mxu2 %vm512_vm1, %v2720_v19  ;;  %5204 = vmatmul.msk.f32.gmra.mxu3 %vm2310_vm10, %v7515_v55  ;;  %v7650_v44 = vpop.f32.mrf.mxu0 }
 0x36e   : > { %v7671_v33 = vpop.f32.mrf.mxu1 }
 0x36f   : > { %5193 = vmatmul.msk.f32.gmra.mxu2 %vm2310_vm10, %v2300_v14 }
 0x370   : > { %v2690_v22 = vpop.permute.xlu1 %2689 }
 0x371   : > { %v2733_v31 = vsel %vm510_vm3, %v2714_v17, %v2690_v22  ;;  %v2696_v28 = vpop.permute.xlu2 %2695 }
 0x372   : > { %5252 = vmatpush.msk.msrb.mxu3 %vm513_vm2, %v2733_v31  ;;  %v2700_v58 = vpop.permute.xlu0 %2699  ;;  %v2724_v4 = vsel %vm510_vm3, %v2696_v28, %v7475_v24 }
 0x373   : > { %5165 = vmatmul.msk.f32.gmra.mxu0 %vm2310_vm10, %v2296_v34  ;;  %5177 = vmatmul.msk.f32.gmra.mxu1 %vm2310_vm10, %v2296_v34  ;;  %v2726_v11 = vsel %vm510_vm3, %v2700_v58, %v7445_v13  ;;  %v2730_v2 = vsel %vm510_vm3, %v2692_v21, %v2700_v58  ;;  %v7631_v51 = vpop.f32.mrf.mxu2  ;;  %v5213_v34 = vld [vmem:[%s9854_s8 + $0xb8] sm:$0xff] }
 0x374   : > { %5215 = vmatpush.msk.msrb.mxu0 %vm510_vm3, %v2730_v2  ;;  %5227 = vmatpush.msk.msrb.mxu1 %vm511_vm4, %v2726_v11  ;;  %v7611_v26 = vpop.f32.mrf.mxu3 }
 0x375   : > { %5205 = vmatmul.msk.f32.gmra.mxu3 %vm2310_vm10, %v2300_v14  ;;  %v7666_v13 = vpop.f32.mrf.mxu0 }
 0x377   : > { %5242 = vmatmul.msk.f32.vlgmr.msrb.gmra.mxu2 %vm2310_vm10, %v5206_v61 }
 0x378   : > { %v2688_v7 = vpop.permute.xlu1 %2687 }
 0x379   : > { %v2732_v29 = vsel %vm510_vm3, %v2712_v12, %v2688_v7  ;;  %v2728_v25 = vsel %vm510_vm3, %v2688_v7, %v2696_v28 }
 0x37a   : > { %5253 = vmatpush.msk.msrb.mxu3 %vm513_vm2, %v2732_v29 }
 0x37b   : > { %5166 = vmatmul.msk.f32.gmra.mxu0 %vm2310_vm10, %v7466_v30  ;;  %5178 = vmatmul.msk.f32.gmra.mxu1 %vm2310_vm10, %v7466_v30  ;;  %v7648_v9 = vpop.f32.mrf.mxu2  ;;  %v7687_v30 = vpop.f32.mrf.mxu1 }
 0x37c   : > { %v7628_v47 = vpop.f32.mrf.mxu3 }
 0x37d   : > { %5254 = vmatmul.msk.f32.vlgmr.msrb.gmra.mxu3 %vm2310_vm10, %v5206_v61  ;;  %v7685_v62 = vpop.f32.mrf.mxu0 }
 0x37f   : > { %5243 = vmatmul.msk.f32.gmra.mxu2 %vm2310_vm10, %v5207_v10 }
 0x380   : > { %v2698_v45 = vpop.permute.xlu1 %2697 }
 0x381   : > { %v2725_v36 = vsel %vm510_vm3, %v2698_v45, %v7460_v37  ;;  %v2729_v59 = vsel %vm510_vm3, %v2690_v22, %v2698_v45 }
 0x382   : > { %5216 = vmatpush.msk.msrb.mxu0 %vm510_vm3, %v2729_v59  ;;  %5228 = vmatpush.msk.msrb.mxu1 %vm511_vm4, %v2725_v36 }
 0x383   : > { %5167 = vmatmul.msk.f32.gmra.mxu0 %vm2310_vm10, %v7488_v57  ;;  %5179 = vmatmul.msk.f32.gmra.mxu1 %vm2310_vm10, %v7488_v57  ;;  %v7664_v42 = vpop.f32.mrf.mxu2  ;;  %v7698_v24 = vpop.f32.mrf.mxu1 }
 0x384   : > { %5217 = vmatpush.msk.msrb.mxu0 %vm510_vm3, %v2728_v25  ;;  %5229 = vmatpush.msk.msrb.mxu1 %vm511_vm4, %v2724_v4  ;;  %v7644_v52 = vpop.f32.mrf.mxu3  ;;  %10204 = vst [vmem:[#allocation20_spill] sm:$0xff] %v7698_v24  ;;  %v7763_v25 = vpop.permute.xlu0 %2999 }
 0x385   : > { %5255 = vmatmul.msk.f32.gmra.mxu3 %vm2310_vm10, %v5207_v10  ;;  %v7696_v38 = vpop.f32.mrf.mxu0 }
 0x386   : > { %10203 = vst [vmem:[#allocation30_spill] sm:$0xff] %v7696_v38 }
 0x387   : > { %5244 = vmatmul.msk.f32.gmra.mxu2 %vm2310_vm10, %v5208_v18 }
 0x38b   : > { %5168 = vmatmul.msk.f32.gmra.mxu0 %vm2310_vm10, %v7515_v55  ;;  %5180 = vmatmul.msk.f32.gmra.mxu1 %vm2310_vm10, %v7515_v55  ;;  %v7682_v37 = vpop.f32.mrf.mxu2  ;;  %v7708_v40 = vpop.f32.mrf.mxu1 }
 0x38c   : > { %v7659_v56 = vpop.f32.mrf.mxu3  ;;  %10206 = vst [vmem:[#allocation51_spill] sm:$0xff] %v7708_v40 }
 0x38d   : > { %5256 = vmatmul.msk.f32.gmra.mxu3 %vm2310_vm10, %v5208_v18  ;;  %v7706_v60 = vpop.f32.mrf.mxu0 }
 0x38e   : > { %10205 = vst [vmem:[#allocation24_spill] sm:$0xff] %v7706_v60 }
 0x38f   : > { %5245 = vmatmul.msk.f32.gmra.mxu2 %vm2310_vm10, %v5209_v20 }
 0x393   : > { %5169 = vmatmul.msk.f32.gmra.mxu0 %vm2310_vm10, %v2300_v14  ;;  %5181 = vmatmul.msk.f32.gmra.mxu1 %vm2310_vm10, %v2300_v14  ;;  %v7694_v54 = vpop.f32.mrf.mxu2  ;;  %v7716_v63 = vpop.f32.mrf.mxu1 }
 0x394   : > { %v7676_v49 = vpop.f32.mrf.mxu3  ;;  %10208 = vst [vmem:[#allocation27_spill] sm:$0xff] %v7716_v63 }
 0x395   : > { %5257 = vmatmul.msk.f32.gmra.mxu3 %vm2310_vm10, %v5209_v20  ;;  %v7714_v15 = vpop.f32.mrf.mxu0 }
 0x396   : > { %10207 = vst [vmem:[#allocation36_spill] sm:$0xff] %v7714_v15 }
 0x397   : > { %5246 = vmatmul.msk.f32.gmra.mxu2 %vm2310_vm10, %v5210_v1 }
 0x39b   : > { %5218 = vmatmul.msk.f32.vlgmr.msrb.gmra.mxu0 %vm2310_vm10, %v5206_v61  ;;  %5230 = vmatmul.msk.f32.vlgmr.msrb.gmra.mxu1 %vm2310_vm10, %v5206_v61  ;;  %v7726_v8 = vpop.f32.mrf.mxu1 }
 0x39c   : > { %v7692_v53 = vpop.f32.mrf.mxu3  ;;  %v7704_v57 = vpop.f32.mrf.mxu2  ;;  %10210 = vst [vmem:[#allocation45_spill] sm:$0xff] %v7726_v8 }
 0x39d   : > { %5258 = vmatmul.msk.f32.gmra.mxu3 %vm2310_vm10, %v5210_v1  ;;  %10202 = vst [vmem:[#allocation29_spill] sm:$0xff] %v7692_v53  ;;  %v7724_v21 = vpop.f32.mrf.mxu0 }
 0x39e   : > { %10209 = vst [vmem:[#allocation48_spill] sm:$0xff] %v7724_v21 }
 0x39f   : > { %5247 = vmatmul.msk.f32.gmra.mxu2 %vm2310_vm10, %v5211_v3 }
 0x3a3   : > { %5219 = vmatmul.msk.f32.gmra.mxu0 %vm2310_vm10, %v5207_v10  ;;  %5231 = vmatmul.msk.f32.gmra.mxu1 %vm2310_vm10, %v5207_v10 }
 0x3a5   : > { %5259 = vmatmul.msk.f32.gmra.mxu3 %vm2310_vm10, %v5211_v3 }
 0x3a7   : > { %5248 = vmatmul.msk.f32.gmra.mxu2 %vm2310_vm10, %v5212_v41 }
 0x3ab   : > { %5220 = vmatmul.msk.f32.gmra.mxu0 %vm2310_vm10, %v5208_v18  ;;  %5232 = vmatmul.msk.f32.gmra.mxu1 %vm2310_vm10, %v5208_v18 }
 0x3ad   : > { %5260 = vmatmul.msk.f32.gmra.mxu3 %vm2310_vm10, %v5212_v41 }
 0x3af   : > { %5249 = vmatmul.msk.f32.gmra.mxu2 %vm2310_vm10, %v5213_v34 }
 0x3b3   : > { %5221 = vmatmul.msk.f32.gmra.mxu0 %vm2310_vm10, %v5209_v20  ;;  %5233 = vmatmul.msk.f32.gmra.mxu1 %vm2310_vm10, %v5209_v20  ;;  %v7766_v20 = vpop.permute.xlu1 %3079 }
 0x3b5   : > { %5261 = vmatmul.msk.f32.gmra.mxu3 %vm2310_vm10, %v5213_v34 }
 0x3b9   : > { %v2622_v16 = vpop.f32.mrf.mxu2 }
 0x3ba   : > { %v2623_v60 = vadd.f32 %v2622_v16, %v7583_v27 }
 0x3bb   : > { %5222 = vmatmul.msk.f32.gmra.mxu0 %vm2310_vm10, %v5210_v1  ;;  %5234 = vmatmul.msk.f32.gmra.mxu1 %vm2310_vm10, %v5210_v1 }
 0x3c0   : > { %v2663_v17 = vpop.f32.mrf.mxu3 }
 0x3c1   : > { %v7722_v6 = vpop.f32.mrf.mxu2  ;;  %v2664_v28 = vadd.f32 %v2663_v17, %v7550_v35 }
 0x3c3   : > { %5223 = vmatmul.msk.f32.gmra.mxu0 %vm2310_vm10, %v5211_v3  ;;  %5235 = vmatmul.msk.f32.gmra.mxu1 %vm2310_vm10, %v5211_v3 }
 0x3c8   : > { %v7710_v0 = vpop.f32.mrf.mxu3 }
 0x3c9   : > { %v7730_v5 = vpop.f32.mrf.mxu2 }
 0x3cb   : > { %5224 = vmatmul.msk.f32.gmra.mxu0 %vm2310_vm10, %v5212_v41  ;;  %5236 = vmatmul.msk.f32.gmra.mxu1 %vm2310_vm10, %v5212_v41 }
 0x3d0   : > { %v7718_v55 = vpop.f32.mrf.mxu3 }
 0x3d1   : > { %v7740_v22 = vpop.f32.mrf.mxu2 }
 0x3d3   : > { %5225 = vmatmul.msk.f32.gmra.mxu0 %vm2310_vm10, %v5213_v34  ;;  %5237 = vmatmul.msk.f32.gmra.mxu1 %vm2310_vm10, %v5213_v34 }
 0x3d8   : > { %v7728_v43 = vpop.f32.mrf.mxu3  ;;  %v7734_v12 = vpop.f32.mrf.mxu0 }
 0x3d9   : > { %v7736_v19 = vpop.f32.mrf.mxu1  ;;  %v7748_v2 = vpop.f32.mrf.mxu2 }
 0x3e0   : > { %v7732_v50 = vpop.f32.mrf.mxu3  ;;  %v7742_v31 = vpop.f32.mrf.mxu0 }
 0x3e1   : > { %v7744_v58 = vpop.f32.mrf.mxu1  ;;  %v7756_v10 = vpop.f32.mrf.mxu2 }
 0x3e8   : > { %v7738_v14 = vpop.f32.mrf.mxu3  ;;  %v7750_v61 = vpop.f32.mrf.mxu0 }
 0x3e9   : > { %v7752_v7 = vpop.f32.mrf.mxu1 }
 0x3ea   : > { %v7774_v41 = vpop.f32.mrf.mxu2 }
 0x3f0   : > { %v7746_v11 = vpop.f32.mrf.mxu3  ;;  %v7759_v45 = vpop.f32.mrf.mxu0 }
 0x3f1   : > { %v7761_v36 = vpop.f32.mrf.mxu1 }
 0x3f8   : > { %v7754_v29 = vpop.f32.mrf.mxu3  ;;  %v7777_v34 = vpop.f32.mrf.mxu0 }
 0x3f9   : > { %10211 = vst [vmem:[#allocation35_spill] sm:$0xff] %v7754_v29  ;;  %v7779_v17 = vpop.f32.mrf.mxu1 }
 0x3fa   : > { %10214 = vst [vmem:[#allocation46_spill] sm:$0xff] %v7777_v34 }
 0x3fb   : > { %10215 = vst [vmem:[#allocation37_spill] sm:$0xff] %v7779_v17 }
 0x400   : > { %v2933_v59 = vpop.f32.mrf.mxu3  ;;  %v7783_v8 = vpop.f32.mrf.mxu0 }
 0x401   : > { %v2960_v4 = vadd.f32 %v2933_v59, %v2664_v28  ;;  %10216 = vst [vmem:[#allocation34_spill] sm:$0xff] %v7783_v8 }
 0x403   : > { %v3040_v18 = vmul.f32 %v7763_v25, %v2960_v4  ;;  %v7781_v4 = vpop.f32.mrf.mxu2 }
 0x405   : > { %v7769_v1 = vadd.f32 %v7766_v20, %v3040_v18  ;;  %v7785_v18 = vpop.f32.mrf.mxu1 }
 0x406   : > { %10217 = vst [vmem:[#allocation25_spill] sm:$0xff] %v7785_v18 }
 0x407   : > { %10212 = vst [vmem:[#allocation42_spill] sm:$0xff] %v7769_v1  ;;  %v7772_v3 = vmul.f32 0.70710677, %v7769_v1 }
 0x408   : > { %v7788_v24 = vpop.f32.mrf.mxu0 }
 0x409   : > { %10213 = vst [vmem:[#allocation47_spill] sm:$0xff] %v7772_v3  ;;  %v3216_v35 = vand.u32 2147483647, %v7772_v3 }
 0x40b   : > { %v3248_v28 = vmul.f32 0.3275911, %v3216_v35  ;;  %v2892_v53 = vpop.f32.mrf.mxu2  ;;  %v4080_v16 = vsub.f32 0.0, %v3216_v35 }
 0x40c   : > { %v2959_v17 = vadd.f32 %v2892_v53, %v2623_v60 }
 0x40d   : > { %v3280_v59 = vadd.f32 1.0, %v3248_v28  ;;  %v7790_v8 = vpop.f32.mrf.mxu1 }
 0x40f   : > { %5422 = vrcp.f32 %v3280_v59  ;;  %v3365_v40 = vand.u32 2147483648, %v3280_v59  ;;  %v3363_v3 = vand.u32 2147483647, %v3280_v59  ;;  %vm3359_vm6 = vweird.f32 %v3280_v59 }
 0x411   : > { %v3366_v28 = vor.u32 1.1754944e-38, %v3365_v40  ;;  %vm3364_vm8 = vcmp.eq.f32.partialorder %v3363_v3, 8.507059e+37  ;;  %v7803_v3 = vpop.f32.mrf.mxu0 }
 0x415   : > { %v5423_v21 = vpop.eup %5422 }
 0x416   : > { %v3355_v63 = vmul.f32 %v5423_v21, %v3280_v59  ;;  %vm3360_vm5 = vweird.f32 %v5423_v21  ;;  %v4112_v59 = vmul.f32 %v4080_v16, %v3216_v35  ;;  %v2626_v35 = vadd.f32 %v7722_v6, %v7617_v23 }
 0x417   : > { %vm3361_vm7 = vmor %vm3359_vm6, %vm3360_vm5  ;;  %v7816_v16 = vadd.f32 %v7718_v55, %v7611_v26  ;;  %v7832_v26 = vadd.f32 %v7740_v22, %v7648_v9  ;;  %v7836_v23 = vadd.f32 %v7742_v31, %v7650_v44  ;;  %v7850_v9 = vpop.permute.xlu2 %3004  ;;  %v7854_v44 = vadd.f32 %v7750_v61, %v7666_v13  ;;  %v7878_v31 = vpop.permute.xlu0 %3084 }
 0x418   : > { %v3356_v15 = vsub.f32 1.0, %v3355_v63  ;;  %v3039_v63 = vmul.f32 %v7763_v25, %v2959_v17  ;;  %v7805_v17 = vpop.f32.mrf.mxu1 }
 0x41a   : > { %v3357_v1 = vmul.f32 %v5423_v21, %v3356_v15  ;;  %v7794_v38 = vadd.f32 %v7766_v20, %v3039_v63  ;;  %v4147_v63 = vmul.f32 1.442695, %v4112_v59  ;;  %v2541_v59 = vadd.f32 %v7734_v12, %v7633_v48 }
 0x41b   : > { %v7844_v48 = vadd.f32 %v7732_v50, %v7644_v52  ;;  %v7862_v52 = vadd.f32 %v7752_v7, %v7671_v33 }
 0x41c   : > { %v3358_v29 = vadd.f32 %v5423_v21, %v3357_v1  ;;  %v7797_v1 = vmul.f32 0.70710677, %v7794_v38 }
 0x41e   : > { %v3362_v18 = vsel %vm3361_vm7, %v5423_v21, %v3358_v29  ;;  %v7800_v53 = vand.u32 2147483647, %v7797_v1  ;;  %vm4271_vm6 = vcmp.lt.f32.partialorder %v7797_v1, 0.0 }
 0x41f   : > { %v3367_v34 = vsel %vm3364_vm8, %v3366_v28, %v3362_v18 }
 0x420   : > { %v3792_v15 = vmul.f32 1.0614054, %v3367_v34  ;;  %v3247_v21 = vmul.f32 0.3275911, %v7800_v53  ;;  %v2851_v50 = vpop.f32.mrf.mxu1 }
 0x422   : > { %v3824_v27 = vadd.f32 -1.4531521, %v3792_v15  ;;  %v7807_v18 = vadd.f32 1.0, %v3247_v21  ;;  %v2582_v21 = vadd.f32 %v7736_v19, %v7637_v39  ;;  %v2936_v39 = vpop.f32.mrf.mxu3 }
 0x424   : > { %v3856_v40 = vmul.f32 %v3824_v27, %v3367_v34  ;;  %5424 = vrcp.f32 %v7807_v18  ;;  %v2667_v27 = vadd.f32 %v7710_v0, %v7576_v46  ;;  %v7828_v46 = vadd.f32 %v7728_v43, %v7628_v47 }
 0x425   : > { %5426 = vpow2.f32 %v4147_v63  ;;  %v7848_v47 = vadd.f32 %v7748_v2, %v7664_v42  ;;  %v7866_v42 = vadd.f32 %v7738_v14, %v7659_v56  ;;  %v7870_v43 = vadd.f32 %v7774_v41, %v7694_v54 }
 0x426   : > { %v3888_v60 = vadd.f32 1.4214138, %v3856_v40  ;;  %v7820_v40 = vadd.f32 %v7730_v5, %v7631_v51  ;;  %v7840_v51 = vadd.f32 %v7744_v58, %v7652_v32  ;;  %v7858_v32 = vadd.f32 %v7756_v10, %v7682_v37  ;;  %v2810_v5 = vpop.f32.mrf.mxu0 }
 0x427   : > { %v2964_v6 = vadd.f32 %v2936_v39, %v2667_v27  ;;  %v7875_v37 = vadd.f32 %v7759_v45, %v7685_v62  ;;  %v2957_v33 = vadd.f32 %v2810_v5, %v2541_v59  ;;  %v2958_v19 = vadd.f32 %v2851_v50, %v2582_v21  ;;  %v10223_v21 = vld [vmem:[#allocation20_spill] sm:$0xff]  ;;  %v10224_v39 = vld [vmem:[#allocation37_spill] sm:$0xff] }
 0x428   : > { %v3920_v29 = vmul.f32 %v3888_v60, %v3367_v34  ;;  %v7882_v56 = vadd.f32 %v7761_v36, %v7687_v30  ;;  %v7886_v54 = vadd.f32 %v7746_v11, %v7676_v49  ;;  %v3350_v58 = vand.u32 2147483648, %v7807_v18  ;;  %v2895_v11 = vpop.f32.mrf.mxu2 }
 0x429   : > { %v3044_v12 = vmul.f32 %v7850_v9, %v2964_v6  ;;  %v3037_v61 = vmul.f32 %v7763_v25, %v2957_v33  ;;  %v3038_v7 = vmul.f32 %v7763_v25, %v2958_v19  ;;  %v7896_v10 = vadd.f32 %v7781_v4, %v7704_v57  ;;  %v10221_v25 = vld [vmem:[#allocation30_spill] sm:$0xff]  ;;  %v10226_v6 = vld [vmem:[#allocation35_spill] sm:$0xff] }
 0x42a   : > { %v3952_v28 = vadd.f32 -0.28449672, %v3920_v29  ;;  %v5425_v0 = vpop.eup %5424  ;;  %v3348_v49 = vand.u32 2147483647, %v7807_v18  ;;  %v10222_v29 = vld [vmem:[#allocation46_spill] sm:$0xff]  ;;  %vm3344_vm12 = vweird.f32 %v7807_v18  ;;  %v4079_v4 = vsub.f32 0.0, %v7800_v53 }
 0x42b   : > { %v3340_v13 = vmul.f32 %v5425_v0, %v7807_v18  ;;  %v5427_v22 = vpop.eup %5426  ;;  %v7890_v2 = vadd.f32 %v7878_v31, %v3044_v12  ;;  %10219 = vst [vmem:[#allocation40_spill] sm:$0xff] %v7896_v10  ;;  %vm3345_vm9 = vweird.f32 %v5425_v0  ;;  %v7903_v36 = vadd.f32 %v7766_v20, %v3037_v61  ;;  %v10227_v12 = vld [vmem:[#allocation24_spill] sm:$0xff]  ;;  %v10228_v33 = vld [vmem:[#allocation34_spill] sm:$0xff] }
 0x42c   : > { %v3984_v15 = vmul.f32 %v3952_v28, %v3367_v34  ;;  %v7906_v41 = vadd.f32 %v7766_v20, %v3038_v7  ;;  %v7910_v28 = vadd.f32 %v10222_v29, %v10221_v25  ;;  %vm3346_vm10 = vmor %vm3344_vm12, %vm3345_vm9  ;;  %vm3349_vm11 = vcmp.eq.f32.partialorder %v3348_v49, 8.507059e+37  ;;  %v10229_v19 = vld [vmem:[#allocation42_spill] sm:$0xff] }
 0x42d   : > { %v3341_v14 = vsub.f32 1.0, %v3340_v13  ;;  %10218 = vst [vmem:[#allocation49_spill] sm:$0xff] %v7890_v2  ;;  %v7900_v45 = vmul.f32 0.70710677, %v7890_v2  ;;  %v7924_v18 = vadd.f32 %v10224_v39, %v10223_v21  ;;  %v4111_v7 = vmul.f32 %v4079_v4, %v7800_v53  ;;  %v10234_v4 = vld [vmem:[#allocation27_spill] sm:$0xff] }
 0x42e   : > { %v4016_v60 = vadd.f32 0.2548296, %v3984_v15  ;;  %v3351_v15 = vor.u32 1.1754944e-38, %v3350_v58 }
 0x42f   : > { %v3342_v30 = vmul.f32 %v5425_v0, %v3341_v14  ;;  %10220 = vst [vmem:[#allocation33_spill] sm:$0xff] %v7900_v45  ;;  %v3220_v27 = vand.u32 2147483647, %v7900_v45 }
 0x430   : > { %v4048_v55 = vmul.f32 %v4016_v60, %v3367_v34  ;;  %v2963_v34 = vadd.f32 %v2895_v11, %v2626_v35  ;;  %v7916_v60 = vmul.f32 0.70710677, %v7903_v36  ;;  %v7919_v35 = vmul.f32 0.70710677, %v7906_v41  ;;  %v10231_v11 = vld [vmem:[#allocation51_spill] sm:$0xff] }
 0x431   : > { %v3343_v57 = vadd.f32 %v5425_v0, %v3342_v30  ;;  %v4084_v50 = vsub.f32 0.0, %v3220_v27 }
 0x432   : > { %v4208_v62 = vmul.f32 %v5427_v22, %v4048_v55  ;;  %v3043_v59 = vmul.f32 %v7850_v9, %v2963_v34  ;;  %v10225_v55 = vld [vmem:[#allocation29_spill] sm:$0xff]  ;;  %v7937_v22 = vmul.f32 0.5, %v10229_v19  ;;  %v3213_v58 = vand.u32 2147483647, %v7916_v60 }
 0x433   : > { %v3347_v20 = vsel %vm3346_vm10, %v5425_v0, %v3343_v57  ;;  %v7928_v13 = vadd.f32 %v10226_v6, %v10225_v55  ;;  %v7934_v0 = vadd.f32 %v10228_v33, %v10227_v12  ;;  %v3214_v30 = vand.u32 2147483647, %v7919_v35  ;;  %v10232_v34 = vld [vmem:[#allocation25_spill] sm:$0xff] }
 0x434   : > { %v4240_v63 = vsub.f32 1.0, %v4208_v62  ;;  %v7930_v5 = vsel %vm3349_vm11, %v3351_v15, %v3347_v20  ;;  %v2939_v62 = vpop.f32.mrf.mxu3  ;;  %v7944_v49 = vadd.f32 %v7878_v31, %v3043_v59  ;;  %v7948_v25 = vadd.f32 %v10232_v34, %v10231_v11  ;;  %v10233_v20 = vld [vmem:[#allocation36_spill] sm:$0xff]  ;;  %v10236_v59 = vld [vmem:[#allocation47_spill] sm:$0xff] }
 0x435   : > { %v3791_v14 = vmul.f32 1.0614054, %v7930_v5  ;;  %v3252_v57 = vmul.f32 0.3275911, %v3220_v27  ;;  %v3245_v15 = vmul.f32 0.3275911, %v3213_v58  ;;  %v7952_v21 = vadd.f32 %v7788_v24, %v10233_v20 }
 0x436   : > { %v4304_v61 = vsub.f32 0.0, %v4240_v63  ;;  %10230 = vst [vmem:[#allocation43_spill] sm:$0xff] %v7944_v49  ;;  %v4116_v39 = vmul.f32 %v4084_v50, %v3220_v27  ;;  %v3246_v55 = vmul.f32 0.3275911, %v3214_v30  ;;  %v2968_v53 = vadd.f32 %v2939_v62, %v7816_v16  ;;  %v7968_v27 = vpop.permute.xlu1 %3009  ;;  %v10240_v20 = vld [vmem:[#allocation45_spill] sm:$0xff] }
 0x437   : > { %v3823_v29 = vadd.f32 -1.4531521, %v3791_v14  ;;  %v7957_v6 = vadd.f32 %v7790_v8, %v10234_v4  ;;  %vm4272_vm13 = vcmp.lt.f32.partialorder %v10236_v59, 0.0  ;;  %v7961_v33 = vadd.f32 1.0, %v3245_v15  ;;  %v2854_v59 = vpop.f32.mrf.mxu1 }
 0x438   : > { %v4145_v19 = vmul.f32 1.442695, %v4111_v7  ;;  %v4077_v14 = vsub.f32 0.0, %v3213_v58  ;;  %v7963_v11 = vadd.f32 1.0, %v3246_v55  ;;  %v7966_v24 = vmul.f32 0.70710677, %v7944_v49 }
 0x439   : > { %10235 = vst [vmem:[#allocation39_spill] sm:$0xff] %v7957_v6  ;;  %v3855_v12 = vmul.f32 %v3823_v29, %v7930_v5  ;;  %v4336_v16 = vsel %vm4272_vm13, %v4304_v61, %v4240_v63  ;;  %v7970_v62 = vadd.f32 1.0, %v3252_v57  ;;  %5428 = vrcp.f32 %v7961_v33  ;;  %v10238_v29 = vld [vmem:[#allocation48_spill] sm:$0xff] }
 0x43a   : > { %10237 = vst [vmem:[#allocation41_spill] sm:$0xff] %v7966_v24  ;;  %v4155_v8 = vmul.f32 1.442695, %v4116_v39  ;;  %5430 = vrcp.f32 %v7963_v11  ;;  %v4078_v34 = vsub.f32 0.0, %v3214_v30  ;;  %v3048_v7 = vmul.f32 %v7968_v27, %v2968_v53  ;;  %v2813_v53 = vpop.f32.mrf.mxu0 }
 0x43b   : > { %v3887_v50 = vadd.f32 1.4214138, %v3855_v12  ;;  %v7977_v15 = vadd.f32 %v7803_v3, %v10238_v29  ;;  %v7981_v55 = vadd.f32 %v7805_v17, %v10240_v20  ;;  %v7984_v63 = vmul.f32 0.5, %v7794_v38  ;;  %v4492_v3 = vld [vmem:[%s9847_s1 + $0x1f8] sm:$0xff]  ;;  %v7995_v17 = vpop.permute.xlu2 %3089 }
 0x43c   : > { %v7987_v57 = vadd.f32 1.0, %v4336_v16  ;;  %5432 = vpow2.f32 %v4145_v19  ;;  %v4109_v39 = vmul.f32 %v4077_v14, %v3213_v58  ;;  %v7990_v4 = vand.u32 2147483647, %v7966_v24  ;;  %4616 = vmatpush.msra.mxu3 %v4492_v3 }
 0x43d   : > { %10239 = vst [vmem:[#allocation31_spill] sm:$0xff] %v7977_v15  ;;  %v3919_v61 = vmul.f32 %v3887_v50, %v7930_v5  ;;  %5434 = vrcp.f32 %v7970_v62  ;;  %v7999_v38 = vmul.f32 0.5, %v7903_v36  ;;  %v8002_v19 = vmul.f32 0.5, %v7906_v41  ;;  %v4491_v41 = vld [vmem:[%s9847_s1 + $0x1f0] sm:$0xff] }
 0x43e   : > { %10241 = vst [vmem:[#allocation13_spill] sm:$0xff] %v7981_v55  ;;  %5436 = vpow2.f32 %v4155_v8  ;;  %vm3314_vm14 = vweird.f32 %v7961_v33  ;;  %v8005_v58 = vmul.f32 %v4078_v34, %v3214_v30  ;;  %v8008_v14 = vadd.f32 %v7995_v17, %v3048_v7  ;;  %4617 = vmatpush.msra.mxu3 %v4491_v41 }
 0x43f   : > { %v3951_v12 = vadd.f32 -0.28449672, %v3919_v61  ;;  %v5429_v16 = vpop.eup %5428  ;;  %v3251_v29 = vmul.f32 0.3275911, %v7990_v4  ;;  %v2961_v36 = vadd.f32 %v2813_v53, %v7836_v23  ;;  %v2962_v20 = vadd.f32 %v2854_v59, %v7840_v51  ;;  %v2898_v51 = vpop.f32.mrf.mxu2 }
 0x440   : > { %10242 = vst [vmem:[#allocation15_spill] sm:$0xff] %v8008_v14  ;;  %v5431_v8 = vpop.eup %5430  ;;  %v3310_v30 = vmul.f32 %v5429_v16, %v7961_v33  ;;  %v3318_v34 = vand.u32 2147483647, %v7961_v33  ;;  %v3320_v7 = vand.u32 2147483648, %v7961_v33  ;;  %v8020_v61 = vmul.f32 1.442695, %v4109_v39 }
 0x441   : > { %v3983_v50 = vmul.f32 %v3951_v12, %v7930_v5  ;;  %v3325_v12 = vmul.f32 %v5431_v8, %v7963_v11  ;;  %vm3329_vm15 = vweird.f32 %v7963_v11  ;;  %v8025_v23 = vmul.f32 0.70710677, %v8008_v14 }
 0x442   : > { %v5433_v53 = vpop.eup %5432  ;;  %v3311_v59 = vsub.f32 1.0, %v3310_v30  ;;  %v3333_v24 = vand.u32 2147483647, %v7963_v11  ;;  %v3335_v45 = vand.u32 2147483648, %v7963_v11  ;;  %v3041_v49 = vmul.f32 %v7850_v9, %v2961_v36 }
 0x443   : > { %v4015_v3 = vadd.f32 0.2548296, %v3983_v50  ;;  %10243 = vst [vmem:[#allocation28_spill] sm:$0xff] %v8025_v23  ;;  %v8030_v39 = vpop.eup %5434  ;;  %v3326_v41 = vsub.f32 1.0, %v3325_v12  ;;  %v8033_v2 = vadd.f32 1.0, %v3251_v29  ;;  %v3042_v55 = vmul.f32 %v7850_v9, %v2962_v20 }
 0x444   : > { %v8036_v14 = vpop.eup %5436  ;;  %v3312_v15 = vmul.f32 %v5429_v16, %v3311_v59  ;;  %vm3315_vm0 = vweird.f32 %v5429_v16  ;;  %v8039_v30 = vadd.f32 %v7878_v31, %v3041_v49  ;;  %v2967_v10 = vadd.f32 %v2898_v51, %v7820_v40  ;;  %v4490_v40 = vld [vmem:[%s9847_s1 + $0x1e8] sm:$0xff]  ;;  %v2942_v59 = vpop.f32.mrf.mxu3 }
 0x445   : > { %v4047_v50 = vmul.f32 %v4015_v3, %v7930_v5  ;;  %10244 = vst [vmem:[#allocation22_spill] sm:$0xff] %v8036_v14  ;;  %vm8042_vm1 = vcmp.eq.f32.partialorder %v3318_v34, 8.507059e+37  ;;  %v3327_v6 = vmul.f32 %v5431_v8, %v3326_v41  ;;  %vm3330_vm2 = vweird.f32 %v5431_v8  ;;  %vm3316_vm3 = vmor %vm3314_vm14, %vm3315_vm0  ;;  %4618 = vmatpush.msra.mxu3 %v4490_v40 }
 0x446   : > { %10245 = vst [vmem:[#allocation18_spill] sm:$0xff] %v8039_v30  ;;  %v3224_v5 = vand.u32 2147483647, %v8025_v23  ;;  %v3313_v29 = vadd.f32 %v5429_v16, %v3312_v15  ;;  %v8048_v9 = vmul.f32 0.70710677, %v8039_v30  ;;  %v8051_v20 = vadd.f32 %v7878_v31, %v3042_v55  ;;  %vm3331_vm4 = vmor %vm3329_vm15, %vm3330_vm2  ;;  %v4476_v55 = vld [vmem:[%s9847_s1 + $0x178] sm:$0xff] }
 0x447   : > { %v3047_v49 = vmul.f32 %v7968_v27, %v2967_v10  ;;  %v8057_v34 = vmul.f32 %v5433_v53, %v4047_v50  ;;  %v3321_v3 = vor.u32 1.1754944e-38, %v3320_v7  ;;  %v3328_v12 = vadd.f32 %v5431_v8, %v3327_v6  ;;  %v4489_v6 = vld [vmem:[%s9847_s1 + $0x1e0] sm:$0xff]  ;;  %4575 = vmatpush.msra.mxu2 %v4476_v55  ;;  %v4488_v50 = vld [vmem:[%s9847_s1 + $0x1d8] sm:$0xff]  ;;  %v4474_v55 = vld [vmem:[%s9847_s1 + $0x168] sm:$0xff] }
 0x448   : > { %10248 = vst [vmem:[#allocation38_spill] sm:$0xff] %v8048_v9  ;;  %5438 = vrcp.f32 %v8033_v2  ;;  %v3317_v15 = vsel %vm3316_vm3, %v5429_v16, %v3313_v29  ;;  %vm3334_vm5 = vcmp.eq.f32.partialorder %v3333_v24, 8.507059e+37  ;;  %v3336_v31 = vor.u32 1.1754944e-38, %v3335_v45  ;;  %4619 = vmatpush.msra.mxu3 %v4489_v6 }
 0x449   : > { %10249 = vst [vmem:[#allocation32_spill] sm:$0xff] %v8051_v20  ;;  %v8065_v10 = vand.u32 2147483647, %v8048_v9  ;;  %v8075_v33 = vsel %vm8042_vm1, %v3321_v3, %v3317_v15  ;;  %v3332_v16 = vsel %vm3331_vm4, %v5431_v8, %v3328_v12  ;;  %v4083_v11 = vsub.f32 0.0, %v7990_v4  ;;  %v4475_v8 = vld [vmem:[%s9847_s1 + $0x170] sm:$0xff] }
 0x44a   : > { %v8079_v45 = vmul.f32 0.70710677, %v8051_v20  ;;  %v3789_v24 = vmul.f32 1.0614054, %v8075_v33  ;;  %v8083_v7 = vsel %vm3334_vm5, %v3336_v31, %v3332_v16  ;;  %v3256_v51 = vmul.f32 0.3275911, %v3224_v5  ;;  %4576 = vmatpush.msra.mxu2 %v4475_v8  ;;  %4620 = vmatpush.msra.mxu3 %v4488_v50  ;;  %v8154_v20 = vpop.permute.xlu1 %3094 }
 0x44b   : > { %v8086_v53 = vadd.f32 %v7995_v17, %v3047_v49  ;;  %v4239_v41 = vsub.f32 1.0, %v8057_v34  ;;  %v3790_v36 = vmul.f32 1.0614054, %v8083_v7  ;;  %v4143_v29 = vmul.f32 1.442695, %v8005_v58  ;;  %v4444_v34 = vld [vmem:[%s9847_s1 + $0x78] sm:$0xff] }
 0x44c   : > { %10250 = vst [vmem:[#allocation14_spill] sm:$0xff] %v8079_v45  ;;  %v4088_v40 = vsub.f32 0.0, %v3224_v5  ;;  %v8099_v49 = vmul.f32 %v7987_v57, %v7937_v22  ;;  %v3821_v3 = vadd.f32 -1.4531521, %v3789_v24  ;;  %5440 = vpow2.f32 %v8020_v61  ;;  %v4460_v58 = vld [vmem:[%s9847_s1 + $0xf8] sm:$0xff]  ;;  %4493 = vmatpush.msra.mxu0 %v4444_v34  ;;  %4577 = vmatpush.msra.mxu2 %v4474_v55  ;;  %v2945_v14 = vpop.f32.mrf.mxu3 }
 0x44d   : > { %10251 = vst [vmem:[#allocation44_spill] sm:$0xff] %v8086_v53  ;;  %v3249_v12 = vmul.f32 0.3275911, %v8065_v10  ;;  %v8113_v31 = vmul.f32 %v8030_v39, %v7970_v62  ;;  %v3822_v22 = vadd.f32 -1.4531521, %v3790_v36  ;;  %v2972_v61 = vadd.f32 %v2942_v59, %v7828_v46  ;;  %4534 = vmatpush.msra.mxu1 %v4460_v58  ;;  %v4487_v46 = vld [vmem:[%s9847_s1 + $0x1d0] sm:$0xff]  ;;  %v8132_v59 = vpop.permute.xlu0 %3014 }
 0x44e   : > { %v8109_v15 = vpop.eup %5438  ;;  %v8116_v57 = vand.u32 2147483647, %v8079_v45  ;;  %v3853_v6 = vmul.f32 %v3821_v3, %v8075_v33  ;;  %v4115_v16 = vmul.f32 %v4083_v11, %v7990_v4  ;;  %v8124_v24 = vadd.f32 1.0, %v3256_v51  ;;  %4621 = vmatpush.msra.mxu3 %v4487_v46  ;;  %v2816_v46 = vpop.f32.mrf.mxu0 }
 0x44f   : > { %v8127_v8 = vmul.f32 0.70710677, %v8086_v53  ;;  %v4303_v50 = vsub.f32 0.0, %v4239_v41  ;;  %v3854_v36 = vmul.f32 %v3822_v22, %v8083_v7  ;;  %v4120_v34 = vmul.f32 %v4088_v40, %v3224_v5 }
 0x450   : > { %v3250_v3 = vmul.f32 0.3275911, %v8116_v57  ;;  %v3885_v4 = vadd.f32 1.4214138, %v3853_v6  ;;  %v8138_v11 = vmul.f32 %v8109_v15, %v8033_v2  ;;  %v3052_v58 = vmul.f32 %v8132_v59, %v2972_v61 }
 0x451   : > { %10252 = vst [vmem:[#allocation50_spill] sm:$0xff] %v8127_v8  ;;  %v8141_v51 = vand.u32 2147483647, %v8127_v8  ;;  %v3886_v53 = vadd.f32 1.4214138, %v3854_v36  ;;  %5442 = vpow2.f32 %v4143_v29  ;;  %v8145_v45 = vadd.f32 1.0, %v3249_v12  ;;  %v2857_v8 = vpop.f32.mrf.mxu1 }
 0x452   : > { %v8147_v5 = vpop.eup %5440  ;;  %v3917_v40 = vmul.f32 %v3885_v4, %v8075_v33  ;;  %5444 = vrcp.f32 %v8124_v24  ;;  %v8151_v22 = vadd.f32 1.0, %v3250_v3  ;;  %v4335_v61 = vsel %vm4271_vm6, %v4303_v50, %v4239_v41 }
 0x453   : > { %v3255_v6 = vmul.f32 0.3275911, %v8141_v51  ;;  %v3918_v29 = vmul.f32 %v3886_v53, %v8083_v7  ;;  %v8159_v12 = vmul.f32 1.442695, %v4115_v16  ;;  %v8161_v36 = vmul.f32 1.442695, %v4120_v34  ;;  %v2901_v53 = vpop.f32.mrf.mxu2 }
 0x454   : > { %10253 = vst [vmem:[#allocation26_spill] sm:$0xff] %v8151_v22  ;;  %v3949_v4 = vadd.f32 -0.28449672, %v3917_v40  ;;  %v8167_v9 = vadd.f32 %v8154_v20, %v3052_v58  ;;  %5446 = vrcp.f32 %v8145_v45  ;;  %v2965_v1 = vadd.f32 %v2816_v46, %v7854_v44  ;;  %v4473_v46 = vld [vmem:[%s9847_s1 + $0x160] sm:$0xff] }
 0x455   : > { %v8164_v3 = vadd.f32 1.0, %v3255_v6  ;;  %v3950_v30 = vadd.f32 -0.28449672, %v3918_v29  ;;  %v2966_v41 = vadd.f32 %v2857_v8, %v7862_v52  ;;  %v4081_v50 = vsub.f32 0.0, %v8065_v10  ;;  %v4443_v52 = vld [vmem:[%s9847_s1 + $0x70] sm:$0xff]  ;;  %4578 = vmatpush.msra.mxu2 %v4473_v46 }
 0x456   : > { %10255 = vst [vmem:[#allocation17_spill] sm:$0xff] %v8167_v9  ;;  %v3981_v16 = vmul.f32 %v3949_v4, %v8075_v33  ;;  %5448 = vrcp.f32 %v8151_v22  ;;  %v4082_v34 = vsub.f32 0.0, %v8116_v57  ;;  %v8178_v6 = vmul.f32 0.70710677, %v8167_v9  ;;  %v4459_v8 = vld [vmem:[%s9847_s1 + $0xf0] sm:$0xff]  ;;  %4494 = vmatpush.msra.mxu0 %v4443_v52 }
 0x457   : > { %10254 = vst [vmem:[#allocation23_spill] sm:$0xff] %v8164_v3  ;;  %v5443_v40 = vpop.eup %5442  ;;  %v3982_v58 = vmul.f32 %v3950_v30, %v8083_v7  ;;  %v3045_v29 = vmul.f32 %v7968_v27, %v2965_v1  ;;  %v3046_v44 = vmul.f32 %v7968_v27, %v2966_v41  ;;  %5450 = vrcp.f32 %v8164_v3  ;;  %4535 = vmatpush.msra.mxu1 %v4459_v8  ;;  %v4486_v41 = vld [vmem:[%s9847_s1 + $0x1c8] sm:$0xff]  ;;  %v4485_v8 = vld [vmem:[%s9847_s1 + $0x1c0] sm:$0xff] }
 0x458   : > { %10256 = vst [vmem:[#allocation16_spill] sm:$0xff] %v8178_v6  ;;  %v8191_v30 = vpop.eup %5444  ;;  %v4013_v4 = vadd.f32 0.2548296, %v3981_v16  ;;  %v4087_v1 = vsub.f32 0.0, %v8141_v51  ;;  %v2971_v27 = vadd.f32 %v2901_v53, %v7832_v26  ;;  %v8200_v9 = vand.u32 2147483647, %v8178_v6  ;;  %4622 = vmatpush.msra.mxu3 %v4486_v41 }
 0x459   : > { %v4014_v55 = vadd.f32 0.2548296, %v3982_v58  ;;  %v8203_v23 = vadd.f32 %v7995_v17, %v3045_v29  ;;  %v8206_v16 = vadd.f32 %v7995_v17, %v3046_v44  ;;  %v4442_v26 = vld [vmem:[%s9847_s1 + $0x68] sm:$0xff]  ;;  %v8214_v58 = vadd.f32 1.0, %v4335_v61  ;;  %v4472_v44 = vld [vmem:[%s9847_s1 + $0x158] sm:$0xff] }
 0x45a   : > { %v4458_v53 = vld [vmem:[%s9847_s1 + $0xe8] sm:$0xff]  ;;  %v4045_v52 = vmul.f32 %v4013_v4, %v8075_v33  ;;  %v4113_v29 = vmul.f32 %v4081_v50, %v8065_v10  ;;  %v3051_v17 = vmul.f32 %v8132_v59, %v2971_v27  ;;  %4495 = vmatpush.msra.mxu0 %v4442_v26  ;;  %v8225_v46 = vpop.eup %5446  ;;  %v8230_v33 = vmul.f32 %v8191_v30, %v8124_v24  ;;  %v4441_v4 = vld [vmem:[%s9847_s1 + $0x60] sm:$0xff]  ;;  %v4471_v26 = vld [vmem:[%s9847_s1 + $0x150] sm:$0xff] }
 0x45b   : > { %10257 = vst [vmem:[#allocation21_spill] sm:$0xff] %v8203_v23  ;;  %v4046_v61 = vmul.f32 %v4014_v55, %v8083_v7  ;;  %v4114_v10 = vmul.f32 %v4082_v34, %v8116_v57  ;;  %v8234_v50 = vmul.f32 0.70710677, %v8203_v23  ;;  %4536 = vmatpush.msra.mxu1 %v4458_v53  ;;  %4579 = vmatpush.msra.mxu2 %v4472_v44  ;;  %v8246_v55 = vmul.f32 0.70710677, %v8206_v16  ;;  %v4457_v34 = vld [vmem:[%s9847_s1 + $0xe0] sm:$0xff] }
 0x45c   : > { %10258 = vst [vmem:[#allocation19_spill] sm:$0xff] %v8206_v16  ;;  %v8239_v27 = vpop.eup %5448  ;;  %v8242_v41 = vmul.f32 %v8147_v5, %v4045_v52  ;;  %v4119_v7 = vmul.f32 %v4087_v1, %v8141_v51  ;;  %v2976_v57 = vadd.f32 %v2945_v14, %v7844_v48  ;;  %4623 = vmatpush.msra.mxu3 %v4485_v8  ;;  %v4484_v5 = vld [vmem:[%s9847_s1 + $0x1b8] sm:$0xff]  ;;  %vm4269_vm7 = vcmp.lt.f32.partialorder %v7916_v60, 0.0  ;;  %v4482_v6 = vld [vmem:[%s9847_s1 + $0x1a8] sm:$0xff] }
 0x45d   : > { %10259 = vst [vmem:[#allocation12_spill] sm:$0xff] %v8234_v50  ;;  %4496 = vmatpush.msra.mxu0 %v4441_v4  ;;  %v8259_v51 = vmul.f32 %v5443_v40, %v4046_v61  ;;  %v3260_v48 = vmul.f32 0.3275911, %v8200_v9  ;;  %v4092_v14 = vsub.f32 0.0, %v8200_v9  ;;  %v8264_v1 = vadd.f32 %v8154_v20, %v3051_v17  ;;  %4537 = vmatpush.msra.mxu1 %v4457_v34  ;;  %v4440_v53 = vld [vmem:[%s9847_s1 + $0x58] sm:$0xff]  ;;  %v4470_v40 = vld [vmem:[%s9847_s1 + $0x148] sm:$0xff]  ;;  %v8275_v44 = vpop.eup %5450  ;;  %v8285_v4 = vpop.f32.mrf.mxu0 }
 0x45e   : > { %10260 = vst [vmem:[#allocation11_spill] sm:$0xff] %v8246_v55  ;;  %4580 = vmatpush.msra.mxu2 %v4471_v26  ;;  %v4456_v52 = vld [vmem:[%s9847_s1 + $0xd8] sm:$0xff]  ;;  %5452 = vpow2.f32 %v8159_v12  ;;  %v8280_v17 = vand.u32 2147483647, %v8234_v50  ;;  %v8283_v61 = vand.u32 2147483647, %v8246_v55  ;;  %4624 = vmatpush.msra.mxu3 %v4484_v5  ;;  %v8290_v26 = vpop.permute.xlu2 %3019  ;;  %v8298_v5 = vmul.f32 %v8225_v46, %v8145_v45 }
 0x45f   : > { %10261 = vst [vmem:[#allocation7_spill] sm:$0xff] %v8264_v1  ;;  %4497 = vmatpush.msra.mxu0 %v4440_v53  ;;  %v4483_v34 = vld [vmem:[%s9847_s1 + $0x1b0] sm:$0xff]  ;;  %vm4270_vm8 = vcmp.lt.f32.partialorder %v7919_v35, 0.0  ;;  %5454 = vpow2.f32 %v8161_v36  ;;  %v4149_v8 = vmul.f32 1.442695, %v4113_v29  ;;  %4538 = vmatpush.msra.mxu1 %v4456_v52  ;;  %v4238_v55 = vsub.f32 1.0, %v8259_v51 }
 0x460   : > { %10262 = vst [vmem:[#allocation9_spill] sm:$0xff] %v8275_v44  ;;  %v4151_v16 = vmul.f32 1.442695, %v4114_v10  ;;  %4581 = vmatpush.msra.mxu2 %v4470_v40  ;;  %v4161_v53 = vmul.f32 1.442695, %v4119_v7  ;;  %v3056_v50 = vmul.f32 %v8290_v26, %v2976_v57  ;;  %4625 = vmatpush.msra.mxu3 %v4483_v34  ;;  %v8303_v23 = vmul.f32 %v8239_v27, %v8151_v22  ;;  %v4439_v7 = vld [vmem:[%s9847_s1 + $0x50] sm:$0xff] }
 0x461   : > { %v8307_v36 = vmul.f32 %v8275_v44, %v8164_v3  ;;  %v3253_v29 = vmul.f32 0.3275911, %v8280_v17  ;;  %v8311_v10 = vmul.f32 0.70710677, %v8264_v1  ;;  %v4455_v57 = vld [vmem:[%s9847_s1 + $0xd0] sm:$0xff]  ;;  %v10264_v51 = vsub.f32 1.0, %v8242_v41  ;;  %4498 = vmatpush.msra.mxu0 %v4439_v7  ;;  %v8331_v3 = vpop.permute.xlu0 %3099 }
 0x462   : > { %v8321_v40 = vadd.f32 1.0, %v3260_v48  ;;  %v4124_v34 = vmul.f32 %v4092_v14, %v8200_v9  ;;  %v3254_v12 = vmul.f32 0.3275911, %v8283_v61  ;;  %4539 = vmatpush.msra.mxu1 %v4455_v57  ;;  %v4469_v1 = vld [vmem:[%s9847_s1 + $0x140] sm:$0xff]  ;;  %v8335_v48 = vmul.f32 %v8214_v58, %v7984_v63  ;;  %4626 = vmatpush.msra.mxu3 %v4482_v6  ;;  %v4438_v7 = vld [vmem:[%s9847_s1 + $0x48] sm:$0xff]  ;;  %v4468_v63 = vld [vmem:[%s9847_s1 + $0x138] sm:$0xff] }
 0x463   : > { %10263 = vst [vmem:[#allocation10_spill] sm:$0xff] %v8311_v10  ;;  %v4301_v52 = vsub.f32 0.0, %v10264_v51  ;;  %5456 = vpow2.f32 %v4149_v8  ;;  %v4085_v9 = vsub.f32 0.0, %v8280_v17  ;;  %v8339_v14 = vand.u32 2147483647, %v8311_v10  ;;  %4582 = vmatpush.msra.mxu2 %v4469_v1  ;;  %v4454_v57 = vld [vmem:[%s9847_s1 + $0xc8] sm:$0xff]  ;;  %4499 = vmatpush.msra.mxu0 %v4438_v7  ;;  %v2860_v51 = vpop.f32.mrf.mxu1 }
 0x464   : > { %v8350_v58 = vpop.eup %5452  ;;  %v4302_v8 = vsub.f32 0.0, %v4238_v55  ;;  %5458 = vpow2.f32 %v4151_v16  ;;  %v8354_v6 = vadd.f32 %v8331_v3, %v3056_v50  ;;  %4540 = vmatpush.msra.mxu1 %v4454_v57  ;;  %v4481_v1 = vld [vmem:[%s9847_s1 + $0x1a0] sm:$0xff]  ;;  %v2904_v16 = vpop.f32.mrf.mxu2  ;;  %v10269_v50 = vsub.f32 1.0, %v8242_v41  ;;  %v4467_v41 = vld [vmem:[%s9847_s1 + $0x130] sm:$0xff]  ;;  %v4466_v35 = vld [vmem:[%s9847_s1 + $0x128] sm:$0xff] }
 0x465   : > { %10265 = vst [vmem:[#allocation8_spill] sm:$0xff] %v8350_v58  ;;  %v8359_v10 = vpop.eup %5454  ;;  %5460 = vpow2.f32 %v4161_v53  ;;  %v8363_v58 = vadd.f32 1.0, %v3253_v29  ;;  %4583 = vmatpush.msra.mxu2 %v4468_v63  ;;  %4627 = vmatpush.msra.mxu3 %v4481_v1  ;;  %v8370_v57 = vmul.f32 1.442695, %v4124_v34  ;;  %v4437_v53 = vld [vmem:[%s9847_s1 + $0x40] sm:$0xff]  ;;  %v4117_v60 = vmul.f32 %v4085_v9, %v8280_v17  ;;  %v2948_v63 = vpop.f32.mrf.mxu3  ;;  %v4480_v1 = vld [vmem:[%s9847_s1 + $0x198] sm:$0xff] }
 0x466   : > { %10266 = vst [vmem:[#allocation30_spill] sm:$0xff] %v8354_v6  ;;  %v4333_v7 = vsel %vm4269_vm7, %v4301_v52, %v10269_v50  ;;  %5462 = vrcp.f32 %v8321_v40  ;;  %v4453_v29 = vld [vmem:[%s9847_s1 + $0xc0] sm:$0xff]  ;;  %v3259_v52 = vmul.f32 0.3275911, %v8339_v14  ;;  %v8386_v34 = vmul.f32 0.70710677, %v8354_v6  ;;  %4500 = vmatpush.msra.mxu0 %v4437_v53  ;;  %v2822_v44 = vpop.f32.mrf.mxu0 }
 0x467   : > { %10267 = vst [vmem:[#allocation46_spill] sm:$0xff] %v8359_v10  ;;  %v8372_v10 = vadd.f32 1.0, %v3254_v12  ;;  %v2969_v12 = vadd.f32 %v8285_v4, %v7875_v37  ;;  %4541 = vmatpush.msra.mxu1 %v4453_v29  ;;  %v4334_v50 = vsel %vm4270_vm8, %v4302_v8, %v4238_v55  ;;  %v4086_v17 = vsub.f32 0.0, %v8283_v61  ;;  %4584 = vmatpush.msra.mxu2 %v4467_v41  ;;  %v4436_v37 = vld [vmem:[%s9847_s1 + $0x38] sm:$0xff] }
 0x468   : > { %10268 = vst [vmem:[#allocation20_spill] sm:$0xff] %v8363_v58  ;;  %v2970_v9 = vadd.f32 %v2860_v51, %v7882_v56  ;;  %v2975_v22 = vadd.f32 %v2904_v16, %v7848_v47  ;;  %4628 = vmatpush.msra.mxu3 %v4480_v1  ;;  %v4452_v4 = vld [vmem:[%s9847_s1 + $0xb8] sm:$0xff]  ;;  %5464 = vrcp.f32 %v8363_v58  ;;  %v4091_v47 = vsub.f32 0.0, %v8339_v14  ;;  %4501 = vmatpush.msra.mxu0 %v4436_v37  ;;  %v4479_v51 = vld [vmem:[%s9847_s1 + $0x190] sm:$0xff] }
 0x469   : > { %10270 = vst [vmem:[#allocation37_spill] sm:$0xff] %v8372_v10  ;;  %v8407_v55 = vpop.eup %5456  ;;  %v3232_v56 = vand.u32 2147483647, %v8386_v34  ;;  %v3049_v8 = vmul.f32 %v8132_v59, %v2969_v12  ;;  %4542 = vmatpush.msra.mxu1 %v4452_v4  ;;  %5466 = vrcp.f32 %v8372_v10  ;;  %v2980_v41 = vadd.f32 %v2948_v63, %v7866_v42  ;;  %4585 = vmatpush.msra.mxu2 %v4466_v35  ;;  %v8439_v63 = vpop.permute.xlu1 %3024 }
 0x46a   : > { %10271 = vst [vmem:[#allocation29_spill] sm:$0xff] %v8386_v34  ;;  %v8416_v16 = vpop.eup %5458  ;;  %v3050_v53 = vmul.f32 %v8132_v59, %v2970_v9  ;;  %v3055_v29 = vmul.f32 %v8290_v26, %v2975_v22  ;;  %4629 = vmatpush.msra.mxu3 %v4479_v51  ;;  %v8424_v12 = vadd.f32 1.0, %v3259_v52  ;;  %v2973_v34 = vadd.f32 %v2822_v44, %v7910_v28 }
 0x46b   : > { %10272 = vst [vmem:[#allocation35_spill] sm:$0xff] %v8416_v16  ;;  %v8422_v1 = vpop.eup %5460  ;;  %v3264_v37 = vmul.f32 0.3275911, %v3232_v56  ;;  %v8427_v4 = vadd.f32 %v8154_v20, %v3049_v8  ;;  %v4365_v16 = vadd.f32 1.0, %v4333_v7  ;;  %v4118_v59 = vmul.f32 %v4086_v17, %v8283_v61 }
 0x46c   : > { %10273 = vst [vmem:[#allocation24_spill] sm:$0xff] %v8422_v1  ;;  %v8430_v6 = vpop.eup %5462  ;;  %v8434_v22 = vadd.f32 %v8154_v20, %v3050_v53  ;;  %v8437_v42 = vadd.f32 %v8331_v3, %v3055_v29  ;;  %v8441_v52 = vadd.f32 1.0, %v4334_v50  ;;  %v4123_v9 = vmul.f32 %v4091_v47, %v8339_v14  ;;  %v4435_v50 = vld [vmem:[%s9847_s1 + $0x30] sm:$0xff]  ;;  %v8461_v14 = vpop.permute.xlu2 %3104  ;;  %v4465_v29 = vld [vmem:[%s9847_s1 + $0x120] sm:$0xff] }
 0x46d   : > { %10274 = vst [vmem:[#allocation34_spill] sm:$0xff] %v8424_v12  ;;  %v4096_v35 = vsub.f32 0.0, %v3232_v56  ;;  %v8445_v28 = vmul.f32 0.70710677, %v8427_v4  ;;  %v8447_v44 = vadd.f32 1.0, %v3264_v37  ;;  %v3060_v7 = vmul.f32 %v8439_v63, %v2980_v41  ;;  %4502 = vmatpush.msra.mxu0 %v4435_v50  ;;  %v4451_v53 = vld [vmem:[%s9847_s1 + $0xb0] sm:$0xff]  ;;  %4586 = vmatpush.msra.mxu2 %v4465_v29 }
 0x46e   : > { %10275 = vst [vmem:[#allocation42_spill] sm:$0xff] %v8427_v4  ;;  %v8450_v61 = vmul.f32 0.70710677, %v8434_v22  ;;  %v8453_v20 = vmul.f32 0.70710677, %v8437_v42  ;;  %v8459_v17 = vpop.eup %5464  ;;  %5468 = vrcp.f32 %v8424_v12  ;;  %v3053_v51 = vmul.f32 %v8290_v26, %v2973_v34  ;;  %4543 = vmatpush.msra.mxu1 %v4451_v53  ;;  %v4478_v34 = vld [vmem:[%s9847_s1 + $0x188] sm:$0xff] }
 0x46f   : > { %10276 = vst [vmem:[#allocation51_spill] sm:$0xff] %v8434_v22  ;;  %v4157_v47 = vmul.f32 1.442695, %v4117_v60  ;;  %v3225_v8 = vand.u32 2147483647, %v8445_v28  ;;  %v8472_v41 = vpop.eup %5466  ;;  %5470 = vpow2.f32 %v8370_v57  ;;  %v4434_v50 = vld [vmem:[%s9847_s1 + $0x28] sm:$0xff]  ;;  %v4128_v22 = vmul.f32 %v4096_v35, %v3232_v56  ;;  %4630 = vmatpush.msra.mxu3 %v4478_v34  ;;  %v2863_v34 = vpop.f32.mrf.mxu1 }
 0x470   : > { %10277 = vst [vmem:[#allocation25_spill] sm:$0xff] %v8437_v42  ;;  %v4159_v60 = vmul.f32 1.442695, %v4118_v59  ;;  %v3226_v37 = vand.u32 2147483647, %v8450_v61  ;;  %v8477_v42 = vadd.f32 %v8461_v14, %v3060_v7  ;;  %v8487_v59 = vadd.f32 %v8331_v3, %v3053_v51  ;;  %4503 = vmatpush.msra.mxu0 %v4434_v50  ;;  %v4450_v7 = vld [vmem:[%s9847_s1 + $0xa8] sm:$0xff] }
 0x471   : > { %10278 = vst [vmem:[#allocation36_spill] sm:$0xff] %v8445_v28  ;;  %v4089_v28 = vsub.f32 0.0, %v3225_v8  ;;  %v3231_v57 = vand.u32 2147483647, %v8453_v20  ;;  %v4464_v53 = vld [vmem:[%s9847_s1 + $0x118] sm:$0xff]  ;;  %v4477_v56 = vld [vmem:[%s9847_s1 + $0x180] sm:$0xff]  ;;  %v8500_v35 = vmul.f32 %v8430_v6, %v8321_v40  ;;  %5472 = vrcp.f32 %v8447_v44  ;;  %4544 = vmatpush.msra.mxu1 %v4450_v7 }
 0x472   : > { %10279 = vst [vmem:[#allocation27_spill] sm:$0xff] %v8450_v61  ;;  %v4169_v51 = vmul.f32 1.442695, %v4123_v9  ;;  %v3257_v29 = vmul.f32 0.3275911, %v3225_v8  ;;  %4587 = vmatpush.msra.mxu2 %v4464_v53  ;;  %v8505_v50 = vmul.f32 %v8459_v17, %v8363_v58  ;;  %4631 = vmatpush.msra.mxu3 %v4477_v56  ;;  %v8515_v9 = vmul.f32 %v4365_v16, %v7999_v38  ;;  %v4433_v53 = vld [vmem:[%s9847_s1 + $0x20] sm:$0xff] }
 0x473   : > { %10280 = vst [vmem:[#allocation47_spill] sm:$0xff] %v8453_v20  ;;  %v8509_v20 = vmul.f32 %v8472_v41, %v8372_v10  ;;  %v3258_v61 = vmul.f32 0.3275911, %v3226_v37  ;;  %v8512_v4 = vmul.f32 0.70710677, %v8477_v42  ;;  %5474 = vpow2.f32 %v4157_v47  ;;  %4632 = vmatmul.f32.vlgmr.msra.gmra.mxu3 %v8099_v49  ;;  %4504 = vmatpush.msra.mxu0 %v4433_v53  ;;  %v4463_v49 = vld [vmem:[%s9847_s1 + $0x110] sm:$0xff] }
 0x474   : > { %10281 = vst [vmem:[#allocation48_spill] sm:$0xff] %v8472_v41  ;;  %v4090_v1 = vsub.f32 0.0, %v3226_v37  ;;  %v8518_v7 = vmul.f32 0.70710677, %v8487_v59  ;;  %v8527_v10 = vpop.eup %5468  ;;  %v4179_v56 = vmul.f32 1.442695, %v4128_v22  ;;  %v4121_v38 = vmul.f32 %v4089_v28, %v3225_v8  ;;  %4588 = vmatpush.msra.mxu2 %v4463_v49 }
 0x475   : > { %10282 = vst [vmem:[#allocation45_spill] sm:$0xff] %v8477_v42  ;;  %v4449_v42 = vld [vmem:[%s9847_s1 + $0xa0] sm:$0xff]  ;;  %v3263_v16 = vmul.f32 0.3275911, %v3231_v57  ;;  %v4095_v47 = vsub.f32 0.0, %v3231_v57  ;;  %v8536_v41 = vmul.f32 %v8441_v52, %v8002_v19  ;;  %5476 = vpow2.f32 %v4159_v60  ;;  %v4448_v28 = vld [vmem:[%s9847_s1 + $0x98] sm:$0xff]  ;;  %v2907_v52 = vpop.f32.mrf.mxu2  ;;  %v2951_v19 = vpop.f32.mrf.mxu3 }
 0x476   : > { %10283 = vst [vmem:[#allocation52_spill] sm:$0xff] %v8487_v59  ;;  %4545 = vmatpush.msra.mxu1 %v4449_v42  ;;  %v8532_v59 = vpop.eup %5470  ;;  %v8538_v58 = vadd.f32 1.0, %v3257_v29  ;;  %v3236_v22 = vand.u32 2147483647, %v8512_v4  ;;  %v4432_v42 = vld [vmem:[%s9847_s1 + $0x18] sm:$0xff]  ;;  %5478 = vpow2.f32 %v4169_v51  ;;  %v4462_v60 = vld [vmem:[%s9847_s1 + $0x108] sm:$0xff]  ;;  %v8557_v49 = vmul.f32 %v8527_v10, %v8424_v12 }
 0x477   : > { %10284 = vst [vmem:[#allocation53_spill] sm:$0xff] %v8509_v20  ;;  %4505 = vmatpush.msra.mxu0 %v4432_v42  ;;  %v8553_v29 = vpop.eup %5472  ;;  %v4122_v8 = vmul.f32 %v4090_v1, %v3226_v37  ;;  %v3229_v53 = vand.u32 2147483647, %v8518_v7  ;;  %4589 = vmatpush.msra.mxu2 %v4462_v60  ;;  %5480 = vpow2.f32 %v4179_v56  ;;  %v4165_v51 = vmul.f32 1.442695, %v4121_v38  ;;  %v4431_v1 = vld [vmem:[%s9847_s1 + $0x10] sm:$0xff]  ;;  %v2825_v38 = vpop.f32.mrf.mxu0 }
 0x478   : > { %10285 = vst [vmem:[#allocation54_spill] sm:$0xff] %v8512_v4  ;;  %4546 = vmatpush.msra.mxu1 %v4448_v28  ;;  %v8559_v4 = vadd.f32 1.0, %v3258_v61  ;;  %v4127_v42 = vmul.f32 %v4095_v47, %v3231_v57  ;;  %v2974_v28 = vadd.f32 %v2863_v34, %v7924_v18  ;;  %5482 = vrcp.f32 %v8538_v58  ;;  %v4447_v37 = vld [vmem:[%s9847_s1 + $0x90] sm:$0xff]  ;;  %v4461_v18 = vld [vmem:[%s9847_s1 + $0x100] sm:$0xff]  ;;  %v8586_v47 = vpop.permute.xlu0 %3029 }
 0x479   : > { %10286 = vst [vmem:[#allocation55_spill] sm:$0xff] %v8518_v7  ;;  %v8566_v20 = vadd.f32 1.0, %v3263_v16  ;;  %v3268_v12 = vmul.f32 0.3275911, %v3236_v22  ;;  %v2979_v61 = vadd.f32 %v2907_v52, %v7858_v32  ;;  %v8580_v57 = vmul.f32 %v8553_v29, %v8447_v44  ;;  %4506 = vmatpush.msra.mxu0 %v4431_v1  ;;  %4590 = vmatpush.msra.mxu2 %v4461_v18 }
 0x47a   : > { %10287 = vst [vmem:[#allocation56_spill] sm:$0xff] %v8532_v59  ;;  %v8563_v59 = vpop.eup %5474  ;;  %v4100_v34 = vsub.f32 0.0, %v3236_v22  ;;  %v3054_v56 = vmul.f32 %v8290_v26, %v2974_v28  ;;  %v2984_v32 = vadd.f32 %v2951_v19, %v7886_v54  ;;  %4547 = vmatpush.msra.mxu1 %v4447_v37  ;;  %5484 = vrcp.f32 %v8559_v4  ;;  %v4430_v26 = vld [vmem:[%s9847_s1 + $0x8] sm:$0xff]  ;;  %4591 = vmatmul.f32.vlgmr.msra.gmra.mxu2 %v8335_v48 }
 0x47b   : > { %10288 = vst [vmem:[#allocation57_spill] sm:$0xff] %v8538_v58  ;;  %v8584_v16 = vpop.eup %5476  ;;  %v4167_v52 = vmul.f32 1.442695, %v4122_v8  ;;  %v4093_v60 = vsub.f32 0.0, %v3229_v53  ;;  %v3059_v7 = vmul.f32 %v8439_v63, %v2979_v61  ;;  %v4446_v54 = vld [vmem:[%s9847_s1 + $0x88] sm:$0xff]  ;;  %4507 = vmatpush.msra.mxu0 %v4430_v26  ;;  %v8603_v61 = vpop.permute.xlu1 %3109  ;;  %5486 = vrcp.f32 %v8566_v20 }
 0x47c   : > { %10289 = vst [vmem:[#allocation58_spill] sm:$0xff] %v8559_v4  ;;  %v8596_v19 = vpop.eup %5478  ;;  %v4177_v28 = vmul.f32 1.442695, %v4127_v42  ;;  %v3261_v1 = vmul.f32 0.3275911, %v3229_v53  ;;  %v8599_v37 = vadd.f32 %v8331_v3, %v3054_v56  ;;  %v3064_v8 = vmul.f32 %v8586_v47, %v2984_v32  ;;  %4548 = vmatpush.msra.mxu1 %v4446_v54 }
 0x47d   : > { %10290 = vst [vmem:[#allocation59_spill] sm:$0xff] %v8563_v59  ;;  %v2866_v59 = vpop.f32.mrf.mxu1  ;;  %v8606_v18 = vadd.f32 1.0, %v3268_v12  ;;  %v2977_v42 = vadd.f32 %v2825_v38, %v7934_v0  ;;  %v4132_v3 = vmul.f32 %v4100_v34, %v3236_v22  ;;  %5488 = vpow2.f32 %v4165_v51  ;;  %v2910_v51 = vpop.f32.mrf.mxu2 }
 0x47e   : > { %10291 = vst [vmem:[#allocation60_spill] sm:$0xff] %v8566_v20  ;;  %v8615_v56 = vmul.f32 0.70710677, %v8599_v37  ;;  %v8618_v48 = vadd.f32 %v8603_v61, %v3064_v8  ;;  %v2978_v32 = vadd.f32 %v2866_v59, %v7948_v25  ;;  %v4125_v12 = vmul.f32 %v4093_v60, %v3229_v53  ;;  %v2954_v8 = vpop.f32.mrf.mxu3 }
 0x47f   : > { %10292 = vst [vmem:[#allocation61_spill] sm:$0xff] %v8584_v16  ;;  %v8609_v16 = vadd.f32 %v8461_v14, %v3059_v7  ;;  %v3057_v0 = vmul.f32 %v8439_v63, %v2977_v42  ;;  %5490 = vpow2.f32 %v4167_v52  ;;  %v8627_v38 = vadd.f32 1.0, %v3261_v1 }
 0x480   : > { %10293 = vst [vmem:[#allocation62_spill] sm:$0xff] %v8596_v19  ;;  %v8612_v19 = vpop.eup %5480  ;;  %v3230_v22 = vand.u32 2147483647, %v8615_v56  ;;  %v8631_v34 = vmul.f32 0.70710677, %v8618_v48  ;;  %5492 = vpow2.f32 %v4177_v28  ;;  %v3058_v1 = vmul.f32 %v8439_v63, %v2978_v32 }
 0x481   : > { %10294 = vst [vmem:[#allocation63_spill] sm:$0xff] %v8599_v37  ;;  %v8621_v26 = vpop.eup %5482  ;;  %v8624_v7 = vmul.f32 0.70710677, %v8609_v16  ;;  %v8638_v53 = vadd.f32 %v8461_v14, %v3057_v0  ;;  %5494 = vrcp.f32 %v8606_v18  ;;  %v4187_v52 = vmul.f32 1.442695, %v4132_v3 }
 0x482   : > { %10295 = vst [vmem:[#allocation64_spill] sm:$0xff] %v8606_v18  ;;  %v8633_v54 = vpop.eup %5484  ;;  %v3262_v60 = vmul.f32 0.3275911, %v3230_v22  ;;  %v4173_v28 = vmul.f32 1.442695, %v4125_v12  ;;  %5496 = vrcp.f32 %v8627_v38  ;;  %v2983_v63 = vadd.f32 %v2910_v51, %v7870_v43 }
 0x483   : > { %10296 = vst [vmem:[#allocation65_spill] sm:$0xff] %v8609_v16  ;;  %v3235_v59 = vand.u32 2147483647, %v8624_v7  ;;  %v8642_v42 = vpop.eup %5486  ;;  %v3240_v25 = vand.u32 2147483647, %v8631_v34  ;;  %v8659_v16 = vmul.f32 %v8633_v54, %v8559_v4  ;;  %5498 = vpow2.f32 %v4187_v52  ;;  %v8692_v4 = vpop.permute.xlu0 %3114 }
 0x484   : > { %10297 = vst [vmem:[#allocation66_spill] sm:$0xff] %v8612_v19  ;;  %v8650_v0 = vmul.f32 0.70710677, %v8638_v53  ;;  %v8655_v32 = vpop.eup %5488  ;;  %v4094_v43 = vsub.f32 0.0, %v3230_v22  ;;  %v8672_v51 = vadd.f32 %v8461_v14, %v3058_v1  ;;  %5500 = vpow2.f32 %v4173_v28  ;;  %v2828_v1 = vpop.f32.mrf.mxu0 }
 0x485   : > { %10298 = vst [vmem:[#allocation67_spill] sm:$0xff] %v8615_v56  ;;  %v3267_v3 = vmul.f32 0.3275911, %v3235_v59  ;;  %v8661_v56 = vadd.f32 1.0, %v3262_v60  ;;  %v3063_v14 = vmul.f32 %v8586_v47, %v2983_v63  ;;  %vm3420_vm9 = vweird.f32 %v8030_v39 }
 0x486   : > { %10299 = vst [vmem:[#allocation68_spill] sm:$0xff] %v8618_v48  ;;  %v8646_v48 = vmul.f32 %v8621_v26, %v8538_v58  ;;  %v3233_v12 = vand.u32 2147483647, %v8650_v0  ;;  %v8684_v52 = vmul.f32 0.70710677, %v8672_v51  ;;  %vm3419_vm12 = vweird.f32 %v7970_v62 }
 0x487   : > { %10300 = vst [vmem:[#allocation69_spill] sm:$0xff] %v8621_v26  ;;  %5502 = vrcp.f32 %v8661_v56  ;;  %v8696_v58 = vadd.f32 %v8603_v61, %v3063_v14  ;;  %vm8861_vm10 = vmor %vm3419_vm12, %vm3420_vm9  ;;  %vm3405_vm13 = vweird.f32 %v8109_v15  ;;  %vm3404_vm14 = vweird.f32 %v8033_v2 }
 0x488   : > { %10301 = vst [vmem:[#allocation70_spill] sm:$0xff] %v8624_v7  ;;  %v8669_v7 = vmul.f32 %v8642_v42, %v8566_v20  ;;  %v3265_v28 = vmul.f32 0.3275911, %v3233_v12  ;;  %v2869_v20 = vpop.f32.mrf.mxu1  ;;  %vm3406_vm15 = vmor %vm3404_vm14, %vm3405_vm13  ;;  %vm3480_vm1 = vweird.f32 %v8191_v30  ;;  %vm3479_vm2 = vweird.f32 %v8124_v24 }
 0x489   : > { %10302 = vst [vmem:[#allocation71_spill] sm:$0xff] %v8627_v38  ;;  %vm3481_vm3 = vmor %vm3479_vm2, %vm3480_vm1  ;;  %vm3375_vm5 = vweird.f32 %v8225_v46  ;;  %vm3374_vm6 = vweird.f32 %v8145_v45 }
 0x48a   : > { %10303 = vst [vmem:[#allocation72_spill] sm:$0xff] %v8631_v34  ;;  %v8665_v34 = vpop.eup %5490  ;;  %v8711_v14 = vadd.f32 1.0, %v3265_v28  ;;  %vm3376_vm7 = vmor %vm3374_vm6, %vm3375_vm5  ;;  %vm3539_vm5 = vweird.f32 %v8321_v40 }
 0x48b   : > { %10304 = vst [vmem:[#allocation73_spill] sm:$0xff] %v8633_v54  ;;  %v8674_v37 = vpop.eup %5492  ;;  %v4126_v54 = vmul.f32 %v4094_v43, %v3230_v22  ;;  %v10323_v22 = vld [vmem:[#allocation39_spill] sm:$0xff] }
 0x48c   : > { %10305 = vst [vmem:[#allocation74_spill] sm:$0xff] %v8638_v53  ;;  %v2988_v53 = vadd.f32 %v2954_v8, %v7928_v13  ;;  %v8677_v19 = vpop.eup %5494  ;;  %v8679_v13 = vpop.permute.xlu2 %3034  ;;  %v8681_v8 = vadd.f32 1.0, %v3267_v3  ;;  %v2982_v43 = vadd.f32 %v2869_v20, %v10323_v22 }
 0x48d   : > { %10306 = vst [vmem:[#allocation75_spill] sm:$0xff] %v8642_v42  ;;  %v8690_v42 = vpop.eup %5496  ;;  %v4175_v20 = vmul.f32 1.442695, %v4126_v54 }
 0x48e   : > { %10307 = vst [vmem:[#allocation76_spill] sm:$0xff] %v8646_v48  ;;  %v3068_v60 = vmul.f32 %v8679_v13, %v2988_v53  ;;  %v2981_v53 = vadd.f32 %v2828_v1, %v7952_v21  ;;  %v8703_v26 = vpop.eup %5498  ;;  %5504 = vrcp.f32 %v8681_v8 }
 0x48f   : > { %10308 = vst [vmem:[#allocation77_spill] sm:$0xff] %v8650_v0  ;;  %v3272_v0 = vmul.f32 0.3275911, %v3240_v25 }
 0x490   : > { %10309 = vst [vmem:[#allocation78_spill] sm:$0xff] %v8655_v32  ;;  %v4099_v32 = vsub.f32 0.0, %v3235_v59  ;;  %v3061_v21 = vmul.f32 %v8586_v47, %v2981_v53 }
 0x491   : > { %10310 = vst [vmem:[#allocation79_spill] sm:$0xff] %v8659_v16  ;;  %v8700_v16 = vadd.f32 %v8692_v4, %v3068_v60  ;;  %v8706_v48 = vadd.f32 1.0, %v3272_v0  ;;  %v8722_v60 = vmul.f32 %v8677_v19, %v8606_v18 }
 0x492   : > { %10311 = vst [vmem:[#allocation80_spill] sm:$0xff] %v8661_v56  ;;  %v4131_v63 = vmul.f32 %v4099_v32, %v3235_v59  ;;  %v8714_v59 = vmul.f32 0.70710677, %v8696_v58 }
 0x493   : > { %10312 = vst [vmem:[#allocation81_spill] sm:$0xff] %v8665_v34  ;;  %v4104_v34 = vsub.f32 0.0, %v3240_v25  ;;  %v8717_v32 = vmul.f32 0.70710677, %v8700_v16  ;;  %5506 = vrcp.f32 %v8706_v48 }
 0x494   : > { %10313 = vst [vmem:[#allocation82_spill] sm:$0xff] %v8669_v7  ;;  %v8709_v7 = vpop.eup %5500  ;;  %v3239_v28 = vand.u32 2147483647, %v8714_v59  ;;  %v4185_v53 = vmul.f32 1.442695, %v4131_v63  ;;  %5508 = vrcp.f32 %v8711_v14 }
 0x495   : > { %10314 = vst [vmem:[#allocation83_spill] sm:$0xff] %v8672_v51  ;;  %v4097_v51 = vsub.f32 0.0, %v3233_v12  ;;  %v4136_v3 = vmul.f32 %v4104_v34, %v3240_v25  ;;  %v8726_v34 = vmul.f32 %v8690_v42, %v8627_v38  ;;  %v8728_v0 = vpop.eup %5502  ;;  %v3244_v22 = vand.u32 2147483647, %v8717_v32 }
 0x496   : > { %10315 = vst [vmem:[#allocation84_spill] sm:$0xff] %v8674_v37  ;;  %v3234_v37 = vand.u32 2147483647, %v8684_v52  ;;  %5510 = vpow2.f32 %v4175_v20  ;;  %v10338_v20 = vld [vmem:[#allocation31_spill] sm:$0xff] }
 0x497   : > { %10316 = vst [vmem:[#allocation85_spill] sm:$0xff] %v8681_v8  ;;  %v4129_v25 = vmul.f32 %v4097_v51, %v3233_v12  ;;  %v3271_v12 = vmul.f32 0.3275911, %v3239_v28  ;;  %v3276_v51 = vmul.f32 0.3275911, %v3244_v22  ;;  %5512 = vpow2.f32 %v4185_v53 }
 0x498   : > { %10317 = vst [vmem:[#allocation86_spill] sm:$0xff] %v8684_v52  ;;  %v3266_v1 = vmul.f32 0.3275911, %v3234_v37  ;;  %v3062_v52 = vmul.f32 %v8586_v47, %v2982_v43  ;;  %v4098_v54 = vsub.f32 0.0, %v3234_v37  ;;  %v2831_v47 = vpop.f32.mrf.mxu0 }
 0x499   : > { %10318 = vst [vmem:[#allocation87_spill] sm:$0xff] %v8690_v42  ;;  %v8754_v38 = vadd.f32 1.0, %v3271_v12  ;;  %v2985_v43 = vadd.f32 %v2831_v47, %v10338_v20  ;;  %v10342_v47 = vld [vmem:[#allocation13_spill] sm:$0xff] }
 0x49a   : > { %10319 = vst [vmem:[#allocation88_spill] sm:$0xff] %v8696_v58  ;;  %v4195_v58 = vmul.f32 1.442695, %v4136_v3  ;;  %v8748_v63 = vadd.f32 %v8603_v61, %v3062_v52  ;;  %v2913_v3 = vpop.f32.mrf.mxu2  ;;  %v10336_v52 = vld [vmem:[#allocation40_spill] sm:$0xff] }
 0x49b   : > { %10320 = vst [vmem:[#allocation89_spill] sm:$0xff] %v8700_v16  ;;  %v8733_v16 = vadd.f32 %v8603_v61, %v3061_v21  ;;  %v8760_v61 = vadd.f32 1.0, %v3276_v51  ;;  %v2872_v51 = vpop.f32.mrf.mxu1 }
 0x49c   : > { %10321 = vst [vmem:[#allocation90_spill] sm:$0xff] %v8703_v26  ;;  %v8752_v26 = vadd.f32 1.0, %v3266_v1  ;;  %5514 = vpow2.f32 %v4195_v58  ;;  %v4103_v58 = vsub.f32 0.0, %v3239_v28  ;;  %v2986_v20 = vadd.f32 %v2872_v51, %v10342_v47 }
 0x49d   : > { %10322 = vst [vmem:[#allocation91_spill] sm:$0xff] %v8706_v48  ;;  %v8745_v21 = vmul.f32 0.70710677, %v8733_v16 }
 0x49e   : > { %10324 = vst [vmem:[#allocation39_spill] sm:$0xff] %v8709_v7  ;;  %v8738_v7 = vpop.eup %5504 }
 0x49f   : > { %10325 = vst [vmem:[#allocation92_spill] sm:$0xff] %v8714_v59  ;;  %v8742_v59 = vmul.f32 %v8728_v0, %v8661_v56  ;;  %v3237_v56 = vand.u32 2147483647, %v8745_v21  ;;  %v8763_v42 = vpop.eup %5506  ;;  %v8768_v1 = vmul.f32 %v8738_v7, %v8681_v8 }
 0x4a0   : > { %10326 = vst [vmem:[#allocation93_spill] sm:$0xff] %v8717_v32  ;;  %v4181_v32 = vmul.f32 1.442695, %v4129_v25  ;;  %v8758_v25 = vmul.f32 0.70710677, %v8748_v63  ;;  %v8770_v12 = vpop.eup %5508 }
 0x4a1   : > { %10327 = vst [vmem:[#allocation94_spill] sm:$0xff] %v8726_v34  ;;  %v3269_v53 = vmul.f32 0.3275911, %v3237_v56 }
 0x4a2   : > { %10328 = vst [vmem:[#allocation95_spill] sm:$0xff] %v8728_v0  ;;  %v2987_v0 = vadd.f32 %v2913_v3, %v10336_v52  ;;  %5516 = vpow2.f32 %v4181_v32  ;;  %v4108_v3 = vsub.f32 0.0, %v3244_v22  ;;  %v4101_v52 = vsub.f32 0.0, %v3237_v56 }
 0x4a3   : > { %10329 = vst [vmem:[#allocation96_spill] sm:$0xff] %v8733_v16  ;;  %v4130_v16 = vmul.f32 %v4098_v54, %v3234_v37  ;;  %5518 = vrcp.f32 %v8752_v26  ;;  %v3238_v37 = vand.u32 2147483647, %v8758_v25  ;;  %v8781_v32 = vmul.f32 %v8763_v42, %v8706_v48 }
 0x4a4   : > { %10330 = vst [vmem:[#allocation97_spill] sm:$0xff] %v8738_v7  ;;  %v3067_v54 = vmul.f32 %v8679_v13, %v2987_v0  ;;  %5520 = vrcp.f32 %v8754_v38  ;;  %v8789_v8 = vadd.f32 1.0, %v3269_v53  ;;  %v8797_v48 = vmul.f32 %v8770_v12, %v8711_v14 }
 0x4a5   : > { %10331 = vst [vmem:[#allocation98_spill] sm:$0xff] %v8742_v59  ;;  %5522 = vrcp.f32 %v8760_v61  ;;  %v3270_v7 = vmul.f32 0.3275911, %v3238_v37  ;;  %v3065_v59 = vmul.f32 %v8679_v13, %v2985_v43  ;;  %v4140_v53 = vmul.f32 %v4108_v3, %v3244_v22 }
 0x4a6   : > { %10332 = vst [vmem:[#allocation99_spill] sm:$0xff] %v8745_v21  ;;  %v4183_v21 = vmul.f32 1.442695, %v4130_v16  ;;  %v4135_v16 = vmul.f32 %v4103_v58, %v3239_v28  ;;  %v3066_v43 = vmul.f32 %v8679_v13, %v2986_v20  ;;  %v10349_v13 = vsub.f32 1.0, %v8113_v31 }
 0x4a7   : > { %10333 = vst [vmem:[#allocation100_spill] sm:$0xff] %v8748_v63  ;;  %v8777_v63 = vpop.eup %5510  ;;  %v8805_v18 = vadd.f32 %v8692_v4, %v3065_v59  ;;  %v8816_v22 = vadd.f32 1.0, %v3270_v7  ;;  %v4203_v47 = vmul.f32 1.442695, %v4140_v53 }
 0x4a8   : > { %10334 = vst [vmem:[#allocation101_spill] sm:$0xff] %v8758_v25  ;;  %v8785_v25 = vadd.f32 %v8692_v4, %v3067_v54  ;;  %v8787_v0 = vpop.eup %5512  ;;  %5524 = vpow2.f32 %v4183_v21  ;;  %v3417_v59 = vmul.f32 %v8030_v39, %v10349_v13  ;;  %v4193_v21 = vmul.f32 1.442695, %v4135_v16 }
 0x4a9   : > { %10335 = vst [vmem:[#allocation102_spill] sm:$0xff] %v8760_v61  ;;  %5526 = vrcp.f32 %v8789_v8 }
 0x4aa   : > { %10337 = vst [vmem:[#allocation40_spill] sm:$0xff] %v8763_v42  ;;  %v4102_v42 = vsub.f32 0.0, %v3238_v37  ;;  %v8800_v54 = vmul.f32 0.70710677, %v8785_v25  ;;  %v3418_v13 = vadd.f32 %v8030_v39, %v3417_v59  ;;  %5528 = vrcp.f32 %v8816_v22 }
 0x4ab   : > { %10339 = vst [vmem:[#allocation31_spill] sm:$0xff] %v8777_v63  ;;  %v8793_v63 = vpop.eup %5514  ;;  %5530 = vpow2.f32 %v4193_v21 }
 0x4ac   : > { %10340 = vst [vmem:[#allocation103_spill] sm:$0xff] %v8785_v25  ;;  %v8802_v34 = vpop.eup %5516  ;;  %v3243_v28 = vand.u32 2147483647, %v8800_v54  ;;  %v4134_v20 = vmul.f32 %v4102_v42, %v3238_v37  ;;  %5532 = vpow2.f32 %v4203_v47  ;;  %v3423_v47 = vand.u32 2147483647, %v7970_v62 }
 0x4ad   : > { %10341 = vst [vmem:[#allocation104_spill] sm:$0xff] %v8787_v0  ;;  %v4133_v0 = vmul.f32 %v4101_v52, %v3237_v56  ;;  %v8808_v51 = vpop.eup %5518  ;;  %v8819_v56 = vadd.f32 %v8692_v4, %v3066_v43 }
 0x4ae   : > { %10343 = vst [vmem:[#allocation13_spill] sm:$0xff] %v8793_v63  ;;  %v8813_v58 = vpop.eup %5520  ;;  %v8828_v63 = vmul.f32 0.70710677, %v8805_v18  ;;  %v8832_v7 = vmul.f32 %v8808_v51, %v8752_v26  ;;  %v4107_v43 = vsub.f32 0.0, %v3243_v28  ;;  %v3275_v25 = vmul.f32 0.3275911, %v3243_v28 }
 0x4af   : > { %10344 = vst [vmem:[#allocation105_spill] sm:$0xff] %v8800_v54  ;;  %v8824_v3 = vpop.eup %5522  ;;  %v4189_v4 = vmul.f32 1.442695, %v4133_v0  ;;  %v8835_v31 = vmul.f32 0.70710677, %v8819_v56  ;;  %v8841_v42 = vmul.f32 %v8813_v58, %v8754_v38  ;;  %v3425_v0 = vand.u32 2147483648, %v7970_v62 }
 0x4b0   : > { %10345 = vst [vmem:[#allocation106_spill] sm:$0xff] %v8802_v34  ;;  %v8845_v37 = vmul.f32 %v8824_v3, %v8760_v61  ;;  %v8849_v16 = vpop.eup %5524  ;;  %v4191_v53 = vmul.f32 1.442695, %v4134_v20  ;;  %v3241_v59 = vand.u32 2147483647, %v8828_v63  ;;  %v10353_v54 = vld [vmem:[#allocation49_spill] sm:$0xff] }
 0x4b1   : > { %10346 = vst [vmem:[#allocation107_spill] sm:$0xff] %v8805_v18  ;;  %v8853_v52 = vpop.eup %5526  ;;  %v4139_v18 = vmul.f32 %v4107_v43, %v3243_v28  ;;  %v8857_v34 = vmul.f32 0.5, %v10353_v54  ;;  %v8865_v21 = vadd.f32 1.0, %v3275_v25  ;;  %v8868_v20 = vand.u32 2147483647, %v8835_v31  ;;  %v4429_v25 = vld [vmem:[%s9847_s1] sm:$0xff] }
 0x4b2   : > { %10347 = vst [vmem:[#allocation108_spill] sm:$0xff] %v8816_v22  ;;  %5534 = vpow2.f32 %v4189_v4  ;;  %v3426_v43 = vor.u32 1.1754944e-38, %v3425_v0  ;;  %v8884_v61 = vmul.f32 %v8853_v52, %v8789_v8  ;;  %v3273_v62 = vmul.f32 0.3275911, %v3241_v59  ;;  %4508 = vmatpush.msra.mxu0 %v4429_v25 }
 0x4b3   : > { %10348 = vst [vmem:[#allocation109_spill] sm:$0xff] %v8819_v56  ;;  %v3422_v56 = vsel %vm8861_vm10, %v8030_v39, %v3418_v13  ;;  %5536 = vpow2.f32 %v4191_v53  ;;  %vm3424_vm11 = vcmp.eq.f32.partialorder %v3423_v47, 8.507059e+37  ;;  %v8886_v39 = vpop.eup %5528  ;;  %v4201_v4 = vmul.f32 1.442695, %v4139_v18  ;;  %4509 = vmatmul.f32.vlgmr.msra.gmra.mxu0 %v8515_v9 }
 0x4b4   : > { %10350 = vst [vmem:[#allocation110_spill] sm:$0xff] %v8828_v63  ;;  %v4105_v13 = vsub.f32 0.0, %v3241_v59  ;;  %v8888_v0 = vsel %vm3424_vm11, %v3426_v43, %v3422_v56  ;;  %v10358_v28 = vsub.f32 1.0, %v8138_v11  ;;  %v8895_v63 = vpop.eup %5530  ;;  %5538 = vrcp.f32 %v8865_v21 }
 0x4b5   : > { %10351 = vst [vmem:[#allocation111_spill] sm:$0xff] %v8835_v31  ;;  %v4445_v31 = vld [vmem:[%s9847_s1 + $0x80] sm:$0xff]  ;;  %v3796_v53 = vmul.f32 1.0614054, %v8888_v0  ;;  %v8901_v18 = vpop.eup %5532  ;;  %v3408_v11 = vand.u32 2147483647, %v8033_v2  ;;  %v8910_v47 = vmul.f32 %v8886_v39, %v8816_v22  ;;  %5540 = vpow2.f32 %v4201_v4 }
 0x4b6   : > { %10352 = vst [vmem:[#allocation112_spill] sm:$0xff] %v8849_v16  ;;  %4549 = vmatpush.msra.mxu1 %v4445_v31  ;;  %v3402_v54 = vmul.f32 %v8109_v15, %v10358_v28  ;;  %v3274_v31 = vmul.f32 0.3275911, %v8868_v20  ;;  %v8912_v28 = vadd.f32 1.0, %v3273_v62  ;;  %v10365_v62 = vsub.f32 1.0, %v8230_v33 }
 0x4b7   : > { %10356 = vst [vmem:[#allocation49_spill] sm:$0xff] %v8865_v21  ;;  %4550 = vmatmul.f32.vlgmr.msra.gmra.mxu1 %v8536_v41  ;;  %v3410_v41 = vand.u32 2147483648, %v8033_v2  ;;  %v3828_v43 = vadd.f32 -1.4531521, %v3796_v53  ;;  %vm3409_vm0 = vcmp.eq.f32.partialorder %v3408_v11, 8.507059e+37  ;;  %vm3390_vm10 = vweird.f32 %v8239_v27 }
 0x4b8   : > { %10357 = vst [vmem:[#allocation113_spill] sm:$0xff] %v8868_v20  ;;  %v3403_v9 = vadd.f32 %v8109_v15, %v3402_v54  ;;  %v8914_v25 = vpop.eup %5534  ;;  %v8916_v54 = vmul.f32 %v4105_v13, %v3241_v59  ;;  %v8921_v2 = vadd.f32 1.0, %v3274_v31  ;;  %v3477_v53 = vmul.f32 %v8191_v30, %v10365_v62 }
 0x4b9   : > { %10359 = vst [vmem:[#allocation114_spill] sm:$0xff] %v8895_v63  ;;  %v8919_v63 = vpop.eup %5536  ;;  %v3860_v56 = vmul.f32 %v3828_v43, %v8888_v0  ;;  %v3483_v59 = vand.u32 2147483647, %v8124_v24  ;;  %5542 = vrcp.f32 %v8912_v28 }
 0x4ba   : > { %10360 = vst [vmem:[#allocation115_spill] sm:$0xff] %v8901_v18  ;;  %v3407_v20 = vsel %vm3406_vm15, %v8109_v15, %v3403_v9  ;;  %v3411_v18 = vor.u32 1.1754944e-38, %v3410_v41  ;;  %v3485_v15 = vand.u32 2147483648, %v8124_v24  ;;  %v8932_v4 = vpop.eup %5538  ;;  %v3478_v9 = vadd.f32 %v8191_v30, %v3477_v53 }
 0x4bb   : > { %10361 = vst [vmem:[#allocation116_spill] sm:$0xff] %v8912_v28  ;;  %v3892_v13 = vadd.f32 1.4214138, %v3860_v56  ;;  %vm3484_vm4 = vcmp.eq.f32.partialorder %v3483_v59, 8.507059e+37  ;;  %v8944_v62 = vpop.eup %5540  ;;  %v8948_v24 = vmul.f32 %v8932_v4, %v8865_v21  ;;  %5544 = vrcp.f32 %v8921_v2 }
 0x4bc   : > { %10362 = vst [vmem:[#allocation117_spill] sm:$0xff] %v8914_v25  ;;  %v8927_v22 = vsel %vm3409_vm0, %v3411_v18, %v3407_v20  ;;  %v10367_v20 = vld [vmem:[#allocation43_spill] sm:$0xff]  ;;  %v3486_v11 = vor.u32 1.1754944e-38, %v3485_v15  ;;  %v3482_v56 = vsel %vm3481_vm3, %v8191_v30, %v3478_v9  ;;  %v3380_v9 = vand.u32 2147483648, %v8145_v45 }
 0x4bd   : > { %10363 = vst [vmem:[#allocation118_spill] sm:$0xff] %v8916_v54  ;;  %v3795_v31 = vmul.f32 1.0614054, %v8927_v22  ;;  %v8940_v18 = vmul.f32 0.5, %v10367_v20  ;;  %v3924_v41 = vmul.f32 %v3892_v13, %v8888_v0  ;;  %v10370_v20 = vsub.f32 1.0, %v8298_v5 }
 0x4be   : > { %10364 = vst [vmem:[#allocation119_spill] sm:$0xff] %v8919_v63  ;;  %v8951_v53 = vsel %vm3484_vm4, %v3486_v11, %v3482_v56  ;;  %v10371_v56 = vld [vmem:[#allocation15_spill] sm:$0xff]  ;;  %v10373_v54 = vsub.f32 1.0, %v8303_v23  ;;  %vm3540_vm4 = vweird.f32 %v8430_v6 }
 0x4bf   : > { %10366 = vst [vmem:[#allocation120_spill] sm:$0xff] %v8932_v4  ;;  %v3827_v43 = vadd.f32 -1.4531521, %v3795_v31  ;;  %v3372_v15 = vmul.f32 %v8225_v46, %v10370_v20  ;;  %v3956_v33 = vadd.f32 -0.28449672, %v3924_v41  ;;  %v8965_v20 = vmul.f32 0.5, %v10371_v56  ;;  %vm9054_vm6 = vmor %vm3539_vm5, %vm3540_vm4 }
 0x4c0   : > { %10368 = vst [vmem:[#allocation43_spill] sm:$0xff] %v8944_v62  ;;  %v3800_v30 = vmul.f32 1.0614054, %v8951_v53  ;;  %v3378_v31 = vand.u32 2147483647, %v8145_v45  ;;  %v3387_v63 = vmul.f32 %v8239_v27, %v10373_v54  ;;  %vm3525_vm4 = vweird.f32 %v8527_v10 }
 0x4c1   : > { %10369 = vst [vmem:[#allocation121_spill] sm:$0xff] %v8948_v24  ;;  %v3859_v13 = vmul.f32 %v3827_v43, %v8927_v22  ;;  %v3373_v59 = vadd.f32 %v8225_v46, %v3372_v15  ;;  %v3988_v11 = vmul.f32 %v3956_v33, %v8888_v0  ;;  %v8967_v43 = vpop.eup %5542  ;;  %v3381_v15 = vor.u32 1.1754944e-38, %v3380_v9  ;;  %v10381_v24 = vld [vmem:[#allocation9_spill] sm:$0xff] }
 0x4c2   : > { %v3832_v41 = vadd.f32 -1.4531521, %v3800_v30  ;;  %10372 = vst [vmem:[#allocation15_spill] sm:$0xff] %v8967_v43  ;;  %vm3379_vm8 = vcmp.eq.f32.partialorder %v3378_v31, 8.507059e+37  ;;  %v8976_v56 = vpop.eup %5544  ;;  %v10375_v30 = vld [vmem:[#allocation33_spill] sm:$0xff]  ;;  %vm3465_vm0 = vweird.f32 %v10381_v24 }
 0x4c3   : > { %v3891_v5 = vadd.f32 1.4214138, %v3859_v13  ;;  %v3377_v62 = vsel %vm3376_vm7, %v8225_v46, %v3373_v59  ;;  %v4020_v25 = vadd.f32 0.2548296, %v3988_v11  ;;  %v10374_v13 = vld [vmem:[#allocation26_spill] sm:$0xff]  ;;  %vm4276_vm12 = vcmp.lt.f32.partialorder %v10375_v30, 0.0 }
 0x4c4   : > { %v3864_v33 = vmul.f32 %v3832_v41, %v8951_v53  ;;  %vm3389_vm9 = vweird.f32 %v10374_v13  ;;  %v8979_v21 = vsel %vm3379_vm8, %v3381_v15, %v3377_v62  ;;  %v3388_v46 = vadd.f32 %v8239_v27, %v3387_v63 }
 0x4c5   : > { %v3923_v45 = vmul.f32 %v3891_v5, %v8927_v22  ;;  %v3393_v23 = vand.u32 2147483647, %v10374_v13  ;;  %v4052_v54 = vmul.f32 %v4020_v25, %v8888_v0  ;;  %v3793_v9 = vmul.f32 1.0614054, %v8979_v21  ;;  %vm8986_vm11 = vmor %vm3389_vm9, %vm3390_vm10  ;;  %v10379_v25 = vld [vmem:[#allocation22_spill] sm:$0xff] }
 0x4c6   : > { %v3896_v31 = vadd.f32 1.4214138, %v3864_v33  ;;  %v8993_v62 = vmul.f32 %v8967_v43, %v8912_v28  ;;  %v3392_v63 = vsel %vm8986_vm11, %v8239_v27, %v3388_v46  ;;  %v3395_v0 = vand.u32 2147483648, %v10374_v13  ;;  %v10382_v43 = vld [vmem:[#allocation23_spill] sm:$0xff]  ;;  %v10383_v46 = vld [vmem:[#allocation41_spill] sm:$0xff] }
 0x4c7   : > { %v3955_v59 = vadd.f32 -0.28449672, %v3923_v45  ;;  %v4212_v41 = vmul.f32 %v10379_v25, %v4052_v54  ;;  %v3825_v33 = vadd.f32 -1.4531521, %v3793_v9  ;;  %vm3394_vm13 = vcmp.eq.f32.partialorder %v3393_v23, 8.507059e+37 }
 0x4c8   : > { %10378 = vst [vmem:[#allocation26_spill] sm:$0xff] %v8993_v62  ;;  %v3928_v45 = vmul.f32 %v3896_v31, %v8951_v53  ;;  %v3396_v4 = vor.u32 1.1754944e-38, %v3395_v0  ;;  %v10380_v5 = vsub.f32 1.0, %v8307_v36  ;;  %vm3464_vm14 = vweird.f32 %v10382_v43 }
 0x4c9   : > { %v3987_v15 = vmul.f32 %v3955_v59, %v8927_v22  ;;  %v4244_v16 = vsub.f32 1.0, %v4212_v41  ;;  %v3857_v13 = vmul.f32 %v3825_v33, %v8979_v21  ;;  %vm4275_vm15 = vcmp.lt.f32.partialorder %v10383_v46, 0.0  ;;  %vm9015_vm1 = vmor %vm3464_vm14, %vm3465_vm0  ;;  %v10386_v41 = vld [vmem:[#allocation8_spill] sm:$0xff] }
 0x4ca   : > { %v3462_v28 = vmul.f32 %v10381_v24, %v10380_v5  ;;  %v3960_v27 = vadd.f32 -0.28449672, %v3928_v45  ;;  %v9008_v54 = vsel %vm3394_vm13, %v3396_v4, %v3392_v63  ;;  %v3468_v23 = vand.u32 2147483647, %v10382_v43 }
 0x4cb   : > { %v4019_v11 = vadd.f32 0.2548296, %v3987_v15  ;;  %v4308_v36 = vsub.f32 0.0, %v4244_v16  ;;  %v3889_v5 = vadd.f32 1.4214138, %v3857_v13  ;;  %v3470_v63 = vand.u32 2147483648, %v10382_v43 }
 0x4cc   : > { %v3463_v59 = vadd.f32 %v10381_v24, %v3462_v28  ;;  %v3992_v9 = vmul.f32 %v3960_v27, %v8951_v53  ;;  %v3794_v4 = vmul.f32 1.0614054, %v9008_v54  ;;  %vm3469_vm2 = vcmp.eq.f32.partialorder %v3468_v23, 8.507059e+37 }
 0x4cd   : > { %v4051_v31 = vmul.f32 %v4019_v11, %v8927_v22  ;;  %v4340_v22 = vsel %vm4276_vm12, %v4308_v36, %v4244_v16  ;;  %v3921_v33 = vmul.f32 %v3889_v5, %v8979_v21  ;;  %v9031_v11 = vmul.f32 %v8976_v56, %v8921_v2  ;;  %v10388_v5 = vld [vmem:[#allocation46_spill] sm:$0xff] }
 0x4ce   : > { %v3467_v28 = vsel %vm9015_vm1, %v10381_v24, %v3463_v59  ;;  %v4024_v45 = vadd.f32 0.2548296, %v3992_v9  ;;  %v4372_v27 = vadd.f32 1.0, %v4340_v22  ;;  %v3826_v13 = vadd.f32 -1.4531521, %v3794_v4 }
 0x4cf   : > { %v4211_v15 = vmul.f32 %v10386_v41, %v4051_v31  ;;  %v3471_v25 = vor.u32 1.1754944e-38, %v3470_v63  ;;  %v3953_v59 = vadd.f32 -0.28449672, %v3921_v33  ;;  %v10387_v36 = vsub.f32 1.0, %v8500_v35 }
 0x4d0   : > { %v4056_v24 = vmul.f32 %v4024_v45, %v8951_v53  ;;  %v4404_v43 = vmul.f32 %v4372_v27, %v8857_v34  ;;  %v3858_v16 = vmul.f32 %v3826_v13, %v9008_v54  ;;  %v10389_v53 = vld [vmem:[#allocation28_spill] sm:$0xff]  ;;  %v3543_v45 = vand.u32 2147483647, %v8321_v40 }
 0x4d1   : > { %v4243_v62 = vsub.f32 1.0, %v4211_v15  ;;  %v9036_v30 = vsel %vm3469_vm2, %v3471_v25, %v3467_v28  ;;  %v3537_v31 = vmul.f32 %v8430_v6, %v10387_v36  ;;  %v3985_v4 = vmul.f32 %v3953_v59, %v8979_v21  ;;  %v10392_v59 = vld [vmem:[#allocation18_spill] sm:$0xff] }
 0x4d2   : > { %v4216_v0 = vmul.f32 %v10388_v5, %v4056_v24  ;;  %v3799_v63 = vmul.f32 1.0614054, %v9036_v30  ;;  %4635 = vmatmul.f32.gmra.mxu3 %v4404_v43  ;;  %vm4280_vm3 = vcmp.lt.f32.partialorder %v10389_v53, 0.0  ;;  %v3890_v23 = vadd.f32 1.4214138, %v3858_v16  ;;  %v10394_v53 = vld [vmem:[#allocation20_spill] sm:$0xff] }
 0x4d3   : > { %v4307_v9 = vsub.f32 0.0, %v4243_v62  ;;  %v3538_v34 = vadd.f32 %v8430_v6, %v3537_v31  ;;  %v4017_v28 = vadd.f32 0.2548296, %v3985_v4  ;;  %v3153_v43 = vmul.f32 0.5, %v10392_v59 }
 0x4d4   : > { %v4248_v25 = vsub.f32 1.0, %v4216_v0  ;;  %v3831_v22 = vadd.f32 -1.4531521, %v3799_v63  ;;  %v3922_v15 = vmul.f32 %v3890_v23, %v9008_v54  ;;  %vm3544_vm7 = vcmp.eq.f32.partialorder %v3543_v45, 8.507059e+37 }
 0x4d5   : > { %v4339_v35 = vsel %vm4275_vm15, %v4307_v9, %v4243_v62  ;;  %v4049_v27 = vmul.f32 %v4017_v28, %v8979_v21  ;;  %v3545_v62 = vand.u32 2147483648, %v8321_v40  ;;  %v3542_v36 = vsel %vm9054_vm6, %v8430_v6, %v3538_v34 }
 0x4d6   : > { %v4371_v41 = vadd.f32 1.0, %v4339_v35  ;;  %v4312_v33 = vsub.f32 0.0, %v4248_v25  ;;  %v3863_v13 = vmul.f32 %v3831_v22, %v9036_v30  ;;  %v3954_v16 = vadd.f32 -0.28449672, %v3922_v15 }
 0x4d7   : > { %v4209_v31 = vmul.f32 %v8407_v55, %v4049_v27  ;;  %v3546_v5 = vor.u32 1.1754944e-38, %v3545_v62  ;;  %vm3434_vm8 = vweird.f32 %v10394_v53  ;;  %vm3435_vm9 = vweird.f32 %v8459_v17 }
 0x4d8   : > { %v4403_v46 = vmul.f32 %v4371_v41, %v8940_v18  ;;  %v4344_v21 = vsel %vm4280_vm3, %v4312_v33, %v4248_v25  ;;  %v3895_v9 = vadd.f32 1.4214138, %v3863_v13  ;;  %v3986_v40 = vmul.f32 %v3954_v16, %v9008_v54  ;;  %v10395_v41 = vld [vmem:[#allocation38_spill] sm:$0xff]  ;;  %vm9082_vm10 = vmor %vm3434_vm8, %vm3435_vm9  ;;  %v10398_v13 = vld [vmem:[#allocation32_spill] sm:$0xff] }
 0x4d9   : > { %v4376_v0 = vadd.f32 1.0, %v4344_v21  ;;  %v10393_v18 = vsub.f32 1.0, %v8505_v50  ;;  %v4241_v63 = vsub.f32 1.0, %v4209_v31  ;;  %v9072_v6 = vsel %vm3544_vm7, %v3546_v5, %v3542_v36  ;;  %v10399_v16 = vld [vmem:[#allocation35_spill] sm:$0xff] }
 0x4da   : > { %4594 = vmatmul.f32.gmra.mxu2 %v4403_v46  ;;  %v3927_v23 = vmul.f32 %v3895_v9, %v9036_v30  ;;  %v4018_v34 = vadd.f32 0.2548296, %v3986_v40  ;;  %v3804_v35 = vmul.f32 1.0614054, %v9072_v6  ;;  %v3438_v50 = vand.u32 2147483647, %v10394_v53 }
 0x4db   : > { %v3432_v4 = vmul.f32 %v8459_v17, %v10393_v18  ;;  %v4408_v55 = vmul.f32 %v4376_v0, %v8965_v20  ;;  %v4305_v28 = vsub.f32 0.0, %v4241_v63  ;;  %vm4273_vm12 = vcmp.lt.f32.partialorder %v10395_v41, 0.0  ;;  %v10400_v9 = vld [vmem:[#allocation53_spill] sm:$0xff]  ;;  %v10402_v0 = vld [vmem:[#allocation48_spill] sm:$0xff] }
 0x4dc   : > { %v3959_v22 = vadd.f32 -0.28449672, %v3927_v23  ;;  %v4050_v15 = vmul.f32 %v4018_v34, %v9008_v54  ;;  %v3836_v45 = vadd.f32 -1.4531521, %v3804_v35  ;;  %v3440_v20 = vand.u32 2147483648, %v10394_v53  ;;  %v10403_v18 = vld [vmem:[#allocation37_spill] sm:$0xff] }
 0x4dd   : > { %v3433_v25 = vadd.f32 %v8459_v17, %v3432_v4  ;;  %4638 = vmatmul.f32.gmra.mxu3 %v4408_v55  ;;  %v4337_v27 = vsel %vm4273_vm12, %v4305_v28, %v4241_v63  ;;  %v3154_v24 = vmul.f32 0.5, %v10398_v13  ;;  %vm3439_vm11 = vcmp.eq.f32.partialorder %v3438_v50, 8.507059e+37  ;;  %v10406_v50 = vld [vmem:[#allocation14_spill] sm:$0xff] }
 0x4de   : > { %v3991_v62 = vmul.f32 %v3959_v22, %v9036_v30  ;;  %v4369_v59 = vadd.f32 1.0, %v4337_v27  ;;  %v4210_v36 = vmul.f32 %v10399_v16, %v4050_v15  ;;  %v3868_v54 = vmul.f32 %v3836_v45, %v9072_v6 }
 0x4df   : > { %v3437_v46 = vsel %vm9082_vm10, %v8459_v17, %v3433_v25  ;;  %v3441_v21 = vor.u32 1.1754944e-38, %v3440_v20  ;;  %v10401_v5 = vsub.f32 1.0, %v10400_v9  ;;  %vm3449_vm13 = vweird.f32 %v10403_v18  ;;  %v10408_v20 = vld [vmem:[#allocation50_spill] sm:$0xff] }
 0x4e0   : > { %v4023_v31 = vadd.f32 0.2548296, %v3991_v62  ;;  %v4401_v4 = vmul.f32 %v4369_v59, %v3153_v43  ;;  %v4242_v63 = vsub.f32 1.0, %v4210_v36  ;;  %v3900_v23 = vadd.f32 1.4214138, %v3868_v54 }
 0x4e1   : > { %v3447_v40 = vmul.f32 %v10402_v0, %v10401_v5  ;;  %v9098_v53 = vsel %vm3439_vm11, %v3441_v21, %v3437_v46  ;;  %vm3450_vm14 = vweird.f32 %v10402_v0  ;;  %v3453_v43 = vand.u32 2147483647, %v10403_v18 }
 0x4e2   : > { %v4055_v17 = vmul.f32 %v4023_v31, %v9036_v30  ;;  %v3797_v55 = vmul.f32 1.0614054, %v9098_v53  ;;  %4512 = vmatmul.f32.gmra.mxu0 %v4401_v4  ;;  %v4306_v35 = vsub.f32 0.0, %v4242_v63  ;;  %v3932_v25 = vmul.f32 %v3900_v23, %v9072_v6  ;;  %vm9105_vm15 = vmor %vm3449_vm13, %vm3450_vm14  ;;  %v10407_v30 = vld [vmem:[#allocation24_spill] sm:$0xff]  ;;  %v10410_v31 = vld [vmem:[#allocation34_spill] sm:$0xff] }
 0x4e3   : > { %v3448_v34 = vadd.f32 %v10402_v0, %v3447_v40  ;;  %v3455_v22 = vand.u32 2147483648, %v10403_v18  ;;  %vm4274_vm0 = vcmp.lt.f32.partialorder %v10406_v50, 0.0  ;;  %vm4279_vm1 = vcmp.lt.f32.partialorder %v10408_v20, 0.0 }
 0x4e4   : > { %v4215_v41 = vmul.f32 %v10407_v30, %v4055_v17  ;;  %v3829_v15 = vadd.f32 -1.4531521, %v3797_v55  ;;  %v4338_v33 = vsel %vm4274_vm0, %v4306_v35, %v4242_v63  ;;  %v3964_v27 = vadd.f32 -0.28449672, %v3932_v25 }
 0x4e5   : > { %v3452_v45 = vsel %vm9105_vm15, %v10402_v0, %v3448_v34  ;;  %v3456_v13 = vor.u32 1.1754944e-38, %v3455_v22  ;;  %v4370_v62 = vadd.f32 1.0, %v4338_v33  ;;  %vm3454_vm2 = vcmp.eq.f32.partialorder %v3453_v43, 8.507059e+37  ;;  %v10413_v34 = vld [vmem:[#allocation44_spill] sm:$0xff]  ;;  %v10414_v22 = vld [vmem:[#allocation17_spill] sm:$0xff] }
 0x4e6   : > { %v4247_v46 = vsub.f32 1.0, %v4215_v41  ;;  %v3861_v59 = vmul.f32 %v3829_v15, %v9098_v53  ;;  %v3996_v16 = vmul.f32 %v3964_v27, %v9072_v6  ;;  %v10409_v54 = vsub.f32 1.0, %v8557_v49  ;;  %v10415_v33 = vld [vmem:[#allocation56_spill] sm:$0xff] }
 0x4e7   : > { %v9119_v36 = vsel %vm3454_vm2, %v3456_v13, %v3452_v45  ;;  %vm3524_vm3 = vweird.f32 %v10410_v31  ;;  %v4402_v9 = vmul.f32 %v4370_v62, %v3154_v24  ;;  %v3528_v63 = vand.u32 2147483647, %v10410_v31 }
 0x4e8   : > { %v3522_v21 = vmul.f32 %v8527_v10, %v10409_v54  ;;  %v4311_v5 = vsub.f32 0.0, %v4247_v46  ;;  %v3893_v0 = vadd.f32 1.4214138, %v3861_v59  ;;  %v3798_v40 = vmul.f32 1.0614054, %v9119_v36  ;;  %vm9132_vm5 = vmor %vm3524_vm3, %vm3525_vm4 }
 0x4e9   : > { %v4028_v18 = vadd.f32 0.2548296, %v3996_v16  ;;  %4553 = vmatmul.f32.gmra.mxu1 %v4402_v9  ;;  %v3530_v55 = vand.u32 2147483648, %v10410_v31  ;;  %v3159_v35 = vmul.f32 0.5, %v10413_v34  ;;  %v3164_v50 = vmul.f32 0.5, %v10414_v22  ;;  %v10421_v34 = vld [vmem:[#allocation76_spill] sm:$0xff] }
 0x4ea   : > { %v3523_v4 = vadd.f32 %v8527_v10, %v3522_v21  ;;  %v4343_v49 = vsel %vm4279_vm1, %v4311_v5, %v4247_v46  ;;  %v3925_v23 = vmul.f32 %v3893_v0, %v9098_v53  ;;  %v3830_v17 = vadd.f32 -1.4531521, %v3798_v40  ;;  %v10419_v5 = vld [vmem:[#allocation16_spill] sm:$0xff]  ;;  %v10429_v21 = vld [vmem:[#allocation19_spill] sm:$0xff] }
 0x4eb   : > { %v4375_v25 = vadd.f32 1.0, %v4343_v49  ;;  %v4060_v28 = vmul.f32 %v4028_v18, %v9072_v6  ;;  %v3531_v15 = vor.u32 1.1754944e-38, %v3530_v55  ;;  %vm3529_vm6 = vcmp.eq.f32.partialorder %v3528_v63, 8.507059e+37 }
 0x4ec   : > { %v3527_v43 = vsel %vm9132_vm5, %v8527_v10, %v3523_v4  ;;  %v3957_v30 = vadd.f32 -0.28449672, %v3925_v23  ;;  %v3862_v41 = vmul.f32 %v3830_v17, %v9119_v36  ;;  %v10416_v27 = vsub.f32 1.0, %v8580_v57  ;;  %v10420_v4 = vld [vmem:[#allocation21_spill] sm:$0xff] }
 0x4ed   : > { %v4407_v45 = vmul.f32 %v4375_v25, %v3159_v35  ;;  %v4220_v20 = vmul.f32 %v10415_v33, %v4060_v28  ;;  %v9149_v46 = vsel %vm3529_vm6, %v3531_v15, %v3527_v43  ;;  %vm3599_vm7 = vweird.f32 %v8447_v44  ;;  %v10423_v35 = vld [vmem:[#allocation69_spill] sm:$0xff]  ;;  %v10424_v43 = vld [vmem:[#allocation59_spill] sm:$0xff] }
 0x4ee   : > { %v3597_v13 = vmul.f32 %v8553_v29, %v10416_v27  ;;  %v3989_v6 = vmul.f32 %v3957_v30, %v9098_v53  ;;  %v3894_v62 = vadd.f32 1.4214138, %v3862_v41  ;;  %v3803_v59 = vmul.f32 1.0614054, %v9149_v46 }
 0x4ef   : > { %4597 = vmatmul.f32.gmra.mxu2 %v4407_v45  ;;  %v4252_v10 = vsub.f32 1.0, %v4220_v20  ;;  %vm3600_vm8 = vweird.f32 %v8553_v29  ;;  %v3603_v31 = vand.u32 2147483647, %v8447_v44  ;;  %v3605_v9 = vand.u32 2147483648, %v8447_v44  ;;  %v10425_v45 = vld [vmem:[#allocation57_spill] sm:$0xff] }
 0x4f0   : > { %v3598_v16 = vadd.f32 %v8553_v29, %v3597_v13  ;;  %v4021_v54 = vadd.f32 0.2548296, %v3989_v6  ;;  %v3926_v57 = vmul.f32 %v3894_v62, %v9119_v36  ;;  %vm9156_vm9 = vmor %vm3599_vm7, %vm3600_vm8  ;;  %vm4284_vm12 = vcmp.lt.f32.partialorder %v10419_v5, 0.0 }
 0x4f1   : > { %v4316_v0 = vsub.f32 0.0, %v4252_v10  ;;  %v3835_v40 = vadd.f32 -1.4531521, %v3803_v59  ;;  %v3157_v63 = vmul.f32 0.5, %v10420_v4  ;;  %v3606_v17 = vor.u32 1.1754944e-38, %v3605_v9 }
 0x4f2   : > { %v3602_v18 = vsel %vm9156_vm9, %v8553_v29, %v3598_v16  ;;  %v4053_v49 = vmul.f32 %v4021_v54, %v9098_v53  ;;  %v3958_v23 = vadd.f32 -0.28449672, %v3926_v57  ;;  %vm3604_vm10 = vcmp.eq.f32.partialorder %v3603_v31, 8.507059e+37  ;;  %v10428_v16 = vld [vmem:[#allocation12_spill] sm:$0xff] }
 0x4f3   : > { %v4348_v24 = vsel %vm4284_vm12, %v4316_v0, %v4252_v10  ;;  %v3867_v55 = vmul.f32 %v3835_v40, %v9149_v46  ;;  %v10422_v44 = vsub.f32 1.0, %v10421_v34  ;;  %v9174_v29 = vsel %vm3604_vm10, %v3606_v17, %v3602_v18  ;;  %v10430_v18 = vld [vmem:[#allocation61_spill] sm:$0xff] }
 0x4f4   : > { %v4380_v28 = vadd.f32 1.0, %v4348_v24  ;;  %v4213_v22 = vmul.f32 %v10424_v43, %v4053_v49  ;;  %v3990_v30 = vmul.f32 %v3958_v23, %v9119_v36  ;;  %v3808_v53 = vmul.f32 1.0614054, %v9174_v29  ;;  %v10431_v49 = vld [vmem:[#allocation79_spill] sm:$0xff]  ;;  %v10433_v17 = vld [vmem:[#allocation73_spill] sm:$0xff]  ;;  %v10434_v43 = vld [vmem:[#allocation58_spill] sm:$0xff] }
 0x4f5   : > { %v3492_v25 = vmul.f32 %v10423_v35, %v10422_v44  ;;  %v3899_v41 = vadd.f32 1.4214138, %v3867_v55  ;;  %vm3494_vm11 = vweird.f32 %v10425_v45  ;;  %vm3495_vm13 = vweird.f32 %v10423_v35 }
 0x4f6   : > { %v4412_v33 = vmul.f32 %v4380_v28, %v3164_v50  ;;  %v4245_v20 = vsub.f32 1.0, %v4213_v22  ;;  %v4022_v27 = vadd.f32 0.2548296, %v3990_v30  ;;  %v3840_v6 = vadd.f32 -1.4531521, %v3808_v53  ;;  %vm9181_vm14 = vmor %vm3494_vm11, %vm3495_vm13 }
 0x4f7   : > { %v3493_v15 = vadd.f32 %v10423_v35, %v3492_v25  ;;  %v3931_v13 = vmul.f32 %v3899_v41, %v9149_v46  ;;  %v3498_v10 = vand.u32 2147483647, %v10425_v45  ;;  %v3500_v59 = vand.u32 2147483648, %v10425_v45 }
 0x4f8   : > { %4641 = vmatmul.f32.gmra.mxu3 %v4412_v33  ;;  %vm4277_vm15 = vcmp.lt.f32.partialorder %v10428_v16, 0.0  ;;  %v4309_v54 = vsub.f32 0.0, %v4245_v20  ;;  %v4054_v50 = vmul.f32 %v4022_v27, %v9119_v36  ;;  %v3158_v31 = vmul.f32 0.5, %v10429_v21  ;;  %v10437_v27 = vld [vmem:[#allocation11_spill] sm:$0xff] }
 0x4f9   : > { %v3497_v57 = vsel %vm9181_vm14, %v10423_v35, %v3493_v15  ;;  %v3963_v9 = vadd.f32 -0.28449672, %v3931_v13  ;;  %v3872_v5 = vmul.f32 %v3840_v6, %v9174_v29  ;;  %v3501_v0 = vor.u32 1.1754944e-38, %v3500_v59 }
 0x4fa   : > { %v4341_v40 = vsel %vm4277_vm15, %v4309_v54, %v4245_v20  ;;  %v4214_v4 = vmul.f32 %v10430_v18, %v4054_v50  ;;  %vm3499_vm0 = vcmp.eq.f32.partialorder %v3498_v10, 8.507059e+37  ;;  %v10432_v23 = vsub.f32 1.0, %v10431_v49  ;;  %v10438_v10 = vld [vmem:[#allocation7_spill] sm:$0xff]  ;;  %v10443_v49 = vld [vmem:[#allocation60_spill] sm:$0xff] }
 0x4fb   : > { %v4373_v55 = vadd.f32 1.0, %v4341_v40  ;;  %v3995_v36 = vmul.f32 %v3963_v9, %v9149_v46  ;;  %v3904_v34 = vadd.f32 1.4214138, %v3872_v5  ;;  %v9199_v44 = vsel %vm3499_vm0, %v3501_v0, %v3497_v57  ;;  %v10439_v57 = vld [vmem:[#allocation62_spill] sm:$0xff]  ;;  %v10442_v18 = vld [vmem:[#allocation75_spill] sm:$0xff] }
 0x4fc   : > { %v3507_v24 = vmul.f32 %v10433_v17, %v10432_v23  ;;  %v4246_v35 = vsub.f32 1.0, %v4214_v4  ;;  %v3801_v25 = vmul.f32 1.0614054, %v9199_v44  ;;  %vm3509_vm1 = vweird.f32 %v10434_v43 }
 0x4fd   : > { %v4405_v22 = vmul.f32 %v4373_v55, %v3157_v63  ;;  %v4027_v30 = vadd.f32 0.2548296, %v3995_v36  ;;  %v3936_v41 = vmul.f32 %v3904_v34, %v9174_v29  ;;  %vm3510_vm2 = vweird.f32 %v10433_v17 }
 0x4fe   : > { %v3508_v28 = vadd.f32 %v10433_v17, %v3507_v24  ;;  %v4310_v53 = vsub.f32 0.0, %v4246_v35  ;;  %v3833_v15 = vadd.f32 -1.4531521, %v3801_v25  ;;  %vm9206_vm3 = vmor %vm3509_vm1, %vm3510_vm2  ;;  %v3513_v33 = vand.u32 2147483647, %v10434_v43 }
 0x4ff   : > { %v3515_v20 = vand.u32 2147483648, %v10434_v43  ;;  %4515 = vmatmul.f32.gmra.mxu0 %v4405_v22  ;;  %vm4278_vm4 = vcmp.lt.f32.partialorder %v10437_v27, 0.0  ;;  %v4059_v63 = vmul.f32 %v4027_v30, %v9149_v46  ;;  %v3968_v13 = vadd.f32 -0.28449672, %v3936_v41  ;;  %v10440_v46 = vld [vmem:[#allocation82_spill] sm:$0xff] }
 0x500   : > { %v3512_v6 = vsel %vm9206_vm3, %v10433_v17, %v3508_v28  ;;  %v4342_v62 = vsel %vm4278_vm4, %v4310_v53, %v4246_v35  ;;  %v3163_v59 = vmul.f32 0.5, %v10438_v10  ;;  %v3865_v16 = vmul.f32 %v3833_v15, %v9199_v44  ;;  %v10446_v30 = vld [vmem:[#allocation10_spill] sm:$0xff] }
 0x501   : > { %v3516_v54 = vor.u32 1.1754944e-38, %v3515_v20  ;;  %v4374_v50 = vadd.f32 1.0, %v4342_v62  ;;  %v4219_v21 = vmul.f32 %v10439_v57, %v4059_v63  ;;  %v4000_v9 = vmul.f32 %v3968_v13, %v9174_v29  ;;  %v10447_v41 = vld [vmem:[#allocation30_spill] sm:$0xff]  ;;  %v10450_v57 = vld [vmem:[#allocation64_spill] sm:$0xff] }
 0x502   : > { %vm3514_vm5 = vcmp.eq.f32.partialorder %v3513_v33, 8.507059e+37  ;;  %v3897_v5 = vadd.f32 1.4214138, %v3865_v16  ;;  %v10441_v40 = vsub.f32 1.0, %v10440_v46  ;;  %vm3584_vm6 = vweird.f32 %v10443_v49  ;;  %v10448_v20 = vld [vmem:[#allocation66_spill] sm:$0xff] }
 0x503   : > { %v9221_v0 = vsel %vm3514_vm5, %v3516_v54, %v3512_v6  ;;  %v4406_v23 = vmul.f32 %v4374_v50, %v3158_v31  ;;  %v4251_v17 = vsub.f32 1.0, %v4219_v21  ;;  %v4032_v24 = vadd.f32 0.2548296, %v4000_v9 }
 0x504   : > { %v3582_v4 = vmul.f32 %v10442_v18, %v10441_v40  ;;  %v3802_v55 = vmul.f32 1.0614054, %v9221_v0  ;;  %v3929_v36 = vmul.f32 %v3897_v5, %v9199_v44  ;;  %vm3585_vm7 = vweird.f32 %v10442_v18 }
 0x505   : > { %v3588_v35 = vand.u32 2147483647, %v10443_v49  ;;  %4556 = vmatmul.f32.gmra.mxu1 %v4406_v23  ;;  %v4315_v25 = vsub.f32 0.0, %v4251_v17  ;;  %v4064_v28 = vmul.f32 %v4032_v24, %v9174_v29  ;;  %vm9233_vm8 = vmor %vm3584_vm6, %vm3585_vm7  ;;  %v3590_v31 = vand.u32 2147483648, %v10443_v49 }
 0x506   : > { %v3583_v34 = vadd.f32 %v10442_v18, %v3582_v4  ;;  %v3834_v43 = vadd.f32 -1.4531521, %v3802_v55  ;;  %vm4283_vm9 = vcmp.lt.f32.partialorder %v10446_v30, 0.0  ;;  %v3168_v53 = vmul.f32 0.5, %v10447_v41  ;;  %v10451_v4 = vld [vmem:[#allocation29_spill] sm:$0xff]  ;;  %v10454_v55 = vld [vmem:[#allocation42_spill] sm:$0xff] }
 0x507   : > { %v3961_v15 = vadd.f32 -0.28449672, %v3929_v36  ;;  %v4347_v33 = vsel %vm4283_vm9, %v4315_v25, %v4251_v17  ;;  %v4224_v27 = vmul.f32 %v10448_v20, %v4064_v28  ;;  %v3591_v63 = vor.u32 1.1754944e-38, %v3590_v31  ;;  %v10455_v28 = vld [vmem:[#allocation78_spill] sm:$0xff] }
 0x508   : > { %v3587_v45 = vsel %vm9233_vm8, %v10442_v18, %v3583_v34  ;;  %v3866_v29 = vmul.f32 %v3834_v43, %v9221_v0  ;;  %v4379_v13 = vadd.f32 1.0, %v4347_v33  ;;  %vm3589_vm12 = vcmp.eq.f32.partialorder %v3588_v35, 8.507059e+37  ;;  %v10456_v30 = vld [vmem:[#allocation94_spill] sm:$0xff]  ;;  %v10459_v33 = vld [vmem:[#allocation71_spill] sm:$0xff] }
 0x509   : > { %v3993_v6 = vmul.f32 %v3961_v15, %v9199_v44  ;;  %v10449_v62 = vsub.f32 1.0, %v8722_v60  ;;  %v4256_v16 = vsub.f32 1.0, %v4224_v27  ;;  %v9249_v50 = vsel %vm3589_vm12, %v3591_v63, %v3587_v45  ;;  %v10458_v15 = vld [vmem:[#allocation87_spill] sm:$0xff] }
 0x50a   : > { %v3898_v54 = vadd.f32 1.4214138, %v3866_v29  ;;  %vm3659_vm10 = vweird.f32 %v10450_v57  ;;  %v4411_v21 = vmul.f32 %v4379_v13, %v3163_v59  ;;  %v3807_v5 = vmul.f32 1.0614054, %v9249_v50 }
 0x50b   : > { %v3657_v10 = vmul.f32 %v8677_v19, %v10449_v62  ;;  %v4025_v9 = vadd.f32 0.2548296, %v3993_v6  ;;  %v4320_v40 = vsub.f32 0.0, %v4256_v16  ;;  %vm3660_vm11 = vweird.f32 %v8677_v19 }
 0x50c   : > { %v3930_v18 = vmul.f32 %v3898_v54, %v9221_v0  ;;  %v3663_v60 = vand.u32 2147483647, %v10450_v57  ;;  %4600 = vmatmul.f32.gmra.mxu2 %v4411_v21  ;;  %vm4288_vm13 = vcmp.lt.f32.partialorder %v10451_v4, 0.0  ;;  %v3839_v23 = vadd.f32 -1.4531521, %v3807_v5  ;;  %vm9259_vm14 = vmor %vm3659_vm10, %vm3660_vm11 }
 0x50d   : > { %v3658_v46 = vadd.f32 %v8677_v19, %v3657_v10  ;;  %v4057_v49 = vmul.f32 %v4025_v9, %v9199_v44  ;;  %v3665_v17 = vand.u32 2147483648, %v10450_v57  ;;  %v4352_v24 = vsel %vm4288_vm13, %v4320_v40, %v4256_v16  ;;  %v10462_v57 = vld [vmem:[#allocation36_spill] sm:$0xff]  ;;  %v10463_v40 = vld [vmem:[#allocation51_spill] sm:$0xff] }
 0x50e   : > { %v3161_v36 = vmul.f32 0.5, %v10454_v55  ;;  %v3962_v34 = vadd.f32 -0.28449672, %v3930_v18  ;;  %v4384_v25 = vadd.f32 1.0, %v4352_v24  ;;  %v3871_v44 = vmul.f32 %v3839_v23, %v9249_v50  ;;  %v10464_v23 = vld [vmem:[#allocation81_spill] sm:$0xff] }
 0x50f   : > { %v3662_v35 = vsel %vm9259_vm14, %v8677_v19, %v3658_v46  ;;  %v4217_v43 = vmul.f32 %v10455_v28, %v4057_v49  ;;  %v3666_v22 = vor.u32 1.1754944e-38, %v3665_v17  ;;  %vm3664_vm15 = vcmp.eq.f32.partialorder %v3663_v60, 8.507059e+37  ;;  %v10468_v28 = vld [vmem:[#allocation80_spill] sm:$0xff] }
 0x510   : > { %v3994_v31 = vmul.f32 %v3962_v34, %v9221_v0  ;;  %v10457_v41 = vsub.f32 1.0, %v10456_v30  ;;  %vm3554_vm0 = vweird.f32 %v10459_v33  ;;  %v4416_v20 = vmul.f32 %v4384_v25, %v3168_v53 }
 0x511   : > { %v4249_v27 = vsub.f32 1.0, %v4217_v43  ;;  %v3903_v29 = vadd.f32 1.4214138, %v3871_v44  ;;  %v9275_v63 = vsel %vm3664_vm15, %v3666_v22, %v3662_v35  ;;  %vm3555_vm1 = vweird.f32 %v10458_v15  ;;  %v10467_v35 = vld [vmem:[#allocation95_spill] sm:$0xff] }
 0x512   : > { %v3552_v45 = vmul.f32 %v10458_v15, %v10457_v41  ;;  %v4026_v19 = vadd.f32 0.2548296, %v3994_v31  ;;  %v3812_v13 = vmul.f32 1.0614054, %v9275_v63  ;;  %4644 = vmatmul.f32.gmra.mxu3 %v4416_v20  ;;  %vm9281_vm2 = vmor %vm3554_vm0, %vm3555_vm1  ;;  %v3558_v53 = vand.u32 2147483647, %v10459_v33 }
 0x513   : > { %v4313_v62 = vsub.f32 0.0, %v4249_v27  ;;  %v3935_v10 = vmul.f32 %v3903_v29, %v9249_v50  ;;  %v3560_v54 = vand.u32 2147483648, %v10459_v33  ;;  %vm4281_vm3 = vcmp.lt.f32.partialorder %v10462_v57, 0.0  ;;  %v10471_v29 = vld [vmem:[#allocation27_spill] sm:$0xff] }
 0x514   : > { %v3553_v6 = vadd.f32 %v10458_v15, %v3552_v45  ;;  %v4058_v21 = vmul.f32 %v4026_v19, %v9221_v0  ;;  %v3844_v9 = vadd.f32 -1.4531521, %v3812_v13  ;;  %v3162_v18 = vmul.f32 0.5, %v10463_v40  ;;  %v10465_v0 = vld [vmem:[#allocation98_spill] sm:$0xff]  ;;  %v10472_v19 = vld [vmem:[#allocation25_spill] sm:$0xff] }
 0x515   : > { %v4345_v46 = vsel %vm4281_vm3, %v4313_v62, %v4249_v27  ;;  %v3967_v60 = vadd.f32 -0.28449672, %v3935_v10  ;;  %v3561_v4 = vor.u32 1.1754944e-38, %v3560_v54  ;;  %vm3559_vm4 = vcmp.eq.f32.partialorder %v3558_v53, 8.507059e+37  ;;  %v10481_v27 = vld [vmem:[#allocation90_spill] sm:$0xff] }
 0x516   : > { %v3557_v5 = vsel %vm9281_vm2, %v10458_v15, %v3553_v6  ;;  %v4377_v49 = vadd.f32 1.0, %v4345_v46  ;;  %v4218_v59 = vmul.f32 %v10464_v23, %v4058_v21  ;;  %v3876_v17 = vmul.f32 %v3844_v9, %v9275_v63  ;;  %v10473_v21 = vld [vmem:[#allocation84_spill] sm:$0xff]  ;;  %v10475_v46 = vld [vmem:[#allocation97_spill] sm:$0xff] }
 0x517   : > { %v3999_v24 = vmul.f32 %v3967_v60, %v9249_v50  ;;  %v9296_v55 = vsel %vm3559_vm4, %v3561_v4, %v3557_v5  ;;  %v10466_v34 = vsub.f32 1.0, %v10465_v0  ;;  %vm3569_vm5 = vweird.f32 %v10468_v28 }
 0x518   : > { %v4409_v43 = vmul.f32 %v4377_v49, %v3161_v36  ;;  %v4250_v44 = vsub.f32 1.0, %v4218_v59  ;;  %v3908_v22 = vadd.f32 1.4214138, %v3876_v17  ;;  %v3805_v31 = vmul.f32 1.0614054, %v9296_v55  ;;  %v10476_v49 = vld [vmem:[#allocation85_spill] sm:$0xff] }
 0x519   : > { %v3567_v25 = vmul.f32 %v10467_v35, %v10466_v34  ;;  %v4031_v30 = vadd.f32 0.2548296, %v3999_v24  ;;  %vm3570_vm6 = vweird.f32 %v10467_v35  ;;  %v3573_v15 = vand.u32 2147483647, %v10468_v28 }
 0x51a   : > { %4518 = vmatmul.f32.gmra.mxu0 %v4409_v43  ;;  %v4314_v45 = vsub.f32 0.0, %v4250_v44  ;;  %v3940_v33 = vmul.f32 %v3908_v22, %v9275_v63  ;;  %v3837_v20 = vadd.f32 -1.4531521, %v3805_v31  ;;  %vm9307_vm7 = vmor %vm3569_vm5, %vm3570_vm6  ;;  %v3575_v36 = vand.u32 2147483648, %v10468_v28 }
 0x51b   : > { %v3568_v41 = vadd.f32 %v10467_v35, %v3567_v25  ;;  %vm4282_vm8 = vcmp.lt.f32.partialorder %v10471_v29, 0.0  ;;  %v3167_v13 = vmul.f32 0.5, %v10472_v19  ;;  %v4063_v6 = vmul.f32 %v4031_v30, %v9249_v50 }
 0x51c   : > { %v4346_v10 = vsel %vm4282_vm8, %v4314_v45, %v4250_v44  ;;  %v3972_v16 = vadd.f32 -0.28449672, %v3940_v33  ;;  %v3869_v53 = vmul.f32 %v3837_v20, %v9296_v55  ;;  %v3576_v54 = vor.u32 1.1754944e-38, %v3575_v36  ;;  %v10480_v44 = vld [vmem:[#allocation45_spill] sm:$0xff] }
 0x51d   : > { %v3572_v62 = vsel %vm9307_vm7, %v10467_v35, %v3568_v41  ;;  %v4378_v57 = vadd.f32 1.0, %v4346_v10  ;;  %v4223_v9 = vmul.f32 %v10473_v21, %v4063_v6  ;;  %vm3574_vm9 = vcmp.eq.f32.partialorder %v3573_v15, 8.507059e+37  ;;  %v10477_v35 = vld [vmem:[#allocation47_spill] sm:$0xff]  ;;  %v10483_v6 = vld [vmem:[#allocation40_spill] sm:$0xff] }
 0x51e   : > { %v10474_v5 = vsub.f32 1.0, %v8768_v1  ;;  %v4004_v60 = vmul.f32 %v3972_v16, %v9275_v63  ;;  %v3901_v50 = vadd.f32 1.4214138, %v3869_v53  ;;  %v9324_v4 = vsel %vm3574_vm9, %v3576_v54, %v3572_v62  ;;  %v10484_v16 = vld [vmem:[#allocation91_spill] sm:$0xff] }
 0x51f   : > { %vm3644_vm12 = vweird.f32 %v10476_v49  ;;  %v4410_v23 = vmul.f32 %v4378_v57, %v3162_v18  ;;  %v4255_v59 = vsub.f32 1.0, %v4223_v9  ;;  %v3806_v17 = vmul.f32 1.0614054, %v9324_v4 }
 0x520   : > { %v3642_v40 = vmul.f32 %v10475_v46, %v10474_v5  ;;  %v4036_v0 = vadd.f32 0.2548296, %v4004_v60  ;;  %v3933_v34 = vmul.f32 %v3901_v50, %v9296_v55  ;;  %vm3645_vm10 = vweird.f32 %v10475_v46 }
 0x521   : > { %v3648_v1 = vand.u32 2147483647, %v10476_v49  ;;  %4559 = vmatmul.f32.gmra.mxu1 %v4410_v23  ;;  %vm4287_vm11 = vcmp.lt.f32.partialorder %v10477_v35, 0.0  ;;  %v4319_v25 = vsub.f32 0.0, %v4255_v59  ;;  %v3838_v28 = vadd.f32 -1.4531521, %v3806_v17  ;;  %vm9333_vm13 = vmor %vm3644_vm12, %vm3645_vm10 }
 0x522   : > { %v3643_v24 = vadd.f32 %v10475_v46, %v3642_v40  ;;  %v3650_v18 = vand.u32 2147483648, %v10476_v49  ;;  %v3172_v22 = vmul.f32 0.5, %v10480_v44  ;;  %v4068_v31 = vmul.f32 %v4036_v0, %v9275_v63  ;;  %v10485_v40 = vld [vmem:[#allocation54_spill] sm:$0xff] }
 0x523   : > { %v3965_v30 = vadd.f32 -0.28449672, %v3933_v34  ;;  %v4351_v15 = vsel %vm4287_vm11, %v4319_v25, %v4255_v59  ;;  %v3870_v45 = vmul.f32 %v3838_v28, %v9324_v4  ;;  %vm3649_vm14 = vcmp.eq.f32.partialorder %v3648_v1, 8.507059e+37  ;;  %v10487_v34 = vld [vmem:[#allocation39_spill] sm:$0xff] }
 0x524   : > { %v3647_v41 = vsel %vm9333_vm13, %v10475_v46, %v3643_v24  ;;  %v3651_v33 = vor.u32 1.1754944e-38, %v3650_v18  ;;  %v4383_v20 = vadd.f32 1.0, %v4351_v15  ;;  %v4228_v36 = vmul.f32 %v10481_v27, %v4068_v31 }
 0x525   : > { %v3997_v29 = vmul.f32 %v3965_v30, %v9296_v55  ;;  %v10482_v19 = vsub.f32 1.0, %v8781_v32  ;;  %v3902_v63 = vadd.f32 1.4214138, %v3870_v45  ;;  %vm3719_vm15 = vweird.f32 %v10484_v16 }
 0x526   : > { %v9349_v10 = vsel %vm3649_vm14, %v3651_v33, %v3647_v41  ;;  %vm3720_vm0 = vweird.f32 %v10483_v6  ;;  %v4415_v53 = vmul.f32 %v4383_v20, %v3167_v13  ;;  %v4260_v54 = vsub.f32 1.0, %v4228_v36  ;;  %v10486_v13 = vld [vmem:[#allocation52_spill] sm:$0xff]  ;;  %v10489_v36 = vld [vmem:[#allocation55_spill] sm:$0xff] }
 0x527   : > { %v3717_v62 = vmul.f32 %v10483_v6, %v10482_v19  ;;  %v4029_v57 = vadd.f32 0.2548296, %v3997_v29  ;;  %v3811_v21 = vmul.f32 1.0614054, %v9349_v10  ;;  %v3934_v9 = vmul.f32 %v3902_v63, %v9324_v4  ;;  %vm3721_vm2 = vmor %vm3719_vm15, %vm3720_vm0  ;;  %v10490_v29 = vld [vmem:[#allocation63_spill] sm:$0xff] }
 0x528   : > { %v3723_v32 = vand.u32 2147483647, %v10484_v16  ;;  %v3725_v46 = vand.u32 2147483648, %v10484_v16  ;;  %4603 = vmatmul.f32.gmra.mxu2 %v4415_v53  ;;  %vm4292_vm1 = vcmp.lt.f32.partialorder %v10485_v40, 0.0  ;;  %v4324_v60 = vsub.f32 0.0, %v4260_v54 }
 0x529   : > { %v3718_v5 = vadd.f32 %v10483_v6, %v3717_v62  ;;  %v4061_v50 = vmul.f32 %v4029_v57, %v9296_v55  ;;  %v3843_v49 = vadd.f32 -1.4531521, %v3811_v21  ;;  %v3165_v23 = vmul.f32 0.5, %v10486_v13  ;;  %v10493_v21 = vld [vmem:[#allocation31_spill] sm:$0xff] }
 0x52a   : > { %v3966_v59 = vadd.f32 -0.28449672, %v3934_v9  ;;  %v3726_v24 = vor.u32 1.1754944e-38, %v3725_v46  ;;  %v4356_v0 = vsel %vm4292_vm1, %v4324_v60, %v4260_v54  ;;  %vm3724_vm3 = vcmp.eq.f32.partialorder %v3723_v32, 8.507059e+37 }
 0x52b   : > { %v3722_v17 = vsel %vm3721_vm2, %v10483_v6, %v3718_v5  ;;  %v4221_v1 = vmul.f32 %v10487_v34, %v4061_v50  ;;  %v3875_v35 = vmul.f32 %v3843_v49, %v9349_v10  ;;  %v4388_v25 = vadd.f32 1.0, %v4356_v0 }
 0x52c   : > { %v3998_v28 = vmul.f32 %v3966_v59, %v9324_v4  ;;  %v9367_v55 = vsel %vm3724_vm3, %v3726_v24, %v3722_v17  ;;  %v10488_v43 = vsub.f32 1.0, %v8797_v48  ;;  %vm3614_vm4 = vweird.f32 %v8711_v14  ;;  %v10495_v17 = vld [vmem:[#allocation67_spill] sm:$0xff] }
 0x52d   : > { %v4253_v44 = vsub.f32 1.0, %v4221_v1  ;;  %v3907_v31 = vadd.f32 1.4214138, %v3875_v35  ;;  %v3816_v30 = vmul.f32 1.0614054, %v9367_v55  ;;  %v4420_v41 = vmul.f32 %v4388_v25, %v3172_v22 }
 0x52e   : > { %v3612_v18 = vmul.f32 %v8770_v12, %v10488_v43  ;;  %v4030_v15 = vadd.f32 0.2548296, %v3998_v28  ;;  %vm3615_vm5 = vweird.f32 %v8770_v12  ;;  %v3618_v48 = vand.u32 2147483647, %v8711_v14  ;;  %v10498_v43 = vld [vmem:[#allocation65_spill] sm:$0xff] }
 0x52f   : > { %v4317_v33 = vsub.f32 0.0, %v4253_v44  ;;  %v3939_v20 = vmul.f32 %v3907_v31, %v9349_v10  ;;  %v3848_v27 = vadd.f32 -1.4531521, %v3816_v30  ;;  %4647 = vmatmul.f32.gmra.mxu3 %v4420_v41  ;;  %vm4285_vm6 = vcmp.lt.f32.partialorder %v10489_v36, 0.0  ;;  %vm9381_vm7 = vmor %vm3614_vm4, %vm3615_vm5  ;;  %v10499_v30 = vld [vmem:[#allocation104_spill] sm:$0xff] }
 0x530   : > { %v3613_v45 = vadd.f32 %v8770_v12, %v3612_v18  ;;  %v3166_v19 = vmul.f32 0.5, %v10490_v29  ;;  %v4062_v6 = vmul.f32 %v4030_v15, %v9324_v4  ;;  %v3620_v62 = vand.u32 2147483648, %v8711_v14 }
 0x531   : > { %v4349_v63 = vsel %vm4285_vm6, %v4317_v33, %v4253_v44  ;;  %v3971_v16 = vadd.f32 -0.28449672, %v3939_v20  ;;  %v3880_v53 = vmul.f32 %v3848_v27, %v9367_v55  ;;  %vm3619_vm8 = vcmp.eq.f32.partialorder %v3618_v48, 8.507059e+37 }
 0x532   : > { %v3617_v54 = vsel %vm9381_vm7, %v8770_v12, %v3613_v45  ;;  %v4381_v57 = vadd.f32 1.0, %v4349_v63  ;;  %v4222_v9 = vmul.f32 %v10493_v21, %v4062_v6  ;;  %v3621_v5 = vor.u32 1.1754944e-38, %v3620_v62 }
 0x533   : > { %v4003_v4 = vmul.f32 %v3971_v16, %v9349_v10  ;;  %v3912_v32 = vadd.f32 1.4214138, %v3880_v53  ;;  %v10494_v46 = vsub.f32 1.0, %v8832_v7  ;;  %vm3629_vm9 = vweird.f32 %v8752_v26 }
 0x534   : > { %v4413_v40 = vmul.f32 %v4381_v57, %v3165_v23  ;;  %v4254_v60 = vsub.f32 1.0, %v4222_v9  ;;  %v9396_v50 = vsel %vm3619_vm8, %v3621_v5, %v3617_v54  ;;  %vm3630_vm12 = vweird.f32 %v8808_v51  ;;  %v10503_v5 = vld [vmem:[#allocation13_spill] sm:$0xff] }
 0x535   : > { %v3627_v14 = vmul.f32 %v8808_v51, %v10494_v46  ;;  %v4035_v12 = vadd.f32 0.2548296, %v4003_v4  ;;  %v3944_v49 = vmul.f32 %v3912_v32, %v9367_v55  ;;  %v3809_v13 = vmul.f32 1.0614054, %v9396_v50  ;;  %vm9403_vm11 = vmor %vm3629_vm9, %vm3630_vm12 }
 0x536   : > { %4521 = vmatmul.f32.gmra.mxu0 %v4413_v40  ;;  %vm4286_vm10 = vcmp.lt.f32.partialorder %v10495_v17, 0.0  ;;  %v4318_v7 = vsub.f32 0.0, %v4254_v60  ;;  %v3633_v23 = vand.u32 2147483647, %v8752_v26  ;;  %v3635_v0 = vand.u32 2147483648, %v8752_v26 }
 0x537   : > { %v3628_v59 = vadd.f32 %v8808_v51, %v3627_v14  ;;  %v4067_v34 = vmul.f32 %v4035_v12, %v9349_v10  ;;  %v3976_v1 = vadd.f32 -0.28449672, %v3944_v49  ;;  %v3841_v35 = vadd.f32 -1.4531521, %v3809_v13  ;;  %v10505_v49 = vld [vmem:[#allocation102_spill] sm:$0xff] }
 0x538   : > { %v4350_v28 = vsel %vm4286_vm10, %v4318_v7, %v4254_v60  ;;  %v3171_v18 = vmul.f32 0.5, %v10498_v43  ;;  %vm3634_vm13 = vcmp.eq.f32.partialorder %v3633_v23, 8.507059e+37  ;;  %v3636_v44 = vor.u32 1.1754944e-38, %v3635_v0 }
 0x539   : > { %v3632_v25 = vsel %vm9403_vm11, %v8808_v51, %v3628_v59  ;;  %v4382_v31 = vadd.f32 1.0, %v4350_v28  ;;  %v4227_v41 = vmul.f32 %v10499_v30, %v4067_v34  ;;  %v4008_v15 = vmul.f32 %v3976_v1, %v9367_v55  ;;  %v10508_v34 = vld [vmem:[#allocation72_spill] sm:$0xff]  ;;  %v10509_v30 = vld [vmem:[#allocation74_spill] sm:$0xff] }
 0x53a   : > { %v3873_v26 = vmul.f32 %v3841_v35, %v9396_v50  ;;  %v9417_v45 = vsel %vm3634_vm13, %v3636_v44, %v3632_v25  ;;  %v10500_v10 = vsub.f32 1.0, %v8841_v42  ;;  %vm3704_vm14 = vweird.f32 %v8754_v38  ;;  %v10501_v42 = vld [vmem:[#allocation70_spill] sm:$0xff] }
 0x53b   : > { %vm3705_vm15 = vweird.f32 %v8813_v58  ;;  %v4414_v51 = vmul.f32 %v4382_v31, %v3166_v19  ;;  %v4259_v20 = vsub.f32 1.0, %v4227_v41  ;;  %v4040_v27 = vadd.f32 0.2548296, %v4008_v15  ;;  %v10502_v19 = vld [vmem:[#allocation68_spill] sm:$0xff] }
 0x53c   : > { %v3702_v33 = vmul.f32 %v8813_v58, %v10500_v10  ;;  %v3905_v48 = vadd.f32 1.4214138, %v3873_v26  ;;  %v3810_v36 = vmul.f32 1.0614054, %v9417_v45  ;;  %v3708_v6 = vand.u32 2147483647, %v8754_v38  ;;  %vm3706_vm1 = vmor %vm3704_vm14, %vm3705_vm15 }
 0x53d   : > { %v3710_v22 = vand.u32 2147483648, %v8754_v38  ;;  %4562 = vmatmul.f32.gmra.mxu1 %v4414_v51  ;;  %vm4291_vm0 = vcmp.lt.f32.partialorder %v10501_v42, 0.0  ;;  %v4323_v62 = vsub.f32 0.0, %v4259_v20  ;;  %v4072_v63 = vmul.f32 %v4040_v27, %v9367_v55  ;;  %v10510_v26 = vld [vmem:[#allocation106_spill] sm:$0xff] }
 0x53e   : > { %v3703_v29 = vadd.f32 %v8813_v58, %v3702_v33  ;;  %v3937_v16 = vmul.f32 %v3905_v48, %v9396_v50  ;;  %v3176_v53 = vmul.f32 0.5, %v10502_v19  ;;  %v3842_v54 = vadd.f32 -1.4531521, %v3810_v36 }
 0x53f   : > { %v3711_v21 = vor.u32 1.1754944e-38, %v3710_v22  ;;  %v4355_v9 = vsel %vm4291_vm0, %v4323_v62, %v4259_v20  ;;  %v4232_v4 = vmul.f32 %v10503_v5, %v4072_v63  ;;  %vm3709_vm2 = vcmp.eq.f32.partialorder %v3708_v6, 8.507059e+37 }
 0x540   : > { %v3707_v57 = vsel %vm3706_vm1, %v8813_v58, %v3703_v29  ;;  %v3969_v32 = vadd.f32 -0.28449672, %v3937_v16  ;;  %v4387_v46 = vadd.f32 1.0, %v4355_v9  ;;  %v3874_v14 = vmul.f32 %v3842_v54, %v9417_v45  ;;  %v10513_v16 = vld [vmem:[#allocation77_spill] sm:$0xff] }
 0x541   : > { %v9437_v55 = vsel %vm3709_vm2, %v3711_v21, %v3707_v57  ;;  %v10504_v40 = vsub.f32 1.0, %v8845_v37  ;;  %v4264_v60 = vsub.f32 1.0, %v4232_v4  ;;  %vm3779_vm3 = vweird.f32 %v10505_v49  ;;  %v10516_v21 = vld [vmem:[#allocation83_spill] sm:$0xff] }
 0x542   : > { %v4001_v12 = vmul.f32 %v3969_v32, %v9396_v50  ;;  %v3815_v58 = vmul.f32 1.0614054, %v9437_v55  ;;  %v4419_v13 = vmul.f32 %v4387_v46, %v3171_v18  ;;  %v3906_v59 = vadd.f32 1.4214138, %v3874_v14 }
 0x543   : > { %v3777_v38 = vmul.f32 %v8824_v3, %v10504_v40  ;;  %vm3780_vm4 = vweird.f32 %v8824_v3  ;;  %v4328_v7 = vsub.f32 0.0, %v4264_v60  ;;  %v3785_v0 = vand.u32 2147483648, %v10505_v49 }
 0x544   : > { %v4033_v24 = vadd.f32 0.2548296, %v4001_v12  ;;  %v3847_v23 = vadd.f32 -1.4531521, %v3815_v58  ;;  %vm9447_vm5 = vmor %vm3779_vm3, %vm3780_vm4  ;;  %4606 = vmatmul.f32.gmra.mxu2 %v4419_v13  ;;  %vm4296_vm6 = vcmp.lt.f32.partialorder %v10508_v34, 0.0  ;;  %v3938_v1 = vmul.f32 %v3906_v59, %v9417_v45 }
 0x545   : > { %v3778_v17 = vadd.f32 %v8824_v3, %v3777_v38  ;;  %v3783_v25 = vand.u32 2147483647, %v10505_v49  ;;  %v4360_v28 = vsel %vm4296_vm6, %v4328_v7, %v4264_v60  ;;  %v3786_v44 = vor.u32 1.1754944e-38, %v3785_v0  ;;  %v10517_v38 = vld [vmem:[#allocation112_spill] sm:$0xff]  ;;  %v10519_v7 = vld [vmem:[#allocation86_spill] sm:$0xff] }
 0x546   : > { %v4065_v43 = vmul.f32 %v4033_v24, %v9396_v50  ;;  %v3879_v18 = vmul.f32 %v3847_v23, %v9437_v55  ;;  %v4392_v31 = vadd.f32 1.0, %v4360_v28  ;;  %v3169_v41 = vmul.f32 0.5, %v10509_v30  ;;  %v10522_v28 = vld [vmem:[#allocation114_spill] sm:$0xff] }
 0x547   : > { %v3782_v35 = vsel %vm9447_vm5, %v8824_v3, %v3778_v17  ;;  %v3970_v15 = vadd.f32 -0.28449672, %v3938_v1  ;;  %vm3784_vm7 = vcmp.eq.f32.partialorder %v3783_v25, 8.507059e+37  ;;  %v10511_v3 = vsub.f32 1.0, %v8884_v61 }
 0x548   : > { %v4225_v10 = vmul.f32 %v10510_v26, %v4065_v43  ;;  %v3911_v33 = vadd.f32 1.4214138, %v3879_v18  ;;  %v9462_v51 = vsel %vm3784_vm7, %v3786_v44, %v3782_v35  ;;  %v4424_v27 = vmul.f32 %v4392_v31, %v3176_v53  ;;  %v10523_v18 = vld [vmem:[#allocation92_spill] sm:$0xff] }
 0x549   : > { %v3672_v20 = vmul.f32 %v8853_v52, %v10511_v3  ;;  %v4002_v50 = vmul.f32 %v3970_v15, %v9417_v45  ;;  %v3820_v48 = vmul.f32 1.0614054, %v9462_v51  ;;  %vm3674_vm8 = vweird.f32 %v8789_v8  ;;  %v10526_v26 = vld [vmem:[#allocation120_spill] sm:$0xff] }
 0x54a   : > { %v4257_v36 = vsub.f32 1.0, %v4225_v10  ;;  %v3943_v29 = vmul.f32 %v3911_v33, %v9437_v55  ;;  %vm3675_vm9 = vweird.f32 %v8853_v52  ;;  %4650 = vmatmul.f32.gmra.mxu3 %v4424_v27  ;;  %v3678_v61 = vand.u32 2147483647, %v8789_v8 }
 0x54b   : > { %v3673_v6 = vadd.f32 %v8853_v52, %v3672_v20  ;;  %v4034_v22 = vadd.f32 0.2548296, %v4002_v50  ;;  %v3852_v42 = vadd.f32 -1.4531521, %v3820_v48  ;;  %v10512_v62 = vsub.f32 1.0, %v8910_v47  ;;  %vm9478_vm10 = vmor %vm3674_vm8, %vm3675_vm9 }
 0x54c   : > { %vm4289_vm12 = vcmp.lt.f32.partialorder %v10513_v16, 0.0  ;;  %v4321_v19 = vsub.f32 0.0, %v4257_v36  ;;  %v3975_v53 = vadd.f32 -0.28449672, %v3943_v29  ;;  %v3680_v57 = vand.u32 2147483648, %v8789_v8 }
 0x54d   : > { %v3687_v63 = vmul.f32 %v8886_v39, %v10512_v62  ;;  %v3170_v9 = vmul.f32 0.5, %v10516_v21  ;;  %v4066_v5 = vmul.f32 %v4034_v22, %v9417_v45  ;;  %v3884_v4 = vmul.f32 %v3852_v42, %v9462_v51  ;;  %v10518_v45 = vld [vmem:[#allocation108_spill] sm:$0xff] }
 0x54e   : > { %v3677_v47 = vsel %vm9478_vm10, %v8853_v52, %v3673_v6  ;;  %v4353_v32 = vsel %vm4289_vm12, %v4321_v19, %v4257_v36  ;;  %v4007_v46 = vmul.f32 %v3975_v53, %v9437_v55  ;;  %vm3679_vm11 = vcmp.eq.f32.partialorder %v3678_v61, 8.507059e+37  ;;  %v10530_v53 = vld [vmem:[#allocation88_spill] sm:$0xff] }
 0x54f   : > { %v3681_v14 = vor.u32 1.1754944e-38, %v3680_v57  ;;  %v4385_v40 = vadd.f32 1.0, %v4353_v32  ;;  %v4226_v60 = vmul.f32 %v10517_v38, %v4066_v5  ;;  %v3916_v12 = vadd.f32 1.4214138, %v3884_v4  ;;  %v10535_v38 = vld [vmem:[#allocation116_spill] sm:$0xff] }
 0x550   : > { %v3688_v8 = vadd.f32 %v8886_v39, %v3687_v63  ;;  %v4039_v58 = vadd.f32 0.2548296, %v4007_v46  ;;  %vm3689_vm13 = vweird.f32 %v10518_v45  ;;  %vm3690_vm14 = vweird.f32 %v8886_v39  ;;  %v10532_v46 = vld [vmem:[#allocation26_spill] sm:$0xff] }
 0x551   : > { %v9492_v49 = vsel %vm3679_vm11, %v3681_v14, %v3677_v47  ;;  %v4417_v13 = vmul.f32 %v4385_v40, %v3169_v41  ;;  %v4258_v52 = vsub.f32 1.0, %v4226_v60  ;;  %v3948_v59 = vmul.f32 %v3916_v12, %v9462_v51  ;;  %vm9500_vm0 = vmor %vm3689_vm13, %vm3690_vm14  ;;  %v10524_v41 = vld [vmem:[#allocation121_spill] sm:$0xff]  ;;  %v10534_v14 = vld [vmem:[#allocation15_spill] sm:$0xff] }
 0x552   : > { %v3813_v17 = vmul.f32 1.0614054, %v9492_v49  ;;  %vm4290_vm15 = vcmp.lt.f32.partialorder %v10519_v7, 0.0  ;;  %v4071_v24 = vmul.f32 %v4039_v58, %v9437_v55  ;;  %v3693_v37 = vand.u32 2147483647, %v10518_v45 }
 0x553   : > { %v3695_v0 = vand.u32 2147483648, %v10518_v45  ;;  %4524 = vmatmul.f32.gmra.mxu0 %v4417_v13  ;;  %v4322_v34 = vsub.f32 0.0, %v4258_v52  ;;  %v3980_v1 = vadd.f32 -0.28449672, %v3948_v59  ;;  %v3692_v25 = vsel %vm9500_vm0, %v8886_v39, %v3688_v8  ;;  %v10527_v39 = vld [vmem:[#allocation49_spill] sm:$0xff] }
 0x554   : > { %v3845_v35 = vadd.f32 -1.4531521, %v3813_v17  ;;  %v4231_v43 = vmul.f32 %v10522_v28, %v4071_v24  ;;  %vm4295_vm1 = vcmp.lt.f32.partialorder %v10523_v18, 0.0  ;;  %vm3694_vm2 = vcmp.eq.f32.partialorder %v3693_v37, 8.507059e+37  ;;  %v10538_v37 = vld [vmem:[#allocation89_spill] sm:$0xff] }
 0x555   : > { %v3696_v55 = vor.u32 1.1754944e-38, %v3695_v0  ;;  %v4354_v44 = vsel %vm4290_vm15, %v4322_v34, %v4258_v52  ;;  %v4012_v31 = vmul.f32 %v3980_v1, %v9462_v51  ;;  %v10525_v15 = vsub.f32 1.0, %v10524_v41  ;;  %v10539_v34 = vld [vmem:[#allocation93_spill] sm:$0xff] }
 0x556   : > { %v3877_v30 = vmul.f32 %v3845_v35, %v9492_v49  ;;  %v4386_v33 = vadd.f32 1.0, %v4354_v44  ;;  %v4263_v3 = vsub.f32 1.0, %v4231_v43  ;;  %vm3764_vm3 = vweird.f32 %v10527_v39 }
 0x557   : > { %v3762_v10 = vmul.f32 %v10526_v26, %v10525_v15  ;;  %v9516_v20 = vsel %vm3694_vm2, %v3696_v55, %v3692_v25  ;;  %v4044_v27 = vadd.f32 0.2548296, %v4012_v31  ;;  %vm3765_vm4 = vweird.f32 %v10526_v26 }
 0x558   : > { %v3909_v50 = vadd.f32 1.4214138, %v3877_v30  ;;  %v3814_v48 = vmul.f32 1.0614054, %v9516_v20  ;;  %v4418_v29 = vmul.f32 %v4386_v33, %v3170_v9  ;;  %v4327_v6 = vsub.f32 0.0, %v4263_v3  ;;  %vm9525_vm5 = vmor %vm3764_vm3, %vm3765_vm4  ;;  %v10531_v9 = vld [vmem:[#allocation115_spill] sm:$0xff] }
 0x559   : > { %v3763_v36 = vadd.f32 %v10526_v26, %v3762_v10  ;;  %v3768_v22 = vand.u32 2147483647, %v10527_v39  ;;  %v4076_v42 = vmul.f32 %v4044_v27, %v9462_v51  ;;  %v3770_v16 = vand.u32 2147483648, %v10527_v39  ;;  %v10540_v30 = vld [vmem:[#allocation117_spill] sm:$0xff] }
 0x55a   : > { %v3941_v61 = vmul.f32 %v3909_v50, %v9492_v49  ;;  %v3846_v62 = vadd.f32 -1.4531521, %v3814_v48  ;;  %v3746_v19 = vsub.f32 1.0, %v9031_v11  ;;  %4565 = vmatmul.f32.gmra.mxu1 %v4418_v29  ;;  %v3175_v54 = vmul.f32 0.5, %v10530_v53  ;;  %v10544_v53 = vld [vmem:[#allocation96_spill] sm:$0xff] }
 0x55b   : > { %v4359_v57 = vsel %vm4295_vm1, %v4327_v6, %v4263_v3  ;;  %v3767_v51 = vsel %vm9525_vm5, %v10526_v26, %v3763_v36  ;;  %v4236_v5 = vmul.f32 %v10531_v9, %v4076_v42  ;;  %vm3769_vm6 = vcmp.eq.f32.partialorder %v3768_v22, 8.507059e+37  ;;  %v10543_v36 = vld [vmem:[#allocation113_spill] sm:$0xff]  ;;  %v4592_v9 = vpop.f32.mrf.mxu2 }
 0x55c   : > { %v4391_v21 = vadd.f32 1.0, %v4359_v57  ;;  %v3973_v4 = vadd.f32 -0.28449672, %v3941_v61  ;;  %v3878_v47 = vmul.f32 %v3846_v62, %v9516_v20  ;;  %v3771_v32 = vor.u32 1.1754944e-38, %v3770_v16  ;;  %v10545_v57 = vld [vmem:[#allocation99_spill] sm:$0xff] }
 0x55d   : > { %v10533_v11 = vsub.f32 1.0, %v10532_v46  ;;  %vm3734_vm7 = vweird.f32 %v10535_v38  ;;  %v4268_v12 = vsub.f32 1.0, %v4236_v5  ;;  %vm3735_vm8 = vweird.f32 %v10534_v14 }
 0x55e   : > { %v4423_v60 = vmul.f32 %v4391_v21, %v3175_v54  ;;  %v4005_v8 = vmul.f32 %v3973_v4, %v9492_v49  ;;  %v3910_v58 = vadd.f32 1.4214138, %v3878_v47  ;;  %v9544_v45 = vsel %vm3769_vm6, %v3771_v32, %v3767_v51  ;;  %vm9551_vm9 = vmor %vm3734_vm7, %vm3735_vm8  ;;  %v4551_v21 = vpop.f32.mrf.mxu1  ;;  %v10546_v4 = vld [vmem:[#allocation119_spill] sm:$0xff] }
 0x55f   : > { %v3732_v40 = vmul.f32 %v10534_v14, %v10533_v11  ;;  %v3738_v52 = vand.u32 2147483647, %v10535_v38  ;;  %v4332_v59 = vsub.f32 0.0, %v4268_v12  ;;  %v3819_v24 = vmul.f32 1.0614054, %v9544_v45  ;;  %v4633_v11 = vpop.f32.mrf.mxu3 }
 0x560   : > { %4609 = vmatmul.f32.gmra.mxu2 %v4423_v60  ;;  %v4037_v17 = vadd.f32 0.2548296, %v4005_v8  ;;  %v3942_v7 = vmul.f32 %v3910_v58, %v9516_v20  ;;  %v3180_v0 = vmul.f32 0.5, %v10538_v37  ;;  %vm4300_vm12 = vcmp.lt.f32.partialorder %v10539_v34, 0.0  ;;  %v10549_v34 = vld [vmem:[#allocation100_spill] sm:$0xff] }
 0x561   : > { %v3733_v13 = vadd.f32 %v10534_v14, %v3732_v40  ;;  %v3740_v35 = vand.u32 2147483648, %v10535_v38  ;;  %v4364_v25 = vsel %vm4300_vm12, %v4332_v59, %v4268_v12  ;;  %v3851_v18 = vadd.f32 -1.4531521, %v3819_v24  ;;  %v10548_v24 = vld [vmem:[#allocation101_spill] sm:$0xff] }
 0x562   : > { %v4069_v28 = vmul.f32 %v4037_v17, %v9492_v49  ;;  %v3974_v43 = vadd.f32 -0.28449672, %v3942_v7  ;;  %v4396_v55 = vadd.f32 1.0, %v4364_v25  ;;  %vm3739_vm10 = vcmp.eq.f32.partialorder %v3738_v52, 8.507059e+37 }
 0x563   : > { %v3737_v1 = vsel %vm9551_vm9, %v10534_v14, %v3733_v13  ;;  %v3741_v44 = vor.u32 1.1754944e-38, %v3740_v35  ;;  %v3747_v31 = vmul.f32 %v8976_v56, %v3746_v19  ;;  %v3883_v26 = vmul.f32 %v3851_v18, %v9544_v45  ;;  %v4510_v19 = vpop.f32.mrf.mxu0  ;;  %v10547_v13 = vld [vmem:[#allocation118_spill] sm:$0xff] }
 0x564   : > { %v4229_v41 = vmul.f32 %v10540_v30, %v4069_v28  ;;  %v4006_v15 = vmul.f32 %v3974_v43, %v9516_v20  ;;  %vm3749_vm11 = vweird.f32 %v8921_v2  ;;  %v4428_v10 = vmul.f32 %v4396_v55, %v3180_v0 }
 0x565   : > { %v9567_v33 = vsel %vm3739_vm10, %v3741_v44, %v3737_v1  ;;  %v3748_v49 = vadd.f32 %v8976_v56, %v3747_v31  ;;  %vm3750_vm13 = vweird.f32 %v8976_v56  ;;  %v3915_v27 = vadd.f32 1.4214138, %v3883_v26  ;;  %v4595_v31 = vpop.f32.mrf.mxu2 }
 0x566   : > { %v4261_v3 = vsub.f32 1.0, %v4229_v41  ;;  %v4038_v39 = vadd.f32 0.2548296, %v4006_v15  ;;  %vm9571_vm14 = vmor %vm3749_vm11, %vm3750_vm13  ;;  %v3755_v48 = vand.u32 2147483648, %v8921_v2  ;;  %v4106_v29 = vsub.f32 0.0, %v10543_v36  ;;  %4653 = vmatmul.f32.gmra.mxu3 %v4428_v10  ;;  %v4554_v44 = vpop.f32.mrf.mxu1  ;;  %v10550_v41 = vld [vmem:[#allocation43_spill] sm:$0xff] }
 0x567   : > { %v3817_v6 = vmul.f32 1.0614054, %v9567_v33  ;;  %v3752_v22 = vsel %vm9571_vm14, %v8976_v56, %v3748_v49  ;;  %v3753_v42 = vand.u32 2147483647, %v8921_v2  ;;  %v3947_v63 = vmul.f32 %v3915_v27, %v9544_v45 }
 0x568   : > { %v4325_v61 = vsub.f32 0.0, %v4261_v3  ;;  %v4070_v62 = vmul.f32 %v4038_v39, %v9516_v20  ;;  %v3756_v16 = vor.u32 1.1754944e-38, %v3755_v48  ;;  %v3173_v54 = vmul.f32 0.5, %v10544_v53  ;;  %v4636_v48 = vpop.f32.mrf.mxu3 }
 0x569   : > { %vm4293_vm15 = vcmp.lt.f32.partialorder %v10545_v57, 0.0  ;;  %v3849_v51 = vadd.f32 -1.4531521, %v3817_v6  ;;  %vm3754_vm0 = vcmp.eq.f32.partialorder %v3753_v42, 8.507059e+37  ;;  %v3979_v47 = vadd.f32 -0.28449672, %v3947_v63 }
 0x56a   : > { %v4357_v5 = vsel %vm4293_vm15, %v4325_v61, %v4261_v3  ;;  %v4230_v56 = vmul.f32 %v10546_v4, %v4070_v62  ;;  %v3757_v2 = vsel %vm3754_vm0, %v3756_v16, %v3752_v22  ;;  %v4552_v14 = vadd.f32 %v4551_v21, %v4510_v19  ;;  %v10551_v6 = vld [vmem:[#allocation105_spill] sm:$0xff]  ;;  %v10552_v63 = vld [vmem:[#allocation103_spill] sm:$0xff] }
 0x56b   : > { %v4389_v32 = vadd.f32 1.0, %v4357_v5  ;;  %v3881_v20 = vmul.f32 %v3849_v51, %v9567_v33  ;;  %v3818_v46 = vmul.f32 1.0614054, %v3757_v2  ;;  %v4011_v38 = vmul.f32 %v3979_v47, %v9544_v45  ;;  %v4513_v28 = vpop.f32.mrf.mxu0 }
 0x56c   : > { %v4262_v40 = vsub.f32 1.0, %v4230_v56  ;;  %v4593_v58 = vadd.f32 %v4592_v9, %v4552_v14  ;;  %v4197_v52 = vmul.f32 1.442695, %v10547_v13  ;;  %v4138_v59 = vmul.f32 %v4106_v29, %v10543_v36  ;;  %v10553_v56 = vld [vmem:[#allocation110_spill] sm:$0xff] }
 0x56d   : > { %v4421_v60 = vmul.f32 %v4389_v32, %v3173_v54  ;;  %v3913_v12 = vadd.f32 1.4214138, %v3881_v20  ;;  %v3850_v8 = vadd.f32 -1.4531521, %v3818_v46  ;;  %v4043_v7 = vadd.f32 0.2548296, %v4011_v38 }
 0x56e   : > { %v4326_v17 = vsub.f32 0.0, %v4262_v40  ;;  %vm4294_vm1 = vcmp.lt.f32.partialorder %v10548_v24, 0.0  ;;  %v4634_v0 = vadd.f32 %v4633_v11, %v4593_v58  ;;  %v3174_v1 = vmul.f32 0.5, %v10549_v34  ;;  %v10554_v32 = vld [vmem:[#allocation107_spill] sm:$0xff] }
 0x56f   : > { %4527 = vmatmul.f32.gmra.mxu0 %v4421_v60  ;;  %v3945_v23 = vmul.f32 %v3913_v12, %v9567_v33  ;;  %v3882_v37 = vmul.f32 %v3850_v8, %v3757_v2  ;;  %v4075_v25 = vmul.f32 %v4043_v7, %v9544_v45  ;;  %5546 = vpow2.f32 %v4197_v52  ;;  %v10556_v60 = vld [vmem:[#allocation109_spill] sm:$0xff] }
 0x570   : > { %v4358_v35 = vsel %vm4294_vm1, %v4326_v17, %v4262_v40  ;;  %4739 = vxpose.xlu1.b32.start [1/8] (short) (narrow) %v4634_v0, 8  ;;  %v4199_v30 = vmul.f32 1.442695, %v4138_v59  ;;  %v4555_v26 = vadd.f32 %v4554_v44, %v4513_v28  ;;  %vm4299_vm2 = vcmp.lt.f32.partialorder %v10551_v6, 0.0  ;;  %v10555_v40 = vld [vmem:[#allocation111_spill] sm:$0xff]  ;;  %v4639_v7 = vpop.f32.mrf.mxu3  ;;  %v4706_v6 = vld [vmem:[%s9857_s11 + $0x188] sm:$0xff] }
 0x571   : > { %v4390_v43 = vadd.f32 1.0, %v4358_v35  ;;  %v3977_v18 = vadd.f32 -0.28449672, %v3945_v23  ;;  %v3914_v55 = vadd.f32 1.4214138, %v3882_v37  ;;  %v4235_v15 = vmul.f32 %v10550_v41, %v4075_v25 }
 0x572   : > { %v4596_v27 = vadd.f32 %v4595_v31, %v4555_v26  ;;  %5548 = vpow2.f32 %v4199_v30  ;;  %v3179_v16 = vmul.f32 0.5, %v10552_v63  ;;  %vm4297_vm3 = vcmp.lt.f32.partialorder %v10553_v56, 0.0  ;;  %v4598_v52 = vpop.f32.mrf.mxu2  ;;  %v4697_v63 = vld [vmem:[%s9857_s11 + $0x140] sm:$0xff]  ;;  %v4682_v56 = vld [vmem:[%s9857_s11 + $0xc8] sm:$0xff] }
 0x573   : > { %v4422_v10 = vmul.f32 %v4390_v43, %v3174_v1  ;;  %v4009_v49 = vmul.f32 %v3977_v18, %v9567_v33  ;;  %v3946_v3 = vmul.f32 %v3914_v55, %v3757_v2  ;;  %v4267_v39 = vsub.f32 1.0, %v4235_v15 }
 0x574   : > { %v4637_v29 = vadd.f32 %v4636_v48, %v4596_v27  ;;  %v3177_v20 = vmul.f32 0.5, %v10554_v32  ;;  %vm4298_vm4 = vcmp.lt.f32.partialorder %v10555_v40, 0.0  ;;  %v3178_v12 = vmul.f32 0.5, %v10556_v60  ;;  %v4716_v27 = vld [vmem:[%s9857_s11 + $0x1d8] sm:$0xff]  ;;  %v4713_v48 = vld [vmem:[%s9857_s11 + $0x1c0] sm:$0xff]  ;;  %v4675_v32 = vld [vmem:[%s9857_s11 + $0x90] sm:$0xff] }
 0x575   : > { %4568 = vmatmul.f32.gmra.mxu1 %v4422_v10  ;;  %v4041_v45 = vadd.f32 0.2548296, %v4009_v49  ;;  %v3978_v50 = vadd.f32 -0.28449672, %v3946_v3  ;;  %v4331_v36 = vsub.f32 0.0, %v4267_v39  ;;  %v5547_v61 = vpop.eup %5546  ;;  %4843 = vmatpush.msrb.mxu3 %v4716_v27  ;;  %v4668_v40 = vld [vmem:[%s9857_s11 + $0x58] sm:$0xff] }
 0x576   : > { %4783 = vmatpush.msrb.mxu0 %v4713_v48  ;;  %v4666_v60 = vld [vmem:[%s9857_s11 + $0x48] sm:$0xff]  ;;  %v4685_v27 = vld [vmem:[%s9857_s11 + $0xe0] sm:$0xff]  ;;  %v4680_v48 = vld [vmem:[%s9857_s11 + $0xb8] sm:$0xff]  ;;  %vm4771_vm5 = vcmask 523264   ;;  %vm4947_vm6 = vcmask 1043456  }
 0x577   : > { %v4073_v22 = vmul.f32 %v4041_v45, %v9567_v33  ;;  %v4010_v42 = vmul.f32 %v3978_v50, %v3757_v2  ;;  %v4363_v62 = vsel %vm4299_vm2, %v4331_v36, %v4267_v39  ;;  %v4715_v45 = vld [vmem:[%s9857_s11 + $0x1d0] sm:$0xff]  ;;  %v4714_v50 = vld [vmem:[%s9857_s11 + $0x1c8] sm:$0xff]  ;;  %v4708_v36 = vld [vmem:[%s9857_s11 + $0x198] sm:$0xff] }
 0x578   : > { %v4395_v19 = vadd.f32 1.0, %v4363_v62  ;;  %4740 = vxpose.xlu1.b32.cont [2/8] (short) (narrow) %v4637_v29, 8  ;;  %v5549_v9 = vpop.eup %5548  ;;  %4823 = vmatpush.msrb.mxu2 %v4715_v45  ;;  %v4707_v29 = vld [vmem:[%s9857_s11 + $0x190] sm:$0xff]  ;;  %v4698_v62 = vld [vmem:[%s9857_s11 + $0x148] sm:$0xff] }
 0x579   : > { %v4233_v53 = vmul.f32 %v5547_v61, %v4073_v22  ;;  %v4042_v54 = vadd.f32 0.2548296, %v4010_v42  ;;  %4803 = vmatpush.msrb.mxu1 %v4714_v50  ;;  %v4705_v22 = vld [vmem:[%s9857_s11 + $0x180] sm:$0xff]  ;;  %v4700_v42 = vld [vmem:[%s9857_s11 + $0x158] sm:$0xff]  ;;  %4844 = vmatpush.msrb.mxu3 %v4708_v36  ;;  %v4699_v61 = vld [vmem:[%s9857_s11 + $0x150] sm:$0xff] }
 0x57a   : > { %v4427_v57 = vmul.f32 %v4395_v19, %v3179_v16  ;;  %4824 = vmatpush.msrb.mxu2 %v4707_v29  ;;  %4784 = vmatpush.msrb.mxu0 %v4705_v22  ;;  %v4692_v19 = vld [vmem:[%s9857_s11 + $0x118] sm:$0xff]  ;;  %v4678_v45 = vld [vmem:[%s9857_s11 + $0xa8] sm:$0xff]  ;;  %v4687_v50 = vld [vmem:[%s9857_s11 + $0xf0] sm:$0xff] }
 0x57b   : > { %v4265_v51 = vsub.f32 1.0, %v4233_v53  ;;  %v4074_v21 = vmul.f32 %v4042_v54, %v3757_v2  ;;  %v4642_v35 = vpop.f32.mrf.mxu3  ;;  %4804 = vmatpush.msrb.mxu1 %v4706_v6  ;;  %v4691_v53 = vld [vmem:[%s9857_s11 + $0x110] sm:$0xff]  ;;  %4845 = vmatpush.msrb.mxu3 %v4700_v42  ;;  %v4690_v54 = vld [vmem:[%s9857_s11 + $0x108] sm:$0xff]  ;;  %v4677_v36 = vld [vmem:[%s9857_s11 + $0xa0] sm:$0xff] }
 0x57c   : > { %4612 = vmatmul.f32.gmra.mxu2 %v4427_v57  ;;  %v4516_v8 = vpop.f32.mrf.mxu0  ;;  %v4689_v57 = vld [vmem:[%s9857_s11 + $0x100] sm:$0xff]  ;;  %4785 = vmatpush.msrb.mxu0 %v4697_v63  ;;  %v4670_v29 = vld [vmem:[%s9857_s11 + $0x68] sm:$0xff]  ;;  %v4679_v6 = vld [vmem:[%s9857_s11 + $0xb0] sm:$0xff] }
 0x57d   : > { %v4329_v5 = vsub.f32 0.0, %v4265_v51  ;;  %v4234_v4 = vmul.f32 %v5549_v9, %v4074_v21  ;;  %4825 = vmatpush.msrb.mxu2 %v4699_v61  ;;  %4805 = vmatpush.msrb.mxu1 %v4698_v62  ;;  %v4684_v9 = vld [vmem:[%s9857_s11 + $0xd8] sm:$0xff]  ;;  %v4669_v42 = vld [vmem:[%s9857_s11 + $0x60] sm:$0xff]  ;;  %v4662_v61 = vld [vmem:[%s9857_s11 + $0x28] sm:$0xff] }
 0x57e   : > { %4846 = vmatpush.msrb.mxu3 %v4692_v19  ;;  %4786 = vmatpush.msrb.mxu0 %v4689_v57  ;;  %v4672_v22 = vld [vmem:[%s9857_s11 + $0x78] sm:$0xff]  ;;  %v4671_v62 = vld [vmem:[%s9857_s11 + $0x70] sm:$0xff] }
 0x57f   : > { %v4361_v47 = vsel %vm4297_vm3, %v4329_v5, %v4265_v51  ;;  %v4266_v33 = vsub.f32 1.0, %v4234_v4  ;;  %v4683_v5 = vld [vmem:[%s9857_s11 + $0xd0] sm:$0xff]  ;;  %4826 = vmatpush.msrb.mxu2 %v4691_v53  ;;  %4806 = vmatpush.msrb.mxu1 %v4690_v54  ;;  %v4664_v63 = vld [vmem:[%s9857_s11 + $0x38] sm:$0xff]  ;;  %v4721_v54 = vld [vmem:[%s9858_s12] sm:$0xff] }
 0x580   : > { %v4393_v46 = vadd.f32 1.0, %v4361_v47  ;;  %v4681_v47 = vld [vmem:[%s9857_s11 + $0xc0] sm:$0xff]  ;;  %4847 = vmatpush.msrb.mxu3 %v4684_v9  ;;  %v4663_v19 = vld [vmem:[%s9857_s11 + $0x30] sm:$0xff]  ;;  %v4724_v57 = vperm.slane %v4721_v54, 1 }
 0x581   : > { %v4330_v11 = vsub.f32 0.0, %v4266_v33  ;;  %4827 = vmatpush.msrb.mxu2 %v4683_v5  ;;  %4807 = vmatpush.msrb.mxu1 %v4682_v56 }
 0x582   : > { %v4425_v14 = vmul.f32 %v4393_v46, %v3177_v20  ;;  %v4557_v13 = vpop.f32.mrf.mxu1  ;;  %v4674_v46 = vld [vmem:[%s9857_s11 + $0x88] sm:$0xff]  ;;  %4787 = vmatpush.msrb.mxu0 %v4681_v47  ;;  %v4726_v47 = vperm.slane %v4721_v54, 3 }
 0x583   : > { %v4362_v38 = vsel %vm4298_vm4, %v4330_v11, %v4266_v33  ;;  %v4558_v59 = vadd.f32 %v4557_v13, %v4516_v8  ;;  %v4676_v33 = vld [vmem:[%s9857_s11 + $0x98] sm:$0xff]  ;;  %v4673_v11 = vld [vmem:[%s9857_s11 + $0x80] sm:$0xff]  ;;  %4828 = vmatpush.msrb.mxu2 %v4675_v32  ;;  %4808 = vmatpush.msrb.mxu1 %v4674_v46  ;;  %v4725_v32 = vperm.slane %v4721_v54, 2 }
 0x584   : > { %4530 = vmatmul.f32.gmra.mxu0 %v4425_v14  ;;  %v4394_v2 = vadd.f32 1.0, %v4362_v38  ;;  %4848 = vmatpush.msrb.mxu3 %v4676_v33  ;;  %v4660_v8 = vld [vmem:[%s9857_s11 + $0x18] sm:$0xff] }
 0x585   : > { %v4599_v17 = vadd.f32 %v4598_v52, %v4558_v59  ;;  %4788 = vmatpush.msrb.mxu0 %v4673_v11  ;;  %v4720_v13 = vld [vmem:[%s9857_s11 + $0x1f8] sm:$0xff]  ;;  %4809 = vmatpush.msrb.mxu1 %v4666_v60  ;;  %v4718_v52 = vld [vmem:[%s9857_s11 + $0x1e8] sm:$0xff]  ;;  %v4657_v59 = vld [vmem:[%s9857_s11] sm:$0xff] }
 0x586   : > { %v4426_v58 = vmul.f32 %v4394_v2, %v3178_v12  ;;  %v4665_v12 = vld [vmem:[%s9857_s11 + $0x40] sm:$0xff]  ;;  %v4667_v2 = vld [vmem:[%s9857_s11 + $0x50] sm:$0xff]  ;;  %4849 = vmatpush.msrb.mxu3 %v4668_v40  ;;  %v4727_v40 = vperm.slane %v4721_v54, 4 }
 0x587   : > { %v4640_v24 = vadd.f32 %v4639_v7, %v4599_v17  ;;  %4789 = vmatpush.msrb.mxu0 %v4665_v12  ;;  %4829 = vmatpush.msrb.mxu2 %v4667_v2  ;;  %v4659_v17 = vld [vmem:[%s9857_s11 + $0x10] sm:$0xff]  ;;  %v4717_v7 = vld [vmem:[%s9857_s11 + $0x1e0] sm:$0xff] }
 0x588   : > { %4571 = vmatmul.f32.gmra.mxu1 %v4426_v58  ;;  %v4658_v58 = vld [vmem:[%s9857_s11 + $0x8] sm:$0xff]  ;;  %4850 = vmatpush.msrb.mxu3 %v4660_v8 }
 0x589   : > { %4741 = vxpose.xlu1.b32.cont [3/8] (short) (narrow) %v4640_v24, 8  ;;  %4810 = vmatpush.msrb.mxu1 %v4658_v58  ;;  %v4710_v24 = vld [vmem:[%s9857_s11 + $0x1a8] sm:$0xff] }
 0x58a   : > { %4923 = vmatpush.msra.mxu3 %v4720_v13  ;;  %4790 = vmatpush.msrb.mxu0 %v4657_v59  ;;  %v4730_v59 = vperm.slane %v4721_v54, 7 }
 0x58b   : > { %4883 = vmatpush.msra.mxu1 %v4718_v52  ;;  %4830 = vmatpush.msrb.mxu2 %v4659_v17 }
 0x58c   : > { %4863 = vmatpush.msra.mxu0 %v4717_v7  ;;  %v4729_v7 = vperm.slane %v4721_v54, 6 }
 0x58d   : > { %4884 = vmatpush.msra.mxu1 %v4710_v24 }
 0x58f   : > { %v4601_v0 = vpop.f32.mrf.mxu2 }
 0x595   : > { %v4645_v31 = vpop.f32.mrf.mxu3 }
 0x597   : > { %v4519_v23 = vpop.f32.mrf.mxu0 }
 0x59e   : > { %v4560_v37 = vpop.f32.mrf.mxu1 }
 0x59f   : > { %v4561_v34 = vadd.f32 %v4560_v37, %v4519_v23  ;;  %v4719_v23 = vld [vmem:[%s9857_s11 + $0x1f0] sm:$0xff]  ;;  %v4712_v37 = vld [vmem:[%s9857_s11 + $0x1b8] sm:$0xff] }
 0x5a0   : > { %4903 = vmatpush.msra.mxu2 %v4719_v23  ;;  %4924 = vmatpush.msra.mxu3 %v4712_v37 }
 0x5a1   : > { %v4602_v1 = vadd.f32 %v4601_v0, %v4561_v34  ;;  %v4709_v0 = vld [vmem:[%s9857_s11 + $0x1a0] sm:$0xff]  ;;  %v4702_v34 = vld [vmem:[%s9857_s11 + $0x168] sm:$0xff] }
 0x5a2   : > { %4864 = vmatpush.msra.mxu0 %v4709_v0  ;;  %4885 = vmatpush.msra.mxu1 %v4702_v34 }
 0x5a3   : > { %v4643_v25 = vadd.f32 %v4642_v35, %v4602_v1  ;;  %v4711_v1 = vld [vmem:[%s9857_s11 + $0x1b0] sm:$0xff]  ;;  %v4704_v35 = vld [vmem:[%s9857_s11 + $0x178] sm:$0xff] }
 0x5a4   : > { %4904 = vmatpush.msra.mxu2 %v4711_v1  ;;  %4925 = vmatpush.msra.mxu3 %v4704_v35 }
 0x5a5   : > { %4742 = vxpose.xlu1.b32.cont [4/8] (short) (narrow) %v4643_v25, 8  ;;  %v4701_v25 = vld [vmem:[%s9857_s11 + $0x160] sm:$0xff] }
 0x5a6   : > { %4865 = vmatpush.msra.mxu0 %v4701_v25 }
 0x5ab   : > { %v4604_v18 = vpop.f32.mrf.mxu2 }
 0x5b2   : > { %v4648_v3 = vpop.f32.mrf.mxu3 }
 0x5b3   : > { %v4522_v28 = vpop.f32.mrf.mxu0 }
 0x5ba   : > { %v4563_v43 = vpop.f32.mrf.mxu1 }
 0x5bb   : > { %v4564_v55 = vadd.f32 %v4563_v43, %v4522_v28  ;;  %v4694_v28 = vld [vmem:[%s9857_s11 + $0x128] sm:$0xff]  ;;  %v4703_v43 = vld [vmem:[%s9857_s11 + $0x170] sm:$0xff] }
 0x5bc   : > { %4886 = vmatpush.msra.mxu1 %v4694_v28  ;;  %4905 = vmatpush.msra.mxu2 %v4703_v43 }
 0x5bd   : > { %v4605_v44 = vadd.f32 %v4604_v18, %v4564_v55  ;;  %v4696_v18 = vld [vmem:[%s9857_s11 + $0x138] sm:$0xff] }
 0x5be   : > { %4926 = vmatpush.msra.mxu3 %v4696_v18 }
 0x5bf   : > { %v4646_v30 = vadd.f32 %v4645_v31, %v4605_v44 }
 0x5c1   : > { %4743 = vxpose.xlu1.b32.cont [5/8] (short) (narrow) %v4646_v30, 8 }
 0x5c7   : > { %v4607_v26 = vpop.f32.mrf.mxu2 }
 0x5cd   : > { %v4651_v14 = vpop.f32.mrf.mxu3 }
 0x5d0   : > { %v4525_v41 = vpop.f32.mrf.mxu0 }
 0x5d7   : > { %v4566_v15 = vpop.f32.mrf.mxu1 }
 0x5d8   : > { %v4567_v10 = vadd.f32 %v4566_v15, %v4525_v41 }
 0x5da   : > { %v4608_v49 = vadd.f32 %v4607_v26, %v4567_v10  ;;  %v4693_v10 = vld [vmem:[%s9857_s11 + $0x120] sm:$0xff] }
 0x5db   : > { %4866 = vmatpush.msra.mxu0 %v4693_v10 }
 0x5dc   : > { %v4649_v39 = vadd.f32 %v4648_v3, %v4608_v49  ;;  %v4686_v49 = vld [vmem:[%s9857_s11 + $0xe8] sm:$0xff]  ;;  %v4695_v3 = vld [vmem:[%s9857_s11 + $0x130] sm:$0xff] }
 0x5dd   : > { %4887 = vmatpush.msra.mxu1 %v4686_v49  ;;  %4906 = vmatpush.msra.mxu2 %v4695_v3 }
 0x5de   : > { %4744 = vxpose.xlu1.b32.cont [6/8] (short) (narrow) %v4649_v39, 8  ;;  %v4688_v39 = vld [vmem:[%s9857_s11 + $0xf8] sm:$0xff]  ;;  %4867 = vmatpush.msra.mxu0 %v4685_v27 }
 0x5df   : > { %4927 = vmatpush.msra.mxu3 %v4688_v39  ;;  %4888 = vmatpush.msra.mxu1 %v4678_v45 }
 0x5e0   : > { %4907 = vmatpush.msra.mxu2 %v4687_v50  ;;  %4868 = vmatpush.msra.mxu0 %v4677_v36 }
 0x5e1   : > { %4928 = vmatpush.msra.mxu3 %v4680_v48  ;;  %4889 = vmatpush.msra.mxu1 %v4670_v29 }
 0x5e2   : > { %4908 = vmatpush.msra.mxu2 %v4679_v6  ;;  %4869 = vmatpush.msra.mxu0 %v4669_v42 }
 0x5e3   : > { %v4610_v21 = vpop.f32.mrf.mxu2  ;;  %4929 = vmatpush.msra.mxu3 %v4672_v22  ;;  %4890 = vmatpush.msra.mxu1 %v4662_v61 }
 0x5e4   : > { %4909 = vmatpush.msra.mxu2 %v4671_v62 }
 0x5e5   : > { %4930 = vmatpush.msra.mxu3 %v4664_v63 }
 0x5e6   : > { %4910 = vmatpush.msra.mxu2 %v4663_v19 }
 0x5e9   : > { %v4654_v15 = vpop.f32.mrf.mxu3 }
 0x5ec   : > { %v4528_v16 = vpop.f32.mrf.mxu0 }
 0x5f2   : > { %v4569_v51 = vpop.f32.mrf.mxu1 }
 0x5f3   : > { %v4570_v4 = vadd.f32 %v4569_v51, %v4528_v16  ;;  %v4661_v16 = vld [vmem:[%s9857_s11 + $0x20] sm:$0xff]  ;;  %v4723_v51 = vperm.slane %v4721_v54, 0 }
 0x5f4   : > { %4870 = vmatpush.msra.mxu0 %v4661_v16 }
 0x5f5   : > { %v4611_v20 = vadd.f32 %v4610_v21, %v4570_v4 }
 0x5f7   : > { %v4652_v38 = vadd.f32 %v4651_v14, %v4611_v20  ;;  %v4728_v20 = vperm.slane %v4721_v54, 5 }
 0x5f9   : > { %4745 = vxpose.xlu1.b32.cont [7/8] (short) (narrow) %v4652_v38, 8 }
 0x5ff   : > { %v4613_v31 = vpop.f32.mrf.mxu2 }
 0x601   : > { %v4531_v55 = vpop.f32.mrf.mxu0 }
 0x605   : > { %v4572_v44 = vpop.f32.mrf.mxu1 }
 0x606   : > { %v4573_v30 = vadd.f32 %v4572_v44, %v4531_v55 }
 0x608   : > { %v4614_v41 = vadd.f32 %v4613_v31, %v4573_v30 }
 0x60a   : > { %v4655_v26 = vadd.f32 %v4654_v15, %v4614_v41 }
 0x60c   : > { %4746 = vxpose.xlu1.b32.end [8/8] (short) (narrow) %v4655_v26, 8 }
 0x678   : > { %v4755_v53 = vpop.trf.xlu1 }
 0x679   : > { %5263 = vmatmul.msk.f32.vlgmr.msrb.gmra.mxu1 %vm4771_vm5, %v4755_v53  ;;  %5265 = vmatmul.msk.f32.vlgmr.msrb.gmra.mxu3 %vm4771_vm5, %v4755_v53 }
 0x67a   : > { %5262 = vmatmul.msk.f32.vlgmr.msrb.gmra.mxu0 %vm4771_vm5, %v4755_v53  ;;  %5264 = vmatmul.msk.f32.vlgmr.msrb.gmra.mxu2 %vm4771_vm5, %v4755_v53 }
 0x681   : > { %5267 = vmatmul.msk.f32.vlgmr.msra.gmra.mxu1 %vm4771_vm5, %v4755_v53  ;;  %5269 = vmatmul.msk.f32.vlgmr.msra.gmra.mxu3 %vm4771_vm5, %v4755_v53 }
 0x682   : > { %5266 = vmatmul.msk.f32.vlgmr.msra.gmra.mxu0 %vm4771_vm5, %v4755_v53  ;;  %5268 = vmatmul.msk.f32.vlgmr.msra.gmra.mxu2 %vm4771_vm5, %v4755_v53 }
 0x6f6   : > { %v4812_v21 = vpop.f32.mrf.mxu1 }
 0x6f7   : > { %v4813_v9 = vadd.f32 %v4812_v21, %v4724_v57  ;;  %v4792_v5 = vpop.f32.mrf.mxu0 }
 0x6f8   : > { %v4793_v56 = vadd.f32 %v4792_v5, %v4723_v51 }
 0x6f9   : > { %v4943_v4 = vrot.slane %v4813_v9, 4 }
 0x6fb   : > { %v4948_v33 = vsel %vm4947_vm6, %v4793_v56, %v4943_v4 }
 0x6fc   : > { %4956 = vst [vmem:[%s9803_s16] sm:$0xff] %v4948_v33  ;;  %v4852_v46 = vpop.f32.mrf.mxu3 }
 0x6fd   : > { %v4853_v11 = vadd.f32 %v4852_v46, %v4726_v47  ;;  %v4832_v14 = vpop.f32.mrf.mxu2 }
 0x6fe   : > { %v4892_v38 = vpop.f32.mrf.mxu1  ;;  %v4833_v12 = vadd.f32 %v4832_v14, %v4725_v32 }
 0x6ff   : > { %v4944_v60 = vrot.slane %v4853_v11, 4  ;;  %v4893_v2 = vadd.f32 %v4892_v38, %v4728_v20  ;;  %v4872_v8 = vpop.f32.mrf.mxu0 }
 0x700   : > { %v4873_v52 = vadd.f32 %v4872_v8, %v4727_v40 }
 0x701   : > { %v4949_v58 = vsel %vm4947_vm6, %v4833_v12, %v4944_v60  ;;  %v4945_v13 = vrot.slane %v4893_v2, 4 }
 0x702   : > { %4957 = vst [vmem:[%s9803_s16 + $0x8] sm:$0xff] %v4949_v58 }
 0x703   : > { %v4950_v17 = vsel %vm4947_vm6, %v4873_v52, %v4945_v13 }
 0x704   : > { %4958 = vst [vmem:[%s9803_s16 + $0x10] sm:$0xff] %v4950_v17  ;;  %v4932_v24 = vpop.f32.mrf.mxu3 }
 0x705   : > { %v4933_v23 = vadd.f32 %v4932_v24, %v4730_v59  ;;  %v4912_v37 = vpop.f32.mrf.mxu2 }
 0x706   : > { %v4913_v34 = vadd.f32 %v4912_v37, %v4729_v7 }
 0x707   : > { %v4946_v0 = vrot.slane %v4933_v23, 4 }
 0x709   : > { %v4951_v1 = vsel %vm4947_vm6, %v4913_v34, %v4946_v0 }
 0x70a   : > { %4959 = vst [vmem:[%s9803_s16 + $0x18] sm:$0xff] %v4951_v1 }
 0x70b   : > { %5577 = shalt.err (!%p5574_p3)
}
 0x70c   : > { %5276 = dma.vmem_to_hbm [thread:$0]  (%p5729_p5), %s4975_s29, 512, %s4977_s0, %s4961_s17  }
 0x70d PF: > { %p5282_p4 = scmp.ge.s32.totalorder %s5612_s28, 2  ;;  %s4988_s24 = sand.u32 1, %s5600_s25  }
 0x70e   : > { %s4989_s16 = scalar_lea.sflag [#allocation3], %s4988_s24 }
 0x70f   : > { %p5279_p7 = pnand %p5282_p4, %p5733_p6 }
 0x711   : > { %p5280_p8 = pneg %p5279_p7 }
 0x713   : > { %5595 = dma.done.wait (%p5280_p8), %s4989_s16, 512  }
 0x714   : > { %5597 = vsyncadd (%p5280_p8), %s4989_s16, 4294966784  ;;  %s10557_s15 = sld [smem:[#allocation5_spill]]  ;;  %p23_p9 = scmp.ge.s32.totalorder %s5716_s14, 4  }
 0x715   : > { %s10558_s27 = sld [smem:[#allocation6_spill]]  ;;  %s10559_s25 = smov %s5604_s26 }
 0x716   : > { %s10561_s28 = smov %s5716_s14  ;;  %25 = sbr.rel (!%p23_p9) target bundleno = 5 (0x5), region = 113 }
 0x71a   : > { %s10560_s26 = smov %s10557_s15 }
 0x71b   :  { %4995 = vsyncpa [#allocation3], 1 }
 0x71c   :  { %4997 = vsyncpa [#allocation3 + $0x1], 1 }

</bundles_post_ra>
